<compile_context>
chip_gen: v7x
topology: tpu7x:2x2x1
jax: 0.10.0
libtpu: 0.0.40
codegen_flags: <defaults>
</compile_context>

<pallas_src>
import functools

import jax
import jax.numpy as jnp
from jax.experimental import pallas as pl
from jax.experimental.pallas import tpu as pltpu


# ----------------------------------------------------------------------------
# Kernel 1: fused 3x3 conv (stride 1, pad 1) + bias + ReLU + 2x2 max-pool
# ----------------------------------------------------------------------------
def _conv_pool_kernel(xe0_ref, xo0_ref, xe1_ref, xo1_ref, w_ref, b_ref, o_ref,
                      *, H, W_half):
    """One image per grid step.

    x*_ref : ((H+2)*W_half, Cin) column-deinterleaved padded input; row
             (h*W_half + k) holds padded pixel (row=h, col=2k+{0,1,2,3}) for
             xe0/xo0/xe1/xo1 respectively.  W_half is a multiple of 8, so every
             slice below is vreg-aligned.
    w_ref  : (9, Cin, Cout)  conv taps, (dy, dx) row-major.
    b_ref  : (1, Cout)
    o_ref  : (H//2, Wvalid//2, Cout)  pooled NHWC output for this image.
    """
    hp, wv_half, cout = o_ref.shape

    # even conv-output columns (w = 2k) read padded cols 2k, 2k+1, 2k+2
    even_srcs = (xe0_ref, xo0_ref, xe1_ref)
    # odd  conv-output columns (w = 2k+1) read padded cols 2k+1, 2k+2, 2k+3
    odd_srcs = (xo0_ref, xe1_ref, xo1_ref)

    acc_e = jnp.zeros((H * W_half, cout), jnp.float32)
    acc_o = jnp.zeros((H * W_half, cout), jnp.float32)
    for dy in range(3):
        rows = slice(dy * W_half, (dy + H) * W_half)       # aligned offsets
        for dx in range(3):
            w_tap = w_ref[dy * 3 + dx]                      # (Cin, Cout)
            acc_e += jnp.dot(even_srcs[dx][rows, :], w_tap,
                             preferred_element_type=jnp.float32)
            acc_o += jnp.dot(odd_srcs[dx][rows, :], w_tap,
                             preferred_element_type=jnp.float32)

    bias = b_ref[...]                                        # (1, Cout)
    # 2x2 max-pool fused in the epilogue: H-pool = max over the two aligned
    # W_half-row blocks of each row pair; W-pool = max of even/odd accumulators.
    for r in range(hp):
        top = slice((2 * r) * W_half, (2 * r + 1) * W_half)
        bot = slice((2 * r + 1) * W_half, (2 * r + 2) * W_half)
        blk = jnp.maximum(jnp.maximum(acc_e[top, :], acc_e[bot, :]),
                          jnp.maximum(acc_o[top, :], acc_o[bot, :]))
        o_ref[r] = jnp.maximum(blk[:wv_half, :] + bias, 0.0).astype(o_ref.dtype)


def conv3x3_relu_pool(x, w_hwio, b):
    """x: (B, H, W, Cin) NHWC -> (B, H//2, W//2, Cout) with one pallas_call."""
    B, H, Wv, Cin = x.shape
    Cout = w_hwio.shape[-1]
    assert H % 2 == 0 and Wv % 2 == 0, "2x2 pool needs even spatial dims"
    W_half = max(8, ((Wv // 2) + 7) // 8 * 8)   # pooled width, padded to 8-multiple
    W_pad = 2 * W_half

    # conv padding (1 each side) + zero-extend width to W_pad (extra zeros are
    # only read by discarded output columns).
    xp = jnp.pad(x, ((0, 0), (1, 1), (1, 1 + (W_pad - Wv)), (0, 0)))
    rows = (H + 2) * W_half

    def deinterleave(start):
        cols = xp[:, :, start:start + W_pad:2, :]            # (B, H+2, W_half, Cin)
        return cols.reshape(B, rows, Cin)

    xe0, xo0, xe1, xo1 = [deinterleave(s) for s in (0, 1, 2, 3)]
    w_taps = w_hwio.reshape(9, Cin, Cout)
    bias = b.reshape(1, Cout)

    x_spec = pl.BlockSpec((None, rows, Cin), lambda i: (i, 0, 0))
    return pl.pallas_call(
        functools.partial(_conv_pool_kernel, H=H, W_half=W_half),
        grid=(B,),
        in_specs=[x_spec, x_spec, x_spec, x_spec,
                  pl.BlockSpec((9, Cin, Cout), lambda i: (0, 0, 0)),
                  pl.BlockSpec((1, Cout), lambda i: (0, 0))],
        out_specs=pl.BlockSpec((None, H // 2, Wv // 2, Cout),
                               lambda i: (i, 0, 0, 0)),
        out_shape=jax.ShapeDtypeStruct((B, H // 2, Wv // 2, Cout), x.dtype),
        compiler_params=pltpu.CompilerParams(
            dimension_semantics=("parallel",)),
    )(xe0, xo0, xe1, xo1, w_taps, bias)


# ----------------------------------------------------------------------------
# Kernel 2: fused transformer tail (linear -> 2 encoder layers -> fc)
# ----------------------------------------------------------------------------
def _transformer_kernel(feats_ref, lin_w_ref, lin_b_ref,
                        wv_ref, bv_ref, wo_ref, bo_ref, ln1g_ref, ln1b_ref,
                        w1_ref, b1_ref, w2_ref, b2_ref, ln2g_ref, ln2b_ref,
                        fc_w_ref, fc_b_ref, o_ref, *, num_layers, eps):
    def dot(a, w):
        return jnp.dot(a, w, preferred_element_type=jnp.float32)

    def layernorm(v, g, b):
        mean = jnp.mean(v, axis=-1, keepdims=True)
        var = jnp.mean((v - mean) ** 2, axis=-1, keepdims=True)  # biased, like torch
        return (v - mean) * jax.lax.rsqrt(var + eps) * g + b

    h = dot(feats_ref[...], lin_w_ref[...]) + lin_b_ref[...]     # (B, hidden), f32
    for l in range(num_layers):
        # seq_len == 1 => softmax over a single key == 1 => MHA == Wo(Wv h + bv) + bo
        v = dot(h, wv_ref[l]) + bv_ref[l]
        sa = dot(v, wo_ref[l]) + bo_ref[l]
        h = layernorm(h + sa, ln1g_ref[l], ln1b_ref[l])
        f = jnp.maximum(dot(h, w1_ref[l]) + b1_ref[l], 0.0)
        f = dot(f, w2_ref[l]) + b2_ref[l]
        h = layernorm(h + f, ln2g_ref[l], ln2b_ref[l])
    o_ref[...] = (dot(h, fc_w_ref[...]) + fc_b_ref[...]).astype(o_ref.dtype)


def transformer_classifier(feats, p):
    B = feats.shape[0]
    num_layers = p["wv"].shape[0]
    num_classes = p["fc_w"].shape[-1]
    return pl.pallas_call(
        functools.partial(_transformer_kernel, num_layers=num_layers, eps=1e-5),
        out_shape=jax.ShapeDtypeStruct((B, num_classes), feats.dtype),
    )(feats, p["lin_w"], p["lin_b"],
      p["wv"], p["bv"], p["wo"], p["bo"], p["ln1_g"], p["ln1_b"],
      p["w1"], p["b1"], p["w2"], p["b2"], p["ln2_g"], p["ln2_b"],
      p["fc_w"], p["fc_b"])


# ----------------------------------------------------------------------------
# Parameters (deterministic synthetic init; linear weights are (in, out))
# ----------------------------------------------------------------------------
def init_params(key, feature_dim, num_classes, hidden=256, num_layers=2, ff=256):
    keys = iter(jax.random.split(key, 40))

    def nrm(shape, scale=0.02):
        return (scale * jax.random.normal(next(keys), shape)).astype(jnp.float32)

    L = num_layers
    return {
        "conv1_w": nrm((3, 3, 3, 32)),   "conv1_b": nrm((32,)),
        "conv2_w": nrm((3, 3, 32, 64)),  "conv2_b": nrm((64,)),
        "conv3_w": nrm((3, 3, 64, 128)), "conv3_b": nrm((128,)),
        "lin_w": nrm((feature_dim, hidden)), "lin_b": nrm((1, hidden)),
        "fc_w": nrm((hidden, num_classes)),  "fc_b": nrm((1, num_classes)),
        # per-layer weights stacked on a leading layer axis (VMEM-resident in-kernel)
        "wv": nrm((L, hidden, hidden)), "bv": nrm((L, 1, hidden)),
        "wo": nrm((L, hidden, hidden)), "bo": nrm((L, 1, hidden)),
        "ln1_g": jnp.ones((L, 1, hidden), jnp.float32),
        "ln1_b": jnp.zeros((L, 1, hidden), jnp.float32),
        "w1": nrm((L, hidden, ff)), "b1": nrm((L, 1, ff)),
        "w2": nrm((L, ff, hidden)), "b2": nrm((L, 1, hidden)),
        "ln2_g": jnp.ones((L, 1, hidden), jnp.float32),
        "ln2_b": jnp.zeros((L, 1, hidden), jnp.float32),
    }


# ----------------------------------------------------------------------------
# Forward pass (matches CNNTransformer.forward semantics, eval mode)
# ----------------------------------------------------------------------------
@jax.jit
def cnn_transformer_forward(x_nchw, p):
    x = jnp.transpose(x_nchw, (0, 2, 3, 1))                  # NCHW -> NHWC
    x = conv3x3_relu_pool(x, p["conv1_w"], p["conv1_b"])
    x = conv3x3_relu_pool(x, p["conv2_w"], p["conv2_b"])
    x = conv3x3_relu_pool(x, p["conv3_w"], p["conv3_b"])
    B = x.shape[0]
    # match PyTorch flatten order: NCHW -> (B, C*H*W)
    feats = jnp.transpose(x, (0, 3, 1, 2)).reshape(B, -1)
    return transformer_classifier(feats, p)


# ----------------------------------------------------------------------------
# Pure-JAX reference (same math) for a correctness check
# ----------------------------------------------------------------------------
def reference_forward(x_nchw, p):
    x = jnp.transpose(x_nchw, (0, 2, 3, 1))

    def conv_relu_pool(x, w, b):
        y = jax.lax.conv_general_dilated(
            x, w, window_strides=(1, 1), padding=((1, 1), (1, 1)),
            dimension_numbers=("NHWC", "HWIO", "NHWC"))
        y = jnp.maximum(y + b, 0.0)
        B, H, W, C = y.shape
        return y.reshape(B, H // 2, 2, W // 2, 2, C).max(axis=(2, 4))

    x = conv_relu_pool(x, p["conv1_w"], p["conv1_b"])
    x = conv_relu_pool(x, p["conv2_w"], p["conv2_b"])
    x = conv_relu_pool(x, p["conv3_w"], p["conv3_b"])
    B = x.shape[0]
    feats = jnp.transpose(x, (0, 3, 1, 2)).reshape(B, -1)

    def ln(v, g, b, eps=1e-5):
        m = v.mean(-1, keepdims=True)
        s = ((v - m) ** 2).mean(-1, keepdims=True)
        return (v - m) / jnp.sqrt(s + eps) * g + b

    h = feats @ p["lin_w"] + p["lin_b"]
    for l in range(p["wv"].shape[0]):
        v = h @ p["wv"][l] + p["bv"][l]
        sa = v @ p["wo"][l] + p["bo"][l]
        h = ln(h + sa, p["ln1_g"][l], p["ln1_b"][l])
        f = jnp.maximum(h @ p["w1"][l] + p["b1"][l], 0.0)
        f = f @ p["w2"][l] + p["b2"][l]
        h = ln(h + f, p["ln2_g"][l], p["ln2_b"][l])
    return h @ p["fc_w"] + p["fc_b"]


if __name__ == "__main__":
    B, C, H, W = 2, 3, 16, 16                 # small input_shape=[16, 16]
    num_classes = 16
    feature_dim = 128 * (H // 8) * (W // 8)   # 128 * 2 * 2 = 512

    key = jax.random.PRNGKey(0)
    kx, kp = jax.random.split(key)
    x = jax.random.normal(kx, (B, C, H, W), dtype=jnp.float32)
    params = init_params(kp, feature_dim, num_classes)

    out = jax.block_until_ready(cnn_transformer_forward(x, params))
    assert out.shape == (B, num_classes), out.shape

    ref = jax.block_until_ready(jax.jit(reference_forward)(x, params))
    rel_err = float(jnp.max(jnp.abs(out - ref)) / (jnp.max(jnp.abs(ref)) + 1e-6))
    assert rel_err < 0.1, f"mismatch vs pure-JAX reference: rel_err={rel_err}"

    print("KERNEL_OK")
</pallas_src>

<mosaic_0001>
module attributes {stable_mosaic.version = 11 : i64} {
  func.func @_conv_pool_kernel(%arg0: i32, %arg1: memref<1x144x3xf32, #tpu.memory_space<vmem>>, %arg2: memref<1x144x3xf32, #tpu.memory_space<vmem>>, %arg3: memref<1x144x3xf32, #tpu.memory_space<vmem>>, %arg4: memref<1x144x3xf32, #tpu.memory_space<vmem>>, %arg5: memref<9x3x32xf32, #tpu.memory_space<vmem>>, %arg6: memref<1x32xf32, #tpu.memory_space<vmem>>, %arg7: memref<1x8x8x32xf32, #tpu.memory_space<vmem>>) attributes {dimension_semantics = [#tpu.dimension_semantics<parallel>], iteration_bounds = array<i64: 2>, scalar_prefetch = 0 : i64, scratch_operands = 0 : i64, tpu.core_type = #tpu.core_type<tc>, window_params = [{transform_indices = @transform_0, window_bounds = array<i64: 1, 144, 3>}, {transform_indices = @transform_1, window_bounds = array<i64: 1, 144, 3>}, {transform_indices = @transform_2, window_bounds = array<i64: 1, 144, 3>}, {transform_indices = @transform_3, window_bounds = array<i64: 1, 144, 3>}, {pipeline_mode = #tpu.pipeline_mode<synchronous>, transform_indices = @transform_4, window_bounds = array<i64: 9, 3, 32>}, {pipeline_mode = #tpu.pipeline_mode<synchronous>, transform_indices = @transform_5, window_bounds = array<i64: 1, 32>}, {transform_indices = @transform_6, window_bounds = array<i64: 1, 8, 8, 32>}]} {
    %cst = arith.constant 0.000000e+00 : f32
    %0 = vector.broadcast %cst : f32 to vector<128x32xf32>
    %cst_0 = arith.constant 0.000000e+00 : f32
    %1 = vector.broadcast %cst_0 : f32 to vector<128x32xf32>
    %c0 = arith.constant 0 : index
    %c0_1 = arith.constant 0 : index
    %c0_2 = arith.constant 0 : index
    %2 = vector.load %arg5[%c0, %c0_1, %c0_2] : memref<9x3x32xf32, #tpu.memory_space<vmem>>, vector<1x3x32xf32>
    %3 = vector.shape_cast %2 : vector<1x3x32xf32> to vector<3x32xf32>
    %c0_3 = arith.constant 0 : index
    %c0_4 = arith.constant 0 : index
    %c0_5 = arith.constant 0 : index
    %4 = vector.load %arg1[%c0_3, %c0_4, %c0_5] : memref<1x144x3xf32, #tpu.memory_space<vmem>>, vector<1x128x3xf32>
    %5 = vector.shape_cast %4 : vector<1x128x3xf32> to vector<128x3xf32>
    %cst_6 = arith.constant dense<0.000000e+00> : vector<128x32xf32>
    %6 = tpu.matmul %5, %3, %cst_6 {dimension_numbers = #tpu.dot_dimension_numbers<[1], [0], [0], [1], [0, 0, 1, 1], [], []>} : vector<128x3xf32>, vector<3x32xf32>, vector<128x32xf32> -> vector<128x32xf32>
    %7 = arith.addf %0, %6 : vector<128x32xf32>
    %c0_7 = arith.constant 0 : index
    %c0_8 = arith.constant 0 : index
    %c0_9 = arith.constant 0 : index
    %8 = vector.load %arg2[%c0_7, %c0_8, %c0_9] : memref<1x144x3xf32, #tpu.memory_space<vmem>>, vector<1x128x3xf32>
    %9 = vector.shape_cast %8 : vector<1x128x3xf32> to vector<128x3xf32>
    %cst_10 = arith.constant dense<0.000000e+00> : vector<128x32xf32>
    %10 = tpu.matmul %9, %3, %cst_10 {dimension_numbers = #tpu.dot_dimension_numbers<[1], [0], [0], [1], [0, 0, 1, 1], [], []>} : vector<128x3xf32>, vector<3x32xf32>, vector<128x32xf32> -> vector<128x32xf32>
    %11 = arith.addf %1, %10 : vector<128x32xf32>
    %c1 = arith.constant 1 : index
    %c0_11 = arith.constant 0 : index
    %c0_12 = arith.constant 0 : index
    %12 = vector.load %arg5[%c1, %c0_11, %c0_12] : memref<9x3x32xf32, #tpu.memory_space<vmem>>, vector<1x3x32xf32>
    %13 = vector.shape_cast %12 : vector<1x3x32xf32> to vector<3x32xf32>
    %c0_13 = arith.constant 0 : index
    %c0_14 = arith.constant 0 : index
    %c0_15 = arith.constant 0 : index
    %14 = vector.load %arg2[%c0_13, %c0_14, %c0_15] : memref<1x144x3xf32, #tpu.memory_space<vmem>>, vector<1x128x3xf32>
    %15 = vector.shape_cast %14 : vector<1x128x3xf32> to vector<128x3xf32>
    %cst_16 = arith.constant dense<0.000000e+00> : vector<128x32xf32>
    %16 = tpu.matmul %15, %13, %cst_16 {dimension_numbers = #tpu.dot_dimension_numbers<[1], [0], [0], [1], [0, 0, 1, 1], [], []>} : vector<128x3xf32>, vector<3x32xf32>, vector<128x32xf32> -> vector<128x32xf32>
    %17 = arith.addf %7, %16 : vector<128x32xf32>
    %c0_17 = arith.constant 0 : index
    %c0_18 = arith.constant 0 : index
    %c0_19 = arith.constant 0 : index
    %18 = vector.load %arg3[%c0_17, %c0_18, %c0_19] : memref<1x144x3xf32, #tpu.memory_space<vmem>>, vector<1x128x3xf32>
    %19 = vector.shape_cast %18 : vector<1x128x3xf32> to vector<128x3xf32>
    %cst_20 = arith.constant dense<0.000000e+00> : vector<128x32xf32>
    %20 = tpu.matmul %19, %13, %cst_20 {dimension_numbers = #tpu.dot_dimension_numbers<[1], [0], [0], [1], [0, 0, 1, 1], [], []>} : vector<128x3xf32>, vector<3x32xf32>, vector<128x32xf32> -> vector<128x32xf32>
    %21 = arith.addf %11, %20 : vector<128x32xf32>
    %c2 = arith.constant 2 : index
    %c0_21 = arith.constant 0 : index
    %c0_22 = arith.constant 0 : index
    %22 = vector.load %arg5[%c2, %c0_21, %c0_22] : memref<9x3x32xf32, #tpu.memory_space<vmem>>, vector<1x3x32xf32>
    %23 = vector.shape_cast %22 : vector<1x3x32xf32> to vector<3x32xf32>
    %c0_23 = arith.constant 0 : index
    %c0_24 = arith.constant 0 : index
    %c0_25 = arith.constant 0 : index
    %24 = vector.load %arg3[%c0_23, %c0_24, %c0_25] : memref<1x144x3xf32, #tpu.memory_space<vmem>>, vector<1x128x3xf32>
    %25 = vector.shape_cast %24 : vector<1x128x3xf32> to vector<128x3xf32>
    %cst_26 = arith.constant dense<0.000000e+00> : vector<128x32xf32>
    %26 = tpu.matmul %25, %23, %cst_26 {dimension_numbers = #tpu.dot_dimension_numbers<[1], [0], [0], [1], [0, 0, 1, 1], [], []>} : vector<128x3xf32>, vector<3x32xf32>, vector<128x32xf32> -> vector<128x32xf32>
    %27 = arith.addf %17, %26 : vector<128x32xf32>
    %c0_27 = arith.constant 0 : index
    %c0_28 = arith.constant 0 : index
    %c0_29 = arith.constant 0 : index
    %28 = vector.load %arg4[%c0_27, %c0_28, %c0_29] : memref<1x144x3xf32, #tpu.memory_space<vmem>>, vector<1x128x3xf32>
    %29 = vector.shape_cast %28 : vector<1x128x3xf32> to vector<128x3xf32>
    %cst_30 = arith.constant dense<0.000000e+00> : vector<128x32xf32>
    %30 = tpu.matmul %29, %23, %cst_30 {dimension_numbers = #tpu.dot_dimension_numbers<[1], [0], [0], [1], [0, 0, 1, 1], [], []>} : vector<128x3xf32>, vector<3x32xf32>, vector<128x32xf32> -> vector<128x32xf32>
    %31 = arith.addf %21, %30 : vector<128x32xf32>
    %c3 = arith.constant 3 : index
    %c0_31 = arith.constant 0 : index
    %c0_32 = arith.constant 0 : index
    %32 = vector.load %arg5[%c3, %c0_31, %c0_32] : memref<9x3x32xf32, #tpu.memory_space<vmem>>, vector<1x3x32xf32>
    %33 = vector.shape_cast %32 : vector<1x3x32xf32> to vector<3x32xf32>
    %c0_33 = arith.constant 0 : index
    %c8 = arith.constant 8 : index
    %c0_34 = arith.constant 0 : index
    %34 = vector.load %arg1[%c0_33, %c8, %c0_34] : memref<1x144x3xf32, #tpu.memory_space<vmem>>, vector<1x128x3xf32>
    %35 = vector.shape_cast %34 : vector<1x128x3xf32> to vector<128x3xf32>
    %cst_35 = arith.constant dense<0.000000e+00> : vector<128x32xf32>
    %36 = tpu.matmul %35, %33, %cst_35 {dimension_numbers = #tpu.dot_dimension_numbers<[1], [0], [0], [1], [0, 0, 1, 1], [], []>} : vector<128x3xf32>, vector<3x32xf32>, vector<128x32xf32> -> vector<128x32xf32>
    %37 = arith.addf %27, %36 : vector<128x32xf32>
    %c0_36 = arith.constant 0 : index
    %c8_37 = arith.constant 8 : index
    %c0_38 = arith.constant 0 : index
    %38 = vector.load %arg2[%c0_36, %c8_37, %c0_38] : memref<1x144x3xf32, #tpu.memory_space<vmem>>, vector<1x128x3xf32>
    %39 = vector.shape_cast %38 : vector<1x128x3xf32> to vector<128x3xf32>
    %cst_39 = arith.constant dense<0.000000e+00> : vector<128x32xf32>
    %40 = tpu.matmul %39, %33, %cst_39 {dimension_numbers = #tpu.dot_dimension_numbers<[1], [0], [0], [1], [0, 0, 1, 1], [], []>} : vector<128x3xf32>, vector<3x32xf32>, vector<128x32xf32> -> vector<128x32xf32>
    %41 = arith.addf %31, %40 : vector<128x32xf32>
    %c4 = arith.constant 4 : index
    %c0_40 = arith.constant 0 : index
    %c0_41 = arith.constant 0 : index
    %42 = vector.load %arg5[%c4, %c0_40, %c0_41] : memref<9x3x32xf32, #tpu.memory_space<vmem>>, vector<1x3x32xf32>
    %43 = vector.shape_cast %42 : vector<1x3x32xf32> to vector<3x32xf32>
    %c0_42 = arith.constant 0 : index
    %c8_43 = arith.constant 8 : index
    %c0_44 = arith.constant 0 : index
    %44 = vector.load %arg2[%c0_42, %c8_43, %c0_44] : memref<1x144x3xf32, #tpu.memory_space<vmem>>, vector<1x128x3xf32>
    %45 = vector.shape_cast %44 : vector<1x128x3xf32> to vector<128x3xf32>
    %cst_45 = arith.constant dense<0.000000e+00> : vector<128x32xf32>
    %46 = tpu.matmul %45, %43, %cst_45 {dimension_numbers = #tpu.dot_dimension_numbers<[1], [0], [0], [1], [0, 0, 1, 1], [], []>} : vector<128x3xf32>, vector<3x32xf32>, vector<128x32xf32> -> vector<128x32xf32>
    %47 = arith.addf %37, %46 : vector<128x32xf32>
    %c0_46 = arith.constant 0 : index
    %c8_47 = arith.constant 8 : index
    %c0_48 = arith.constant 0 : index
    %48 = vector.load %arg3[%c0_46, %c8_47, %c0_48] : memref<1x144x3xf32, #tpu.memory_space<vmem>>, vector<1x128x3xf32>
    %49 = vector.shape_cast %48 : vector<1x128x3xf32> to vector<128x3xf32>
    %cst_49 = arith.constant dense<0.000000e+00> : vector<128x32xf32>
    %50 = tpu.matmul %49, %43, %cst_49 {dimension_numbers = #tpu.dot_dimension_numbers<[1], [0], [0], [1], [0, 0, 1, 1], [], []>} : vector<128x3xf32>, vector<3x32xf32>, vector<128x32xf32> -> vector<128x32xf32>
    %51 = arith.addf %41, %50 : vector<128x32xf32>
    %c5 = arith.constant 5 : index
    %c0_50 = arith.constant 0 : index
    %c0_51 = arith.constant 0 : index
    %52 = vector.load %arg5[%c5, %c0_50, %c0_51] : memref<9x3x32xf32, #tpu.memory_space<vmem>>, vector<1x3x32xf32>
    %53 = vector.shape_cast %52 : vector<1x3x32xf32> to vector<3x32xf32>
    %c0_52 = arith.constant 0 : index
    %c8_53 = arith.constant 8 : index
    %c0_54 = arith.constant 0 : index
    %54 = vector.load %arg3[%c0_52, %c8_53, %c0_54] : memref<1x144x3xf32, #tpu.memory_space<vmem>>, vector<1x128x3xf32>
    %55 = vector.shape_cast %54 : vector<1x128x3xf32> to vector<128x3xf32>
    %cst_55 = arith.constant dense<0.000000e+00> : vector<128x32xf32>
    %56 = tpu.matmul %55, %53, %cst_55 {dimension_numbers = #tpu.dot_dimension_numbers<[1], [0], [0], [1], [0, 0, 1, 1], [], []>} : vector<128x3xf32>, vector<3x32xf32>, vector<128x32xf32> -> vector<128x32xf32>
    %57 = arith.addf %47, %56 : vector<128x32xf32>
    %c0_56 = arith.constant 0 : index
    %c8_57 = arith.constant 8 : index
    %c0_58 = arith.constant 0 : index
    %58 = vector.load %arg4[%c0_56, %c8_57, %c0_58] : memref<1x144x3xf32, #tpu.memory_space<vmem>>, vector<1x128x3xf32>
    %59 = vector.shape_cast %58 : vector<1x128x3xf32> to vector<128x3xf32>
    %cst_59 = arith.constant dense<0.000000e+00> : vector<128x32xf32>
    %60 = tpu.matmul %59, %53, %cst_59 {dimension_numbers = #tpu.dot_dimension_numbers<[1], [0], [0], [1], [0, 0, 1, 1], [], []>} : vector<128x3xf32>, vector<3x32xf32>, vector<128x32xf32> -> vector<128x32xf32>
    %61 = arith.addf %51, %60 : vector<128x32xf32>
    %c6 = arith.constant 6 : index
    %c0_60 = arith.constant 0 : index
    %c0_61 = arith.constant 0 : index
    %62 = vector.load %arg5[%c6, %c0_60, %c0_61] : memref<9x3x32xf32, #tpu.memory_space<vmem>>, vector<1x3x32xf32>
    %63 = vector.shape_cast %62 : vector<1x3x32xf32> to vector<3x32xf32>
    %c0_62 = arith.constant 0 : index
    %c16 = arith.constant 16 : index
    %c0_63 = arith.constant 0 : index
    %64 = vector.load %arg1[%c0_62, %c16, %c0_63] : memref<1x144x3xf32, #tpu.memory_space<vmem>>, vector<1x128x3xf32>
    %65 = vector.shape_cast %64 : vector<1x128x3xf32> to vector<128x3xf32>
    %cst_64 = arith.constant dense<0.000000e+00> : vector<128x32xf32>
    %66 = tpu.matmul %65, %63, %cst_64 {dimension_numbers = #tpu.dot_dimension_numbers<[1], [0], [0], [1], [0, 0, 1, 1], [], []>} : vector<128x3xf32>, vector<3x32xf32>, vector<128x32xf32> -> vector<128x32xf32>
    %67 = arith.addf %57, %66 : vector<128x32xf32>
    %c0_65 = arith.constant 0 : index
    %c16_66 = arith.constant 16 : index
    %c0_67 = arith.constant 0 : index
    %68 = vector.load %arg2[%c0_65, %c16_66, %c0_67] : memref<1x144x3xf32, #tpu.memory_space<vmem>>, vector<1x128x3xf32>
    %69 = vector.shape_cast %68 : vector<1x128x3xf32> to vector<128x3xf32>
    %cst_68 = arith.constant dense<0.000000e+00> : vector<128x32xf32>
    %70 = tpu.matmul %69, %63, %cst_68 {dimension_numbers = #tpu.dot_dimension_numbers<[1], [0], [0], [1], [0, 0, 1, 1], [], []>} : vector<128x3xf32>, vector<3x32xf32>, vector<128x32xf32> -> vector<128x32xf32>
    %71 = arith.addf %61, %70 : vector<128x32xf32>
    %c7 = arith.constant 7 : index
    %c0_69 = arith.constant 0 : index
    %c0_70 = arith.constant 0 : index
    %72 = vector.load %arg5[%c7, %c0_69, %c0_70] : memref<9x3x32xf32, #tpu.memory_space<vmem>>, vector<1x3x32xf32>
    %73 = vector.shape_cast %72 : vector<1x3x32xf32> to vector<3x32xf32>
    %c0_71 = arith.constant 0 : index
    %c16_72 = arith.constant 16 : index
    %c0_73 = arith.constant 0 : index
    %74 = vector.load %arg2[%c0_71, %c16_72, %c0_73] : memref<1x144x3xf32, #tpu.memory_space<vmem>>, vector<1x128x3xf32>
    %75 = vector.shape_cast %74 : vector<1x128x3xf32> to vector<128x3xf32>
    %cst_74 = arith.constant dense<0.000000e+00> : vector<128x32xf32>
    %76 = tpu.matmul %75, %73, %cst_74 {dimension_numbers = #tpu.dot_dimension_numbers<[1], [0], [0], [1], [0, 0, 1, 1], [], []>} : vector<128x3xf32>, vector<3x32xf32>, vector<128x32xf32> -> vector<128x32xf32>
    %77 = arith.addf %67, %76 : vector<128x32xf32>
    %c0_75 = arith.constant 0 : index
    %c16_76 = arith.constant 16 : index
    %c0_77 = arith.constant 0 : index
    %78 = vector.load %arg3[%c0_75, %c16_76, %c0_77] : memref<1x144x3xf32, #tpu.memory_space<vmem>>, vector<1x128x3xf32>
    %79 = vector.shape_cast %78 : vector<1x128x3xf32> to vector<128x3xf32>
    %cst_78 = arith.constant dense<0.000000e+00> : vector<128x32xf32>
    %80 = tpu.matmul %79, %73, %cst_78 {dimension_numbers = #tpu.dot_dimension_numbers<[1], [0], [0], [1], [0, 0, 1, 1], [], []>} : vector<128x3xf32>, vector<3x32xf32>, vector<128x32xf32> -> vector<128x32xf32>
    %81 = arith.addf %71, %80 : vector<128x32xf32>
    %c8_79 = arith.constant 8 : index
    %c0_80 = arith.constant 0 : index
    %c0_81 = arith.constant 0 : index
    %82 = vector.load %arg5[%c8_79, %c0_80, %c0_81] : memref<9x3x32xf32, #tpu.memory_space<vmem>>, vector<1x3x32xf32>
    %83 = vector.shape_cast %82 : vector<1x3x32xf32> to vector<3x32xf32>
    %c0_82 = arith.constant 0 : index
    %c16_83 = arith.constant 16 : index
    %c0_84 = arith.constant 0 : index
    %84 = vector.load %arg3[%c0_82, %c16_83, %c0_84] : memref<1x144x3xf32, #tpu.memory_space<vmem>>, vector<1x128x3xf32>
    %85 = vector.shape_cast %84 : vector<1x128x3xf32> to vector<128x3xf32>
    %cst_85 = arith.constant dense<0.000000e+00> : vector<128x32xf32>
    %86 = tpu.matmul %85, %83, %cst_85 {dimension_numbers = #tpu.dot_dimension_numbers<[1], [0], [0], [1], [0, 0, 1, 1], [], []>} : vector<128x3xf32>, vector<3x32xf32>, vector<128x32xf32> -> vector<128x32xf32>
    %87 = arith.addf %77, %86 : vector<128x32xf32>
    %c0_86 = arith.constant 0 : index
    %c16_87 = arith.constant 16 : index
    %c0_88 = arith.constant 0 : index
    %88 = vector.load %arg4[%c0_86, %c16_87, %c0_88] : memref<1x144x3xf32, #tpu.memory_space<vmem>>, vector<1x128x3xf32>
    %89 = vector.shape_cast %88 : vector<1x128x3xf32> to vector<128x3xf32>
    %cst_89 = arith.constant dense<0.000000e+00> : vector<128x32xf32>
    %90 = tpu.matmul %89, %83, %cst_89 {dimension_numbers = #tpu.dot_dimension_numbers<[1], [0], [0], [1], [0, 0, 1, 1], [], []>} : vector<128x3xf32>, vector<3x32xf32>, vector<128x32xf32> -> vector<128x32xf32>
    %91 = arith.addf %81, %90 : vector<128x32xf32>
    %c0_90 = arith.constant 0 : index
    %c0_91 = arith.constant 0 : index
    %92 = vector.load %arg6[%c0_90, %c0_91] : memref<1x32xf32, #tpu.memory_space<vmem>>, vector<1x32xf32>
    %93 = vector.extract_strided_slice %87 {offsets = [0, 0], sizes = [8, 32], strides = [1, 1]} : vector<128x32xf32> to vector<8x32xf32>
    %94 = vector.extract_strided_slice %87 {offsets = [8, 0], sizes = [8, 32], strides = [1, 1]} : vector<128x32xf32> to vector<8x32xf32>
    %95 = arith.maximumf %93, %94 : vector<8x32xf32>
    %96 = vector.extract_strided_slice %91 {offsets = [0, 0], sizes = [8, 32], strides = [1, 1]} : vector<128x32xf32> to vector<8x32xf32>
    %97 = vector.extract_strided_slice %91 {offsets = [8, 0], sizes = [8, 32], strides = [1, 1]} : vector<128x32xf32> to vector<8x32xf32>
    %98 = arith.maximumf %96, %97 : vector<8x32xf32>
    %99 = arith.maximumf %95, %98 : vector<8x32xf32>
    %100 = vector.broadcast %92 : vector<1x32xf32> to vector<8x32xf32>
    %101 = arith.addf %99, %100 : vector<8x32xf32>
    %cst_92 = arith.constant 0.000000e+00 : f32
    %102 = vector.broadcast %cst_92 : f32 to vector<8x32xf32>
    %103 = arith.maximumf %101, %102 : vector<8x32xf32>
    %c0_93 = arith.constant 0 : index
    %c0_94 = arith.constant 0 : index
    %c0_95 = arith.constant 0 : index
    %c0_96 = arith.constant 0 : index
    %104 = vector.load %arg7[%c0_93, %c0_94, %c0_95, %c0_96] : memref<1x8x8x32xf32, #tpu.memory_space<vmem>>, vector<1x1x8x32xf32>
    %105 = vector.shape_cast %104 : vector<1x1x8x32xf32> to vector<8x32xf32>
    %106 = vector.shape_cast %103 : vector<8x32xf32> to vector<1x1x8x32xf32>
    tpu.vector_store %arg7[%c0_93, %c0_94, %c0_95, %c0_96], %106 {strides = array<i32>} : memref<1x8x8x32xf32, #tpu.memory_space<vmem>>, vector<1x1x8x32xf32>,
    %107 = vector.extract_strided_slice %87 {offsets = [16, 0], sizes = [8, 32], strides = [1, 1]} : vector<128x32xf32> to vector<8x32xf32>
    %108 = vector.extract_strided_slice %87 {offsets = [24, 0], sizes = [8, 32], strides = [1, 1]} : vector<128x32xf32> to vector<8x32xf32>
    %109 = arith.maximumf %107, %108 : vector<8x32xf32>
    %110 = vector.extract_strided_slice %91 {offsets = [16, 0], sizes = [8, 32], strides = [1, 1]} : vector<128x32xf32> to vector<8x32xf32>
    %111 = vector.extract_strided_slice %91 {offsets = [24, 0], sizes = [8, 32], strides = [1, 1]} : vector<128x32xf32> to vector<8x32xf32>
    %112 = arith.maximumf %110, %111 : vector<8x32xf32>
    %113 = arith.maximumf %109, %112 : vector<8x32xf32>
    %114 = vector.broadcast %92 : vector<1x32xf32> to vector<8x32xf32>
    %115 = arith.addf %113, %114 : vector<8x32xf32>
    %cst_97 = arith.constant 0.000000e+00 : f32
    %116 = vector.broadcast %cst_97 : f32 to vector<8x32xf32>
    %117 = arith.maximumf %115, %116 : vector<8x32xf32>
    %c0_98 = arith.constant 0 : index
    %c1_99 = arith.constant 1 : index
    %c0_100 = arith.constant 0 : index
    %c0_101 = arith.constant 0 : index
    %118 = vector.load %arg7[%c0_98, %c1_99, %c0_100, %c0_101] : memref<1x8x8x32xf32, #tpu.memory_space<vmem>>, vector<1x1x8x32xf32>
    %119 = vector.shape_cast %118 : vector<1x1x8x32xf32> to vector<8x32xf32>
    %120 = vector.shape_cast %117 : vector<8x32xf32> to vector<1x1x8x32xf32>
    tpu.vector_store %arg7[%c0_98, %c1_99, %c0_100, %c0_101], %120 {strides = array<i32>} : memref<1x8x8x32xf32, #tpu.memory_space<vmem>>, vector<1x1x8x32xf32>,
    %121 = vector.extract_strided_slice %87 {offsets = [32, 0], sizes = [8, 32], strides = [1, 1]} : vector<128x32xf32> to vector<8x32xf32>
    %122 = vector.extract_strided_slice %87 {offsets = [40, 0], sizes = [8, 32], strides = [1, 1]} : vector<128x32xf32> to vector<8x32xf32>
    %123 = arith.maximumf %121, %122 : vector<8x32xf32>
    %124 = vector.extract_strided_slice %91 {offsets = [32, 0], sizes = [8, 32], strides = [1, 1]} : vector<128x32xf32> to vector<8x32xf32>
    %125 = vector.extract_strided_slice %91 {offsets = [40, 0], sizes = [8, 32], strides = [1, 1]} : vector<128x32xf32> to vector<8x32xf32>
    %126 = arith.maximumf %124, %125 : vector<8x32xf32>
    %127 = arith.maximumf %123, %126 : vector<8x32xf32>
    %128 = vector.broadcast %92 : vector<1x32xf32> to vector<8x32xf32>
    %129 = arith.addf %127, %128 : vector<8x32xf32>
    %cst_102 = arith.constant 0.000000e+00 : f32
    %130 = vector.broadcast %cst_102 : f32 to vector<8x32xf32>
    %131 = arith.maximumf %129, %130 : vector<8x32xf32>
    %c0_103 = arith.constant 0 : index
    %c2_104 = arith.constant 2 : index
    %c0_105 = arith.constant 0 : index
    %c0_106 = arith.constant 0 : index
    %132 = vector.load %arg7[%c0_103, %c2_104, %c0_105, %c0_106] : memref<1x8x8x32xf32, #tpu.memory_space<vmem>>, vector<1x1x8x32xf32>
    %133 = vector.shape_cast %132 : vector<1x1x8x32xf32> to vector<8x32xf32>
    %134 = vector.shape_cast %131 : vector<8x32xf32> to vector<1x1x8x32xf32>
    tpu.vector_store %arg7[%c0_103, %c2_104, %c0_105, %c0_106], %134 {strides = array<i32>} : memref<1x8x8x32xf32, #tpu.memory_space<vmem>>, vector<1x1x8x32xf32>,
    %135 = vector.extract_strided_slice %87 {offsets = [48, 0], sizes = [8, 32], strides = [1, 1]} : vector<128x32xf32> to vector<8x32xf32>
    %136 = vector.extract_strided_slice %87 {offsets = [56, 0], sizes = [8, 32], strides = [1, 1]} : vector<128x32xf32> to vector<8x32xf32>
    %137 = arith.maximumf %135, %136 : vector<8x32xf32>
    %138 = vector.extract_strided_slice %91 {offsets = [48, 0], sizes = [8, 32], strides = [1, 1]} : vector<128x32xf32> to vector<8x32xf32>
    %139 = vector.extract_strided_slice %91 {offsets = [56, 0], sizes = [8, 32], strides = [1, 1]} : vector<128x32xf32> to vector<8x32xf32>
    %140 = arith.maximumf %138, %139 : vector<8x32xf32>
    %141 = arith.maximumf %137, %140 : vector<8x32xf32>
    %142 = vector.broadcast %92 : vector<1x32xf32> to vector<8x32xf32>
    %143 = arith.addf %141, %142 : vector<8x32xf32>
    %cst_107 = arith.constant 0.000000e+00 : f32
    %144 = vector.broadcast %cst_107 : f32 to vector<8x32xf32>
    %145 = arith.maximumf %143, %144 : vector<8x32xf32>
    %c0_108 = arith.constant 0 : index
    %c3_109 = arith.constant 3 : index
    %c0_110 = arith.constant 0 : index
    %c0_111 = arith.constant 0 : index
    %146 = vector.load %arg7[%c0_108, %c3_109, %c0_110, %c0_111] : memref<1x8x8x32xf32, #tpu.memory_space<vmem>>, vector<1x1x8x32xf32>
    %147 = vector.shape_cast %146 : vector<1x1x8x32xf32> to vector<8x32xf32>
    %148 = vector.shape_cast %145 : vector<8x32xf32> to vector<1x1x8x32xf32>
    tpu.vector_store %arg7[%c0_108, %c3_109, %c0_110, %c0_111], %148 {strides = array<i32>} : memref<1x8x8x32xf32, #tpu.memory_space<vmem>>, vector<1x1x8x32xf32>,
    %149 = vector.extract_strided_slice %87 {offsets = [64, 0], sizes = [8, 32], strides = [1, 1]} : vector<128x32xf32> to vector<8x32xf32>
    %150 = vector.extract_strided_slice %87 {offsets = [72, 0], sizes = [8, 32], strides = [1, 1]} : vector<128x32xf32> to vector<8x32xf32>
    %151 = arith.maximumf %149, %150 : vector<8x32xf32>
    %152 = vector.extract_strided_slice %91 {offsets = [64, 0], sizes = [8, 32], strides = [1, 1]} : vector<128x32xf32> to vector<8x32xf32>
    %153 = vector.extract_strided_slice %91 {offsets = [72, 0], sizes = [8, 32], strides = [1, 1]} : vector<128x32xf32> to vector<8x32xf32>
    %154 = arith.maximumf %152, %153 : vector<8x32xf32>
    %155 = arith.maximumf %151, %154 : vector<8x32xf32>
    %156 = vector.broadcast %92 : vector<1x32xf32> to vector<8x32xf32>
    %157 = arith.addf %155, %156 : vector<8x32xf32>
    %cst_112 = arith.constant 0.000000e+00 : f32
    %158 = vector.broadcast %cst_112 : f32 to vector<8x32xf32>
    %159 = arith.maximumf %157, %158 : vector<8x32xf32>
    %c0_113 = arith.constant 0 : index
    %c4_114 = arith.constant 4 : index
    %c0_115 = arith.constant 0 : index
    %c0_116 = arith.constant 0 : index
    %160 = vector.load %arg7[%c0_113, %c4_114, %c0_115, %c0_116] : memref<1x8x8x32xf32, #tpu.memory_space<vmem>>, vector<1x1x8x32xf32>
    %161 = vector.shape_cast %160 : vector<1x1x8x32xf32> to vector<8x32xf32>
    %162 = vector.shape_cast %159 : vector<8x32xf32> to vector<1x1x8x32xf32>
    tpu.vector_store %arg7[%c0_113, %c4_114, %c0_115, %c0_116], %162 {strides = array<i32>} : memref<1x8x8x32xf32, #tpu.memory_space<vmem>>, vector<1x1x8x32xf32>,
    %163 = vector.extract_strided_slice %87 {offsets = [80, 0], sizes = [8, 32], strides = [1, 1]} : vector<128x32xf32> to vector<8x32xf32>
    %164 = vector.extract_strided_slice %87 {offsets = [88, 0], sizes = [8, 32], strides = [1, 1]} : vector<128x32xf32> to vector<8x32xf32>
    %165 = arith.maximumf %163, %164 : vector<8x32xf32>
    %166 = vector.extract_strided_slice %91 {offsets = [80, 0], sizes = [8, 32], strides = [1, 1]} : vector<128x32xf32> to vector<8x32xf32>
    %167 = vector.extract_strided_slice %91 {offsets = [88, 0], sizes = [8, 32], strides = [1, 1]} : vector<128x32xf32> to vector<8x32xf32>
    %168 = arith.maximumf %166, %167 : vector<8x32xf32>
    %169 = arith.maximumf %165, %168 : vector<8x32xf32>
    %170 = vector.broadcast %92 : vector<1x32xf32> to vector<8x32xf32>
    %171 = arith.addf %169, %170 : vector<8x32xf32>
    %cst_117 = arith.constant 0.000000e+00 : f32
    %172 = vector.broadcast %cst_117 : f32 to vector<8x32xf32>
    %173 = arith.maximumf %171, %172 : vector<8x32xf32>
    %c0_118 = arith.constant 0 : index
    %c5_119 = arith.constant 5 : index
    %c0_120 = arith.constant 0 : index
    %c0_121 = arith.constant 0 : index
    %174 = vector.load %arg7[%c0_118, %c5_119, %c0_120, %c0_121] : memref<1x8x8x32xf32, #tpu.memory_space<vmem>>, vector<1x1x8x32xf32>
    %175 = vector.shape_cast %174 : vector<1x1x8x32xf32> to vector<8x32xf32>
    %176 = vector.shape_cast %173 : vector<8x32xf32> to vector<1x1x8x32xf32>
    tpu.vector_store %arg7[%c0_118, %c5_119, %c0_120, %c0_121], %176 {strides = array<i32>} : memref<1x8x8x32xf32, #tpu.memory_space<vmem>>, vector<1x1x8x32xf32>,
    %177 = vector.extract_strided_slice %87 {offsets = [96, 0], sizes = [8, 32], strides = [1, 1]} : vector<128x32xf32> to vector<8x32xf32>
    %178 = vector.extract_strided_slice %87 {offsets = [104, 0], sizes = [8, 32], strides = [1, 1]} : vector<128x32xf32> to vector<8x32xf32>
    %179 = arith.maximumf %177, %178 : vector<8x32xf32>
    %180 = vector.extract_strided_slice %91 {offsets = [96, 0], sizes = [8, 32], strides = [1, 1]} : vector<128x32xf32> to vector<8x32xf32>
    %181 = vector.extract_strided_slice %91 {offsets = [104, 0], sizes = [8, 32], strides = [1, 1]} : vector<128x32xf32> to vector<8x32xf32>
    %182 = arith.maximumf %180, %181 : vector<8x32xf32>
    %183 = arith.maximumf %179, %182 : vector<8x32xf32>
    %184 = vector.broadcast %92 : vector<1x32xf32> to vector<8x32xf32>
    %185 = arith.addf %183, %184 : vector<8x32xf32>
    %cst_122 = arith.constant 0.000000e+00 : f32
    %186 = vector.broadcast %cst_122 : f32 to vector<8x32xf32>
    %187 = arith.maximumf %185, %186 : vector<8x32xf32>
    %c0_123 = arith.constant 0 : index
    %c6_124 = arith.constant 6 : index
    %c0_125 = arith.constant 0 : index
    %c0_126 = arith.constant 0 : index
    %188 = vector.load %arg7[%c0_123, %c6_124, %c0_125, %c0_126] : memref<1x8x8x32xf32, #tpu.memory_space<vmem>>, vector<1x1x8x32xf32>
    %189 = vector.shape_cast %188 : vector<1x1x8x32xf32> to vector<8x32xf32>
    %190 = vector.shape_cast %187 : vector<8x32xf32> to vector<1x1x8x32xf32>
    tpu.vector_store %arg7[%c0_123, %c6_124, %c0_125, %c0_126], %190 {strides = array<i32>} : memref<1x8x8x32xf32, #tpu.memory_space<vmem>>, vector<1x1x8x32xf32>,
    %191 = vector.extract_strided_slice %87 {offsets = [112, 0], sizes = [8, 32], strides = [1, 1]} : vector<128x32xf32> to vector<8x32xf32>
    %192 = vector.extract_strided_slice %87 {offsets = [120, 0], sizes = [8, 32], strides = [1, 1]} : vector<128x32xf32> to vector<8x32xf32>
    %193 = arith.maximumf %191, %192 : vector<8x32xf32>
    %194 = vector.extract_strided_slice %91 {offsets = [112, 0], sizes = [8, 32], strides = [1, 1]} : vector<128x32xf32> to vector<8x32xf32>
    %195 = vector.extract_strided_slice %91 {offsets = [120, 0], sizes = [8, 32], strides = [1, 1]} : vector<128x32xf32> to vector<8x32xf32>
    %196 = arith.maximumf %194, %195 : vector<8x32xf32>
    %197 = arith.maximumf %193, %196 : vector<8x32xf32>
    %198 = vector.broadcast %92 : vector<1x32xf32> to vector<8x32xf32>
    %199 = arith.addf %197, %198 : vector<8x32xf32>
    %cst_127 = arith.constant 0.000000e+00 : f32
    %200 = vector.broadcast %cst_127 : f32 to vector<8x32xf32>
    %201 = arith.maximumf %199, %200 : vector<8x32xf32>
    %c0_128 = arith.constant 0 : index
    %c7_129 = arith.constant 7 : index
    %c0_130 = arith.constant 0 : index
    %c0_131 = arith.constant 0 : index
    %202 = vector.load %arg7[%c0_128, %c7_129, %c0_130, %c0_131] : memref<1x8x8x32xf32, #tpu.memory_space<vmem>>, vector<1x1x8x32xf32>
    %203 = vector.shape_cast %202 : vector<1x1x8x32xf32> to vector<8x32xf32>
    %204 = vector.shape_cast %201 : vector<8x32xf32> to vector<1x1x8x32xf32>
    tpu.vector_store %arg7[%c0_128, %c7_129, %c0_130, %c0_131], %204 {strides = array<i32>} : memref<1x8x8x32xf32, #tpu.memory_space<vmem>>, vector<1x1x8x32xf32>,
    return
  }
  func.func @transform_0(%arg0: i32) -> (i32, i32, i32) {
    %c0_i32 = arith.constant 0 : i32
    %c0_i32_0 = arith.constant 0 : i32
    %c0_i32_1 = arith.constant 0 : i32
    return %arg0, %c0_i32, %c0_i32_0 : i32, i32, i32
  }
  func.func @transform_1(%arg0: i32) -> (i32, i32, i32) {
    %c0_i32 = arith.constant 0 : i32
    %c0_i32_0 = arith.constant 0 : i32
    %c0_i32_1 = arith.constant 0 : i32
    return %arg0, %c0_i32, %c0_i32_0 : i32, i32, i32
  }
  func.func @transform_2(%arg0: i32) -> (i32, i32, i32) {
    %c0_i32 = arith.constant 0 : i32
    %c0_i32_0 = arith.constant 0 : i32
    %c0_i32_1 = arith.constant 0 : i32
    return %arg0, %c0_i32, %c0_i32_0 : i32, i32, i32
  }
  func.func @transform_3(%arg0: i32) -> (i32, i32, i32) {
    %c0_i32 = arith.constant 0 : i32
    %c0_i32_0 = arith.constant 0 : i32
    %c0_i32_1 = arith.constant 0 : i32
    return %arg0, %c0_i32, %c0_i32_0 : i32, i32, i32
  }
  func.func @transform_4(%arg0: i32) -> (i32, i32, i32) {
    %c0_i32 = arith.constant 0 : i32
    %c0_i32_0 = arith.constant 0 : i32
    %c0_i32_1 = arith.constant 0 : i32
    %c0_i32_2 = arith.constant 0 : i32
    return %c0_i32, %c0_i32_0, %c0_i32_1 : i32, i32, i32
  }
  func.func @transform_5(%arg0: i32) -> (i32, i32) {
    %c0_i32 = arith.constant 0 : i32
    %c0_i32_0 = arith.constant 0 : i32
    %c0_i32_1 = arith.constant 0 : i32
    return %c0_i32, %c0_i32_0 : i32, i32
  }
  func.func @transform_6(%arg0: i32) -> (i32, i32, i32, i32) {
    %c0_i32 = arith.constant 0 : i32
    %c0_i32_0 = arith.constant 0 : i32
    %c0_i32_1 = arith.constant 0 : i32
    %c0_i32_2 = arith.constant 0 : i32
    return %arg0, %c0_i32, %c0_i32_0, %c0_i32_1 : i32, i32, i32, i32
  }
}

module attributes {stable_mosaic.version = 11 : i64} {
  func.func @_conv_pool_kernel(%arg0: i32, %arg1: memref<1x80x32xf32, #tpu.memory_space<vmem>>, %arg2: memref<1x80x32xf32, #tpu.memory_space<vmem>>, %arg3: memref<1x80x32xf32, #tpu.memory_space<vmem>>, %arg4: memref<1x80x32xf32, #tpu.memory_space<vmem>>, %arg5: memref<9x32x64xf32, #tpu.memory_space<vmem>>, %arg6: memref<1x64xf32, #tpu.memory_space<vmem>>, %arg7: memref<1x4x4x64xf32, #tpu.memory_space<vmem>>) attributes {dimension_semantics = [#tpu.dimension_semantics<parallel>], iteration_bounds = array<i64: 2>, scalar_prefetch = 0 : i64, scratch_operands = 0 : i64, tpu.core_type = #tpu.core_type<tc>, window_params = [{transform_indices = @transform_0, window_bounds = array<i64: 1, 80, 32>}, {transform_indices = @transform_1, window_bounds = array<i64: 1, 80, 32>}, {transform_indices = @transform_2, window_bounds = array<i64: 1, 80, 32>}, {transform_indices = @transform_3, window_bounds = array<i64: 1, 80, 32>}, {pipeline_mode = #tpu.pipeline_mode<synchronous>, transform_indices = @transform_4, window_bounds = array<i64: 9, 32, 64>}, {pipeline_mode = #tpu.pipeline_mode<synchronous>, transform_indices = @transform_5, window_bounds = array<i64: 1, 64>}, {transform_indices = @transform_6, window_bounds = array<i64: 1, 4, 4, 64>}]} {
    %cst = arith.constant 0.000000e+00 : f32
    %0 = vector.broadcast %cst : f32 to vector<64x64xf32>
    %cst_0 = arith.constant 0.000000e+00 : f32
    %1 = vector.broadcast %cst_0 : f32 to vector<64x64xf32>
    %c0 = arith.constant 0 : index
    %c0_1 = arith.constant 0 : index
    %c0_2 = arith.constant 0 : index
    %2 = vector.load %arg5[%c0, %c0_1, %c0_2] : memref<9x32x64xf32, #tpu.memory_space<vmem>>, vector<1x32x64xf32>
    %3 = vector.shape_cast %2 : vector<1x32x64xf32> to vector<32x64xf32>
    %c0_3 = arith.constant 0 : index
    %c0_4 = arith.constant 0 : index
    %c0_5 = arith.constant 0 : index
    %4 = vector.load %arg1[%c0_3, %c0_4, %c0_5] : memref<1x80x32xf32, #tpu.memory_space<vmem>>, vector<1x64x32xf32>
    %5 = vector.shape_cast %4 : vector<1x64x32xf32> to vector<64x32xf32>
    %cst_6 = arith.constant dense<0.000000e+00> : vector<64x64xf32>
    %6 = tpu.matmul %5, %3, %cst_6 {dimension_numbers = #tpu.dot_dimension_numbers<[1], [0], [0], [1], [0, 0, 1, 1], [], []>} : vector<64x32xf32>, vector<32x64xf32>, vector<64x64xf32> -> vector<64x64xf32>
    %7 = arith.addf %0, %6 : vector<64x64xf32>
    %c0_7 = arith.constant 0 : index
    %c0_8 = arith.constant 0 : index
    %c0_9 = arith.constant 0 : index
    %8 = vector.load %arg2[%c0_7, %c0_8, %c0_9] : memref<1x80x32xf32, #tpu.memory_space<vmem>>, vector<1x64x32xf32>
    %9 = vector.shape_cast %8 : vector<1x64x32xf32> to vector<64x32xf32>
    %cst_10 = arith.constant dense<0.000000e+00> : vector<64x64xf32>
    %10 = tpu.matmul %9, %3, %cst_10 {dimension_numbers = #tpu.dot_dimension_numbers<[1], [0], [0], [1], [0, 0, 1, 1], [], []>} : vector<64x32xf32>, vector<32x64xf32>, vector<64x64xf32> -> vector<64x64xf32>
    %11 = arith.addf %1, %10 : vector<64x64xf32>
    %c1 = arith.constant 1 : index
    %c0_11 = arith.constant 0 : index
    %c0_12 = arith.constant 0 : index
    %12 = vector.load %arg5[%c1, %c0_11, %c0_12] : memref<9x32x64xf32, #tpu.memory_space<vmem>>, vector<1x32x64xf32>
    %13 = vector.shape_cast %12 : vector<1x32x64xf32> to vector<32x64xf32>
    %c0_13 = arith.constant 0 : index
    %c0_14 = arith.constant 0 : index
    %c0_15 = arith.constant 0 : index
    %14 = vector.load %arg2[%c0_13, %c0_14, %c0_15] : memref<1x80x32xf32, #tpu.memory_space<vmem>>, vector<1x64x32xf32>
    %15 = vector.shape_cast %14 : vector<1x64x32xf32> to vector<64x32xf32>
    %cst_16 = arith.constant dense<0.000000e+00> : vector<64x64xf32>
    %16 = tpu.matmul %15, %13, %cst_16 {dimension_numbers = #tpu.dot_dimension_numbers<[1], [0], [0], [1], [0, 0, 1, 1], [], []>} : vector<64x32xf32>, vector<32x64xf32>, vector<64x64xf32> -> vector<64x64xf32>
    %17 = arith.addf %7, %16 : vector<64x64xf32>
    %c0_17 = arith.constant 0 : index
    %c0_18 = arith.constant 0 : index
    %c0_19 = arith.constant 0 : index
    %18 = vector.load %arg3[%c0_17, %c0_18, %c0_19] : memref<1x80x32xf32, #tpu.memory_space<vmem>>, vector<1x64x32xf32>
    %19 = vector.shape_cast %18 : vector<1x64x32xf32> to vector<64x32xf32>
    %cst_20 = arith.constant dense<0.000000e+00> : vector<64x64xf32>
    %20 = tpu.matmul %19, %13, %cst_20 {dimension_numbers = #tpu.dot_dimension_numbers<[1], [0], [0], [1], [0, 0, 1, 1], [], []>} : vector<64x32xf32>, vector<32x64xf32>, vector<64x64xf32> -> vector<64x64xf32>
    %21 = arith.addf %11, %20 : vector<64x64xf32>
    %c2 = arith.constant 2 : index
    %c0_21 = arith.constant 0 : index
    %c0_22 = arith.constant 0 : index
    %22 = vector.load %arg5[%c2, %c0_21, %c0_22] : memref<9x32x64xf32, #tpu.memory_space<vmem>>, vector<1x32x64xf32>
    %23 = vector.shape_cast %22 : vector<1x32x64xf32> to vector<32x64xf32>
    %c0_23 = arith.constant 0 : index
    %c0_24 = arith.constant 0 : index
    %c0_25 = arith.constant 0 : index
    %24 = vector.load %arg3[%c0_23, %c0_24, %c0_25] : memref<1x80x32xf32, #tpu.memory_space<vmem>>, vector<1x64x32xf32>
    %25 = vector.shape_cast %24 : vector<1x64x32xf32> to vector<64x32xf32>
    %cst_26 = arith.constant dense<0.000000e+00> : vector<64x64xf32>
    %26 = tpu.matmul %25, %23, %cst_26 {dimension_numbers = #tpu.dot_dimension_numbers<[1], [0], [0], [1], [0, 0, 1, 1], [], []>} : vector<64x32xf32>, vector<32x64xf32>, vector<64x64xf32> -> vector<64x64xf32>
    %27 = arith.addf %17, %26 : vector<64x64xf32>
    %c0_27 = arith.constant 0 : index
    %c0_28 = arith.constant 0 : index
    %c0_29 = arith.constant 0 : index
    %28 = vector.load %arg4[%c0_27, %c0_28, %c0_29] : memref<1x80x32xf32, #tpu.memory_space<vmem>>, vector<1x64x32xf32>
    %29 = vector.shape_cast %28 : vector<1x64x32xf32> to vector<64x32xf32>
    %cst_30 = arith.constant dense<0.000000e+00> : vector<64x64xf32>
    %30 = tpu.matmul %29, %23, %cst_30 {dimension_numbers = #tpu.dot_dimension_numbers<[1], [0], [0], [1], [0, 0, 1, 1], [], []>} : vector<64x32xf32>, vector<32x64xf32>, vector<64x64xf32> -> vector<64x64xf32>
    %31 = arith.addf %21, %30 : vector<64x64xf32>
    %c3 = arith.constant 3 : index
    %c0_31 = arith.constant 0 : index
    %c0_32 = arith.constant 0 : index
    %32 = vector.load %arg5[%c3, %c0_31, %c0_32] : memref<9x32x64xf32, #tpu.memory_space<vmem>>, vector<1x32x64xf32>
    %33 = vector.shape_cast %32 : vector<1x32x64xf32> to vector<32x64xf32>
    %c0_33 = arith.constant 0 : index
    %c8 = arith.constant 8 : index
    %c0_34 = arith.constant 0 : index
    %34 = vector.load %arg1[%c0_33, %c8, %c0_34] : memref<1x80x32xf32, #tpu.memory_space<vmem>>, vector<1x64x32xf32>
    %35 = vector.shape_cast %34 : vector<1x64x32xf32> to vector<64x32xf32>
    %cst_35 = arith.constant dense<0.000000e+00> : vector<64x64xf32>
    %36 = tpu.matmul %35, %33, %cst_35 {dimension_numbers = #tpu.dot_dimension_numbers<[1], [0], [0], [1], [0, 0, 1, 1], [], []>} : vector<64x32xf32>, vector<32x64xf32>, vector<64x64xf32> -> vector<64x64xf32>
    %37 = arith.addf %27, %36 : vector<64x64xf32>
    %c0_36 = arith.constant 0 : index
    %c8_37 = arith.constant 8 : index
    %c0_38 = arith.constant 0 : index
    %38 = vector.load %arg2[%c0_36, %c8_37, %c0_38] : memref<1x80x32xf32, #tpu.memory_space<vmem>>, vector<1x64x32xf32>
    %39 = vector.shape_cast %38 : vector<1x64x32xf32> to vector<64x32xf32>
    %cst_39 = arith.constant dense<0.000000e+00> : vector<64x64xf32>
    %40 = tpu.matmul %39, %33, %cst_39 {dimension_numbers = #tpu.dot_dimension_numbers<[1], [0], [0], [1], [0, 0, 1, 1], [], []>} : vector<64x32xf32>, vector<32x64xf32>, vector<64x64xf32> -> vector<64x64xf32>
    %41 = arith.addf %31, %40 : vector<64x64xf32>
    %c4 = arith.constant 4 : index
    %c0_40 = arith.constant 0 : index
    %c0_41 = arith.constant 0 : index
    %42 = vector.load %arg5[%c4, %c0_40, %c0_41] : memref<9x32x64xf32, #tpu.memory_space<vmem>>, vector<1x32x64xf32>
    %43 = vector.shape_cast %42 : vector<1x32x64xf32> to vector<32x64xf32>
    %c0_42 = arith.constant 0 : index
    %c8_43 = arith.constant 8 : index
    %c0_44 = arith.constant 0 : index
    %44 = vector.load %arg2[%c0_42, %c8_43, %c0_44] : memref<1x80x32xf32, #tpu.memory_space<vmem>>, vector<1x64x32xf32>
    %45 = vector.shape_cast %44 : vector<1x64x32xf32> to vector<64x32xf32>
    %cst_45 = arith.constant dense<0.000000e+00> : vector<64x64xf32>
    %46 = tpu.matmul %45, %43, %cst_45 {dimension_numbers = #tpu.dot_dimension_numbers<[1], [0], [0], [1], [0, 0, 1, 1], [], []>} : vector<64x32xf32>, vector<32x64xf32>, vector<64x64xf32> -> vector<64x64xf32>
    %47 = arith.addf %37, %46 : vector<64x64xf32>
    %c0_46 = arith.constant 0 : index
    %c8_47 = arith.constant 8 : index
    %c0_48 = arith.constant 0 : index
    %48 = vector.load %arg3[%c0_46, %c8_47, %c0_48] : memref<1x80x32xf32, #tpu.memory_space<vmem>>, vector<1x64x32xf32>
    %49 = vector.shape_cast %48 : vector<1x64x32xf32> to vector<64x32xf32>
    %cst_49 = arith.constant dense<0.000000e+00> : vector<64x64xf32>
    %50 = tpu.matmul %49, %43, %cst_49 {dimension_numbers = #tpu.dot_dimension_numbers<[1], [0], [0], [1], [0, 0, 1, 1], [], []>} : vector<64x32xf32>, vector<32x64xf32>, vector<64x64xf32> -> vector<64x64xf32>
    %51 = arith.addf %41, %50 : vector<64x64xf32>
    %c5 = arith.constant 5 : index
    %c0_50 = arith.constant 0 : index
    %c0_51 = arith.constant 0 : index
    %52 = vector.load %arg5[%c5, %c0_50, %c0_51] : memref<9x32x64xf32, #tpu.memory_space<vmem>>, vector<1x32x64xf32>
    %53 = vector.shape_cast %52 : vector<1x32x64xf32> to vector<32x64xf32>
    %c0_52 = arith.constant 0 : index
    %c8_53 = arith.constant 8 : index
    %c0_54 = arith.constant 0 : index
    %54 = vector.load %arg3[%c0_52, %c8_53, %c0_54] : memref<1x80x32xf32, #tpu.memory_space<vmem>>, vector<1x64x32xf32>
    %55 = vector.shape_cast %54 : vector<1x64x32xf32> to vector<64x32xf32>
    %cst_55 = arith.constant dense<0.000000e+00> : vector<64x64xf32>
    %56 = tpu.matmul %55, %53, %cst_55 {dimension_numbers = #tpu.dot_dimension_numbers<[1], [0], [0], [1], [0, 0, 1, 1], [], []>} : vector<64x32xf32>, vector<32x64xf32>, vector<64x64xf32> -> vector<64x64xf32>
    %57 = arith.addf %47, %56 : vector<64x64xf32>
    %c0_56 = arith.constant 0 : index
    %c8_57 = arith.constant 8 : index
    %c0_58 = arith.constant 0 : index
    %58 = vector.load %arg4[%c0_56, %c8_57, %c0_58] : memref<1x80x32xf32, #tpu.memory_space<vmem>>, vector<1x64x32xf32>
    %59 = vector.shape_cast %58 : vector<1x64x32xf32> to vector<64x32xf32>
    %cst_59 = arith.constant dense<0.000000e+00> : vector<64x64xf32>
    %60 = tpu.matmul %59, %53, %cst_59 {dimension_numbers = #tpu.dot_dimension_numbers<[1], [0], [0], [1], [0, 0, 1, 1], [], []>} : vector<64x32xf32>, vector<32x64xf32>, vector<64x64xf32> -> vector<64x64xf32>
    %61 = arith.addf %51, %60 : vector<64x64xf32>
    %c6 = arith.constant 6 : index
    %c0_60 = arith.constant 0 : index
    %c0_61 = arith.constant 0 : index
    %62 = vector.load %arg5[%c6, %c0_60, %c0_61] : memref<9x32x64xf32, #tpu.memory_space<vmem>>, vector<1x32x64xf32>
    %63 = vector.shape_cast %62 : vector<1x32x64xf32> to vector<32x64xf32>
    %c0_62 = arith.constant 0 : index
    %c16 = arith.constant 16 : index
    %c0_63 = arith.constant 0 : index
    %64 = vector.load %arg1[%c0_62, %c16, %c0_63] : memref<1x80x32xf32, #tpu.memory_space<vmem>>, vector<1x64x32xf32>
    %65 = vector.shape_cast %64 : vector<1x64x32xf32> to vector<64x32xf32>
    %cst_64 = arith.constant dense<0.000000e+00> : vector<64x64xf32>
    %66 = tpu.matmul %65, %63, %cst_64 {dimension_numbers = #tpu.dot_dimension_numbers<[1], [0], [0], [1], [0, 0, 1, 1], [], []>} : vector<64x32xf32>, vector<32x64xf32>, vector<64x64xf32> -> vector<64x64xf32>
    %67 = arith.addf %57, %66 : vector<64x64xf32>
    %c0_65 = arith.constant 0 : index
    %c16_66 = arith.constant 16 : index
    %c0_67 = arith.constant 0 : index
    %68 = vector.load %arg2[%c0_65, %c16_66, %c0_67] : memref<1x80x32xf32, #tpu.memory_space<vmem>>, vector<1x64x32xf32>
    %69 = vector.shape_cast %68 : vector<1x64x32xf32> to vector<64x32xf32>
    %cst_68 = arith.constant dense<0.000000e+00> : vector<64x64xf32>
    %70 = tpu.matmul %69, %63, %cst_68 {dimension_numbers = #tpu.dot_dimension_numbers<[1], [0], [0], [1], [0, 0, 1, 1], [], []>} : vector<64x32xf32>, vector<32x64xf32>, vector<64x64xf32> -> vector<64x64xf32>
    %71 = arith.addf %61, %70 : vector<64x64xf32>
    %c7 = arith.constant 7 : index
    %c0_69 = arith.constant 0 : index
    %c0_70 = arith.constant 0 : index
    %72 = vector.load %arg5[%c7, %c0_69, %c0_70] : memref<9x32x64xf32, #tpu.memory_space<vmem>>, vector<1x32x64xf32>
    %73 = vector.shape_cast %72 : vector<1x32x64xf32> to vector<32x64xf32>
    %c0_71 = arith.constant 0 : index
    %c16_72 = arith.constant 16 : index
    %c0_73 = arith.constant 0 : index
    %74 = vector.load %arg2[%c0_71, %c16_72, %c0_73] : memref<1x80x32xf32, #tpu.memory_space<vmem>>, vector<1x64x32xf32>
    %75 = vector.shape_cast %74 : vector<1x64x32xf32> to vector<64x32xf32>
    %cst_74 = arith.constant dense<0.000000e+00> : vector<64x64xf32>
    %76 = tpu.matmul %75, %73, %cst_74 {dimension_numbers = #tpu.dot_dimension_numbers<[1], [0], [0], [1], [0, 0, 1, 1], [], []>} : vector<64x32xf32>, vector<32x64xf32>, vector<64x64xf32> -> vector<64x64xf32>
    %77 = arith.addf %67, %76 : vector<64x64xf32>
    %c0_75 = arith.constant 0 : index
    %c16_76 = arith.constant 16 : index
    %c0_77 = arith.constant 0 : index
    %78 = vector.load %arg3[%c0_75, %c16_76, %c0_77] : memref<1x80x32xf32, #tpu.memory_space<vmem>>, vector<1x64x32xf32>
    %79 = vector.shape_cast %78 : vector<1x64x32xf32> to vector<64x32xf32>
    %cst_78 = arith.constant dense<0.000000e+00> : vector<64x64xf32>
    %80 = tpu.matmul %79, %73, %cst_78 {dimension_numbers = #tpu.dot_dimension_numbers<[1], [0], [0], [1], [0, 0, 1, 1], [], []>} : vector<64x32xf32>, vector<32x64xf32>, vector<64x64xf32> -> vector<64x64xf32>
    %81 = arith.addf %71, %80 : vector<64x64xf32>
    %c8_79 = arith.constant 8 : index
    %c0_80 = arith.constant 0 : index
    %c0_81 = arith.constant 0 : index
    %82 = vector.load %arg5[%c8_79, %c0_80, %c0_81] : memref<9x32x64xf32, #tpu.memory_space<vmem>>, vector<1x32x64xf32>
    %83 = vector.shape_cast %82 : vector<1x32x64xf32> to vector<32x64xf32>
    %c0_82 = arith.constant 0 : index
    %c16_83 = arith.constant 16 : index
    %c0_84 = arith.constant 0 : index
    %84 = vector.load %arg3[%c0_82, %c16_83, %c0_84] : memref<1x80x32xf32, #tpu.memory_space<vmem>>, vector<1x64x32xf32>
    %85 = vector.shape_cast %84 : vector<1x64x32xf32> to vector<64x32xf32>
    %cst_85 = arith.constant dense<0.000000e+00> : vector<64x64xf32>
    %86 = tpu.matmul %85, %83, %cst_85 {dimension_numbers = #tpu.dot_dimension_numbers<[1], [0], [0], [1], [0, 0, 1, 1], [], []>} : vector<64x32xf32>, vector<32x64xf32>, vector<64x64xf32> -> vector<64x64xf32>
    %87 = arith.addf %77, %86 : vector<64x64xf32>
    %c0_86 = arith.constant 0 : index
    %c16_87 = arith.constant 16 : index
    %c0_88 = arith.constant 0 : index
    %88 = vector.load %arg4[%c0_86, %c16_87, %c0_88] : memref<1x80x32xf32, #tpu.memory_space<vmem>>, vector<1x64x32xf32>
    %89 = vector.shape_cast %88 : vector<1x64x32xf32> to vector<64x32xf32>
    %cst_89 = arith.constant dense<0.000000e+00> : vector<64x64xf32>
    %90 = tpu.matmul %89, %83, %cst_89 {dimension_numbers = #tpu.dot_dimension_numbers<[1], [0], [0], [1], [0, 0, 1, 1], [], []>} : vector<64x32xf32>, vector<32x64xf32>, vector<64x64xf32> -> vector<64x64xf32>
    %91 = arith.addf %81, %90 : vector<64x64xf32>
    %c0_90 = arith.constant 0 : index
    %c0_91 = arith.constant 0 : index
    %92 = vector.load %arg6[%c0_90, %c0_91] : memref<1x64xf32, #tpu.memory_space<vmem>>, vector<1x64xf32>
    %93 = vector.extract_strided_slice %87 {offsets = [0, 0], sizes = [8, 64], strides = [1, 1]} : vector<64x64xf32> to vector<8x64xf32>
    %94 = vector.extract_strided_slice %87 {offsets = [8, 0], sizes = [8, 64], strides = [1, 1]} : vector<64x64xf32> to vector<8x64xf32>
    %95 = arith.maximumf %93, %94 : vector<8x64xf32>
    %96 = vector.extract_strided_slice %91 {offsets = [0, 0], sizes = [8, 64], strides = [1, 1]} : vector<64x64xf32> to vector<8x64xf32>
    %97 = vector.extract_strided_slice %91 {offsets = [8, 0], sizes = [8, 64], strides = [1, 1]} : vector<64x64xf32> to vector<8x64xf32>
    %98 = arith.maximumf %96, %97 : vector<8x64xf32>
    %99 = arith.maximumf %95, %98 : vector<8x64xf32>
    %100 = vector.extract_strided_slice %99 {offsets = [0, 0], sizes = [4, 64], strides = [1, 1]} : vector<8x64xf32> to vector<4x64xf32>
    %101 = vector.broadcast %92 : vector<1x64xf32> to vector<4x64xf32>
    %102 = arith.addf %100, %101 : vector<4x64xf32>
    %cst_92 = arith.constant 0.000000e+00 : f32
    %103 = vector.broadcast %cst_92 : f32 to vector<4x64xf32>
    %104 = arith.maximumf %102, %103 : vector<4x64xf32>
    %c0_93 = arith.constant 0 : index
    %c0_94 = arith.constant 0 : index
    %c0_95 = arith.constant 0 : index
    %c0_96 = arith.constant 0 : index
    %105 = vector.load %arg7[%c0_93, %c0_94, %c0_95, %c0_96] : memref<1x4x4x64xf32, #tpu.memory_space<vmem>>, vector<1x1x4x64xf32>
    %106 = vector.shape_cast %105 : vector<1x1x4x64xf32> to vector<4x64xf32>
    %107 = vector.shape_cast %104 : vector<4x64xf32> to vector<1x1x4x64xf32>
    tpu.vector_store %arg7[%c0_93, %c0_94, %c0_95, %c0_96], %107 {strides = array<i32>} : memref<1x4x4x64xf32, #tpu.memory_space<vmem>>, vector<1x1x4x64xf32>,
    %108 = vector.extract_strided_slice %87 {offsets = [16, 0], sizes = [8, 64], strides = [1, 1]} : vector<64x64xf32> to vector<8x64xf32>
    %109 = vector.extract_strided_slice %87 {offsets = [24, 0], sizes = [8, 64], strides = [1, 1]} : vector<64x64xf32> to vector<8x64xf32>
    %110 = arith.maximumf %108, %109 : vector<8x64xf32>
    %111 = vector.extract_strided_slice %91 {offsets = [16, 0], sizes = [8, 64], strides = [1, 1]} : vector<64x64xf32> to vector<8x64xf32>
    %112 = vector.extract_strided_slice %91 {offsets = [24, 0], sizes = [8, 64], strides = [1, 1]} : vector<64x64xf32> to vector<8x64xf32>
    %113 = arith.maximumf %111, %112 : vector<8x64xf32>
    %114 = arith.maximumf %110, %113 : vector<8x64xf32>
    %115 = vector.extract_strided_slice %114 {offsets = [0, 0], sizes = [4, 64], strides = [1, 1]} : vector<8x64xf32> to vector<4x64xf32>
    %116 = vector.broadcast %92 : vector<1x64xf32> to vector<4x64xf32>
    %117 = arith.addf %115, %116 : vector<4x64xf32>
    %cst_97 = arith.constant 0.000000e+00 : f32
    %118 = vector.broadcast %cst_97 : f32 to vector<4x64xf32>
    %119 = arith.maximumf %117, %118 : vector<4x64xf32>
    %c0_98 = arith.constant 0 : index
    %c1_99 = arith.constant 1 : index
    %c0_100 = arith.constant 0 : index
    %c0_101 = arith.constant 0 : index
    %120 = vector.load %arg7[%c0_98, %c1_99, %c0_100, %c0_101] : memref<1x4x4x64xf32, #tpu.memory_space<vmem>>, vector<1x1x4x64xf32>
    %121 = vector.shape_cast %120 : vector<1x1x4x64xf32> to vector<4x64xf32>
    %122 = vector.shape_cast %119 : vector<4x64xf32> to vector<1x1x4x64xf32>
    tpu.vector_store %arg7[%c0_98, %c1_99, %c0_100, %c0_101], %122 {strides = array<i32>} : memref<1x4x4x64xf32, #tpu.memory_space<vmem>>, vector<1x1x4x64xf32>,
    %123 = vector.extract_strided_slice %87 {offsets = [32, 0], sizes = [8, 64], strides = [1, 1]} : vector<64x64xf32> to vector<8x64xf32>
    %124 = vector.extract_strided_slice %87 {offsets = [40, 0], sizes = [8, 64], strides = [1, 1]} : vector<64x64xf32> to vector<8x64xf32>
    %125 = arith.maximumf %123, %124 : vector<8x64xf32>
    %126 = vector.extract_strided_slice %91 {offsets = [32, 0], sizes = [8, 64], strides = [1, 1]} : vector<64x64xf32> to vector<8x64xf32>
    %127 = vector.extract_strided_slice %91 {offsets = [40, 0], sizes = [8, 64], strides = [1, 1]} : vector<64x64xf32> to vector<8x64xf32>
    %128 = arith.maximumf %126, %127 : vector<8x64xf32>
    %129 = arith.maximumf %125, %128 : vector<8x64xf32>
    %130 = vector.extract_strided_slice %129 {offsets = [0, 0], sizes = [4, 64], strides = [1, 1]} : vector<8x64xf32> to vector<4x64xf32>
    %131 = vector.broadcast %92 : vector<1x64xf32> to vector<4x64xf32>
    %132 = arith.addf %130, %131 : vector<4x64xf32>
    %cst_102 = arith.constant 0.000000e+00 : f32
    %133 = vector.broadcast %cst_102 : f32 to vector<4x64xf32>
    %134 = arith.maximumf %132, %133 : vector<4x64xf32>
    %c0_103 = arith.constant 0 : index
    %c2_104 = arith.constant 2 : index
    %c0_105 = arith.constant 0 : index
    %c0_106 = arith.constant 0 : index
    %135 = vector.load %arg7[%c0_103, %c2_104, %c0_105, %c0_106] : memref<1x4x4x64xf32, #tpu.memory_space<vmem>>, vector<1x1x4x64xf32>
    %136 = vector.shape_cast %135 : vector<1x1x4x64xf32> to vector<4x64xf32>
    %137 = vector.shape_cast %134 : vector<4x64xf32> to vector<1x1x4x64xf32>
    tpu.vector_store %arg7[%c0_103, %c2_104, %c0_105, %c0_106], %137 {strides = array<i32>} : memref<1x4x4x64xf32, #tpu.memory_space<vmem>>, vector<1x1x4x64xf32>,
    %138 = vector.extract_strided_slice %87 {offsets = [48, 0], sizes = [8, 64], strides = [1, 1]} : vector<64x64xf32> to vector<8x64xf32>
    %139 = vector.extract_strided_slice %87 {offsets = [56, 0], sizes = [8, 64], strides = [1, 1]} : vector<64x64xf32> to vector<8x64xf32>
    %140 = arith.maximumf %138, %139 : vector<8x64xf32>
    %141 = vector.extract_strided_slice %91 {offsets = [48, 0], sizes = [8, 64], strides = [1, 1]} : vector<64x64xf32> to vector<8x64xf32>
    %142 = vector.extract_strided_slice %91 {offsets = [56, 0], sizes = [8, 64], strides = [1, 1]} : vector<64x64xf32> to vector<8x64xf32>
    %143 = arith.maximumf %141, %142 : vector<8x64xf32>
    %144 = arith.maximumf %140, %143 : vector<8x64xf32>
    %145 = vector.extract_strided_slice %144 {offsets = [0, 0], sizes = [4, 64], strides = [1, 1]} : vector<8x64xf32> to vector<4x64xf32>
    %146 = vector.broadcast %92 : vector<1x64xf32> to vector<4x64xf32>
    %147 = arith.addf %145, %146 : vector<4x64xf32>
    %cst_107 = arith.constant 0.000000e+00 : f32
    %148 = vector.broadcast %cst_107 : f32 to vector<4x64xf32>
    %149 = arith.maximumf %147, %148 : vector<4x64xf32>
    %c0_108 = arith.constant 0 : index
    %c3_109 = arith.constant 3 : index
    %c0_110 = arith.constant 0 : index
    %c0_111 = arith.constant 0 : index
    %150 = vector.load %arg7[%c0_108, %c3_109, %c0_110, %c0_111] : memref<1x4x4x64xf32, #tpu.memory_space<vmem>>, vector<1x1x4x64xf32>
    %151 = vector.shape_cast %150 : vector<1x1x4x64xf32> to vector<4x64xf32>
    %152 = vector.shape_cast %149 : vector<4x64xf32> to vector<1x1x4x64xf32>
    tpu.vector_store %arg7[%c0_108, %c3_109, %c0_110, %c0_111], %152 {strides = array<i32>} : memref<1x4x4x64xf32, #tpu.memory_space<vmem>>, vector<1x1x4x64xf32>,
    return
  }
  func.func @transform_0(%arg0: i32) -> (i32, i32, i32) {
    %c0_i32 = arith.constant 0 : i32
    %c0_i32_0 = arith.constant 0 : i32
    %c0_i32_1 = arith.constant 0 : i32
    return %arg0, %c0_i32, %c0_i32_0 : i32, i32, i32
  }
  func.func @transform_1(%arg0: i32) -> (i32, i32, i32) {
    %c0_i32 = arith.constant 0 : i32
    %c0_i32_0 = arith.constant 0 : i32
    %c0_i32_1 = arith.constant 0 : i32
    return %arg0, %c0_i32, %c0_i32_0 : i32, i32, i32
  }
  func.func @transform_2(%arg0: i32) -> (i32, i32, i32) {
    %c0_i32 = arith.constant 0 : i32
    %c0_i32_0 = arith.constant 0 : i32
    %c0_i32_1 = arith.constant 0 : i32
    return %arg0, %c0_i32, %c0_i32_0 : i32, i32, i32
  }
  func.func @transform_3(%arg0: i32) -> (i32, i32, i32) {
    %c0_i32 = arith.constant 0 : i32
    %c0_i32_0 = arith.constant 0 : i32
    %c0_i32_1 = arith.constant 0 : i32
    return %arg0, %c0_i32, %c0_i32_0 : i32, i32, i32
  }
  func.func @transform_4(%arg0: i32) -> (i32, i32, i32) {
    %c0_i32 = arith.constant 0 : i32
    %c0_i32_0 = arith.constant 0 : i32
    %c0_i32_1 = arith.constant 0 : i32
    %c0_i32_2 = arith.constant 0 : i32
    return %c0_i32, %c0_i32_0, %c0_i32_1 : i32, i32, i32
  }
  func.func @transform_5(%arg0: i32) -> (i32, i32) {
    %c0_i32 = arith.constant 0 : i32
    %c0_i32_0 = arith.constant 0 : i32
    %c0_i32_1 = arith.constant 0 : i32
    return %c0_i32, %c0_i32_0 : i32, i32
  }
  func.func @transform_6(%arg0: i32) -> (i32, i32, i32, i32) {
    %c0_i32 = arith.constant 0 : i32
    %c0_i32_0 = arith.constant 0 : i32
    %c0_i32_1 = arith.constant 0 : i32
    %c0_i32_2 = arith.constant 0 : i32
    return %arg0, %c0_i32, %c0_i32_0, %c0_i32_1 : i32, i32, i32, i32
  }
}

module attributes {stable_mosaic.version = 11 : i64} {
  func.func @_conv_pool_kernel(%arg0: i32, %arg1: memref<1x48x64xf32, #tpu.memory_space<vmem>>, %arg2: memref<1x48x64xf32, #tpu.memory_space<vmem>>, %arg3: memref<1x48x64xf32, #tpu.memory_space<vmem>>, %arg4: memref<1x48x64xf32, #tpu.memory_space<vmem>>, %arg5: memref<9x64x128xf32, #tpu.memory_space<vmem>>, %arg6: memref<1x128xf32, #tpu.memory_space<vmem>>, %arg7: memref<1x2x2x128xf32, #tpu.memory_space<vmem>>) attributes {dimension_semantics = [#tpu.dimension_semantics<parallel>], iteration_bounds = array<i64: 2>, scalar_prefetch = 0 : i64, scratch_operands = 0 : i64, tpu.core_type = #tpu.core_type<tc>, window_params = [{transform_indices = @transform_0, window_bounds = array<i64: 1, 48, 64>}, {transform_indices = @transform_1, window_bounds = array<i64: 1, 48, 64>}, {transform_indices = @transform_2, window_bounds = array<i64: 1, 48, 64>}, {transform_indices = @transform_3, window_bounds = array<i64: 1, 48, 64>}, {pipeline_mode = #tpu.pipeline_mode<synchronous>, transform_indices = @transform_4, window_bounds = array<i64: 9, 64, 128>}, {pipeline_mode = #tpu.pipeline_mode<synchronous>, transform_indices = @transform_5, window_bounds = array<i64: 1, 128>}, {transform_indices = @transform_6, window_bounds = array<i64: 1, 2, 2, 128>}]} {
    %cst = arith.constant 0.000000e+00 : f32
    %0 = vector.broadcast %cst : f32 to vector<32x128xf32>
    %cst_0 = arith.constant 0.000000e+00 : f32
    %1 = vector.broadcast %cst_0 : f32 to vector<32x128xf32>
    %c0 = arith.constant 0 : index
    %c0_1 = arith.constant 0 : index
    %c0_2 = arith.constant 0 : index
    %2 = vector.load %arg5[%c0, %c0_1, %c0_2] : memref<9x64x128xf32, #tpu.memory_space<vmem>>, vector<1x64x128xf32>
    %3 = vector.shape_cast %2 : vector<1x64x128xf32> to vector<64x128xf32>
    %c0_3 = arith.constant 0 : index
    %c0_4 = arith.constant 0 : index
    %c0_5 = arith.constant 0 : index
    %4 = vector.load %arg1[%c0_3, %c0_4, %c0_5] : memref<1x48x64xf32, #tpu.memory_space<vmem>>, vector<1x32x64xf32>
    %5 = vector.shape_cast %4 : vector<1x32x64xf32> to vector<32x64xf32>
    %cst_6 = arith.constant dense<0.000000e+00> : vector<32x128xf32>
    %6 = tpu.matmul %5, %3, %cst_6 {dimension_numbers = #tpu.dot_dimension_numbers<[1], [0], [0], [1], [0, 0, 1, 1], [], []>} : vector<32x64xf32>, vector<64x128xf32>, vector<32x128xf32> -> vector<32x128xf32>
    %7 = arith.addf %0, %6 : vector<32x128xf32>
    %c0_7 = arith.constant 0 : index
    %c0_8 = arith.constant 0 : index
    %c0_9 = arith.constant 0 : index
    %8 = vector.load %arg2[%c0_7, %c0_8, %c0_9] : memref<1x48x64xf32, #tpu.memory_space<vmem>>, vector<1x32x64xf32>
    %9 = vector.shape_cast %8 : vector<1x32x64xf32> to vector<32x64xf32>
    %cst_10 = arith.constant dense<0.000000e+00> : vector<32x128xf32>
    %10 = tpu.matmul %9, %3, %cst_10 {dimension_numbers = #tpu.dot_dimension_numbers<[1], [0], [0], [1], [0, 0, 1, 1], [], []>} : vector<32x64xf32>, vector<64x128xf32>, vector<32x128xf32> -> vector<32x128xf32>
    %11 = arith.addf %1, %10 : vector<32x128xf32>
    %c1 = arith.constant 1 : index
    %c0_11 = arith.constant 0 : index
    %c0_12 = arith.constant 0 : index
    %12 = vector.load %arg5[%c1, %c0_11, %c0_12] : memref<9x64x128xf32, #tpu.memory_space<vmem>>, vector<1x64x128xf32>
    %13 = vector.shape_cast %12 : vector<1x64x128xf32> to vector<64x128xf32>
    %c0_13 = arith.constant 0 : index
    %c0_14 = arith.constant 0 : index
    %c0_15 = arith.constant 0 : index
    %14 = vector.load %arg2[%c0_13, %c0_14, %c0_15] : memref<1x48x64xf32, #tpu.memory_space<vmem>>, vector<1x32x64xf32>
    %15 = vector.shape_cast %14 : vector<1x32x64xf32> to vector<32x64xf32>
    %cst_16 = arith.constant dense<0.000000e+00> : vector<32x128xf32>
    %16 = tpu.matmul %15, %13, %cst_16 {dimension_numbers = #tpu.dot_dimension_numbers<[1], [0], [0], [1], [0, 0, 1, 1], [], []>} : vector<32x64xf32>, vector<64x128xf32>, vector<32x128xf32> -> vector<32x128xf32>
    %17 = arith.addf %7, %16 : vector<32x128xf32>
    %c0_17 = arith.constant 0 : index
    %c0_18 = arith.constant 0 : index
    %c0_19 = arith.constant 0 : index
    %18 = vector.load %arg3[%c0_17, %c0_18, %c0_19] : memref<1x48x64xf32, #tpu.memory_space<vmem>>, vector<1x32x64xf32>
    %19 = vector.shape_cast %18 : vector<1x32x64xf32> to vector<32x64xf32>
    %cst_20 = arith.constant dense<0.000000e+00> : vector<32x128xf32>
    %20 = tpu.matmul %19, %13, %cst_20 {dimension_numbers = #tpu.dot_dimension_numbers<[1], [0], [0], [1], [0, 0, 1, 1], [], []>} : vector<32x64xf32>, vector<64x128xf32>, vector<32x128xf32> -> vector<32x128xf32>
    %21 = arith.addf %11, %20 : vector<32x128xf32>
    %c2 = arith.constant 2 : index
    %c0_21 = arith.constant 0 : index
    %c0_22 = arith.constant 0 : index
    %22 = vector.load %arg5[%c2, %c0_21, %c0_22] : memref<9x64x128xf32, #tpu.memory_space<vmem>>, vector<1x64x128xf32>
    %23 = vector.shape_cast %22 : vector<1x64x128xf32> to vector<64x128xf32>
    %c0_23 = arith.constant 0 : index
    %c0_24 = arith.constant 0 : index
    %c0_25 = arith.constant 0 : index
    %24 = vector.load %arg3[%c0_23, %c0_24, %c0_25] : memref<1x48x64xf32, #tpu.memory_space<vmem>>, vector<1x32x64xf32>
    %25 = vector.shape_cast %24 : vector<1x32x64xf32> to vector<32x64xf32>
    %cst_26 = arith.constant dense<0.000000e+00> : vector<32x128xf32>
    %26 = tpu.matmul %25, %23, %cst_26 {dimension_numbers = #tpu.dot_dimension_numbers<[1], [0], [0], [1], [0, 0, 1, 1], [], []>} : vector<32x64xf32>, vector<64x128xf32>, vector<32x128xf32> -> vector<32x128xf32>
    %27 = arith.addf %17, %26 : vector<32x128xf32>
    %c0_27 = arith.constant 0 : index
    %c0_28 = arith.constant 0 : index
    %c0_29 = arith.constant 0 : index
    %28 = vector.load %arg4[%c0_27, %c0_28, %c0_29] : memref<1x48x64xf32, #tpu.memory_space<vmem>>, vector<1x32x64xf32>
    %29 = vector.shape_cast %28 : vector<1x32x64xf32> to vector<32x64xf32>
    %cst_30 = arith.constant dense<0.000000e+00> : vector<32x128xf32>
    %30 = tpu.matmul %29, %23, %cst_30 {dimension_numbers = #tpu.dot_dimension_numbers<[1], [0], [0], [1], [0, 0, 1, 1], [], []>} : vector<32x64xf32>, vector<64x128xf32>, vector<32x128xf32> -> vector<32x128xf32>
    %31 = arith.addf %21, %30 : vector<32x128xf32>
    %c3 = arith.constant 3 : index
    %c0_31 = arith.constant 0 : index
    %c0_32 = arith.constant 0 : index
    %32 = vector.load %arg5[%c3, %c0_31, %c0_32] : memref<9x64x128xf32, #tpu.memory_space<vmem>>, vector<1x64x128xf32>
    %33 = vector.shape_cast %32 : vector<1x64x128xf32> to vector<64x128xf32>
    %c0_33 = arith.constant 0 : index
    %c8 = arith.constant 8 : index
    %c0_34 = arith.constant 0 : index
    %34 = vector.load %arg1[%c0_33, %c8, %c0_34] : memref<1x48x64xf32, #tpu.memory_space<vmem>>, vector<1x32x64xf32>
    %35 = vector.shape_cast %34 : vector<1x32x64xf32> to vector<32x64xf32>
    %cst_35 = arith.constant dense<0.000000e+00> : vector<32x128xf32>
    %36 = tpu.matmul %35, %33, %cst_35 {dimension_numbers = #tpu.dot_dimension_numbers<[1], [0], [0], [1], [0, 0, 1, 1], [], []>} : vector<32x64xf32>, vector<64x128xf32>, vector<32x128xf32> -> vector<32x128xf32>
    %37 = arith.addf %27, %36 : vector<32x128xf32>
    %c0_36 = arith.constant 0 : index
    %c8_37 = arith.constant 8 : index
    %c0_38 = arith.constant 0 : index
    %38 = vector.load %arg2[%c0_36, %c8_37, %c0_38] : memref<1x48x64xf32, #tpu.memory_space<vmem>>, vector<1x32x64xf32>
    %39 = vector.shape_cast %38 : vector<1x32x64xf32> to vector<32x64xf32>
    %cst_39 = arith.constant dense<0.000000e+00> : vector<32x128xf32>
    %40 = tpu.matmul %39, %33, %cst_39 {dimension_numbers = #tpu.dot_dimension_numbers<[1], [0], [0], [1], [0, 0, 1, 1], [], []>} : vector<32x64xf32>, vector<64x128xf32>, vector<32x128xf32> -> vector<32x128xf32>
    %41 = arith.addf %31, %40 : vector<32x128xf32>
    %c4 = arith.constant 4 : index
    %c0_40 = arith.constant 0 : index
    %c0_41 = arith.constant 0 : index
    %42 = vector.load %arg5[%c4, %c0_40, %c0_41] : memref<9x64x128xf32, #tpu.memory_space<vmem>>, vector<1x64x128xf32>
    %43 = vector.shape_cast %42 : vector<1x64x128xf32> to vector<64x128xf32>
    %c0_42 = arith.constant 0 : index
    %c8_43 = arith.constant 8 : index
    %c0_44 = arith.constant 0 : index
    %44 = vector.load %arg2[%c0_42, %c8_43, %c0_44] : memref<1x48x64xf32, #tpu.memory_space<vmem>>, vector<1x32x64xf32>
    %45 = vector.shape_cast %44 : vector<1x32x64xf32> to vector<32x64xf32>
    %cst_45 = arith.constant dense<0.000000e+00> : vector<32x128xf32>
    %46 = tpu.matmul %45, %43, %cst_45 {dimension_numbers = #tpu.dot_dimension_numbers<[1], [0], [0], [1], [0, 0, 1, 1], [], []>} : vector<32x64xf32>, vector<64x128xf32>, vector<32x128xf32> -> vector<32x128xf32>
    %47 = arith.addf %37, %46 : vector<32x128xf32>
    %c0_46 = arith.constant 0 : index
    %c8_47 = arith.constant 8 : index
    %c0_48 = arith.constant 0 : index
    %48 = vector.load %arg3[%c0_46, %c8_47, %c0_48] : memref<1x48x64xf32, #tpu.memory_space<vmem>>, vector<1x32x64xf32>
    %49 = vector.shape_cast %48 : vector<1x32x64xf32> to vector<32x64xf32>
    %cst_49 = arith.constant dense<0.000000e+00> : vector<32x128xf32>
    %50 = tpu.matmul %49, %43, %cst_49 {dimension_numbers = #tpu.dot_dimension_numbers<[1], [0], [0], [1], [0, 0, 1, 1], [], []>} : vector<32x64xf32>, vector<64x128xf32>, vector<32x128xf32> -> vector<32x128xf32>
    %51 = arith.addf %41, %50 : vector<32x128xf32>
    %c5 = arith.constant 5 : index
    %c0_50 = arith.constant 0 : index
    %c0_51 = arith.constant 0 : index
    %52 = vector.load %arg5[%c5, %c0_50, %c0_51] : memref<9x64x128xf32, #tpu.memory_space<vmem>>, vector<1x64x128xf32>
    %53 = vector.shape_cast %52 : vector<1x64x128xf32> to vector<64x128xf32>
    %c0_52 = arith.constant 0 : index
    %c8_53 = arith.constant 8 : index
    %c0_54 = arith.constant 0 : index
    %54 = vector.load %arg3[%c0_52, %c8_53, %c0_54] : memref<1x48x64xf32, #tpu.memory_space<vmem>>, vector<1x32x64xf32>
    %55 = vector.shape_cast %54 : vector<1x32x64xf32> to vector<32x64xf32>
    %cst_55 = arith.constant dense<0.000000e+00> : vector<32x128xf32>
    %56 = tpu.matmul %55, %53, %cst_55 {dimension_numbers = #tpu.dot_dimension_numbers<[1], [0], [0], [1], [0, 0, 1, 1], [], []>} : vector<32x64xf32>, vector<64x128xf32>, vector<32x128xf32> -> vector<32x128xf32>
    %57 = arith.addf %47, %56 : vector<32x128xf32>
    %c0_56 = arith.constant 0 : index
    %c8_57 = arith.constant 8 : index
    %c0_58 = arith.constant 0 : index
    %58 = vector.load %arg4[%c0_56, %c8_57, %c0_58] : memref<1x48x64xf32, #tpu.memory_space<vmem>>, vector<1x32x64xf32>
    %59 = vector.shape_cast %58 : vector<1x32x64xf32> to vector<32x64xf32>
    %cst_59 = arith.constant dense<0.000000e+00> : vector<32x128xf32>
    %60 = tpu.matmul %59, %53, %cst_59 {dimension_numbers = #tpu.dot_dimension_numbers<[1], [0], [0], [1], [0, 0, 1, 1], [], []>} : vector<32x64xf32>, vector<64x128xf32>, vector<32x128xf32> -> vector<32x128xf32>
    %61 = arith.addf %51, %60 : vector<32x128xf32>
    %c6 = arith.constant 6 : index
    %c0_60 = arith.constant 0 : index
    %c0_61 = arith.constant 0 : index
    %62 = vector.load %arg5[%c6, %c0_60, %c0_61] : memref<9x64x128xf32, #tpu.memory_space<vmem>>, vector<1x64x128xf32>
    %63 = vector.shape_cast %62 : vector<1x64x128xf32> to vector<64x128xf32>
    %c0_62 = arith.constant 0 : index
    %c16 = arith.constant 16 : index
    %c0_63 = arith.constant 0 : index
    %64 = vector.load %arg1[%c0_62, %c16, %c0_63] : memref<1x48x64xf32, #tpu.memory_space<vmem>>, vector<1x32x64xf32>
    %65 = vector.shape_cast %64 : vector<1x32x64xf32> to vector<32x64xf32>
    %cst_64 = arith.constant dense<0.000000e+00> : vector<32x128xf32>
    %66 = tpu.matmul %65, %63, %cst_64 {dimension_numbers = #tpu.dot_dimension_numbers<[1], [0], [0], [1], [0, 0, 1, 1], [], []>} : vector<32x64xf32>, vector<64x128xf32>, vector<32x128xf32> -> vector<32x128xf32>
    %67 = arith.addf %57, %66 : vector<32x128xf32>
    %c0_65 = arith.constant 0 : index
    %c16_66 = arith.constant 16 : index
    %c0_67 = arith.constant 0 : index
    %68 = vector.load %arg2[%c0_65, %c16_66, %c0_67] : memref<1x48x64xf32, #tpu.memory_space<vmem>>, vector<1x32x64xf32>
    %69 = vector.shape_cast %68 : vector<1x32x64xf32> to vector<32x64xf32>
    %cst_68 = arith.constant dense<0.000000e+00> : vector<32x128xf32>
    %70 = tpu.matmul %69, %63, %cst_68 {dimension_numbers = #tpu.dot_dimension_numbers<[1], [0], [0], [1], [0, 0, 1, 1], [], []>} : vector<32x64xf32>, vector<64x128xf32>, vector<32x128xf32> -> vector<32x128xf32>
    %71 = arith.addf %61, %70 : vector<32x128xf32>
    %c7 = arith.constant 7 : index
    %c0_69 = arith.constant 0 : index
    %c0_70 = arith.constant 0 : index
    %72 = vector.load %arg5[%c7, %c0_69, %c0_70] : memref<9x64x128xf32, #tpu.memory_space<vmem>>, vector<1x64x128xf32>
    %73 = vector.shape_cast %72 : vector<1x64x128xf32> to vector<64x128xf32>
    %c0_71 = arith.constant 0 : index
    %c16_72 = arith.constant 16 : index
    %c0_73 = arith.constant 0 : index
    %74 = vector.load %arg2[%c0_71, %c16_72, %c0_73] : memref<1x48x64xf32, #tpu.memory_space<vmem>>, vector<1x32x64xf32>
    %75 = vector.shape_cast %74 : vector<1x32x64xf32> to vector<32x64xf32>
    %cst_74 = arith.constant dense<0.000000e+00> : vector<32x128xf32>
    %76 = tpu.matmul %75, %73, %cst_74 {dimension_numbers = #tpu.dot_dimension_numbers<[1], [0], [0], [1], [0, 0, 1, 1], [], []>} : vector<32x64xf32>, vector<64x128xf32>, vector<32x128xf32> -> vector<32x128xf32>
    %77 = arith.addf %67, %76 : vector<32x128xf32>
    %c0_75 = arith.constant 0 : index
    %c16_76 = arith.constant 16 : index
    %c0_77 = arith.constant 0 : index
    %78 = vector.load %arg3[%c0_75, %c16_76, %c0_77] : memref<1x48x64xf32, #tpu.memory_space<vmem>>, vector<1x32x64xf32>
    %79 = vector.shape_cast %78 : vector<1x32x64xf32> to vector<32x64xf32>
    %cst_78 = arith.constant dense<0.000000e+00> : vector<32x128xf32>
    %80 = tpu.matmul %79, %73, %cst_78 {dimension_numbers = #tpu.dot_dimension_numbers<[1], [0], [0], [1], [0, 0, 1, 1], [], []>} : vector<32x64xf32>, vector<64x128xf32>, vector<32x128xf32> -> vector<32x128xf32>
    %81 = arith.addf %71, %80 : vector<32x128xf32>
    %c8_79 = arith.constant 8 : index
    %c0_80 = arith.constant 0 : index
    %c0_81 = arith.constant 0 : index
    %82 = vector.load %arg5[%c8_79, %c0_80, %c0_81] : memref<9x64x128xf32, #tpu.memory_space<vmem>>, vector<1x64x128xf32>
    %83 = vector.shape_cast %82 : vector<1x64x128xf32> to vector<64x128xf32>
    %c0_82 = arith.constant 0 : index
    %c16_83 = arith.constant 16 : index
    %c0_84 = arith.constant 0 : index
    %84 = vector.load %arg3[%c0_82, %c16_83, %c0_84] : memref<1x48x64xf32, #tpu.memory_space<vmem>>, vector<1x32x64xf32>
    %85 = vector.shape_cast %84 : vector<1x32x64xf32> to vector<32x64xf32>
    %cst_85 = arith.constant dense<0.000000e+00> : vector<32x128xf32>
    %86 = tpu.matmul %85, %83, %cst_85 {dimension_numbers = #tpu.dot_dimension_numbers<[1], [0], [0], [1], [0, 0, 1, 1], [], []>} : vector<32x64xf32>, vector<64x128xf32>, vector<32x128xf32> -> vector<32x128xf32>
    %87 = arith.addf %77, %86 : vector<32x128xf32>
    %c0_86 = arith.constant 0 : index
    %c16_87 = arith.constant 16 : index
    %c0_88 = arith.constant 0 : index
    %88 = vector.load %arg4[%c0_86, %c16_87, %c0_88] : memref<1x48x64xf32, #tpu.memory_space<vmem>>, vector<1x32x64xf32>
    %89 = vector.shape_cast %88 : vector<1x32x64xf32> to vector<32x64xf32>
    %cst_89 = arith.constant dense<0.000000e+00> : vector<32x128xf32>
    %90 = tpu.matmul %89, %83, %cst_89 {dimension_numbers = #tpu.dot_dimension_numbers<[1], [0], [0], [1], [0, 0, 1, 1], [], []>} : vector<32x64xf32>, vector<64x128xf32>, vector<32x128xf32> -> vector<32x128xf32>
    %91 = arith.addf %81, %90 : vector<32x128xf32>
    %c0_90 = arith.constant 0 : index
    %c0_91 = arith.constant 0 : index
    %92 = vector.load %arg6[%c0_90, %c0_91] : memref<1x128xf32, #tpu.memory_space<vmem>>, vector<1x128xf32>
    %93 = vector.extract_strided_slice %87 {offsets = [0, 0], sizes = [8, 128], strides = [1, 1]} : vector<32x128xf32> to vector<8x128xf32>
    %94 = vector.extract_strided_slice %87 {offsets = [8, 0], sizes = [8, 128], strides = [1, 1]} : vector<32x128xf32> to vector<8x128xf32>
    %95 = arith.maximumf %93, %94 : vector<8x128xf32>
    %96 = vector.extract_strided_slice %91 {offsets = [0, 0], sizes = [8, 128], strides = [1, 1]} : vector<32x128xf32> to vector<8x128xf32>
    %97 = vector.extract_strided_slice %91 {offsets = [8, 0], sizes = [8, 128], strides = [1, 1]} : vector<32x128xf32> to vector<8x128xf32>
    %98 = arith.maximumf %96, %97 : vector<8x128xf32>
    %99 = arith.maximumf %95, %98 : vector<8x128xf32>
    %100 = vector.extract_strided_slice %99 {offsets = [0, 0], sizes = [2, 128], strides = [1, 1]} : vector<8x128xf32> to vector<2x128xf32>
    %101 = vector.broadcast %92 : vector<1x128xf32> to vector<2x128xf32>
    %102 = arith.addf %100, %101 : vector<2x128xf32>
    %cst_92 = arith.constant 0.000000e+00 : f32
    %103 = vector.broadcast %cst_92 : f32 to vector<2x128xf32>
    %104 = arith.maximumf %102, %103 : vector<2x128xf32>
    %c0_93 = arith.constant 0 : index
    %c0_94 = arith.constant 0 : index
    %c0_95 = arith.constant 0 : index
    %c0_96 = arith.constant 0 : index
    %105 = vector.load %arg7[%c0_93, %c0_94, %c0_95, %c0_96] : memref<1x2x2x128xf32, #tpu.memory_space<vmem>>, vector<1x1x2x128xf32>
    %106 = vector.shape_cast %105 : vector<1x1x2x128xf32> to vector<2x128xf32>
    %107 = vector.shape_cast %104 : vector<2x128xf32> to vector<1x1x2x128xf32>
    tpu.vector_store %arg7[%c0_93, %c0_94, %c0_95, %c0_96], %107 {strides = array<i32>} : memref<1x2x2x128xf32, #tpu.memory_space<vmem>>, vector<1x1x2x128xf32>,
    %108 = vector.extract_strided_slice %87 {offsets = [16, 0], sizes = [8, 128], strides = [1, 1]} : vector<32x128xf32> to vector<8x128xf32>
    %109 = vector.extract_strided_slice %87 {offsets = [24, 0], sizes = [8, 128], strides = [1, 1]} : vector<32x128xf32> to vector<8x128xf32>
    %110 = arith.maximumf %108, %109 : vector<8x128xf32>
    %111 = vector.extract_strided_slice %91 {offsets = [16, 0], sizes = [8, 128], strides = [1, 1]} : vector<32x128xf32> to vector<8x128xf32>
    %112 = vector.extract_strided_slice %91 {offsets = [24, 0], sizes = [8, 128], strides = [1, 1]} : vector<32x128xf32> to vector<8x128xf32>
    %113 = arith.maximumf %111, %112 : vector<8x128xf32>
    %114 = arith.maximumf %110, %113 : vector<8x128xf32>
    %115 = vector.extract_strided_slice %114 {offsets = [0, 0], sizes = [2, 128], strides = [1, 1]} : vector<8x128xf32> to vector<2x128xf32>
    %116 = vector.broadcast %92 : vector<1x128xf32> to vector<2x128xf32>
    %117 = arith.addf %115, %116 : vector<2x128xf32>
    %cst_97 = arith.constant 0.000000e+00 : f32
    %118 = vector.broadcast %cst_97 : f32 to vector<2x128xf32>
    %119 = arith.maximumf %117, %118 : vector<2x128xf32>
    %c0_98 = arith.constant 0 : index
    %c1_99 = arith.constant 1 : index
    %c0_100 = arith.constant 0 : index
    %c0_101 = arith.constant 0 : index
    %120 = vector.load %arg7[%c0_98, %c1_99, %c0_100, %c0_101] : memref<1x2x2x128xf32, #tpu.memory_space<vmem>>, vector<1x1x2x128xf32>
    %121 = vector.shape_cast %120 : vector<1x1x2x128xf32> to vector<2x128xf32>
    %122 = vector.shape_cast %119 : vector<2x128xf32> to vector<1x1x2x128xf32>
    tpu.vector_store %arg7[%c0_98, %c1_99, %c0_100, %c0_101], %122 {strides = array<i32>} : memref<1x2x2x128xf32, #tpu.memory_space<vmem>>, vector<1x1x2x128xf32>,
    return
  }
  func.func @transform_0(%arg0: i32) -> (i32, i32, i32) {
    %c0_i32 = arith.constant 0 : i32
    %c0_i32_0 = arith.constant 0 : i32
    %c0_i32_1 = arith.constant 0 : i32
    return %arg0, %c0_i32, %c0_i32_0 : i32, i32, i32
  }
  func.func @transform_1(%arg0: i32) -> (i32, i32, i32) {
    %c0_i32 = arith.constant 0 : i32
    %c0_i32_0 = arith.constant 0 : i32
    %c0_i32_1 = arith.constant 0 : i32
    return %arg0, %c0_i32, %c0_i32_0 : i32, i32, i32
  }
  func.func @transform_2(%arg0: i32) -> (i32, i32, i32) {
    %c0_i32 = arith.constant 0 : i32
    %c0_i32_0 = arith.constant 0 : i32
    %c0_i32_1 = arith.constant 0 : i32
    return %arg0, %c0_i32, %c0_i32_0 : i32, i32, i32
  }
  func.func @transform_3(%arg0: i32) -> (i32, i32, i32) {
    %c0_i32 = arith.constant 0 : i32
    %c0_i32_0 = arith.constant 0 : i32
    %c0_i32_1 = arith.constant 0 : i32
    return %arg0, %c0_i32, %c0_i32_0 : i32, i32, i32
  }
  func.func @transform_4(%arg0: i32) -> (i32, i32, i32) {
    %c0_i32 = arith.constant 0 : i32
    %c0_i32_0 = arith.constant 0 : i32
    %c0_i32_1 = arith.constant 0 : i32
    %c0_i32_2 = arith.constant 0 : i32
    return %c0_i32, %c0_i32_0, %c0_i32_1 : i32, i32, i32
  }
  func.func @transform_5(%arg0: i32) -> (i32, i32) {
    %c0_i32 = arith.constant 0 : i32
    %c0_i32_0 = arith.constant 0 : i32
    %c0_i32_1 = arith.constant 0 : i32
    return %c0_i32, %c0_i32_0 : i32, i32
  }
  func.func @transform_6(%arg0: i32) -> (i32, i32, i32, i32) {
    %c0_i32 = arith.constant 0 : i32
    %c0_i32_0 = arith.constant 0 : i32
    %c0_i32_1 = arith.constant 0 : i32
    %c0_i32_2 = arith.constant 0 : i32
    return %arg0, %c0_i32, %c0_i32_0, %c0_i32_1 : i32, i32, i32, i32
  }
}

module attributes {stable_mosaic.version = 11 : i64} {
  func.func @_transformer_kernel(%arg0: memref<2x512xf32, #tpu.memory_space<vmem>>, %arg1: memref<512x256xf32, #tpu.memory_space<vmem>>, %arg2: memref<1x256xf32, #tpu.memory_space<vmem>>, %arg3: memref<2x256x256xf32, #tpu.memory_space<vmem>>, %arg4: memref<2x1x256xf32, #tpu.memory_space<vmem>>, %arg5: memref<2x256x256xf32, #tpu.memory_space<vmem>>, %arg6: memref<2x1x256xf32, #tpu.memory_space<vmem>>, %arg7: memref<2x1x256xf32, #tpu.memory_space<vmem>>, %arg8: memref<2x1x256xf32, #tpu.memory_space<vmem>>, %arg9: memref<2x256x256xf32, #tpu.memory_space<vmem>>, %arg10: memref<2x1x256xf32, #tpu.memory_space<vmem>>, %arg11: memref<2x256x256xf32, #tpu.memory_space<vmem>>, %arg12: memref<2x1x256xf32, #tpu.memory_space<vmem>>, %arg13: memref<2x1x256xf32, #tpu.memory_space<vmem>>, %arg14: memref<2x1x256xf32, #tpu.memory_space<vmem>>, %arg15: memref<256x16xf32, #tpu.memory_space<vmem>>, %arg16: memref<1x16xf32, #tpu.memory_space<vmem>>, %arg17: memref<2x16xf32, #tpu.memory_space<vmem>>) attributes {dimension_semantics = [], scalar_prefetch = 0 : i64, scratch_operands = 0 : i64, tpu.core_type = #tpu.core_type<tc>} {
    %c0 = arith.constant 0 : index
    %c0_0 = arith.constant 0 : index
    %0 = vector.load %arg0[%c0, %c0_0] : memref<2x512xf32, #tpu.memory_space<vmem>>, vector<2x512xf32>
    %c0_1 = arith.constant 0 : index
    %c0_2 = arith.constant 0 : index
    %1 = vector.load %arg1[%c0_1, %c0_2] : memref<512x256xf32, #tpu.memory_space<vmem>>, vector<512x256xf32>
    %cst = arith.constant dense<0.000000e+00> : vector<2x256xf32>
    %2 = tpu.matmul %0, %1, %cst {dimension_numbers = #tpu.dot_dimension_numbers<[1], [0], [0], [1], [0, 0, 1, 1], [], []>} : vector<2x512xf32>, vector<512x256xf32>, vector<2x256xf32> -> vector<2x256xf32>
    %c0_3 = arith.constant 0 : index
    %c0_4 = arith.constant 0 : index
    %3 = vector.load %arg2[%c0_3, %c0_4] : memref<1x256xf32, #tpu.memory_space<vmem>>, vector<1x256xf32>
    %4 = vector.broadcast %3 : vector<1x256xf32> to vector<2x256xf32>
    %5 = arith.addf %2, %4 : vector<2x256xf32>
    %c0_5 = arith.constant 0 : index
    %c0_6 = arith.constant 0 : index
    %c0_7 = arith.constant 0 : index
    %6 = vector.load %arg3[%c0_5, %c0_6, %c0_7] : memref<2x256x256xf32, #tpu.memory_space<vmem>>, vector<1x256x256xf32>
    %7 = vector.shape_cast %6 : vector<1x256x256xf32> to vector<256x256xf32>
    %cst_8 = arith.constant dense<0.000000e+00> : vector<2x256xf32>
    %8 = tpu.matmul %5, %7, %cst_8 {dimension_numbers = #tpu.dot_dimension_numbers<[1], [0], [0], [1], [0, 0, 1, 1], [], []>} : vector<2x256xf32>, vector<256x256xf32>, vector<2x256xf32> -> vector<2x256xf32>
    %c0_9 = arith.constant 0 : index
    %c0_10 = arith.constant 0 : index
    %c0_11 = arith.constant 0 : index
    %9 = vector.load %arg4[%c0_9, %c0_10, %c0_11] : memref<2x1x256xf32, #tpu.memory_space<vmem>>, vector<1x1x256xf32>
    %10 = vector.shape_cast %9 : vector<1x1x256xf32> to vector<1x256xf32>
    %11 = vector.broadcast %10 : vector<1x256xf32> to vector<2x256xf32>
    %12 = arith.addf %8, %11 : vector<2x256xf32>
    %c0_12 = arith.constant 0 : index
    %c0_13 = arith.constant 0 : index
    %c0_14 = arith.constant 0 : index
    %13 = vector.load %arg5[%c0_12, %c0_13, %c0_14] : memref<2x256x256xf32, #tpu.memory_space<vmem>>, vector<1x256x256xf32>
    %14 = vector.shape_cast %13 : vector<1x256x256xf32> to vector<256x256xf32>
    %cst_15 = arith.constant dense<0.000000e+00> : vector<2x256xf32>
    %15 = tpu.matmul %12, %14, %cst_15 {dimension_numbers = #tpu.dot_dimension_numbers<[1], [0], [0], [1], [0, 0, 1, 1], [], []>} : vector<2x256xf32>, vector<256x256xf32>, vector<2x256xf32> -> vector<2x256xf32>
    %c0_16 = arith.constant 0 : index
    %c0_17 = arith.constant 0 : index
    %c0_18 = arith.constant 0 : index
    %16 = vector.load %arg6[%c0_16, %c0_17, %c0_18] : memref<2x1x256xf32, #tpu.memory_space<vmem>>, vector<1x1x256xf32>
    %17 = vector.shape_cast %16 : vector<1x1x256xf32> to vector<1x256xf32>
    %18 = vector.broadcast %17 : vector<1x256xf32> to vector<2x256xf32>
    %19 = arith.addf %15, %18 : vector<2x256xf32>
    %20 = arith.addf %5, %19 : vector<2x256xf32>
    %c0_19 = arith.constant 0 : index
    %c0_20 = arith.constant 0 : index
    %c0_21 = arith.constant 0 : index
    %21 = vector.load %arg7[%c0_19, %c0_20, %c0_21] : memref<2x1x256xf32, #tpu.memory_space<vmem>>, vector<1x1x256xf32>
    %22 = vector.shape_cast %21 : vector<1x1x256xf32> to vector<1x256xf32>
    %c0_22 = arith.constant 0 : index
    %c0_23 = arith.constant 0 : index
    %c0_24 = arith.constant 0 : index
    %23 = vector.load %arg8[%c0_22, %c0_23, %c0_24] : memref<2x1x256xf32, #tpu.memory_space<vmem>>, vector<1x1x256xf32>
    %24 = vector.shape_cast %23 : vector<1x1x256xf32> to vector<1x256xf32>
    %cst_25 = arith.constant dense<0.000000e+00> : vector<2xf32>
    %25 = vector.multi_reduction <add>, %20, %cst_25 [1] : vector<2x256xf32> to vector<2xf32>
    %26 = vector.shape_cast %25 : vector<2xf32> to vector<2x1xf32>
    %cst_26 = arith.constant 2.560000e+02 : f32
    %27 = vector.broadcast %cst_26 : f32 to vector<2x1xf32>
    %28 = arith.divf %26, %27 : vector<2x1xf32>
    %29 = vector.broadcast %28 : vector<2x1xf32> to vector<2x256xf32>
    %30 = arith.subf %20, %29 : vector<2x256xf32>
    %31 = arith.mulf %30, %30 : vector<2x256xf32>
    %cst_27 = arith.constant dense<0.000000e+00> : vector<2xf32>
    %32 = vector.multi_reduction <add>, %31, %cst_27 [1] : vector<2x256xf32> to vector<2xf32>
    %33 = vector.shape_cast %32 : vector<2xf32> to vector<2x1xf32>
    %cst_28 = arith.constant 2.560000e+02 : f32
    %34 = vector.broadcast %cst_28 : f32 to vector<2x1xf32>
    %35 = arith.divf %33, %34 : vector<2x1xf32>
    %36 = vector.broadcast %28 : vector<2x1xf32> to vector<2x256xf32>
    %37 = arith.subf %20, %36 : vector<2x256xf32>
    %cst_29 = arith.constant 9.99999974E-6 : f32
    %38 = vector.broadcast %cst_29 : f32 to vector<2x1xf32>
    %39 = arith.addf %35, %38 : vector<2x1xf32>
    %40 = math.rsqrt %39 : vector<2x1xf32>
    %41 = vector.broadcast %40 : vector<2x1xf32> to vector<2x256xf32>
    %42 = arith.mulf %37, %41 : vector<2x256xf32>
    %43 = vector.broadcast %22 : vector<1x256xf32> to vector<2x256xf32>
    %44 = arith.mulf %42, %43 : vector<2x256xf32>
    %45 = vector.broadcast %24 : vector<1x256xf32> to vector<2x256xf32>
    %46 = arith.addf %44, %45 : vector<2x256xf32>
    %c0_30 = arith.constant 0 : index
    %c0_31 = arith.constant 0 : index
    %c0_32 = arith.constant 0 : index
    %47 = vector.load %arg9[%c0_30, %c0_31, %c0_32] : memref<2x256x256xf32, #tpu.memory_space<vmem>>, vector<1x256x256xf32>
    %48 = vector.shape_cast %47 : vector<1x256x256xf32> to vector<256x256xf32>
    %cst_33 = arith.constant dense<0.000000e+00> : vector<2x256xf32>
    %49 = tpu.matmul %46, %48, %cst_33 {dimension_numbers = #tpu.dot_dimension_numbers<[1], [0], [0], [1], [0, 0, 1, 1], [], []>} : vector<2x256xf32>, vector<256x256xf32>, vector<2x256xf32> -> vector<2x256xf32>
    %c0_34 = arith.constant 0 : index
    %c0_35 = arith.constant 0 : index
    %c0_36 = arith.constant 0 : index
    %50 = vector.load %arg10[%c0_34, %c0_35, %c0_36] : memref<2x1x256xf32, #tpu.memory_space<vmem>>, vector<1x1x256xf32>
    %51 = vector.shape_cast %50 : vector<1x1x256xf32> to vector<1x256xf32>
    %52 = vector.broadcast %51 : vector<1x256xf32> to vector<2x256xf32>
    %53 = arith.addf %49, %52 : vector<2x256xf32>
    %cst_37 = arith.constant 0.000000e+00 : f32
    %54 = vector.broadcast %cst_37 : f32 to vector<2x256xf32>
    %55 = arith.maximumf %53, %54 : vector<2x256xf32>
    %c0_38 = arith.constant 0 : index
    %c0_39 = arith.constant 0 : index
    %c0_40 = arith.constant 0 : index
    %56 = vector.load %arg11[%c0_38, %c0_39, %c0_40] : memref<2x256x256xf32, #tpu.memory_space<vmem>>, vector<1x256x256xf32>
    %57 = vector.shape_cast %56 : vector<1x256x256xf32> to vector<256x256xf32>
    %cst_41 = arith.constant dense<0.000000e+00> : vector<2x256xf32>
    %58 = tpu.matmul %55, %57, %cst_41 {dimension_numbers = #tpu.dot_dimension_numbers<[1], [0], [0], [1], [0, 0, 1, 1], [], []>} : vector<2x256xf32>, vector<256x256xf32>, vector<2x256xf32> -> vector<2x256xf32>
    %c0_42 = arith.constant 0 : index
    %c0_43 = arith.constant 0 : index
    %c0_44 = arith.constant 0 : index
    %59 = vector.load %arg12[%c0_42, %c0_43, %c0_44] : memref<2x1x256xf32, #tpu.memory_space<vmem>>, vector<1x1x256xf32>
    %60 = vector.shape_cast %59 : vector<1x1x256xf32> to vector<1x256xf32>
    %61 = vector.broadcast %60 : vector<1x256xf32> to vector<2x256xf32>
    %62 = arith.addf %58, %61 : vector<2x256xf32>
    %63 = arith.addf %46, %62 : vector<2x256xf32>
    %c0_45 = arith.constant 0 : index
    %c0_46 = arith.constant 0 : index
    %c0_47 = arith.constant 0 : index
    %64 = vector.load %arg13[%c0_45, %c0_46, %c0_47] : memref<2x1x256xf32, #tpu.memory_space<vmem>>, vector<1x1x256xf32>
    %65 = vector.shape_cast %64 : vector<1x1x256xf32> to vector<1x256xf32>
    %c0_48 = arith.constant 0 : index
    %c0_49 = arith.constant 0 : index
    %c0_50 = arith.constant 0 : index
    %66 = vector.load %arg14[%c0_48, %c0_49, %c0_50] : memref<2x1x256xf32, #tpu.memory_space<vmem>>, vector<1x1x256xf32>
    %67 = vector.shape_cast %66 : vector<1x1x256xf32> to vector<1x256xf32>
    %cst_51 = arith.constant dense<0.000000e+00> : vector<2xf32>
    %68 = vector.multi_reduction <add>, %63, %cst_51 [1] : vector<2x256xf32> to vector<2xf32>
    %69 = vector.shape_cast %68 : vector<2xf32> to vector<2x1xf32>
    %cst_52 = arith.constant 2.560000e+02 : f32
    %70 = vector.broadcast %cst_52 : f32 to vector<2x1xf32>
    %71 = arith.divf %69, %70 : vector<2x1xf32>
    %72 = vector.broadcast %71 : vector<2x1xf32> to vector<2x256xf32>
    %73 = arith.subf %63, %72 : vector<2x256xf32>
    %74 = arith.mulf %73, %73 : vector<2x256xf32>
    %cst_53 = arith.constant dense<0.000000e+00> : vector<2xf32>
    %75 = vector.multi_reduction <add>, %74, %cst_53 [1] : vector<2x256xf32> to vector<2xf32>
    %76 = vector.shape_cast %75 : vector<2xf32> to vector<2x1xf32>
    %cst_54 = arith.constant 2.560000e+02 : f32
    %77 = vector.broadcast %cst_54 : f32 to vector<2x1xf32>
    %78 = arith.divf %76, %77 : vector<2x1xf32>
    %79 = vector.broadcast %71 : vector<2x1xf32> to vector<2x256xf32>
    %80 = arith.subf %63, %79 : vector<2x256xf32>
    %cst_55 = arith.constant 9.99999974E-6 : f32
    %81 = vector.broadcast %cst_55 : f32 to vector<2x1xf32>
    %82 = arith.addf %78, %81 : vector<2x1xf32>
    %83 = math.rsqrt %82 : vector<2x1xf32>
    %84 = vector.broadcast %83 : vector<2x1xf32> to vector<2x256xf32>
    %85 = arith.mulf %80, %84 : vector<2x256xf32>
    %86 = vector.broadcast %65 : vector<1x256xf32> to vector<2x256xf32>
    %87 = arith.mulf %85, %86 : vector<2x256xf32>
    %88 = vector.broadcast %67 : vector<1x256xf32> to vector<2x256xf32>
    %89 = arith.addf %87, %88 : vector<2x256xf32>
    %c1 = arith.constant 1 : index
    %c0_56 = arith.constant 0 : index
    %c0_57 = arith.constant 0 : index
    %90 = vector.load %arg3[%c1, %c0_56, %c0_57] : memref<2x256x256xf32, #tpu.memory_space<vmem>>, vector<1x256x256xf32>
    %91 = vector.shape_cast %90 : vector<1x256x256xf32> to vector<256x256xf32>
    %cst_58 = arith.constant dense<0.000000e+00> : vector<2x256xf32>
    %92 = tpu.matmul %89, %91, %cst_58 {dimension_numbers = #tpu.dot_dimension_numbers<[1], [0], [0], [1], [0, 0, 1, 1], [], []>} : vector<2x256xf32>, vector<256x256xf32>, vector<2x256xf32> -> vector<2x256xf32>
    %c1_59 = arith.constant 1 : index
    %c0_60 = arith.constant 0 : index
    %c0_61 = arith.constant 0 : index
    %93 = vector.load %arg4[%c1_59, %c0_60, %c0_61] : memref<2x1x256xf32, #tpu.memory_space<vmem>>, vector<1x1x256xf32>
    %94 = vector.shape_cast %93 : vector<1x1x256xf32> to vector<1x256xf32>
    %95 = vector.broadcast %94 : vector<1x256xf32> to vector<2x256xf32>
    %96 = arith.addf %92, %95 : vector<2x256xf32>
    %c1_62 = arith.constant 1 : index
    %c0_63 = arith.constant 0 : index
    %c0_64 = arith.constant 0 : index
    %97 = vector.load %arg5[%c1_62, %c0_63, %c0_64] : memref<2x256x256xf32, #tpu.memory_space<vmem>>, vector<1x256x256xf32>
    %98 = vector.shape_cast %97 : vector<1x256x256xf32> to vector<256x256xf32>
    %cst_65 = arith.constant dense<0.000000e+00> : vector<2x256xf32>
    %99 = tpu.matmul %96, %98, %cst_65 {dimension_numbers = #tpu.dot_dimension_numbers<[1], [0], [0], [1], [0, 0, 1, 1], [], []>} : vector<2x256xf32>, vector<256x256xf32>, vector<2x256xf32> -> vector<2x256xf32>
    %c1_66 = arith.constant 1 : index
    %c0_67 = arith.constant 0 : index
    %c0_68 = arith.constant 0 : index
    %100 = vector.load %arg6[%c1_66, %c0_67, %c0_68] : memref<2x1x256xf32, #tpu.memory_space<vmem>>, vector<1x1x256xf32>
    %101 = vector.shape_cast %100 : vector<1x1x256xf32> to vector<1x256xf32>
    %102 = vector.broadcast %101 : vector<1x256xf32> to vector<2x256xf32>
    %103 = arith.addf %99, %102 : vector<2x256xf32>
    %104 = arith.addf %89, %103 : vector<2x256xf32>
    %c1_69 = arith.constant 1 : index
    %c0_70 = arith.constant 0 : index
    %c0_71 = arith.constant 0 : index
    %105 = vector.load %arg7[%c1_69, %c0_70, %c0_71] : memref<2x1x256xf32, #tpu.memory_space<vmem>>, vector<1x1x256xf32>
    %106 = vector.shape_cast %105 : vector<1x1x256xf32> to vector<1x256xf32>
    %c1_72 = arith.constant 1 : index
    %c0_73 = arith.constant 0 : index
    %c0_74 = arith.constant 0 : index
    %107 = vector.load %arg8[%c1_72, %c0_73, %c0_74] : memref<2x1x256xf32, #tpu.memory_space<vmem>>, vector<1x1x256xf32>
    %108 = vector.shape_cast %107 : vector<1x1x256xf32> to vector<1x256xf32>
    %cst_75 = arith.constant dense<0.000000e+00> : vector<2xf32>
    %109 = vector.multi_reduction <add>, %104, %cst_75 [1] : vector<2x256xf32> to vector<2xf32>
    %110 = vector.shape_cast %109 : vector<2xf32> to vector<2x1xf32>
    %cst_76 = arith.constant 2.560000e+02 : f32
    %111 = vector.broadcast %cst_76 : f32 to vector<2x1xf32>
    %112 = arith.divf %110, %111 : vector<2x1xf32>
    %113 = vector.broadcast %112 : vector<2x1xf32> to vector<2x256xf32>
    %114 = arith.subf %104, %113 : vector<2x256xf32>
    %115 = arith.mulf %114, %114 : vector<2x256xf32>
    %cst_77 = arith.constant dense<0.000000e+00> : vector<2xf32>
    %116 = vector.multi_reduction <add>, %115, %cst_77 [1] : vector<2x256xf32> to vector<2xf32>
    %117 = vector.shape_cast %116 : vector<2xf32> to vector<2x1xf32>
    %cst_78 = arith.constant 2.560000e+02 : f32
    %118 = vector.broadcast %cst_78 : f32 to vector<2x1xf32>
    %119 = arith.divf %117, %118 : vector<2x1xf32>
    %120 = vector.broadcast %112 : vector<2x1xf32> to vector<2x256xf32>
    %121 = arith.subf %104, %120 : vector<2x256xf32>
    %cst_79 = arith.constant 9.99999974E-6 : f32
    %122 = vector.broadcast %cst_79 : f32 to vector<2x1xf32>
    %123 = arith.addf %119, %122 : vector<2x1xf32>
    %124 = math.rsqrt %123 : vector<2x1xf32>
    %125 = vector.broadcast %124 : vector<2x1xf32> to vector<2x256xf32>
    %126 = arith.mulf %121, %125 : vector<2x256xf32>
    %127 = vector.broadcast %106 : vector<1x256xf32> to vector<2x256xf32>
    %128 = arith.mulf %126, %127 : vector<2x256xf32>
    %129 = vector.broadcast %108 : vector<1x256xf32> to vector<2x256xf32>
    %130 = arith.addf %128, %129 : vector<2x256xf32>
    %c1_80 = arith.constant 1 : index
    %c0_81 = arith.constant 0 : index
    %c0_82 = arith.constant 0 : index
    %131 = vector.load %arg9[%c1_80, %c0_81, %c0_82] : memref<2x256x256xf32, #tpu.memory_space<vmem>>, vector<1x256x256xf32>
    %132 = vector.shape_cast %131 : vector<1x256x256xf32> to vector<256x256xf32>
    %cst_83 = arith.constant dense<0.000000e+00> : vector<2x256xf32>
    %133 = tpu.matmul %130, %132, %cst_83 {dimension_numbers = #tpu.dot_dimension_numbers<[1], [0], [0], [1], [0, 0, 1, 1], [], []>} : vector<2x256xf32>, vector<256x256xf32>, vector<2x256xf32> -> vector<2x256xf32>
    %c1_84 = arith.constant 1 : index
    %c0_85 = arith.constant 0 : index
    %c0_86 = arith.constant 0 : index
    %134 = vector.load %arg10[%c1_84, %c0_85, %c0_86] : memref<2x1x256xf32, #tpu.memory_space<vmem>>, vector<1x1x256xf32>
    %135 = vector.shape_cast %134 : vector<1x1x256xf32> to vector<1x256xf32>
    %136 = vector.broadcast %135 : vector<1x256xf32> to vector<2x256xf32>
    %137 = arith.addf %133, %136 : vector<2x256xf32>
    %cst_87 = arith.constant 0.000000e+00 : f32
    %138 = vector.broadcast %cst_87 : f32 to vector<2x256xf32>
    %139 = arith.maximumf %137, %138 : vector<2x256xf32>
    %c1_88 = arith.constant 1 : index
    %c0_89 = arith.constant 0 : index
    %c0_90 = arith.constant 0 : index
    %140 = vector.load %arg11[%c1_88, %c0_89, %c0_90] : memref<2x256x256xf32, #tpu.memory_space<vmem>>, vector<1x256x256xf32>
    %141 = vector.shape_cast %140 : vector<1x256x256xf32> to vector<256x256xf32>
    %cst_91 = arith.constant dense<0.000000e+00> : vector<2x256xf32>
    %142 = tpu.matmul %139, %141, %cst_91 {dimension_numbers = #tpu.dot_dimension_numbers<[1], [0], [0], [1], [0, 0, 1, 1], [], []>} : vector<2x256xf32>, vector<256x256xf32>, vector<2x256xf32> -> vector<2x256xf32>
    %c1_92 = arith.constant 1 : index
    %c0_93 = arith.constant 0 : index
    %c0_94 = arith.constant 0 : index
    %143 = vector.load %arg12[%c1_92, %c0_93, %c0_94] : memref<2x1x256xf32, #tpu.memory_space<vmem>>, vector<1x1x256xf32>
    %144 = vector.shape_cast %143 : vector<1x1x256xf32> to vector<1x256xf32>
    %145 = vector.broadcast %144 : vector<1x256xf32> to vector<2x256xf32>
    %146 = arith.addf %142, %145 : vector<2x256xf32>
    %147 = arith.addf %130, %146 : vector<2x256xf32>
    %c1_95 = arith.constant 1 : index
    %c0_96 = arith.constant 0 : index
    %c0_97 = arith.constant 0 : index
    %148 = vector.load %arg13[%c1_95, %c0_96, %c0_97] : memref<2x1x256xf32, #tpu.memory_space<vmem>>, vector<1x1x256xf32>
    %149 = vector.shape_cast %148 : vector<1x1x256xf32> to vector<1x256xf32>
    %c1_98 = arith.constant 1 : index
    %c0_99 = arith.constant 0 : index
    %c0_100 = arith.constant 0 : index
    %150 = vector.load %arg14[%c1_98, %c0_99, %c0_100] : memref<2x1x256xf32, #tpu.memory_space<vmem>>, vector<1x1x256xf32>
    %151 = vector.shape_cast %150 : vector<1x1x256xf32> to vector<1x256xf32>
    %cst_101 = arith.constant dense<0.000000e+00> : vector<2xf32>
    %152 = vector.multi_reduction <add>, %147, %cst_101 [1] : vector<2x256xf32> to vector<2xf32>
    %153 = vector.shape_cast %152 : vector<2xf32> to vector<2x1xf32>
    %cst_102 = arith.constant 2.560000e+02 : f32
    %154 = vector.broadcast %cst_102 : f32 to vector<2x1xf32>
    %155 = arith.divf %153, %154 : vector<2x1xf32>
    %156 = vector.broadcast %155 : vector<2x1xf32> to vector<2x256xf32>
    %157 = arith.subf %147, %156 : vector<2x256xf32>
    %158 = arith.mulf %157, %157 : vector<2x256xf32>
    %cst_103 = arith.constant dense<0.000000e+00> : vector<2xf32>
    %159 = vector.multi_reduction <add>, %158, %cst_103 [1] : vector<2x256xf32> to vector<2xf32>
    %160 = vector.shape_cast %159 : vector<2xf32> to vector<2x1xf32>
    %cst_104 = arith.constant 2.560000e+02 : f32
    %161 = vector.broadcast %cst_104 : f32 to vector<2x1xf32>
    %162 = arith.divf %160, %161 : vector<2x1xf32>
    %163 = vector.broadcast %155 : vector<2x1xf32> to vector<2x256xf32>
    %164 = arith.subf %147, %163 : vector<2x256xf32>
    %cst_105 = arith.constant 9.99999974E-6 : f32
    %165 = vector.broadcast %cst_105 : f32 to vector<2x1xf32>
    %166 = arith.addf %162, %165 : vector<2x1xf32>
    %167 = math.rsqrt %166 : vector<2x1xf32>
    %168 = vector.broadcast %167 : vector<2x1xf32> to vector<2x256xf32>
    %169 = arith.mulf %164, %168 : vector<2x256xf32>
    %170 = vector.broadcast %149 : vector<1x256xf32> to vector<2x256xf32>
    %171 = arith.mulf %169, %170 : vector<2x256xf32>
    %172 = vector.broadcast %151 : vector<1x256xf32> to vector<2x256xf32>
    %173 = arith.addf %171, %172 : vector<2x256xf32>
    %c0_106 = arith.constant 0 : index
    %c0_107 = arith.constant 0 : index
    %174 = vector.load %arg15[%c0_106, %c0_107] : memref<256x16xf32, #tpu.memory_space<vmem>>, vector<256x16xf32>
    %cst_108 = arith.constant dense<0.000000e+00> : vector<2x16xf32>
    %175 = tpu.matmul %173, %174, %cst_108 {dimension_numbers = #tpu.dot_dimension_numbers<[1], [0], [0], [1], [0, 0, 1, 1], [], []>} : vector<2x256xf32>, vector<256x16xf32>, vector<2x16xf32> -> vector<2x16xf32>
    %c0_109 = arith.constant 0 : index
    %c0_110 = arith.constant 0 : index
    %176 = vector.load %arg16[%c0_109, %c0_110] : memref<1x16xf32, #tpu.memory_space<vmem>>, vector<1x16xf32>
    %177 = vector.broadcast %176 : vector<1x16xf32> to vector<2x16xf32>
    %178 = arith.addf %175, %177 : vector<2x16xf32>
    %c0_111 = arith.constant 0 : index
    %c0_112 = arith.constant 0 : index
    %179 = vector.load %arg17[%c0_111, %c0_112] : memref<2x16xf32, #tpu.memory_space<vmem>>, vector<2x16xf32>
    tpu.vector_store %arg17[%c0_111, %c0_112], %178 {strides = array<i32>} : memref<2x16xf32, #tpu.memory_space<vmem>>, vector<2x16xf32>,
    return
  }
}

</mosaic_0001>

<bundles_post_ra>
// kernel: cnn_transformer_forward.5
= control target key start
LH: loop header
LB: loop body
LE: loop exit
PB: predicated region body
PF: predicated region fallthrough
CT: control target
= control target key end

     0   :  { %s3963_s21 = smov 0   ;;  %s4506_s0 = inlined_call_operand.vmem [shape: f32[2,80,32], index: 0, kind: input, shape index: {}]   ;;  %s4507_s1 = inlined_call_operand.vmem [shape: f32[2,80,32], index: 1, kind: input, shape index: {}]   ;;  %s4508_s2 = inlined_call_operand.vmem [shape: f32[2,80,32], index: 2, kind: input, shape index: {}]   ;;  %s4509_s3 = inlined_call_operand.vmem [shape: f32[2,80,32], index: 3, kind: input, shape index: {}]   ;;  %s4510_s4 = inlined_call_operand.vmem [shape: f32[9,32,64], index: 4, kind: input, shape index: {}]   ;;  %s4511_s5 = inlined_call_operand.vmem [shape: f32[1,64], index: 5, kind: input, shape index: {}]   ;;  %s4512_s6 = inlined_call_operand.vmem [shape: f32[2,4,4,64], index: 6, kind: output, shape index: {}]  }
   0x1 LB: > { %s2869_s22 = sadd.s32 4294967295, %s3926_s21   ;;  %p2873_p0 = scmp.ge.s32.totalorder %s3926_s21, 1  ;;  %s3926_s21 = sphi %s3963_s21, %s16_s21  }
   0x2   : > { %p242_p1 = scmp.lt.s32.totalorder %s3926_s21, 3 }
   0x4   : > { %p243_p2 = pnand %p2873_p0, %p242_p1 }
   0x5   : > { %v2880_v0 = vld [vmem:[%s4510_s4 + $0x20] sm:$0xff] (!%p243_p2)  ;;  %v2881_v1 = vld [vmem:[%s4510_s4 + $0x28] sm:$0xff] (!%p243_p2)  ;;  %v2882_v2 = vld [vmem:[%s4510_s4 + $0x30] sm:$0xff] (!%p243_p2)  ;;  %p287_p3 = scmp.lt.s32.totalorder (!%p243_p2), %s2869_s22, 1  ;;  %vm337_vm0 = vcmask (!%p243_p2), 261120   ;;  %vm2755_vm1 = vcmask (!%p243_p2), 519168  }
   0x6   : > { %246 = sbr.rel (%p243_p2) target bundleno = 382 (0x17e), region = 44  ;;  %v3639_v3 = vpack.c.bf16 (!%p243_p2), %v2881_v1, %v2880_v0  ;;  %v2883_v4 = vld [vmem:[%s4510_s4 + $0x38] sm:$0xff] (!%p243_p2)  ;;  %v312_v6 = vld [vmem:[%s4510_s4] sm:$0xff] (!%p243_p2)  ;;  %v313_v7 = vld [vmem:[%s4510_s4 + $0x8] sm:$0xff] (!%p243_p2) }
   0x7   : > { %v3643_v5 = vpack.c.bf16 (!%p243_p2), %v2883_v4, %v2882_v2  ;;  %v3647_v8 = vpack.c.bf16 (!%p243_p2), %v313_v7, %v312_v6  ;;  %v314_v9 = vld [vmem:[%s4510_s4 + $0x10] sm:$0xff] (!%p243_p2)  ;;  %v315_v12 = vld [vmem:[%s4510_s4 + $0x18] sm:$0xff] (!%p243_p2)  ;;  %v2916_v18 = vld [vmem:[%s4510_s4 + $0x40] sm:$0xff] (!%p243_p2) }
   0x8   : > { %3640 = vmatprep.subr.bf16.mxu0 (!%p243_p2), %v3639_v3  ;;  %3656 = vmatprep.subr.bf16.mxu1 (!%p243_p2), %v3639_v3  ;;  %v3651_v17 = vpack.c.bf16 (!%p243_p2), %v315_v12, %v314_v9  ;;  %v2917_v19 = vld [vmem:[%s4510_s4 + $0x48] sm:$0xff] (!%p243_p2)  ;;  %v2918_v32 = vld [vmem:[%s4510_s4 + $0x50] sm:$0xff] (!%p243_p2)  ;;  %v2919_v33 = vld [vmem:[%s4510_s4 + $0x58] sm:$0xff] (!%p243_p2) }
   0x9   : > { %3642 = vmatpush3.bf16.msra.mxu0 (!%p243_p2), %v3639_v3  ;;  %3658 = vmatpush3.bf16.msra.mxu1 (!%p243_p2), %v3639_v3  ;;  %v3671_v24 = vpack.c.bf16 (!%p243_p2), %v2917_v19, %v2916_v18  ;;  %v3675_v36 = vpack.c.bf16 (!%p243_p2), %v2919_v33, %v2918_v32  ;;  %v2936_v37 = vld [vmem:[%s4510_s4 + $0x60] sm:$0xff] (!%p243_p2)  ;;  %v2937_v38 = vld [vmem:[%s4510_s4 + $0x68] sm:$0xff] (!%p243_p2)  ;;  %v2938_v46 = vld [vmem:[%s4510_s4 + $0x70] sm:$0xff] (!%p243_p2) }
   0xa   : > { %3644 = vmatprep.subr.bf16.mxu0 (!%p243_p2), %v3643_v5  ;;  %3660 = vmatprep.subr.bf16.mxu1 (!%p243_p2), %v3643_v5  ;;  %v3687_v41 = vpack.c.bf16 (!%p243_p2), %v2937_v38, %v2936_v37  ;;  %v2939_v47 = vld [vmem:[%s4510_s4 + $0x78] sm:$0xff] (!%p243_p2)  ;;  %v2956_v51 = vld [vmem:[%s4510_s4 + $0x80] sm:$0xff] (!%p243_p2)  ;;  %v2957_v52 = vld [vmem:[%s4510_s4 + $0x88] sm:$0xff] (!%p243_p2) }
   0xb   : > { %v3691_v50 = vpack.c.bf16 (!%p243_p2), %v2939_v47, %v2938_v46  ;;  %v3703_v55 = vpack.c.bf16 (!%p243_p2), %v2957_v52, %v2956_v51  ;;  %v2958_v59 = vld [vmem:[%s4510_s4 + $0x90] sm:$0xff] (!%p243_p2)  ;;  %v2959_v60 = vld [vmem:[%s4510_s4 + $0x98] sm:$0xff] (!%p243_p2)  ;;  %v2976_v62 = vld [vmem:[%s4510_s4 + $0xa0] sm:$0xff] (!%p243_p2) }
   0xc   : > { %v3707_v61 = vpack.c.bf16 (!%p243_p2), %v2959_v60, %v2958_v59  ;;  %v2977_v63 = vld [vmem:[%s4510_s4 + $0xa8] sm:$0xff] (!%p243_p2)  ;;  %v2978_v3 = vld [vmem:[%s4510_s4 + $0xb0] sm:$0xff] (!%p243_p2)  ;;  %v2979_v4 = vld [vmem:[%s4510_s4 + $0xb8] sm:$0xff] (!%p243_p2) }
   0xd   : > { %s4514_s22 = smov (!%p287_p3, %s2869_s22), 1  ;;  %3646 = vmatpush3.bf16.msra.mxu0 %v3643_v5  ;;  %3662 = vmatpush3.bf16.msra.mxu1 %v3643_v5  ;;  %v3719_v0 = vpack.c.bf16 %v2977_v63, %v2976_v62  ;;  %v3723_v5 = vpack.c.bf16 %v2979_v4, %v2978_v3  ;;  %v2996_v6 = vld [vmem:[%s4510_s4 + $0xc0] sm:$0xff]  ;;  %v2997_v7 = vld [vmem:[%s4510_s4 + $0xc8] sm:$0xff]  ;;  %v3018_v19 = vld [vmem:[%s4510_s4 + $0xf0] sm:$0xff] }
   0xe   : > { %s3992_s11 = smul.u32 80, %s4514_s22  ;;  %3648 = vmatprep.subr.bf16.mxu0 %v3647_v8  ;;  %3664 = vmatprep.subr.bf16.mxu1 %v3647_v8  ;;  %v3036_v32 = vld [vmem:[%s4510_s4 + $0x100] sm:$0xff]  ;;  %v3037_v33 = vld [vmem:[%s4510_s4 + $0x108] sm:$0xff]  ;;  %v3038_v37 = vld [vmem:[%s4510_s4 + $0x110] sm:$0xff] }
   0xf   : > { %v3039_v38 = vld [vmem:[%s4510_s4 + $0x118] sm:$0xff] }
  0x10   : > { %s3998_s14 = scalar_lea.vmem %s4507_s1, %s3992_s11  ;;  %s4004_s17 = scalar_lea.vmem %s4508_s2, %s3992_s11 }
  0x11   : > { %v324_v10 = vld [vmem:[%s3998_s14] sm:$0xff]  ;;  %v4017_v13 = vld [vmem:[%s3998_s14 + $0x8] sm:$0xff]  ;;  %v4026_v15 = vld [vmem:[%s3998_s14 + $0x10] sm:$0xff]  ;;  %s4081_s30 = scalar_lea.vmem %s4506_s0, %s3992_s11  ;;  %s4154_s20 = scalar_lea.vmem %s4509_s3, %s3992_s11 }
  0x12   : > { %v4011_v11 = vld [vmem:[%s4004_s17] sm:$0xff]  ;;  %v4020_v14 = vld [vmem:[%s4004_s17 + $0x8] sm:$0xff]  ;;  %3287 = vmatprep.mubr.msk.f32.mxu0 %vm337_vm0, %v324_v10  ;;  %v4029_v16 = vld [vmem:[%s4004_s17 + $0x10] sm:$0xff] }
  0x13   : > { %3327 = vmatprep.mubr.msk.f32.mxu1 %vm337_vm0, %v4011_v11  ;;  %3288 = vmatmul.mubr.msk.f32.vlgmr.msra.gmra.mrb[0].mxu0 %vm337_vm0, %v4017_v13  ;;  %v4042_v20 = vld [vmem:[%s3998_s14 + $0x18] sm:$0xff]  ;;  %v4052_v22 = vld [vmem:[%s3998_s14 + $0x20] sm:$0xff]  ;;  %v4066_v25 = vld [vmem:[%s3998_s14 + $0x28] sm:$0xff] }
  0x14   : > { %3328 = vmatmul.mubr.msk.f32.vlgmr.msra.gmra.mrb[0].mxu1 %vm337_vm0, %v4020_v14  ;;  %3650 = vmatpush3.bf16.msra.mxu0 %v3647_v8  ;;  %v4045_v21 = vld [vmem:[%s4004_s17 + $0x18] sm:$0xff]  ;;  %v4055_v23 = vld [vmem:[%s4004_s17 + $0x20] sm:$0xff]  ;;  %v4069_v26 = vld [vmem:[%s4004_s17 + $0x28] sm:$0xff] }
  0x15   : > { %3666 = vmatpush3.bf16.msra.mxu1 %v3647_v8  ;;  %3290 = vmatprep.mubr.msk.f32.mxu0 %vm337_vm0, %v4026_v15  ;;  %v4072_v27 = vld [vmem:[%s3998_s14 + $0x30] sm:$0xff]  ;;  %v4092_v29 = vld [vmem:[%s3998_s14 + $0x38] sm:$0xff]  ;;  %v316_v31 = vld [vmem:[%s4081_s30] sm:$0xff]  ;;  %v3735_v8 = vpack.c.bf16 %v2997_v7, %v2996_v6 }
  0x16   : > { %3330 = vmatprep.mubr.msk.f32.mxu1 %vm337_vm0, %v4029_v16  ;;  %3652 = vmatprep.subr.bf16.mxu0 %v3651_v17  ;;  %v4075_v28 = vld [vmem:[%s4004_s17 + $0x30] sm:$0xff]  ;;  %v4095_v30 = vld [vmem:[%s4004_s17 + $0x38] sm:$0xff]  ;;  %v4111_v34 = vld [vmem:[%s4081_s30 + $0x8] sm:$0xff] }
  0x17   : > { %3668 = vmatprep.subr.bf16.mxu1 %v3651_v17  ;;  %3291 = vmatmul.mubr.msk.f32.gmra.mrb[2].mxu0 %vm337_vm0, %v4042_v20  ;;  %v4114_v35 = vld [vmem:[%s4081_s30 + $0x10] sm:$0xff]  ;;  %v4127_v39 = vld [vmem:[%s4081_s30 + $0x18] sm:$0xff]  ;;  %v4134_v40 = vld [vmem:[%s4081_s30 + $0x20] sm:$0xff] }
  0x18   : > { %3331 = vmatmul.mubr.msk.f32.gmra.mrb[2].mxu1 %vm337_vm0, %v4045_v21  ;;  %3293 = vmatprep.mubr.msk.f32.mxu0 %vm337_vm0, %v4052_v22  ;;  %v4145_v42 = vld [vmem:[%s4081_s30 + $0x28] sm:$0xff]  ;;  %v4148_v43 = vld [vmem:[%s4081_s30 + $0x30] sm:$0xff]  ;;  %v4165_v44 = vld [vmem:[%s4081_s30 + $0x38] sm:$0xff] }
  0x19   : > { %3333 = vmatprep.mubr.msk.f32.mxu1 %vm337_vm0, %v4055_v23  ;;  %3654 = vmatpush3.bf16.msra.mxu0 %v3651_v17  ;;  %v956_v45 = vld [vmem:[%s4154_s20] sm:$0xff]  ;;  %v4182_v48 = vld [vmem:[%s4154_s20 + $0x8] sm:$0xff]  ;;  %v4185_v49 = vld [vmem:[%s4154_s20 + $0x10] sm:$0xff] }
  0x1a   : > { %3670 = vmatpush3.bf16.msra.mxu1 %v3651_v17  ;;  %3672 = vmatprep.subr.bf16.mxu0 %v3671_v24  ;;  %v4198_v53 = vld [vmem:[%s4154_s20 + $0x18] sm:$0xff]  ;;  %v4205_v54 = vld [vmem:[%s4154_s20 + $0x20] sm:$0xff]  ;;  %v4216_v56 = vld [vmem:[%s4154_s20 + $0x28] sm:$0xff] }
  0x1b   : > { %3680 = vmatprep.subr.bf16.mxu1 %v3671_v24  ;;  %3294 = vmatmul.mubr.msk.f32.gmra.mrb[4].mxu0 %vm337_vm0, %v4066_v25  ;;  %v4219_v57 = vld [vmem:[%s4154_s20 + $0x30] sm:$0xff]  ;;  %v4230_v58 = vld [vmem:[%s4154_s20 + $0x38] sm:$0xff]  ;;  %v4277_v1 = vld [vmem:[%s4081_s30 + $0x40] sm:$0xff] }
  0x1c   : > { %3334 = vmatmul.mubr.msk.f32.gmra.mrb[4].mxu1 %vm337_vm0, %v4069_v26  ;;  %3296 = vmatprep.mubr.msk.f32.mxu0 %vm337_vm0, %v4072_v27  ;;  %v4280_v2 = vld [vmem:[%s3998_s14 + $0x40] sm:$0xff]  ;;  %v3017_v17 = vld [vmem:[%s4510_s4 + $0xe8] sm:$0xff] }
  0x1d   : > { %3336 = vmatprep.mubr.msk.f32.mxu1 %vm337_vm0, %v4075_v28  ;;  %v4327_v9 = vld [vmem:[%s4004_s17 + $0x40] sm:$0xff] }
  0x1e   : > { %v4374_v18 = vld [vmem:[%s4154_s20 + $0x40] sm:$0xff] }
  0x1f   : > { %3297 = vmatmul.mubr.msk.f32.gmra.mrb[6].mxu0 %vm337_vm0, %v4092_v29 }
  0x20   : > { %3337 = vmatmul.mubr.msk.f32.gmra.mrb[6].mxu1 %vm337_vm0, %v4095_v30  ;;  %3307 = vmatprep.mubr.msk.f32.mxu0 %vm337_vm0, %v316_v31 }
  0x21   : > { %3347 = vmatprep.mubr.msk.f32.mxu1 %vm337_vm0, %v324_v10  ;;  %v2998_v10 = vld [vmem:[%s4510_s4 + $0xd0] sm:$0xff] }
  0x23   : > { %3308 = vmatmul.mubr.msk.f32.vlgmr.msra.gmra.mrb[0].mxu0 %vm337_vm0, %v4111_v34 }
  0x24   : > { %3348 = vmatmul.mubr.msk.f32.vlgmr.msra.gmra.mrb[0].mxu1 %vm337_vm0, %v4017_v13  ;;  %3674 = vmatpush3.bf16.msra.mxu0 %v3671_v24 }
  0x25   : > { %3682 = vmatpush3.bf16.msra.mxu1 %v3671_v24  ;;  %3310 = vmatprep.mubr.msk.f32.mxu0 %vm337_vm0, %v4114_v35  ;;  %v3019_v24 = vld [vmem:[%s4510_s4 + $0xf8] sm:$0xff] }
  0x26   : > { %3350 = vmatprep.mubr.msk.f32.mxu1 %vm337_vm0, %v4026_v15  ;;  %3676 = vmatprep.subr.bf16.mxu0 %v3675_v36  ;;  %v3755_v31 = vpack.c.bf16 %v3019_v24, %v3018_v19 }
  0x27   : > { %3684 = vmatprep.subr.bf16.mxu1 %v3675_v36  ;;  %3311 = vmatmul.mubr.msk.f32.gmra.mrb[2].mxu0 %vm337_vm0, %v4127_v39 }
  0x28   : > { %3351 = vmatmul.mubr.msk.f32.gmra.mrb[2].mxu1 %vm337_vm0, %v4042_v20  ;;  %3313 = vmatprep.mubr.msk.f32.mxu0 %vm337_vm0, %v4134_v40 }
  0x29   : > { %3353 = vmatprep.mubr.msk.f32.mxu1 %vm337_vm0, %v4052_v22  ;;  %3678 = vmatpush3.bf16.msra.mxu0 %v3675_v36 }
  0x2a   : > { %3686 = vmatpush3.bf16.msra.mxu1 %v3675_v36  ;;  %3688 = vmatprep.subr.bf16.mxu0 %v3687_v41  ;;  %v2079_v36 = vld [vmem:[%s3998_s14 + $0x48] sm:$0xff] }
  0x2b   : > { %3696 = vmatprep.subr.bf16.mxu1 %v3687_v41  ;;  %3314 = vmatmul.mubr.msk.f32.gmra.mrb[4].mxu0 %vm337_vm0, %v4145_v42 }
  0x2c   : > { %3354 = vmatmul.mubr.msk.f32.gmra.mrb[4].mxu1 %vm337_vm0, %v4066_v25  ;;  %3316 = vmatprep.mubr.msk.f32.mxu0 %vm337_vm0, %v4148_v43 }
  0x2d   : > { %3356 = vmatprep.mubr.msk.f32.mxu1 %vm337_vm0, %v4072_v27 }
  0x2f   : > { %3317 = vmatmul.mubr.msk.f32.gmra.mrb[6].mxu0 %vm337_vm0, %v4165_v44 }
  0x30   : > { %3357 = vmatmul.mubr.msk.f32.gmra.mrb[6].mxu1 %vm337_vm0, %v4092_v29  ;;  %3367 = vmatprep.mubr.msk.f32.mxu0 %vm337_vm0, %v4011_v11  ;;  %v2999_v11 = vld [vmem:[%s4510_s4 + $0xd8] sm:$0xff] }
  0x31   : > { %3387 = vmatprep.mubr.msk.f32.mxu1 %vm337_vm0, %v956_v45  ;;  %v3739_v12 = vpack.c.bf16 %v2999_v11, %v2998_v10 }
  0x33   : > { %3368 = vmatmul.mubr.msk.f32.vlgmr.msra.gmra.mrb[0].mxu0 %vm337_vm0, %v4020_v14 }
  0x34   : > { %3388 = vmatmul.mubr.msk.f32.vlgmr.msra.gmra.mrb[0].mxu1 %vm337_vm0, %v4182_v48  ;;  %3690 = vmatpush3.bf16.msra.mxu0 %v3687_v41 }
  0x35   : > { %3698 = vmatpush3.bf16.msra.mxu1 %v3687_v41  ;;  %3370 = vmatprep.mubr.msk.f32.mxu0 %vm337_vm0, %v4029_v16 }
  0x36   : > { %3390 = vmatprep.mubr.msk.f32.mxu1 %vm337_vm0, %v4185_v49  ;;  %3692 = vmatprep.subr.bf16.mxu0 %v3691_v50 }
  0x37   : > { %3700 = vmatprep.subr.bf16.mxu1 %v3691_v50  ;;  %3371 = vmatmul.mubr.msk.f32.gmra.mrb[2].mxu0 %vm337_vm0, %v4045_v21 }
  0x38   : > { %3391 = vmatmul.mubr.msk.f32.gmra.mrb[2].mxu1 %vm337_vm0, %v4198_v53  ;;  %3373 = vmatprep.mubr.msk.f32.mxu0 %vm337_vm0, %v4055_v23 }
  0x39   : > { %3393 = vmatprep.mubr.msk.f32.mxu1 %vm337_vm0, %v4205_v54  ;;  %3694 = vmatpush3.bf16.msra.mxu0 %v3691_v50 }
  0x3a   : > { %3702 = vmatpush3.bf16.msra.mxu1 %v3691_v50  ;;  %3704 = vmatprep.subr.bf16.mxu0 %v3703_v55 }
  0x3b   : > { %3712 = vmatprep.subr.bf16.mxu1 %v3703_v55  ;;  %3374 = vmatmul.mubr.msk.f32.gmra.mrb[4].mxu0 %vm337_vm0, %v4069_v26 }
  0x3c   : > { %3394 = vmatmul.mubr.msk.f32.gmra.mrb[4].mxu1 %vm337_vm0, %v4216_v56  ;;  %3376 = vmatprep.mubr.msk.f32.mxu0 %vm337_vm0, %v4075_v28 }
  0x3d   : > { %3396 = vmatprep.mubr.msk.f32.mxu1 %vm337_vm0, %v4219_v57 }
  0x3f   : > { %3377 = vmatmul.mubr.msk.f32.gmra.mrb[6].mxu0 %vm337_vm0, %v4095_v30 }
  0x40   : > { %3397 = vmatmul.mubr.msk.f32.gmra.mrb[6].mxu1 %vm337_vm0, %v4230_v58  ;;  %3407 = vmatprep.mubr.msk.f32.mxu0 %vm337_vm0, %v4111_v34  ;;  %v3767_v34 = vpack.c.bf16 %v3037_v33, %v3036_v32 }
  0x41   : > { %3427 = vmatprep.mubr.msk.f32.mxu1 %vm337_vm0, %v4017_v13 }
  0x43   : > { %3408 = vmatmul.mubr.msk.f32.vlgmr.msra.gmra.mrb[0].mxu0 %vm337_vm0, %v4114_v35 }
  0x44   : > { %3428 = vmatmul.mubr.msk.f32.vlgmr.msra.gmra.mrb[0].mxu1 %vm337_vm0, %v4026_v15  ;;  %3706 = vmatpush3.bf16.msra.mxu0 %v3703_v55 }
  0x45   : > { %3714 = vmatpush3.bf16.msra.mxu1 %v3703_v55  ;;  %3410 = vmatprep.mubr.msk.f32.mxu0 %vm337_vm0, %v4127_v39 }
  0x46   : > { %3430 = vmatprep.mubr.msk.f32.mxu1 %vm337_vm0, %v4042_v20  ;;  %3708 = vmatprep.subr.bf16.mxu0 %v3707_v61 }
  0x47   : > { %3716 = vmatprep.subr.bf16.mxu1 %v3707_v61  ;;  %3411 = vmatmul.mubr.msk.f32.gmra.mrb[2].mxu0 %vm337_vm0, %v4134_v40 }
  0x48   : > { %3431 = vmatmul.mubr.msk.f32.gmra.mrb[2].mxu1 %vm337_vm0, %v4052_v22  ;;  %3413 = vmatprep.mubr.msk.f32.mxu0 %vm337_vm0, %v4145_v42 }
  0x49   : > { %3433 = vmatprep.mubr.msk.f32.mxu1 %vm337_vm0, %v4066_v25  ;;  %3710 = vmatpush3.bf16.msra.mxu0 %v3707_v61 }
  0x4a   : > { %3718 = vmatpush3.bf16.msra.mxu1 %v3707_v61  ;;  %3720 = vmatprep.subr.bf16.mxu0 %v3719_v0 }
  0x4b   : > { %3728 = vmatprep.subr.bf16.mxu1 %v3719_v0  ;;  %3414 = vmatmul.mubr.msk.f32.gmra.mrb[4].mxu0 %vm337_vm0, %v4148_v43 }
  0x4c   : > { %3434 = vmatmul.mubr.msk.f32.gmra.mrb[4].mxu1 %vm337_vm0, %v4072_v27  ;;  %3416 = vmatprep.mubr.msk.f32.mxu0 %vm337_vm0, %v4165_v44 }
  0x4d   : > { %3436 = vmatprep.mubr.msk.f32.mxu1 %vm337_vm0, %v4092_v29 }
  0x4f   : > { %3417 = vmatmul.mubr.msk.f32.gmra.mrb[6].mxu0 %vm337_vm0, %v4277_v1 }
  0x50   : > { %3437 = vmatmul.mubr.msk.f32.gmra.mrb[6].mxu1 %vm337_vm0, %v4280_v2  ;;  %3447 = vmatprep.mubr.msk.f32.mxu0 %vm337_vm0, %v4017_v13  ;;  %v3016_v13 = vld [vmem:[%s4510_s4 + $0xe0] sm:$0xff] }
  0x51   : > { %3467 = vmatprep.mubr.msk.f32.mxu1 %vm337_vm0, %v4020_v14 }
  0x53   : > { %3448 = vmatmul.mubr.msk.f32.vlgmr.msra.gmra.mrb[0].mxu0 %vm337_vm0, %v4026_v15 }
  0x54   : > { %3468 = vmatmul.mubr.msk.f32.vlgmr.msra.gmra.mrb[0].mxu1 %vm337_vm0, %v4029_v16  ;;  %3722 = vmatpush3.bf16.msra.mxu0 %v3719_v0 }
  0x55   : > { %3730 = vmatpush3.bf16.msra.mxu1 %v3719_v0  ;;  %3450 = vmatprep.mubr.msk.f32.mxu0 %vm337_vm0, %v4042_v20 }
  0x56   : > { %3470 = vmatprep.mubr.msk.f32.mxu1 %vm337_vm0, %v4045_v21  ;;  %3724 = vmatprep.subr.bf16.mxu0 %v3723_v5 }
  0x57   : > { %3732 = vmatprep.subr.bf16.mxu1 %v3723_v5  ;;  %3451 = vmatmul.mubr.msk.f32.gmra.mrb[2].mxu0 %vm337_vm0, %v4052_v22 }
  0x58   : > { %3471 = vmatmul.mubr.msk.f32.gmra.mrb[2].mxu1 %vm337_vm0, %v4055_v23  ;;  %3453 = vmatprep.mubr.msk.f32.mxu0 %vm337_vm0, %v4066_v25 }
  0x59   : > { %3473 = vmatprep.mubr.msk.f32.mxu1 %vm337_vm0, %v4069_v26  ;;  %3726 = vmatpush3.bf16.msra.mxu0 %v3723_v5 }
  0x5a   : > { %3734 = vmatpush3.bf16.msra.mxu1 %v3723_v5  ;;  %3736 = vmatprep.subr.bf16.mxu0 %v3735_v8 }
  0x5b   : > { %3744 = vmatprep.subr.bf16.mxu1 %v3735_v8  ;;  %3454 = vmatmul.mubr.msk.f32.gmra.mrb[4].mxu0 %vm337_vm0, %v4072_v27 }
  0x5c   : > { %3474 = vmatmul.mubr.msk.f32.gmra.mrb[4].mxu1 %vm337_vm0, %v4075_v28  ;;  %3456 = vmatprep.mubr.msk.f32.mxu0 %vm337_vm0, %v4092_v29 }
  0x5d   : > { %3476 = vmatprep.mubr.msk.f32.mxu1 %vm337_vm0, %v4095_v30 }
  0x5f   : > { %3457 = vmatmul.mubr.msk.f32.gmra.mrb[6].mxu0 %vm337_vm0, %v4280_v2 }
  0x60   : > { %3477 = vmatmul.mubr.msk.f32.gmra.mrb[6].mxu1 %vm337_vm0, %v4327_v9  ;;  %3487 = vmatprep.mubr.msk.f32.mxu0 %vm337_vm0, %v4020_v14  ;;  %v3751_v14 = vpack.c.bf16 %v3017_v17, %v3016_v13 }
  0x61   : > { %3507 = vmatprep.mubr.msk.f32.mxu1 %vm337_vm0, %v4182_v48 }
  0x63   : > { %3488 = vmatmul.mubr.msk.f32.vlgmr.msra.gmra.mrb[0].mxu0 %vm337_vm0, %v4029_v16 }
  0x64   : > { %3508 = vmatmul.mubr.msk.f32.vlgmr.msra.gmra.mrb[0].mxu1 %vm337_vm0, %v4185_v49  ;;  %3738 = vmatpush3.bf16.msra.mxu0 %v3735_v8 }
  0x65   : > { %3746 = vmatpush3.bf16.msra.mxu1 %v3735_v8  ;;  %3490 = vmatprep.mubr.msk.f32.mxu0 %vm337_vm0, %v4045_v21 }
  0x66   : > { %3510 = vmatprep.mubr.msk.f32.mxu1 %vm337_vm0, %v4198_v53  ;;  %3740 = vmatprep.subr.bf16.mxu0 %v3739_v12 }
  0x67   : > { %3748 = vmatprep.subr.bf16.mxu1 %v3739_v12  ;;  %3491 = vmatmul.mubr.msk.f32.gmra.mrb[2].mxu0 %vm337_vm0, %v4055_v23 }
  0x68   : > { %3511 = vmatmul.mubr.msk.f32.gmra.mrb[2].mxu1 %vm337_vm0, %v4205_v54  ;;  %3493 = vmatprep.mubr.msk.f32.mxu0 %vm337_vm0, %v4069_v26 }
  0x69   : > { %3513 = vmatprep.mubr.msk.f32.mxu1 %vm337_vm0, %v4216_v56  ;;  %3742 = vmatpush3.bf16.msra.mxu0 %v3739_v12 }
  0x6a   : > { %3750 = vmatpush3.bf16.msra.mxu1 %v3739_v12  ;;  %3752 = vmatprep.subr.bf16.mxu0 %v3751_v14 }
  0x6b   : > { %3760 = vmatprep.subr.bf16.mxu1 %v3751_v14  ;;  %3494 = vmatmul.mubr.msk.f32.gmra.mrb[4].mxu0 %vm337_vm0, %v4075_v28 }
  0x6c   : > { %3514 = vmatmul.mubr.msk.f32.gmra.mrb[4].mxu1 %vm337_vm0, %v4219_v57  ;;  %3496 = vmatprep.mubr.msk.f32.mxu0 %vm337_vm0, %v4095_v30 }
  0x6d   : > { %3516 = vmatprep.mubr.msk.f32.mxu1 %vm337_vm0, %v4230_v58 }
  0x6f   : > { %3497 = vmatmul.mubr.msk.f32.gmra.mrb[6].mxu0 %vm337_vm0, %v4327_v9 }
  0x70   : > { %3517 = vmatmul.mubr.msk.f32.gmra.mrb[6].mxu1 %vm337_vm0, %v4374_v18  ;;  %3527 = vmatprep.mubr.msk.f32.mxu0 %vm337_vm0, %v4114_v35  ;;  %v1934_v35 = vld [vmem:[%s4081_s30 + $0x48] sm:$0xff]  ;;  %s3062_s30 = sshll.u32 %s4514_s22, 4 }
  0x71   : > { %3547 = vmatprep.mubr.msk.f32.mxu1 %vm337_vm0, %v4026_v15  ;;  %s311_s8 = scalar_lea.vmem %s4512_s6, %s3062_s30 }
  0x73   : > { %3528 = vmatmul.mubr.msk.f32.vlgmr.msra.gmra.mrb[0].mxu0 %vm337_vm0, %v4127_v39  ;;  %v3771_v39 = vpack.c.bf16 %v3039_v38, %v3038_v37 }
  0x74   : > { %3548 = vmatmul.mubr.msk.f32.vlgmr.msra.gmra.mrb[0].mxu1 %vm337_vm0, %v4042_v20  ;;  %3754 = vmatpush3.bf16.msra.mxu0 %v3751_v14 }
  0x75   : > { %3762 = vmatpush3.bf16.msra.mxu1 %v3751_v14  ;;  %3530 = vmatprep.mubr.msk.f32.mxu0 %vm337_vm0, %v4134_v40 }
  0x76   : > { %3550 = vmatprep.mubr.msk.f32.mxu1 %vm337_vm0, %v4052_v22  ;;  %3756 = vmatprep.subr.bf16.mxu0 %v3755_v31 }
  0x77   : > { %3764 = vmatprep.subr.bf16.mxu1 %v3755_v31  ;;  %3531 = vmatmul.mubr.msk.f32.gmra.mrb[2].mxu0 %vm337_vm0, %v4145_v42 }
  0x78   : > { %3551 = vmatmul.mubr.msk.f32.gmra.mrb[2].mxu1 %vm337_vm0, %v4066_v25  ;;  %3533 = vmatprep.mubr.msk.f32.mxu0 %vm337_vm0, %v4148_v43 }
  0x79   : > { %3553 = vmatprep.mubr.msk.f32.mxu1 %vm337_vm0, %v4072_v27  ;;  %3758 = vmatpush3.bf16.msra.mxu0 %v3755_v31 }
  0x7a   : > { %3766 = vmatpush3.bf16.msra.mxu1 %v3755_v31  ;;  %3768 = vmatprep.subr.bf16.mxu0 %v3767_v34 }
  0x7b   : > { %3776 = vmatprep.subr.bf16.mxu1 %v3767_v34  ;;  %3534 = vmatmul.mubr.msk.f32.gmra.mrb[4].mxu0 %vm337_vm0, %v4165_v44 }
  0x7c   : > { %3554 = vmatmul.mubr.msk.f32.gmra.mrb[4].mxu1 %vm337_vm0, %v4092_v29  ;;  %3536 = vmatprep.mubr.msk.f32.mxu0 %vm337_vm0, %v4277_v1 }
  0x7d   : > { %3556 = vmatprep.mubr.msk.f32.mxu1 %vm337_vm0, %v4280_v2 }
  0x7f   : > { %3537 = vmatmul.mubr.msk.f32.gmra.mrb[6].mxu0 %vm337_vm0, %v1934_v35 }
  0x80   : > { %3557 = vmatmul.mubr.msk.f32.gmra.mrb[6].mxu1 %vm337_vm0, %v2079_v36  ;;  %3567 = vmatprep.mubr.msk.f32.mxu0 %vm337_vm0, %v4026_v15  ;;  %v2342_v15 = vld [vmem:[%s4004_s17 + $0x48] sm:$0xff] }
  0x81   : > { %3587 = vmatprep.mubr.msk.f32.mxu1 %vm337_vm0, %v4029_v16 }
  0x83   : > { %3568 = vmatmul.mubr.msk.f32.vlgmr.msra.gmra.mrb[0].mxu0 %vm337_vm0, %v4042_v20 }
  0x84   : > { %3588 = vmatmul.mubr.msk.f32.vlgmr.msra.gmra.mrb[0].mxu1 %vm337_vm0, %v4045_v21  ;;  %3770 = vmatpush3.bf16.msra.mxu0 %v3767_v34 }
  0x85   : > { %3778 = vmatpush3.bf16.msra.mxu1 %v3767_v34  ;;  %3570 = vmatprep.mubr.msk.f32.mxu0 %vm337_vm0, %v4052_v22 }
  0x86   : > { %3590 = vmatprep.mubr.msk.f32.mxu1 %vm337_vm0, %v4055_v23  ;;  %3772 = vmatprep.subr.bf16.mxu0 %v3771_v39 }
  0x87   : > { %3780 = vmatprep.subr.bf16.mxu1 %v3771_v39  ;;  %3571 = vmatmul.mubr.msk.f32.gmra.mrb[2].mxu0 %vm337_vm0, %v4066_v25 }
  0x88   : > { %3591 = vmatmul.mubr.msk.f32.gmra.mrb[2].mxu1 %vm337_vm0, %v4069_v26  ;;  %3573 = vmatprep.mubr.msk.f32.mxu0 %vm337_vm0, %v4072_v27  ;;  %v3056_v27 = vld [vmem:[%s4511_s5] ss:$0 sm:$0xff] }
  0x89   : > { %3593 = vmatprep.mubr.msk.f32.mxu1 %vm337_vm0, %v4075_v28  ;;  %3774 = vmatpush3.bf16.msra.mxu0 %v3771_v39 }
  0x8a   : > { %3782 = vmatpush3.bf16.msra.mxu1 %v3771_v39 }
  0x8b   : > { %3574 = vmatmul.mubr.msk.f32.gmra.mrb[4].mxu0 %vm337_vm0, %v4092_v29 }
  0x8c   : > { %3594 = vmatmul.mubr.msk.f32.gmra.mrb[4].mxu1 %vm337_vm0, %v4095_v30  ;;  %3576 = vmatprep.mubr.msk.f32.mxu0 %vm337_vm0, %v4280_v2 }
  0x8d   : > { %3596 = vmatprep.mubr.msk.f32.mxu1 %vm337_vm0, %v4327_v9 }
  0x8f   : > { %3577 = vmatmul.mubr.msk.f32.gmra.mrb[6].mxu0 %vm337_vm0, %v2079_v36 }
  0x90   : > { %3597 = vmatmul.mubr.msk.f32.gmra.mrb[6].mxu1 %vm337_vm0, %v2342_v15  ;;  %3607 = vmatprep.mubr.msk.f32.mxu0 %vm337_vm0, %v4029_v16  ;;  %v2605_v16 = vld [vmem:[%s4154_s20 + $0x48] sm:$0xff] }
  0x91   : > { %3627 = vmatprep.mubr.msk.f32.mxu1 %vm337_vm0, %v4185_v49 }
  0x93   : > { %3608 = vmatmul.mubr.msk.f32.vlgmr.msra.gmra.mrb[0].mxu0 %vm337_vm0, %v4045_v21 }
  0x94   : > { %3628 = vmatmul.mubr.msk.f32.vlgmr.msra.gmra.mrb[0].mxu1 %vm337_vm0, %v4198_v53  ;;  %3610 = vmatprep.mubr.msk.f32.mxu0 %vm337_vm0, %v4055_v23 }
  0x95   : > { %3630 = vmatprep.mubr.msk.f32.mxu1 %vm337_vm0, %v4205_v54 }
  0x97   : > { %3611 = vmatmul.mubr.msk.f32.gmra.mrb[2].mxu0 %vm337_vm0, %v4069_v26 }
  0x98   : > { %3631 = vmatmul.mubr.msk.f32.gmra.mrb[2].mxu1 %vm337_vm0, %v4216_v56  ;;  %3613 = vmatprep.mubr.msk.f32.mxu0 %vm337_vm0, %v4075_v28 }
  0x99   : > { %3633 = vmatprep.mubr.msk.f32.mxu1 %vm337_vm0, %v4219_v57 }
  0x9b   : > { %3614 = vmatmul.mubr.msk.f32.gmra.mrb[4].mxu0 %vm337_vm0, %v4095_v30 }
  0x9c   : > { %3634 = vmatmul.mubr.msk.f32.gmra.mrb[4].mxu1 %vm337_vm0, %v4230_v58  ;;  %3616 = vmatprep.mubr.msk.f32.mxu0 %vm337_vm0, %v4327_v9 }
  0x9d   : > { %3636 = vmatprep.mubr.msk.f32.mxu1 %vm337_vm0, %v4374_v18 }
  0x9f   : > { %3617 = vmatmul.mubr.msk.f32.gmra.mrb[6].mxu0 %vm337_vm0, %v2342_v15 }
  0xa0   : > { %3637 = vmatmul.mubr.msk.f32.gmra.mrb[6].mxu1 %vm337_vm0, %v2605_v16 }
 0x166   : > { %v3609_v20 = vpop.f32.mrb[0].mxu0 }
 0x167   : > { %v3629_v21 = vpop.f32.mrb[0].mxu1  ;;  %v2551_v22 = vpop.f32.mrb[1].mxu0 }
 0x168   : > { %v2696_v23 = vpop.f32.mrb[1].mxu1  ;;  %v2744_v25 = vmax.f32 %v2551_v22, %v3609_v20 }
 0x169   : > { %v2745_v26 = vmax.f32 %v2696_v23, %v3629_v21 }
 0x16a   : > { %v3612_v29 = vpop.f32.mrb[2].mxu0 }
 0x16b   : > { %v2746_v28 = vmax.f32 %v2744_v25, %v2745_v26  ;;  %v3632_v30 = vpop.f32.mrb[2].mxu1  ;;  %v2561_v40 = vpop.f32.mrb[3].mxu0 }
 0x16c   : > { %v2706_v41 = vpop.f32.mrb[3].mxu1  ;;  %v2757_v43 = vmax.f32 %v2561_v40, %v3612_v29 }
 0x16d   : > { %v2753_v42 = vadd.f32 %v3056_v27, %v2746_v28  ;;  %v2758_v44 = vmax.f32 %v2706_v41, %v3632_v30 }
 0x16e   : > { %v3615_v47 = vpop.f32.mrb[4].mxu0 }
 0x16f   : > { %v2754_v45 = vmax.f32 %v2753_v42, 0.0  ;;  %v2759_v46 = vmax.f32 %v2757_v43, %v2758_v44  ;;  %v3635_v48 = vpop.f32.mrb[4].mxu1  ;;  %v2571_v49 = vpop.f32.mrb[5].mxu0 }
 0x170   : > { %v2716_v50 = vpop.f32.mrb[5].mxu1  ;;  %v2764_v52 = vmax.f32 %v2571_v49, %v3615_v47 }
 0x171   : > { %2756 = vst.msk [vmem:[%s311_s8] sm:$0xf] %vm2755_vm1, %v2754_v45  ;;  %v2760_v51 = vadd.f32 %v3056_v27, %v2759_v46  ;;  %v2765_v53 = vmax.f32 %v2716_v50, %v3635_v48 }
 0x172   : > { %v3618_v56 = vpop.f32.mrb[6].mxu0 }
 0x173   : > { %v2761_v54 = vmax.f32 %v2760_v51, 0.0  ;;  %v2766_v55 = vmax.f32 %v2764_v52, %v2765_v53  ;;  %v3638_v57 = vpop.f32.mrb[6].mxu1  ;;  %v2581_v58 = vpop.f32.mrb[7].mxu0 }
 0x174   : > { %v2726_v59 = vpop.f32.mrb[7].mxu1  ;;  %v2771_v61 = vmax.f32 %v2581_v58, %v3618_v56 }
 0x175   : > { %3057 = vst.msk [vmem:[%s311_s8 + $0x4] sm:$0xf] %vm2755_vm1, %v2761_v54  ;;  %v2767_v60 = vadd.f32 %v3056_v27, %v2766_v55  ;;  %v2772_v62 = vmax.f32 %v2726_v59, %v3638_v57 }
 0x177   : > { %v2768_v63 = vmax.f32 %v2767_v60, 0.0  ;;  %v2773_v0 = vmax.f32 %v2771_v61, %v2772_v62 }
 0x179   : > { %3058 = vst.msk [vmem:[%s311_s8 + $0x8] sm:$0xf] %vm2755_vm1, %v2768_v63  ;;  %v2774_v1 = vadd.f32 %v3056_v27, %v2773_v0 }
 0x17b   : > { %v2775_v2 = vmax.f32 %v2774_v1, 0.0 }
 0x17d   : > { %3059 = vst.msk [vmem:[%s311_s8 + $0xc] sm:$0xf] %vm2755_vm1, %v2775_v2 }
 0x17e PF: > { %s16_s21 = sadd.s32 1, %s3926_s21  }
 0x17f   : > { %p13_p4 = scmp.ge.s32.totalorder %s16_s21, 4  }
 0x181   :  { %15 = sbr.rel (!%p13_p4) target bundleno = 1 (0x1), region = 94 }

// kernel: cnn_transformer_forward.6
= control target key start
LH: loop header
LB: loop body
LE: loop exit
PB: predicated region body
PF: predicated region fallthrough
CT: control target
= control target key end

     0   :  { %s3450_s21 = smov 0   ;;  %s3905_s0 = inlined_call_operand.vmem [shape: f32[2,48,64], index: 0, kind: input, shape index: {}]   ;;  %s3906_s1 = inlined_call_operand.vmem [shape: f32[2,48,64], index: 1, kind: input, shape index: {}]   ;;  %s3907_s2 = inlined_call_operand.vmem [shape: f32[2,48,64], index: 2, kind: input, shape index: {}]   ;;  %s3908_s3 = inlined_call_operand.vmem [shape: f32[2,48,64], index: 3, kind: input, shape index: {}]   ;;  %s3909_s4 = inlined_call_operand.vmem [shape: f32[9,64,128], index: 4, kind: input, shape index: {}]   ;;  %s3910_s5 = inlined_call_operand.vmem [shape: f32[1,128], index: 5, kind: input, shape index: {}]   ;;  %s3911_s6 = inlined_call_operand.vmem [shape: f32[2,2,2,128], index: 6, kind: output, shape index: {}]  }
   0x1 LB: > { %s2282_s22 = sadd.s32 4294967295, %s3413_s21   ;;  %p2286_p0 = scmp.ge.s32.totalorder %s3413_s21, 1  ;;  %s3413_s21 = sphi %s3450_s21, %s16_s21  }
   0x2   : > { %p242_p1 = scmp.lt.s32.totalorder %s3413_s21, 3 }
   0x4   : > { %p243_p2 = pnand %p2286_p0, %p242_p1 }
   0x5   : > { %v2293_v0 = vld [vmem:[%s3909_s4 + $0x40] sm:$0xff] (!%p243_p2)  ;;  %v2294_v1 = vld [vmem:[%s3909_s4 + $0x48] sm:$0xff] (!%p243_p2)  ;;  %v2295_v2 = vld [vmem:[%s3909_s4 + $0x50] sm:$0xff] (!%p243_p2)  ;;  %p287_p3 = scmp.lt.s32.totalorder (!%p243_p2), %s2282_s22, 1  ;;  %vm337_vm0 = vcmask (!%p243_p2), 523264  }
   0x6   : > { %246 = sbr.rel (%p243_p2) target bundleno = 378 (0x17a), region = 44  ;;  %v3046_v3 = vpack.c.bf16 (!%p243_p2), %v2294_v1, %v2293_v0  ;;  %v2296_v4 = vld [vmem:[%s3909_s4 + $0x58] sm:$0xff] (!%p243_p2)  ;;  %v2297_v6 = vld [vmem:[%s3909_s4 + $0x60] sm:$0xff] (!%p243_p2)  ;;  %v2298_v7 = vld [vmem:[%s3909_s4 + $0x68] sm:$0xff] (!%p243_p2) }
   0x7   : > { %v3050_v5 = vpack.c.bf16 (!%p243_p2), %v2296_v4, %v2295_v2  ;;  %v3054_v8 = vpack.c.bf16 (!%p243_p2), %v2298_v7, %v2297_v6  ;;  %v2299_v9 = vld [vmem:[%s3909_s4 + $0x70] sm:$0xff] (!%p243_p2)  ;;  %v2300_v10 = vld [vmem:[%s3909_s4 + $0x78] sm:$0xff] (!%p243_p2)  ;;  %v312_v14 = vld [vmem:[%s3909_s4] sm:$0xff] (!%p243_p2) }
   0x8   : > { %3047 = vmatprep.subr.bf16.mxu0 (!%p243_p2), %v3046_v3  ;;  %3079 = vmatprep.subr.bf16.mxu1 (!%p243_p2), %v3046_v3  ;;  %v3058_v13 = vpack.c.bf16 (!%p243_p2), %v2300_v10, %v2299_v9  ;;  %v313_v15 = vld [vmem:[%s3909_s4 + $0x8] sm:$0xff] (!%p243_p2)  ;;  %v314_v17 = vld [vmem:[%s3909_s4 + $0x10] sm:$0xff] (!%p243_p2)  ;;  %v315_v18 = vld [vmem:[%s3909_s4 + $0x18] sm:$0xff] (!%p243_p2) }
   0x9   : > { %3049 = vmatpush3.bf16.msra.mxu0 (!%p243_p2), %v3046_v3  ;;  %3081 = vmatpush3.bf16.msra.mxu1 (!%p243_p2), %v3046_v3  ;;  %v3062_v16 = vpack.c.bf16 (!%p243_p2), %v313_v15, %v312_v14  ;;  %v3066_v21 = vpack.c.bf16 (!%p243_p2), %v315_v18, %v314_v17  ;;  %v316_v22 = vld [vmem:[%s3909_s4 + $0x20] sm:$0xff] (!%p243_p2)  ;;  %v317_v23 = vld [vmem:[%s3909_s4 + $0x28] sm:$0xff] (!%p243_p2)  ;;  %v318_v29 = vld [vmem:[%s3909_s4 + $0x30] sm:$0xff] (!%p243_p2) }
   0xa   : > { %3051 = vmatprep.subr.bf16.mxu0 (!%p243_p2), %v3050_v5  ;;  %3083 = vmatprep.subr.bf16.mxu1 (!%p243_p2), %v3050_v5  ;;  %v3070_v28 = vpack.c.bf16 (!%p243_p2), %v317_v23, %v316_v22  ;;  %v319_v30 = vld [vmem:[%s3909_s4 + $0x38] sm:$0xff] (!%p243_p2)  ;;  %v2317_v33 = vld [vmem:[%s3909_s4 + $0x80] sm:$0xff] (!%p243_p2)  ;;  %v2318_v34 = vld [vmem:[%s3909_s4 + $0x88] sm:$0xff] (!%p243_p2) }
   0xb   : > { %v3074_v32 = vpack.c.bf16 (!%p243_p2), %v319_v30, %v318_v29  ;;  %v3110_v35 = vpack.c.bf16 (!%p243_p2), %v2318_v34, %v2317_v33  ;;  %v2319_v36 = vld [vmem:[%s3909_s4 + $0x90] sm:$0xff] (!%p243_p2)  ;;  %v2320_v37 = vld [vmem:[%s3909_s4 + $0x98] sm:$0xff] (!%p243_p2)  ;;  %v2321_v40 = vld [vmem:[%s3909_s4 + $0xa0] sm:$0xff] (!%p243_p2) }
   0xc   : > { %v3114_v39 = vpack.c.bf16 (!%p243_p2), %v2320_v37, %v2319_v36  ;;  %v2322_v41 = vld [vmem:[%s3909_s4 + $0xa8] sm:$0xff] (!%p243_p2)  ;;  %v2323_v45 = vld [vmem:[%s3909_s4 + $0xb0] sm:$0xff] (!%p243_p2)  ;;  %v2324_v46 = vld [vmem:[%s3909_s4 + $0xb8] sm:$0xff] (!%p243_p2) }
   0xd   : > { %s3913_s22 = smov (!%p287_p3, %s2282_s22), 1  ;;  %3053 = vmatpush3.bf16.msra.mxu0 %v3050_v5  ;;  %3085 = vmatpush3.bf16.msra.mxu1 %v3050_v5  ;;  %v3118_v44 = vpack.c.bf16 %v2322_v41, %v2321_v40  ;;  %v3122_v48 = vpack.c.bf16 %v2324_v46, %v2323_v45  ;;  %v2333_v49 = vld [vmem:[%s3909_s4 + $0xc0] sm:$0xff]  ;;  %v2334_v50 = vld [vmem:[%s3909_s4 + $0xc8] sm:$0xff]  ;;  %v2335_v52 = vld [vmem:[%s3909_s4 + $0xd0] sm:$0xff] }
   0xe   : > { %s3479_s11 = smul.u32 48, %s3913_s22  ;;  %3055 = vmatprep.subr.bf16.mxu0 %v3054_v8  ;;  %3087 = vmatprep.subr.bf16.mxu1 %v3054_v8  ;;  %v3142_v51 = vpack.c.bf16 %v2334_v50, %v2333_v49  ;;  %v2336_v53 = vld [vmem:[%s3909_s4 + $0xd8] sm:$0xff]  ;;  %v2337_v56 = vld [vmem:[%s3909_s4 + $0xe0] sm:$0xff]  ;;  %v2338_v57 = vld [vmem:[%s3909_s4 + $0xe8] sm:$0xff]  ;;  %s2433_s29 = sshll.u32 %s3913_s22, 2 }
   0xf   : > { %v3146_v55 = vpack.c.bf16 %v2336_v53, %v2335_v52  ;;  %v3150_v60 = vpack.c.bf16 %v2338_v57, %v2337_v56  ;;  %v2339_v61 = vld [vmem:[%s3909_s4 + $0xf0] sm:$0xff]  ;;  %v2340_v62 = vld [vmem:[%s3909_s4 + $0xf8] sm:$0xff]  ;;  %v2349_v0 = vld [vmem:[%s3909_s4 + $0x100] sm:$0xff]  ;;  %s311_s7 = scalar_lea.vmem %s3911_s6, %s2433_s29 }
  0x10   : > { %s3491_s18 = scalar_lea.vmem %s3906_s1, %s3479_s11  ;;  %s3497_s23 = scalar_lea.vmem %s3907_s2, %s3479_s11  ;;  %v3154_v63 = vpack.c.bf16 %v2340_v62, %v2339_v61  ;;  %v2350_v1 = vld [vmem:[%s3909_s4 + $0x108] sm:$0xff]  ;;  %v2351_v3 = vld [vmem:[%s3909_s4 + $0x110] sm:$0xff]  ;;  %v2352_v4 = vld [vmem:[%s3909_s4 + $0x118] sm:$0xff] }
  0x11   : > { %v324_v11 = vld [vmem:[%s3491_s18] sm:$0xff]  ;;  %3057 = vmatpush3.bf16.msra.mxu0 %v3054_v8  ;;  %3089 = vmatpush3.bf16.msra.mxu1 %v3054_v8  ;;  %v3519_v19 = vld [vmem:[%s3491_s18 + $0x8] sm:$0xff]  ;;  %v3535_v24 = vld [vmem:[%s3491_s18 + $0x10] sm:$0xff]  ;;  %s3550_s15 = scalar_lea.vmem %s3905_s0, %s3479_s11  ;;  %s3604_s16 = scalar_lea.vmem %s3908_s3, %s3479_s11  ;;  %v3174_v2 = vpack.c.bf16 %v2350_v1, %v2349_v0  ;;  %v3178_v5 = vpack.c.bf16 %v2352_v4, %v2351_v3 }
  0x12   : > { %v3501_v12 = vld [vmem:[%s3497_s23] sm:$0xff]  ;;  %2666 = vmatprep.mubr.msk.f32.mxu0 %vm337_vm0, %v324_v11  ;;  %3059 = vmatprep.subr.bf16.mxu0 %v3058_v13  ;;  %v3522_v20 = vld [vmem:[%s3497_s23 + $0x8] sm:$0xff]  ;;  %v3538_v25 = vld [vmem:[%s3497_s23 + $0x10] sm:$0xff] }
  0x13   : > { %2710 = vmatprep.mubr.msk.f32.mxu1 %vm337_vm0, %v3501_v12  ;;  %3091 = vmatprep.subr.bf16.mxu1 %v3058_v13  ;;  %v3541_v26 = vld [vmem:[%s3491_s18 + $0x18] sm:$0xff]  ;;  %v320_v31 = vld [vmem:[%s3550_s15] sm:$0xff]  ;;  %v3582_v38 = vld [vmem:[%s3550_s15 + $0x8] sm:$0xff] }
  0x14   : > { %v3544_v27 = vld [vmem:[%s3497_s23 + $0x18] sm:$0xff]  ;;  %v3595_v42 = vld [vmem:[%s3550_s15 + $0x10] sm:$0xff]  ;;  %v816_v47 = vld [vmem:[%s3604_s16] sm:$0xff] }
  0x15   : > { %3061 = vmatpush3.bf16.msra.mxu0 %v3058_v13  ;;  %3093 = vmatpush3.bf16.msra.mxu1 %v3058_v13  ;;  %v3598_v43 = vld [vmem:[%s3550_s15 + $0x18] sm:$0xff]  ;;  %v3637_v54 = vld [vmem:[%s3604_s16 + $0x8] sm:$0xff]  ;;  %v3650_v58 = vld [vmem:[%s3604_s16 + $0x10] sm:$0xff] }
  0x16   : > { %3063 = vmatprep.subr.bf16.mxu0 %v3062_v16  ;;  %3095 = vmatprep.subr.bf16.mxu1 %v3062_v16  ;;  %v3653_v59 = vld [vmem:[%s3604_s16 + $0x18] sm:$0xff]  ;;  %v2353_v6 = vld [vmem:[%s3909_s4 + $0x120] sm:$0xff]  ;;  %v2354_v7 = vld [vmem:[%s3909_s4 + $0x128] sm:$0xff] }
  0x17   : > { %v3696_v8 = vld [vmem:[%s3550_s15 + $0x20] sm:$0xff]  ;;  %v3182_v10 = vpack.c.bf16 %v2354_v7, %v2353_v6  ;;  %v2366_v15 = vld [vmem:[%s3909_s4 + $0x148] sm:$0xff]  ;;  %v2367_v17 = vld [vmem:[%s3909_s4 + $0x150] sm:$0xff] }
  0x18   : > { %2667 = vmatmul.mubr.msk.f32.vlgmr.msra.gmra.mrb[0].mxu0 %vm337_vm0, %v3519_v19  ;;  %2711 = vmatmul.mubr.msk.f32.vlgmr.msra.gmra.mrb[0].mxu1 %vm337_vm0, %v3522_v20  ;;  %v3699_v9 = vld [vmem:[%s3491_s18 + $0x20] sm:$0xff]  ;;  %v2368_v18 = vld [vmem:[%s3909_s4 + $0x158] sm:$0xff]  ;;  %v2370_v22 = vld [vmem:[%s3909_s4 + $0x168] sm:$0xff] }
  0x19   : > { %3065 = vmatpush3.bf16.msra.mxu0 %v3062_v16  ;;  %3097 = vmatpush3.bf16.msra.mxu1 %v3062_v16  ;;  %v2365_v14 = vld [vmem:[%s3909_s4 + $0x140] sm:$0xff]  ;;  %v2371_v29 = vld [vmem:[%s3909_s4 + $0x170] sm:$0xff]  ;;  %v2372_v30 = vld [vmem:[%s3909_s4 + $0x178] sm:$0xff] }
  0x1a   : > { %3067 = vmatprep.subr.bf16.mxu0 %v3066_v21  ;;  %3099 = vmatprep.subr.bf16.mxu1 %v3066_v21  ;;  %v3206_v16 = vpack.c.bf16 %v2366_v15, %v2365_v14  ;;  %v3742_v23 = vld [vmem:[%s3497_s23 + $0x20] sm:$0xff]  ;;  %v2382_v33 = vld [vmem:[%s3909_s4 + $0x188] sm:$0xff]  ;;  %v2387_v41 = vld [vmem:[%s3909_s4 + $0x1b0] sm:$0xff] }
  0x1b   : > { %2669 = vmatprep.mubr.msk.f32.mxu0 %vm337_vm0, %v3535_v24  ;;  %2713 = vmatprep.mubr.msk.f32.mxu1 %vm337_vm0, %v3538_v25  ;;  %v2385_v37 = vld [vmem:[%s3909_s4 + $0x1a0] sm:$0xff]  ;;  %v2400_v49 = vld [vmem:[%s3909_s4 + $0x1d8] sm:$0xff]  ;;  %v2402_v52 = vld [vmem:[%s3909_s4 + $0x1e8] sm:$0xff] }
  0x1c   : > { %2670 = vmatmul.mubr.msk.f32.gmra.mrb[2].mxu0 %vm337_vm0, %v3541_v26  ;;  %2714 = vmatmul.mubr.msk.f32.gmra.mrb[2].mxu1 %vm337_vm0, %v3544_v27  ;;  %v2397_v46 = vld [vmem:[%s3909_s4 + $0x1c0] sm:$0xff]  ;;  %v1558_v53 = vld [vmem:[%s3550_s15 + $0x28] sm:$0xff]  ;;  %v2404_v56 = vld [vmem:[%s3909_s4 + $0x1f8] sm:$0xff] }
  0x1d   : > { %3069 = vmatpush3.bf16.msra.mxu0 %v3066_v21  ;;  %3101 = vmatpush3.bf16.msra.mxu1 %v3066_v21  ;;  %v2369_v21 = vld [vmem:[%s3909_s4 + $0x160] sm:$0xff]  ;;  %v2414_v61 = vld [vmem:[%s3909_s4 + $0x208] sm:$0xff] }
  0x1e   : > { %3071 = vmatprep.subr.bf16.mxu0 %v3070_v28  ;;  %3103 = vmatprep.subr.bf16.mxu1 %v3070_v28  ;;  %v2417_v1 = vld [vmem:[%s3909_s4 + $0x220] sm:$0xff]  ;;  %v1866_v3 = vld [vmem:[%s3497_s23 + $0x28] sm:$0xff] }
  0x1f   : > { %2688 = vmatprep.mubr.msk.f32.mxu0 %vm337_vm0, %v320_v31  ;;  %2732 = vmatprep.mubr.msk.f32.mxu1 %vm337_vm0, %v324_v11  ;;  %v2355_v11 = vld [vmem:[%s3909_s4 + $0x130] sm:$0xff]  ;;  %v3218_v31 = vpack.c.bf16 %v2372_v30, %v2371_v29 }
  0x21   : > { %3073 = vmatpush3.bf16.msra.mxu0 %v3070_v28  ;;  %3105 = vmatpush3.bf16.msra.mxu1 %v3070_v28  ;;  %v3214_v28 = vpack.c.bf16 %v2370_v22, %v2369_v21 }
  0x22   : > { %3075 = vmatprep.subr.bf16.mxu0 %v3074_v32  ;;  %3107 = vmatprep.subr.bf16.mxu1 %v3074_v32 }
  0x25   : > { %3077 = vmatpush3.bf16.msra.mxu0 %v3074_v32  ;;  %3109 = vmatpush3.bf16.msra.mxu1 %v3074_v32  ;;  %v2381_v32 = vld [vmem:[%s3909_s4 + $0x180] sm:$0xff] }
  0x26   : > { %3111 = vmatprep.subr.bf16.mxu0 %v3110_v35  ;;  %3127 = vmatprep.subr.bf16.mxu1 %v3110_v35  ;;  %v3238_v34 = vpack.c.bf16 %v2382_v33, %v2381_v32 }
  0x28   : > { %2689 = vmatmul.mubr.msk.f32.vlgmr.msra.gmra.mrb[0].mxu0 %vm337_vm0, %v3582_v38  ;;  %2733 = vmatmul.mubr.msk.f32.vlgmr.msra.gmra.mrb[0].mxu1 %vm337_vm0, %v3519_v19 }
  0x29   : > { %3113 = vmatpush3.bf16.msra.mxu0 %v3110_v35  ;;  %3129 = vmatpush3.bf16.msra.mxu1 %v3110_v35  ;;  %v2384_v35 = vld [vmem:[%s3909_s4 + $0x198] sm:$0xff] }
  0x2a   : > { %3115 = vmatprep.subr.bf16.mxu0 %v3114_v39  ;;  %3131 = vmatprep.subr.bf16.mxu1 %v3114_v39 }
  0x2b   : > { %2691 = vmatprep.mubr.msk.f32.mxu0 %vm337_vm0, %v3595_v42  ;;  %2735 = vmatprep.mubr.msk.f32.mxu1 %vm337_vm0, %v3535_v24 }
  0x2c   : > { %2692 = vmatmul.mubr.msk.f32.gmra.mrb[2].mxu0 %vm337_vm0, %v3598_v43  ;;  %2736 = vmatmul.mubr.msk.f32.gmra.mrb[2].mxu1 %vm337_vm0, %v3541_v26 }
  0x2d   : > { %3117 = vmatpush3.bf16.msra.mxu0 %v3114_v39  ;;  %3133 = vmatpush3.bf16.msra.mxu1 %v3114_v39  ;;  %v3785_v39 = vld [vmem:[%s3604_s16 + $0x20] sm:$0xff] }
  0x2e   : > { %3119 = vmatprep.subr.bf16.mxu0 %v3118_v44  ;;  %3135 = vmatprep.subr.bf16.mxu1 %v3118_v44 }
  0x2f   : > { %2754 = vmatprep.mubr.msk.f32.mxu0 %vm337_vm0, %v3501_v12  ;;  %2776 = vmatprep.mubr.msk.f32.mxu1 %vm337_vm0, %v816_v47  ;;  %v2356_v12 = vld [vmem:[%s3909_s4 + $0x138] sm:$0xff]  ;;  %v2398_v47 = vld [vmem:[%s3909_s4 + $0x1c8] sm:$0xff] }
  0x30   : > { %v3186_v13 = vpack.c.bf16 %v2356_v12, %v2355_v11 }
  0x31   : > { %3121 = vmatpush3.bf16.msra.mxu0 %v3118_v44  ;;  %3137 = vmatpush3.bf16.msra.mxu1 %v3118_v44  ;;  %v2388_v44 = vld [vmem:[%s3909_s4 + $0x1b8] sm:$0xff] }
  0x32   : > { %3123 = vmatprep.subr.bf16.mxu0 %v3122_v48  ;;  %3139 = vmatprep.subr.bf16.mxu1 %v3122_v48  ;;  %v3250_v45 = vpack.c.bf16 %v2388_v44, %v2387_v41 }
  0x35   : > { %3125 = vmatpush3.bf16.msra.mxu0 %v3122_v48  ;;  %3141 = vmatpush3.bf16.msra.mxu1 %v3122_v48  ;;  %v3270_v48 = vpack.c.bf16 %v2398_v47, %v2397_v46 }
  0x36   : > { %3143 = vmatprep.subr.bf16.mxu0 %v3142_v51  ;;  %3159 = vmatprep.subr.bf16.mxu1 %v3142_v51 }
  0x38   : > { %2755 = vmatmul.mubr.msk.f32.vlgmr.msra.gmra.mrb[0].mxu0 %vm337_vm0, %v3522_v20  ;;  %2777 = vmatmul.mubr.msk.f32.vlgmr.msra.gmra.mrb[0].mxu1 %vm337_vm0, %v3637_v54 }
  0x39   : > { %3145 = vmatpush3.bf16.msra.mxu0 %v3142_v51  ;;  %3161 = vmatpush3.bf16.msra.mxu1 %v3142_v51  ;;  %v2401_v51 = vld [vmem:[%s3909_s4 + $0x1e0] sm:$0xff] }
  0x3a   : > { %3147 = vmatprep.subr.bf16.mxu0 %v3146_v55  ;;  %3163 = vmatprep.subr.bf16.mxu1 %v3146_v55 }
  0x3b   : > { %2757 = vmatprep.mubr.msk.f32.mxu0 %vm337_vm0, %v3538_v25  ;;  %2779 = vmatprep.mubr.msk.f32.mxu1 %vm337_vm0, %v3650_v58 }
  0x3c   : > { %2758 = vmatmul.mubr.msk.f32.gmra.mrb[2].mxu0 %vm337_vm0, %v3544_v27  ;;  %2780 = vmatmul.mubr.msk.f32.gmra.mrb[2].mxu1 %vm337_vm0, %v3653_v59 }
  0x3d   : > { %3149 = vmatpush3.bf16.msra.mxu0 %v3146_v55  ;;  %3165 = vmatpush3.bf16.msra.mxu1 %v3146_v55  ;;  %v3278_v55 = vpack.c.bf16 %v2402_v52, %v2401_v51 }
  0x3e   : > { %3151 = vmatprep.subr.bf16.mxu0 %v3150_v60  ;;  %3167 = vmatprep.subr.bf16.mxu1 %v3150_v60 }
  0x3f   : > { %2798 = vmatprep.mubr.msk.f32.mxu0 %vm337_vm0, %v3582_v38  ;;  %2820 = vmatprep.mubr.msk.f32.mxu1 %vm337_vm0, %v3519_v19  ;;  %v2386_v38 = vld [vmem:[%s3909_s4 + $0x1a8] sm:$0xff] }
  0x40   : > { %v3246_v40 = vpack.c.bf16 %v2386_v38, %v2385_v37 }
  0x41   : > { %3153 = vmatpush3.bf16.msra.mxu0 %v3150_v60  ;;  %3169 = vmatpush3.bf16.msra.mxu1 %v3150_v60  ;;  %v2413_v60 = vld [vmem:[%s3909_s4 + $0x200] sm:$0xff] }
  0x42   : > { %3155 = vmatprep.subr.bf16.mxu0 %v3154_v63  ;;  %3171 = vmatprep.subr.bf16.mxu1 %v3154_v63  ;;  %v3302_v62 = vpack.c.bf16 %v2414_v61, %v2413_v60 }
  0x45   : > { %3157 = vmatpush3.bf16.msra.mxu0 %v3154_v63  ;;  %3173 = vmatpush3.bf16.msra.mxu1 %v3154_v63  ;;  %v2416_v63 = vld [vmem:[%s3909_s4 + $0x218] sm:$0xff] }
  0x46   : > { %3175 = vmatprep.subr.bf16.mxu0 %v3174_v2  ;;  %3191 = vmatprep.subr.bf16.mxu1 %v3174_v2 }
  0x48   : > { %2799 = vmatmul.mubr.msk.f32.vlgmr.msra.gmra.mrb[0].mxu0 %vm337_vm0, %v3595_v42  ;;  %2821 = vmatmul.mubr.msk.f32.vlgmr.msra.gmra.mrb[0].mxu1 %vm337_vm0, %v3535_v24 }
  0x49   : > { %3177 = vmatpush3.bf16.msra.mxu0 %v3174_v2  ;;  %3193 = vmatpush3.bf16.msra.mxu1 %v3174_v2  ;;  %v2418_v2 = vld [vmem:[%s3909_s4 + $0x228] sm:$0xff] }
  0x4a   : > { %3179 = vmatprep.subr.bf16.mxu0 %v3178_v5  ;;  %3195 = vmatprep.subr.bf16.mxu1 %v3178_v5  ;;  %v3310_v4 = vpack.c.bf16 %v2418_v2, %v2417_v1 }
  0x4b   : > { %2801 = vmatprep.mubr.msk.f32.mxu0 %vm337_vm0, %v3598_v43  ;;  %2823 = vmatprep.mubr.msk.f32.mxu1 %vm337_vm0, %v3541_v26 }
  0x4c   : > { %2802 = vmatmul.mubr.msk.f32.gmra.mrb[2].mxu0 %vm337_vm0, %v3696_v8  ;;  %2824 = vmatmul.mubr.msk.f32.gmra.mrb[2].mxu1 %vm337_vm0, %v3699_v9 }
  0x4d   : > { %3181 = vmatpush3.bf16.msra.mxu0 %v3178_v5  ;;  %3197 = vmatpush3.bf16.msra.mxu1 %v3178_v5  ;;  %v2419_v5 = vld [vmem:[%s3909_s4 + $0x230] sm:$0xff] }
  0x4e   : > { %3183 = vmatprep.subr.bf16.mxu0 %v3182_v10  ;;  %3199 = vmatprep.subr.bf16.mxu1 %v3182_v10 }
  0x4f   : > { %2842 = vmatprep.mubr.msk.f32.mxu0 %vm337_vm0, %v3519_v19  ;;  %2864 = vmatprep.mubr.msk.f32.mxu1 %vm337_vm0, %v3522_v20  ;;  %v3210_v19 = vpack.c.bf16 %v2368_v18, %v2367_v17 }
  0x51   : > { %3185 = vmatpush3.bf16.msra.mxu0 %v3182_v10  ;;  %3201 = vmatpush3.bf16.msra.mxu1 %v3182_v10 }
  0x52   : > { %3187 = vmatprep.subr.bf16.mxu0 %v3186_v13  ;;  %3203 = vmatprep.subr.bf16.mxu1 %v3186_v13 }
  0x55   : > { %3189 = vmatpush3.bf16.msra.mxu0 %v3186_v13  ;;  %3205 = vmatpush3.bf16.msra.mxu1 %v3186_v13 }
  0x56   : > { %3207 = vmatprep.subr.bf16.mxu0 %v3206_v16  ;;  %3223 = vmatprep.subr.bf16.mxu1 %v3206_v16 }
  0x58   : > { %2843 = vmatmul.mubr.msk.f32.vlgmr.msra.gmra.mrb[0].mxu0 %vm337_vm0, %v3535_v24  ;;  %2865 = vmatmul.mubr.msk.f32.vlgmr.msra.gmra.mrb[0].mxu1 %vm337_vm0, %v3538_v25 }
  0x59   : > { %3209 = vmatpush3.bf16.msra.mxu0 %v3206_v16  ;;  %3225 = vmatpush3.bf16.msra.mxu1 %v3206_v16 }
  0x5a   : > { %3211 = vmatprep.subr.bf16.mxu0 %v3210_v19  ;;  %3227 = vmatprep.subr.bf16.mxu1 %v3210_v19 }
  0x5b   : > { %2845 = vmatprep.mubr.msk.f32.mxu0 %vm337_vm0, %v3541_v26  ;;  %2867 = vmatprep.mubr.msk.f32.mxu1 %vm337_vm0, %v3544_v27 }
  0x5c   : > { %2846 = vmatmul.mubr.msk.f32.gmra.mrb[2].mxu0 %vm337_vm0, %v3699_v9  ;;  %2868 = vmatmul.mubr.msk.f32.gmra.mrb[2].mxu1 %vm337_vm0, %v3742_v23 }
  0x5d   : > { %3213 = vmatpush3.bf16.msra.mxu0 %v3210_v19  ;;  %3229 = vmatpush3.bf16.msra.mxu1 %v3210_v19 }
  0x5e   : > { %3215 = vmatprep.subr.bf16.mxu0 %v3214_v28  ;;  %3231 = vmatprep.subr.bf16.mxu1 %v3214_v28 }
  0x5f   : > { %2886 = vmatprep.mubr.msk.f32.mxu0 %vm337_vm0, %v3522_v20  ;;  %2908 = vmatprep.mubr.msk.f32.mxu1 %vm337_vm0, %v3637_v54  ;;  %v2383_v20 = vld [vmem:[%s3909_s4 + $0x190] sm:$0xff]  ;;  %v1663_v54 = vld [vmem:[%s3491_s18 + $0x28] sm:$0xff] }
  0x60   : > { %v3242_v36 = vpack.c.bf16 %v2384_v35, %v2383_v20 }
  0x61   : > { %3217 = vmatpush3.bf16.msra.mxu0 %v3214_v28  ;;  %3233 = vmatpush3.bf16.msra.mxu1 %v3214_v28 }
  0x62   : > { %3219 = vmatprep.subr.bf16.mxu0 %v3218_v31  ;;  %3235 = vmatprep.subr.bf16.mxu1 %v3218_v31 }
  0x65   : > { %3221 = vmatpush3.bf16.msra.mxu0 %v3218_v31  ;;  %3237 = vmatpush3.bf16.msra.mxu1 %v3218_v31 }
  0x66   : > { %3239 = vmatprep.subr.bf16.mxu0 %v3238_v34  ;;  %3255 = vmatprep.subr.bf16.mxu1 %v3238_v34 }
  0x68   : > { %2887 = vmatmul.mubr.msk.f32.vlgmr.msra.gmra.mrb[0].mxu0 %vm337_vm0, %v3538_v25  ;;  %2909 = vmatmul.mubr.msk.f32.vlgmr.msra.gmra.mrb[0].mxu1 %vm337_vm0, %v3650_v58 }
  0x69   : > { %3241 = vmatpush3.bf16.msra.mxu0 %v3238_v34  ;;  %3257 = vmatpush3.bf16.msra.mxu1 %v3238_v34 }
  0x6a   : > { %3243 = vmatprep.subr.bf16.mxu0 %v3242_v36  ;;  %3259 = vmatprep.subr.bf16.mxu1 %v3242_v36 }
  0x6b   : > { %2889 = vmatprep.mubr.msk.f32.mxu0 %vm337_vm0, %v3544_v27  ;;  %2911 = vmatprep.mubr.msk.f32.mxu1 %vm337_vm0, %v3653_v59 }
  0x6c   : > { %2890 = vmatmul.mubr.msk.f32.gmra.mrb[2].mxu0 %vm337_vm0, %v3742_v23  ;;  %2912 = vmatmul.mubr.msk.f32.gmra.mrb[2].mxu1 %vm337_vm0, %v3785_v39 }
  0x6d   : > { %3245 = vmatpush3.bf16.msra.mxu0 %v3242_v36  ;;  %3261 = vmatpush3.bf16.msra.mxu1 %v3242_v36 }
  0x6e   : > { %3247 = vmatprep.subr.bf16.mxu0 %v3246_v40  ;;  %3263 = vmatprep.subr.bf16.mxu1 %v3246_v40 }
  0x6f   : > { %2930 = vmatprep.mubr.msk.f32.mxu0 %vm337_vm0, %v3595_v42  ;;  %2952 = vmatprep.mubr.msk.f32.mxu1 %vm337_vm0, %v3535_v24  ;;  %v2399_v42 = vld [vmem:[%s3909_s4 + $0x1d0] sm:$0xff] }
  0x70   : > { %v3274_v50 = vpack.c.bf16 %v2400_v49, %v2399_v42 }
  0x71   : > { %3249 = vmatpush3.bf16.msra.mxu0 %v3246_v40  ;;  %3265 = vmatpush3.bf16.msra.mxu1 %v3246_v40 }
  0x72   : > { %3251 = vmatprep.subr.bf16.mxu0 %v3250_v45  ;;  %3267 = vmatprep.subr.bf16.mxu1 %v3250_v45 }
  0x75   : > { %3253 = vmatpush3.bf16.msra.mxu0 %v3250_v45  ;;  %3269 = vmatpush3.bf16.msra.mxu1 %v3250_v45 }
  0x76   : > { %3271 = vmatprep.subr.bf16.mxu0 %v3270_v48  ;;  %3287 = vmatprep.subr.bf16.mxu1 %v3270_v48 }
  0x78   : > { %2931 = vmatmul.mubr.msk.f32.vlgmr.msra.gmra.mrb[0].mxu0 %vm337_vm0, %v3598_v43  ;;  %2953 = vmatmul.mubr.msk.f32.vlgmr.msra.gmra.mrb[0].mxu1 %vm337_vm0, %v3541_v26  ;;  %v2403_v43 = vld [vmem:[%s3909_s4 + $0x1f0] sm:$0xff] }
  0x79   : > { %3273 = vmatpush3.bf16.msra.mxu0 %v3270_v48  ;;  %3289 = vmatpush3.bf16.msra.mxu1 %v3270_v48  ;;  %v3282_v57 = vpack.c.bf16 %v2404_v56, %v2403_v43 }
  0x7a   : > { %3275 = vmatprep.subr.bf16.mxu0 %v3274_v50  ;;  %3291 = vmatprep.subr.bf16.mxu1 %v3274_v50 }
  0x7b   : > { %2933 = vmatprep.mubr.msk.f32.mxu0 %vm337_vm0, %v3696_v8  ;;  %2955 = vmatprep.mubr.msk.f32.mxu1 %vm337_vm0, %v3699_v9 }
  0x7c   : > { %2934 = vmatmul.mubr.msk.f32.gmra.mrb[2].mxu0 %vm337_vm0, %v1558_v53  ;;  %2956 = vmatmul.mubr.msk.f32.gmra.mrb[2].mxu1 %vm337_vm0, %v1663_v54 }
  0x7d   : > { %3277 = vmatpush3.bf16.msra.mxu0 %v3274_v50  ;;  %3293 = vmatpush3.bf16.msra.mxu1 %v3274_v50 }
  0x7e   : > { %3279 = vmatprep.subr.bf16.mxu0 %v3278_v55  ;;  %3295 = vmatprep.subr.bf16.mxu1 %v3278_v55 }
  0x7f   : > { %2974 = vmatprep.mubr.msk.f32.mxu0 %vm337_vm0, %v3535_v24  ;;  %2996 = vmatprep.mubr.msk.f32.mxu1 %vm337_vm0, %v3538_v25  ;;  %v2415_v24 = vld [vmem:[%s3909_s4 + $0x210] sm:$0xff] }
  0x80   : > { %v3306_v0 = vpack.c.bf16 %v2416_v63, %v2415_v24 }
  0x81   : > { %3281 = vmatpush3.bf16.msra.mxu0 %v3278_v55  ;;  %3297 = vmatpush3.bf16.msra.mxu1 %v3278_v55 }
  0x82   : > { %3283 = vmatprep.subr.bf16.mxu0 %v3282_v57  ;;  %3299 = vmatprep.subr.bf16.mxu1 %v3282_v57 }
  0x85   : > { %3285 = vmatpush3.bf16.msra.mxu0 %v3282_v57  ;;  %3301 = vmatpush3.bf16.msra.mxu1 %v3282_v57 }
  0x86   : > { %3303 = vmatprep.subr.bf16.mxu0 %v3302_v62  ;;  %3319 = vmatprep.subr.bf16.mxu1 %v3302_v62 }
  0x88   : > { %2975 = vmatmul.mubr.msk.f32.vlgmr.msra.gmra.mrb[0].mxu0 %vm337_vm0, %v3541_v26  ;;  %2997 = vmatmul.mubr.msk.f32.vlgmr.msra.gmra.mrb[0].mxu1 %vm337_vm0, %v3544_v27  ;;  %v2420_v26 = vld [vmem:[%s3909_s4 + $0x238] sm:$0xff] }
  0x89   : > { %3305 = vmatpush3.bf16.msra.mxu0 %v3302_v62  ;;  %3321 = vmatpush3.bf16.msra.mxu1 %v3302_v62  ;;  %v3314_v6 = vpack.c.bf16 %v2420_v26, %v2419_v5 }
  0x8a   : > { %3307 = vmatprep.subr.bf16.mxu0 %v3306_v0  ;;  %3323 = vmatprep.subr.bf16.mxu1 %v3306_v0 }
  0x8b   : > { %2977 = vmatprep.mubr.msk.f32.mxu0 %vm337_vm0, %v3699_v9  ;;  %2999 = vmatprep.mubr.msk.f32.mxu1 %vm337_vm0, %v3742_v23 }
  0x8c   : > { %2978 = vmatmul.mubr.msk.f32.gmra.mrb[2].mxu0 %vm337_vm0, %v1663_v54  ;;  %3000 = vmatmul.mubr.msk.f32.gmra.mrb[2].mxu1 %vm337_vm0, %v1866_v3 }
  0x8d   : > { %3309 = vmatpush3.bf16.msra.mxu0 %v3306_v0  ;;  %3325 = vmatpush3.bf16.msra.mxu1 %v3306_v0 }
  0x8e   : > { %3311 = vmatprep.subr.bf16.mxu0 %v3310_v4  ;;  %3327 = vmatprep.subr.bf16.mxu1 %v3310_v4 }
  0x8f   : > { %3018 = vmatprep.mubr.msk.f32.mxu0 %vm337_vm0, %v3538_v25  ;;  %3040 = vmatprep.mubr.msk.f32.mxu1 %vm337_vm0, %v3650_v58  ;;  %v2069_v25 = vld [vmem:[%s3604_s16 + $0x28] sm:$0xff] }
  0x91   : > { %3313 = vmatpush3.bf16.msra.mxu0 %v3310_v4  ;;  %3329 = vmatpush3.bf16.msra.mxu1 %v3310_v4 }
  0x92   : > { %3315 = vmatprep.subr.bf16.mxu0 %v3314_v6  ;;  %3331 = vmatprep.subr.bf16.mxu1 %v3314_v6 }
  0x95   : > { %3317 = vmatpush3.bf16.msra.mxu0 %v3314_v6  ;;  %3333 = vmatpush3.bf16.msra.mxu1 %v3314_v6 }
  0x98   : > { %3019 = vmatmul.mubr.msk.f32.vlgmr.msra.gmra.mrb[0].mxu0 %vm337_vm0, %v3544_v27  ;;  %3041 = vmatmul.mubr.msk.f32.vlgmr.msra.gmra.mrb[0].mxu1 %vm337_vm0, %v3653_v59  ;;  %v2429_v59 = vld [vmem:[%s3910_s5] ss:$0 sm:$0xff] }
  0x99   : > { %3021 = vmatprep.mubr.msk.f32.mxu0 %vm337_vm0, %v3742_v23  ;;  %3043 = vmatprep.mubr.msk.f32.mxu1 %vm337_vm0, %v3785_v39 }
  0x9c   : > { %3022 = vmatmul.mubr.msk.f32.gmra.mrb[2].mxu0 %vm337_vm0, %v1866_v3  ;;  %3044 = vmatmul.mubr.msk.f32.gmra.mrb[2].mxu1 %vm337_vm0, %v2069_v25 }
 0x16b   : > { %v3020_v58 = vpop.f32.mrb[0].mxu0  ;;  %v3042_v7 = vpop.f32.mrb[0].mxu1 }
 0x16c   : > { %v2043_v8 = vpop.f32.mrb[1].mxu0  ;;  %v2148_v9 = vpop.f32.mrb[1].mxu1 }
 0x16d   : > { %v2172_v10 = vmax.f32 %v2043_v8, %v3020_v58  ;;  %v2173_v27 = vmax.f32 %v2148_v9, %v3042_v7 }
 0x16f   : > { %v2174_v11 = vmax.f32 %v2172_v10, %v2173_v27  ;;  %v3023_v12 = vpop.f32.mrb[2].mxu0  ;;  %v3045_v13 = vpop.f32.mrb[2].mxu1 }
 0x170   : > { %v2053_v14 = vpop.f32.mrb[3].mxu0  ;;  %v2158_v15 = vpop.f32.mrb[3].mxu1 }
 0x171   : > { %v2181_v16 = vadd.f32 %v2429_v59, %v2174_v11  ;;  %v2184_v17 = vmax.f32 %v2053_v14, %v3023_v12  ;;  %v2185_v18 = vmax.f32 %v2158_v15, %v3045_v13 }
 0x173   : > { %v2182_v19 = vmax.f32 %v2181_v16, 0.0  ;;  %v2186_v21 = vmax.f32 %v2184_v17, %v2185_v18 }
 0x175   : > { %2183 = vst [vmem:[%s311_s7] sm:$0x3] %v2182_v19  ;;  %v2187_v22 = vadd.f32 %v2429_v59, %v2186_v21 }
 0x177   : > { %v2188_v23 = vmax.f32 %v2187_v22, 0.0 }
 0x179   : > { %2430 = vst [vmem:[%s311_s7 + $0x2] sm:$0x3] %v2188_v23 }
 0x17a PF: > { %s16_s21 = sadd.s32 1, %s3413_s21  }
 0x17b   : > { %p13_p4 = scmp.ge.s32.totalorder %s16_s21, 4  }
 0x17d   :  { %15 = sbr.rel (!%p13_p4) target bundleno = 1 (0x1), region = 92 }

// kernel: cnn_transformer_forward.4
= control target key start
LH: loop header
LB: loop body
LE: loop exit
PB: predicated region body
PF: predicated region fallthrough
CT: control target
= control target key end

     0   :  { %s5532_s21 = smov 0   ;;  %s6448_s0 = inlined_call_operand.vmem [shape: f32[2,144,3], index: 0, kind: input, shape index: {}]   ;;  %s6449_s1 = inlined_call_operand.vmem [shape: f32[2,144,3], index: 1, kind: input, shape index: {}]   ;;  %s6450_s2 = inlined_call_operand.vmem [shape: f32[2,144,3], index: 2, kind: input, shape index: {}]   ;;  %s6451_s3 = inlined_call_operand.vmem [shape: f32[2,144,3], index: 3, kind: input, shape index: {}]   ;;  %s6452_s4 = inlined_call_operand.vmem [shape: f32[9,3,32], index: 4, kind: input, shape index: {}]   ;;  %s6453_s5 = inlined_call_operand.vmem [shape: f32[1,32], index: 5, kind: input, shape index: {}]   ;;  %s6454_s6 = inlined_call_operand.vmem [shape: f32[2,8,8,32], index: 6, kind: output, shape index: {}]  }
   0x1 LB: > { %s4114_s22 = sadd.s32 4294967295, %s5495_s21   ;;  %p4118_p0 = scmp.ge.s32.totalorder %s5495_s21, 1  ;;  %s5495_s21 = sphi %s5532_s21, %s16_s21  }
   0x2   : > { %p242_p1 = scmp.lt.s32.totalorder %s5495_s21, 3 }
   0x4   : > { %p243_p2 = pnand %p4118_p0, %p242_p1 }
   0x5   : > { %v4125_v0 = vld [vmem:[%s6452_s4 + $0x4] sm:$0x7] (!%p243_p2)  ;;  %vm396_vm0 = vcmask (!%p243_p2), 1042432   ;;  %p287_p3 = scmp.lt.s32.totalorder (!%p243_p2), %s4114_s22, 1  ;;  %v312_v1 = vld [vmem:[%s6452_s4] sm:$0x7] (!%p243_p2) }
   0x6   : > { %246 = sbr.rel (%p243_p2) target bundleno = 526 (0x20e), region = 44  ;;  %4756 = vmatprep.subr.msk.mxu0 (!%p243_p2), %vm396_vm0, %v4125_v0  ;;  %4808 = vmatprep.subr.msk.mxu1 (!%p243_p2), %vm396_vm0, %v4125_v0  ;;  %vm347_vm1 = vcmask (!%p243_p2), 23552   ;;  %v5598_v8 = vld [vmem:[%s6452_s4 + $0x8] sm:$0x7] (!%p243_p2)  ;;  %v4229_v38 = vld [vmem:[%s6452_s4 + $0xc] sm:$0x7] (!%p243_p2) }
   0x7   : > { %4757 = vmatpush3.msk.msra.mxu0 (!%p243_p2), %vm396_vm0, %v4125_v0  ;;  %4809 = vmatpush3.msk.msra.mxu1 (!%p243_p2), %vm396_vm0, %v4125_v0  ;;  %v4264_v55 = vld [vmem:[%s6452_s4 + $0x10] sm:$0x7] (!%p243_p2)  ;;  %vm3972_vm2 = vcmask (!%p243_p2), 261120  }
   0x8   : > { %4782 = vmatprep.subr.msk.mxu0 (!%p243_p2), %vm396_vm0, %v312_v1  ;;  %4834 = vmatprep.subr.msk.mxu1 (!%p243_p2), %vm396_vm0, %v312_v1 }
   0xd   : > { %s6456_s22 = smov (!%p287_p3, %s4114_s22), 1 }
   0xe   : > { %s5555_s27 = smul.u32 144, %s6456_s22  ;;  %s4449_s10 = sshll.u32 %s6456_s22, 6 }
   0xf   : > { %s6420_s13 = scalar_lea.vmem %s6454_s6, %s4449_s10 }
  0x10   : > { %s5561_s30 = scalar_lea.vmem %s6449_s1, %s5555_s27  ;;  %s5567_s9 = scalar_lea.vmem %s6450_s2, %s5555_s27 }
  0x11   : > { %v5570_v2 = vld [vmem:[%s5561_s30] sm:$0xff]  ;;  %v5576_v4 = vld [vmem:[%s5561_s30 + $0x8] sm:$0xff]  ;;  %v5586_v6 = vld [vmem:[%s5561_s30 + $0x10] sm:$0xff]  ;;  %s5726_s14 = scalar_lea.vmem %s6448_s0, %s5555_s27  ;;  %s5853_s19 = scalar_lea.vmem %s6451_s3, %s5555_s27 }
  0x12   : > { %v5573_v3 = vld [vmem:[%s5567_s9] sm:$0xff]  ;;  %4758 = vmatprep.mubr.msk.f32.mxu0 %vm347_vm1, %v5570_v2  ;;  %v5583_v5 = vld [vmem:[%s5567_s9 + $0x8] sm:$0xff]  ;;  %v5589_v7 = vld [vmem:[%s5567_s9 + $0x10] sm:$0xff] }
  0x13   : > { %4810 = vmatprep.mubr.msk.f32.mxu1 %vm347_vm1, %v5573_v3  ;;  %4759 = vmatmul.mubr.msk.f32.vlgmr.msra.gmra.mrb[0].mxu0 %vm347_vm1, %v5576_v4  ;;  %v5603_v9 = vld [vmem:[%s5561_s30 + $0x18] sm:$0xff]  ;;  %v5613_v11 = vld [vmem:[%s5561_s30 + $0x20] sm:$0xff]  ;;  %v5631_v13 = vld [vmem:[%s5561_s30 + $0x28] sm:$0xff] }
  0x14   : > { %4811 = vmatmul.mubr.msk.f32.vlgmr.msra.gmra.mrb[0].mxu1 %vm347_vm1, %v5583_v5  ;;  %4783 = vmatpush3.msk.msra.mxu0 %vm396_vm0, %v312_v1  ;;  %v5606_v10 = vld [vmem:[%s5567_s9 + $0x18] sm:$0xff]  ;;  %v5616_v12 = vld [vmem:[%s5567_s9 + $0x20] sm:$0xff]  ;;  %v5634_v14 = vld [vmem:[%s5567_s9 + $0x28] sm:$0xff] }
  0x15   : > { %4835 = vmatpush3.msk.msra.mxu1 %vm396_vm0, %v312_v1  ;;  %4761 = vmatprep.mubr.msk.f32.mxu0 %vm347_vm1, %v5586_v6  ;;  %v5637_v15 = vld [vmem:[%s5561_s30 + $0x30] sm:$0xff]  ;;  %v5651_v17 = vld [vmem:[%s5561_s30 + $0x38] sm:$0xff]  ;;  %v5657_v19 = vld [vmem:[%s5561_s30 + $0x40] sm:$0xff] }
  0x16   : > { %4813 = vmatprep.mubr.msk.f32.mxu1 %vm347_vm1, %v5589_v7  ;;  %4860 = vmatprep.subr.msk.mxu0 %vm396_vm0, %v5598_v8  ;;  %v5640_v16 = vld [vmem:[%s5567_s9 + $0x30] sm:$0xff]  ;;  %v5654_v18 = vld [vmem:[%s5567_s9 + $0x38] sm:$0xff]  ;;  %v5660_v20 = vld [vmem:[%s5567_s9 + $0x40] sm:$0xff] }
  0x17   : > { %4886 = vmatprep.subr.msk.mxu1 %vm396_vm0, %v5598_v8  ;;  %4762 = vmatmul.mubr.msk.f32.gmra.mrb[2].mxu0 %vm347_vm1, %v5603_v9  ;;  %v5671_v21 = vld [vmem:[%s5561_s30 + $0x48] sm:$0xff]  ;;  %v5677_v23 = vld [vmem:[%s5561_s30 + $0x50] sm:$0xff]  ;;  %v5691_v25 = vld [vmem:[%s5561_s30 + $0x58] sm:$0xff] }
  0x18   : > { %4814 = vmatmul.mubr.msk.f32.gmra.mrb[2].mxu1 %vm347_vm1, %v5606_v10  ;;  %4764 = vmatprep.mubr.msk.f32.mxu0 %vm347_vm1, %v5613_v11  ;;  %v5674_v22 = vld [vmem:[%s5567_s9 + $0x48] sm:$0xff]  ;;  %v5680_v24 = vld [vmem:[%s5567_s9 + $0x50] sm:$0xff]  ;;  %v5694_v26 = vld [vmem:[%s5567_s9 + $0x58] sm:$0xff] }
  0x19   : > { %4816 = vmatprep.mubr.msk.f32.mxu1 %vm347_vm1, %v5616_v12  ;;  %v5697_v27 = vld [vmem:[%s5561_s30 + $0x60] sm:$0xff]  ;;  %v5711_v29 = vld [vmem:[%s5561_s30 + $0x68] sm:$0xff]  ;;  %v5717_v31 = vld [vmem:[%s5561_s30 + $0x70] sm:$0xff] }
  0x1a   : > { %v5700_v28 = vld [vmem:[%s5567_s9 + $0x60] sm:$0xff]  ;;  %v5714_v30 = vld [vmem:[%s5567_s9 + $0x68] sm:$0xff]  ;;  %v5720_v32 = vld [vmem:[%s5567_s9 + $0x70] sm:$0xff] }
  0x1b   : > { %4765 = vmatmul.mubr.msk.f32.gmra.mrb[4].mxu0 %vm347_vm1, %v5631_v13  ;;  %v5737_v33 = vld [vmem:[%s5561_s30 + $0x78] sm:$0xff]  ;;  %v313_v35 = vld [vmem:[%s5726_s14] sm:$0xff]  ;;  %v5751_v36 = vld [vmem:[%s5726_s14 + $0x8] sm:$0xff] }
  0x1c   : > { %4817 = vmatmul.mubr.msk.f32.gmra.mrb[4].mxu1 %vm347_vm1, %v5634_v14  ;;  %4767 = vmatprep.mubr.msk.f32.mxu0 %vm347_vm1, %v5637_v15  ;;  %v5740_v34 = vld [vmem:[%s5567_s9 + $0x78] sm:$0xff]  ;;  %v5754_v37 = vld [vmem:[%s5726_s14 + $0x10] sm:$0xff]  ;;  %v5775_v40 = vld [vmem:[%s5726_s14 + $0x20] sm:$0xff] }
  0x1d   : > { %4819 = vmatprep.mubr.msk.f32.mxu1 %vm347_vm1, %v5640_v16  ;;  %v5768_v39 = vld [vmem:[%s5726_s14 + $0x18] sm:$0xff]  ;;  %v5788_v41 = vld [vmem:[%s5726_s14 + $0x28] sm:$0xff]  ;;  %v5791_v42 = vld [vmem:[%s5726_s14 + $0x30] sm:$0xff] }
  0x1e   : > { %v5802_v43 = vld [vmem:[%s5726_s14 + $0x38] sm:$0xff]  ;;  %v5805_v44 = vld [vmem:[%s5726_s14 + $0x40] sm:$0xff]  ;;  %v5816_v45 = vld [vmem:[%s5726_s14 + $0x48] sm:$0xff] }
  0x1f   : > { %4768 = vmatmul.mubr.msk.f32.gmra.mrb[6].mxu0 %vm347_vm1, %v5651_v17  ;;  %v5819_v46 = vld [vmem:[%s5726_s14 + $0x50] sm:$0xff]  ;;  %v5830_v47 = vld [vmem:[%s5726_s14 + $0x58] sm:$0xff]  ;;  %v5833_v48 = vld [vmem:[%s5726_s14 + $0x60] sm:$0xff] }
  0x20   : > { %4820 = vmatmul.mubr.msk.f32.gmra.mrb[6].mxu1 %vm347_vm1, %v5654_v18  ;;  %4770 = vmatprep.mubr.msk.f32.mxu0 %vm347_vm1, %v5657_v19  ;;  %v5844_v49 = vld [vmem:[%s5726_s14 + $0x68] sm:$0xff]  ;;  %v5847_v50 = vld [vmem:[%s5726_s14 + $0x70] sm:$0xff]  ;;  %v5864_v51 = vld [vmem:[%s5726_s14 + $0x78] sm:$0xff] }
  0x21   : > { %4822 = vmatprep.mubr.msk.f32.mxu1 %vm347_vm1, %v5660_v20  ;;  %v1261_v52 = vld [vmem:[%s5853_s19] sm:$0xff]  ;;  %v5875_v53 = vld [vmem:[%s5853_s19 + $0x8] sm:$0xff]  ;;  %v5878_v54 = vld [vmem:[%s5853_s19 + $0x10] sm:$0xff] }
  0x22   : > { %v5890_v56 = vld [vmem:[%s5853_s19 + $0x18] sm:$0xff]  ;;  %v5897_v57 = vld [vmem:[%s5853_s19 + $0x20] sm:$0xff]  ;;  %v5910_v58 = vld [vmem:[%s5853_s19 + $0x28] sm:$0xff] }
  0x23   : > { %4771 = vmatmul.mubr.msk.f32.gmra.mrb[8].mxu0 %vm347_vm1, %v5671_v21  ;;  %v5913_v59 = vld [vmem:[%s5853_s19 + $0x30] sm:$0xff]  ;;  %v5924_v60 = vld [vmem:[%s5853_s19 + $0x38] sm:$0xff]  ;;  %v5927_v61 = vld [vmem:[%s5853_s19 + $0x40] sm:$0xff] }
  0x24   : > { %4823 = vmatmul.mubr.msk.f32.gmra.mrb[8].mxu1 %vm347_vm1, %v5674_v22  ;;  %4773 = vmatprep.mubr.msk.f32.mxu0 %vm347_vm1, %v5677_v23  ;;  %v5938_v62 = vld [vmem:[%s5853_s19 + $0x48] sm:$0xff]  ;;  %v5941_v63 = vld [vmem:[%s5853_s19 + $0x50] sm:$0xff]  ;;  %v5952_v0 = vld [vmem:[%s5853_s19 + $0x58] sm:$0xff] }
  0x25   : > { %4825 = vmatprep.mubr.msk.f32.mxu1 %vm347_vm1, %v5680_v24  ;;  %v5955_v1 = vld [vmem:[%s5853_s19 + $0x60] sm:$0xff] }
  0x27   : > { %4774 = vmatmul.mubr.msk.f32.gmra.mrb[10].mxu0 %vm347_vm1, %v5691_v25 }
  0x28   : > { %4826 = vmatmul.mubr.msk.f32.gmra.mrb[10].mxu1 %vm347_vm1, %v5694_v26  ;;  %4776 = vmatprep.mubr.msk.f32.mxu0 %vm347_vm1, %v5697_v27 }
  0x29   : > { %4828 = vmatprep.mubr.msk.f32.mxu1 %vm347_vm1, %v5700_v28 }
  0x2b   : > { %4777 = vmatmul.mubr.msk.f32.gmra.mrb[12].mxu0 %vm347_vm1, %v5711_v29 }
  0x2c   : > { %4829 = vmatmul.mubr.msk.f32.gmra.mrb[12].mxu1 %vm347_vm1, %v5714_v30  ;;  %4779 = vmatprep.mubr.msk.f32.mxu0 %vm347_vm1, %v5717_v31 }
  0x2d   : > { %4831 = vmatprep.mubr.msk.f32.mxu1 %vm347_vm1, %v5720_v32 }
  0x2f   : > { %4780 = vmatmul.mubr.msk.f32.gmra.mrb[14].mxu0 %vm347_vm1, %v5737_v33 }
  0x30   : > { %4832 = vmatmul.mubr.msk.f32.gmra.mrb[14].mxu1 %vm347_vm1, %v5740_v34  ;;  %4784 = vmatprep.mubr.msk.f32.mxu0 %vm347_vm1, %v313_v35  ;;  %v4299_v35 = vld [vmem:[%s6452_s4 + $0x14] sm:$0x7] }
  0x31   : > { %4836 = vmatprep.mubr.msk.f32.mxu1 %vm347_vm1, %v5570_v2  ;;  %v5966_v2 = vld [vmem:[%s5853_s19 + $0x68] sm:$0xff] }
  0x33   : > { %4785 = vmatmul.mubr.msk.f32.vlgmr.msra.gmra.mrb[0].mxu0 %vm347_vm1, %v5751_v36 }
  0x34   : > { %4837 = vmatmul.mubr.msk.f32.vlgmr.msra.gmra.mrb[0].mxu1 %vm347_vm1, %v5576_v4  ;;  %4861 = vmatpush3.msk.msra.mxu0 %vm396_vm0, %v5598_v8 }
  0x35   : > { %4887 = vmatpush3.msk.msra.mxu1 %vm396_vm0, %v5598_v8  ;;  %4787 = vmatprep.mubr.msk.f32.mxu0 %vm347_vm1, %v5754_v37  ;;  %v5980_v8 = vld [vmem:[%s5853_s19 + $0x78] sm:$0xff] }
  0x36   : > { %4839 = vmatprep.mubr.msk.f32.mxu1 %vm347_vm1, %v5586_v6  ;;  %4912 = vmatprep.subr.msk.mxu0 %vm396_vm0, %v4229_v38 }
  0x37   : > { %4938 = vmatprep.subr.msk.mxu1 %vm396_vm0, %v4229_v38  ;;  %4788 = vmatmul.mubr.msk.f32.gmra.mrb[2].mxu0 %vm347_vm1, %v5768_v39 }
  0x38   : > { %4840 = vmatmul.mubr.msk.f32.gmra.mrb[2].mxu1 %vm347_vm1, %v5603_v9  ;;  %4790 = vmatprep.mubr.msk.f32.mxu0 %vm347_vm1, %v5775_v40 }
  0x39   : > { %4842 = vmatprep.mubr.msk.f32.mxu1 %vm347_vm1, %v5613_v11 }
  0x3b   : > { %4791 = vmatmul.mubr.msk.f32.gmra.mrb[4].mxu0 %vm347_vm1, %v5788_v41 }
  0x3c   : > { %4843 = vmatmul.mubr.msk.f32.gmra.mrb[4].mxu1 %vm347_vm1, %v5631_v13  ;;  %4793 = vmatprep.mubr.msk.f32.mxu0 %vm347_vm1, %v5791_v42 }
  0x3d   : > { %4845 = vmatprep.mubr.msk.f32.mxu1 %vm347_vm1, %v5637_v15 }
  0x3f   : > { %4794 = vmatmul.mubr.msk.f32.gmra.mrb[6].mxu0 %vm347_vm1, %v5802_v43 }
  0x40   : > { %4846 = vmatmul.mubr.msk.f32.gmra.mrb[6].mxu1 %vm347_vm1, %v5651_v17  ;;  %4796 = vmatprep.mubr.msk.f32.mxu0 %vm347_vm1, %v5805_v44 }
  0x41   : > { %4848 = vmatprep.mubr.msk.f32.mxu1 %vm347_vm1, %v5657_v19 }
  0x43   : > { %4797 = vmatmul.mubr.msk.f32.gmra.mrb[8].mxu0 %vm347_vm1, %v5816_v45 }
  0x44   : > { %4849 = vmatmul.mubr.msk.f32.gmra.mrb[8].mxu1 %vm347_vm1, %v5671_v21  ;;  %4799 = vmatprep.mubr.msk.f32.mxu0 %vm347_vm1, %v5819_v46 }
  0x45   : > { %4851 = vmatprep.mubr.msk.f32.mxu1 %vm347_vm1, %v5677_v23 }
  0x47   : > { %4800 = vmatmul.mubr.msk.f32.gmra.mrb[10].mxu0 %vm347_vm1, %v5830_v47 }
  0x48   : > { %4852 = vmatmul.mubr.msk.f32.gmra.mrb[10].mxu1 %vm347_vm1, %v5691_v25  ;;  %4802 = vmatprep.mubr.msk.f32.mxu0 %vm347_vm1, %v5833_v48 }
  0x49   : > { %4854 = vmatprep.mubr.msk.f32.mxu1 %vm347_vm1, %v5697_v27 }
  0x4b   : > { %4803 = vmatmul.mubr.msk.f32.gmra.mrb[12].mxu0 %vm347_vm1, %v5844_v49 }
  0x4c   : > { %4855 = vmatmul.mubr.msk.f32.gmra.mrb[12].mxu1 %vm347_vm1, %v5711_v29  ;;  %4805 = vmatprep.mubr.msk.f32.mxu0 %vm347_vm1, %v5847_v50 }
  0x4d   : > { %4857 = vmatprep.mubr.msk.f32.mxu1 %vm347_vm1, %v5717_v31 }
  0x4f   : > { %4806 = vmatmul.mubr.msk.f32.gmra.mrb[14].mxu0 %vm347_vm1, %v5864_v51 }
  0x50   : > { %4858 = vmatmul.mubr.msk.f32.gmra.mrb[14].mxu1 %vm347_vm1, %v5737_v33  ;;  %4862 = vmatprep.mubr.msk.f32.mxu0 %vm347_vm1, %v5573_v3  ;;  %v5969_v3 = vld [vmem:[%s5853_s19 + $0x70] sm:$0xff] }
  0x51   : > { %4888 = vmatprep.mubr.msk.f32.mxu1 %vm347_vm1, %v1261_v52  ;;  %v4334_v52 = vld [vmem:[%s6452_s4 + $0x18] sm:$0x7] }
  0x53   : > { %4863 = vmatmul.mubr.msk.f32.vlgmr.msra.gmra.mrb[0].mxu0 %vm347_vm1, %v5583_v5 }
  0x54   : > { %4889 = vmatmul.mubr.msk.f32.vlgmr.msra.gmra.mrb[0].mxu1 %vm347_vm1, %v5875_v53  ;;  %4913 = vmatpush3.msk.msra.mxu0 %vm396_vm0, %v4229_v38 }
  0x55   : > { %4939 = vmatpush3.msk.msra.mxu1 %vm396_vm0, %v4229_v38  ;;  %4865 = vmatprep.mubr.msk.f32.mxu0 %vm347_vm1, %v5589_v7  ;;  %v6057_v38 = vld [vmem:[%s5561_s30 + $0x80] sm:$0xff] }
  0x56   : > { %4891 = vmatprep.mubr.msk.f32.mxu1 %vm347_vm1, %v5878_v54  ;;  %4964 = vmatprep.subr.msk.mxu0 %vm396_vm0, %v4264_v55 }
  0x57   : > { %4990 = vmatprep.subr.msk.mxu1 %vm396_vm0, %v4264_v55  ;;  %4866 = vmatmul.mubr.msk.f32.gmra.mrb[2].mxu0 %vm347_vm1, %v5606_v10 }
  0x58   : > { %4892 = vmatmul.mubr.msk.f32.gmra.mrb[2].mxu1 %vm347_vm1, %v5890_v56  ;;  %4868 = vmatprep.mubr.msk.f32.mxu0 %vm347_vm1, %v5616_v12 }
  0x59   : > { %4894 = vmatprep.mubr.msk.f32.mxu1 %vm347_vm1, %v5897_v57 }
  0x5b   : > { %4869 = vmatmul.mubr.msk.f32.gmra.mrb[4].mxu0 %vm347_vm1, %v5634_v14 }
  0x5c   : > { %4895 = vmatmul.mubr.msk.f32.gmra.mrb[4].mxu1 %vm347_vm1, %v5910_v58  ;;  %4871 = vmatprep.mubr.msk.f32.mxu0 %vm347_vm1, %v5640_v16 }
  0x5d   : > { %4897 = vmatprep.mubr.msk.f32.mxu1 %vm347_vm1, %v5913_v59 }
  0x5f   : > { %4872 = vmatmul.mubr.msk.f32.gmra.mrb[6].mxu0 %vm347_vm1, %v5654_v18 }
  0x60   : > { %4898 = vmatmul.mubr.msk.f32.gmra.mrb[6].mxu1 %vm347_vm1, %v5924_v60  ;;  %4874 = vmatprep.mubr.msk.f32.mxu0 %vm347_vm1, %v5660_v20 }
  0x61   : > { %4900 = vmatprep.mubr.msk.f32.mxu1 %vm347_vm1, %v5927_v61 }
  0x63   : > { %4875 = vmatmul.mubr.msk.f32.gmra.mrb[8].mxu0 %vm347_vm1, %v5674_v22 }
  0x64   : > { %4901 = vmatmul.mubr.msk.f32.gmra.mrb[8].mxu1 %vm347_vm1, %v5938_v62  ;;  %4877 = vmatprep.mubr.msk.f32.mxu0 %vm347_vm1, %v5680_v24 }
  0x65   : > { %4903 = vmatprep.mubr.msk.f32.mxu1 %vm347_vm1, %v5941_v63 }
  0x67   : > { %4878 = vmatmul.mubr.msk.f32.gmra.mrb[10].mxu0 %vm347_vm1, %v5694_v26 }
  0x68   : > { %4904 = vmatmul.mubr.msk.f32.gmra.mrb[10].mxu1 %vm347_vm1, %v5952_v0  ;;  %4880 = vmatprep.mubr.msk.f32.mxu0 %vm347_vm1, %v5700_v28 }
  0x69   : > { %4906 = vmatprep.mubr.msk.f32.mxu1 %vm347_vm1, %v5955_v1 }
  0x6b   : > { %4881 = vmatmul.mubr.msk.f32.gmra.mrb[12].mxu0 %vm347_vm1, %v5714_v30 }
  0x6c   : > { %4907 = vmatmul.mubr.msk.f32.gmra.mrb[12].mxu1 %vm347_vm1, %v5966_v2  ;;  %4883 = vmatprep.mubr.msk.f32.mxu0 %vm347_vm1, %v5720_v32 }
  0x6d   : > { %4909 = vmatprep.mubr.msk.f32.mxu1 %vm347_vm1, %v5969_v3 }
  0x6f   : > { %4884 = vmatmul.mubr.msk.f32.gmra.mrb[14].mxu0 %vm347_vm1, %v5740_v34 }
  0x70   : > { %4910 = vmatmul.mubr.msk.f32.gmra.mrb[14].mxu1 %vm347_vm1, %v5980_v8  ;;  %4914 = vmatprep.mubr.msk.f32.mxu0 %vm347_vm1, %v5751_v36  ;;  %v6054_v36 = vld [vmem:[%s5726_s14 + $0x80] sm:$0xff] }
  0x71   : > { %4940 = vmatprep.mubr.msk.f32.mxu1 %vm347_vm1, %v5576_v4 }
  0x73   : > { %4915 = vmatmul.mubr.msk.f32.vlgmr.msra.gmra.mrb[0].mxu0 %vm347_vm1, %v5754_v37 }
  0x74   : > { %4941 = vmatmul.mubr.msk.f32.vlgmr.msra.gmra.mrb[0].mxu1 %vm347_vm1, %v5586_v6  ;;  %4965 = vmatpush3.msk.msra.mxu0 %vm396_vm0, %v4264_v55 }
  0x75   : > { %4991 = vmatpush3.msk.msra.mxu1 %vm396_vm0, %v4264_v55  ;;  %4917 = vmatprep.mubr.msk.f32.mxu0 %vm347_vm1, %v5768_v39  ;;  %v4369_v55 = vld [vmem:[%s6452_s4 + $0x1c] sm:$0x7] }
  0x76   : > { %4943 = vmatprep.mubr.msk.f32.mxu1 %vm347_vm1, %v5603_v9  ;;  %5016 = vmatprep.subr.msk.mxu0 %vm396_vm0, %v4299_v35 }
  0x77   : > { %5042 = vmatprep.subr.msk.mxu1 %vm396_vm0, %v4299_v35  ;;  %4918 = vmatmul.mubr.msk.f32.gmra.mrb[2].mxu0 %vm347_vm1, %v5775_v40 }
  0x78   : > { %4944 = vmatmul.mubr.msk.f32.gmra.mrb[2].mxu1 %vm347_vm1, %v5613_v11  ;;  %4920 = vmatprep.mubr.msk.f32.mxu0 %vm347_vm1, %v5788_v41 }
  0x79   : > { %4946 = vmatprep.mubr.msk.f32.mxu1 %vm347_vm1, %v5631_v13 }
  0x7b   : > { %4921 = vmatmul.mubr.msk.f32.gmra.mrb[4].mxu0 %vm347_vm1, %v5791_v42 }
  0x7c   : > { %4947 = vmatmul.mubr.msk.f32.gmra.mrb[4].mxu1 %vm347_vm1, %v5637_v15  ;;  %4923 = vmatprep.mubr.msk.f32.mxu0 %vm347_vm1, %v5802_v43 }
  0x7d   : > { %4949 = vmatprep.mubr.msk.f32.mxu1 %vm347_vm1, %v5651_v17 }
  0x7f   : > { %4924 = vmatmul.mubr.msk.f32.gmra.mrb[6].mxu0 %vm347_vm1, %v5805_v44 }
  0x80   : > { %4950 = vmatmul.mubr.msk.f32.gmra.mrb[6].mxu1 %vm347_vm1, %v5657_v19  ;;  %4926 = vmatprep.mubr.msk.f32.mxu0 %vm347_vm1, %v5816_v45 }
  0x81   : > { %4952 = vmatprep.mubr.msk.f32.mxu1 %vm347_vm1, %v5671_v21 }
  0x83   : > { %4927 = vmatmul.mubr.msk.f32.gmra.mrb[8].mxu0 %vm347_vm1, %v5819_v46 }
  0x84   : > { %4953 = vmatmul.mubr.msk.f32.gmra.mrb[8].mxu1 %vm347_vm1, %v5677_v23  ;;  %4929 = vmatprep.mubr.msk.f32.mxu0 %vm347_vm1, %v5830_v47 }
  0x85   : > { %4955 = vmatprep.mubr.msk.f32.mxu1 %vm347_vm1, %v5691_v25 }
  0x87   : > { %4930 = vmatmul.mubr.msk.f32.gmra.mrb[10].mxu0 %vm347_vm1, %v5833_v48 }
  0x88   : > { %4956 = vmatmul.mubr.msk.f32.gmra.mrb[10].mxu1 %vm347_vm1, %v5697_v27  ;;  %4932 = vmatprep.mubr.msk.f32.mxu0 %vm347_vm1, %v5844_v49 }
  0x89   : > { %4958 = vmatprep.mubr.msk.f32.mxu1 %vm347_vm1, %v5711_v29 }
  0x8b   : > { %4933 = vmatmul.mubr.msk.f32.gmra.mrb[12].mxu0 %vm347_vm1, %v5847_v50 }
  0x8c   : > { %4959 = vmatmul.mubr.msk.f32.gmra.mrb[12].mxu1 %vm347_vm1, %v5717_v31  ;;  %4935 = vmatprep.mubr.msk.f32.mxu0 %vm347_vm1, %v5864_v51 }
  0x8d   : > { %4961 = vmatprep.mubr.msk.f32.mxu1 %vm347_vm1, %v5737_v33 }
  0x8f   : > { %4936 = vmatmul.mubr.msk.f32.gmra.mrb[14].mxu0 %vm347_vm1, %v6054_v36 }
  0x90   : > { %4962 = vmatmul.mubr.msk.f32.gmra.mrb[14].mxu1 %vm347_vm1, %v6057_v38  ;;  %4966 = vmatprep.mubr.msk.f32.mxu0 %vm347_vm1, %v5576_v4  ;;  %v6131_v4 = vld [vmem:[%s5567_s9 + $0x80] sm:$0xff] }
  0x91   : > { %4992 = vmatprep.mubr.msk.f32.mxu1 %vm347_vm1, %v5583_v5 }
  0x93   : > { %4967 = vmatmul.mubr.msk.f32.vlgmr.msra.gmra.mrb[0].mxu0 %vm347_vm1, %v5586_v6 }
  0x94   : > { %4993 = vmatmul.mubr.msk.f32.vlgmr.msra.gmra.mrb[0].mxu1 %vm347_vm1, %v5589_v7  ;;  %5017 = vmatpush3.msk.msra.mxu0 %vm396_vm0, %v4299_v35 }
  0x95   : > { %5043 = vmatpush3.msk.msra.mxu1 %vm396_vm0, %v4299_v35  ;;  %4969 = vmatprep.mubr.msk.f32.mxu0 %vm347_vm1, %v5603_v9 }
  0x96   : > { %4995 = vmatprep.mubr.msk.f32.mxu1 %vm347_vm1, %v5606_v10  ;;  %5068 = vmatprep.subr.msk.mxu0 %vm396_vm0, %v4334_v52 }
  0x97   : > { %5094 = vmatprep.subr.msk.mxu1 %vm396_vm0, %v4334_v52  ;;  %4970 = vmatmul.mubr.msk.f32.gmra.mrb[2].mxu0 %vm347_vm1, %v5613_v11 }
  0x98   : > { %4996 = vmatmul.mubr.msk.f32.gmra.mrb[2].mxu1 %vm347_vm1, %v5616_v12  ;;  %4972 = vmatprep.mubr.msk.f32.mxu0 %vm347_vm1, %v5631_v13 }
  0x99   : > { %4998 = vmatprep.mubr.msk.f32.mxu1 %vm347_vm1, %v5634_v14 }
  0x9b   : > { %4973 = vmatmul.mubr.msk.f32.gmra.mrb[4].mxu0 %vm347_vm1, %v5637_v15 }
  0x9c   : > { %4999 = vmatmul.mubr.msk.f32.gmra.mrb[4].mxu1 %vm347_vm1, %v5640_v16  ;;  %4975 = vmatprep.mubr.msk.f32.mxu0 %vm347_vm1, %v5651_v17 }
  0x9d   : > { %5001 = vmatprep.mubr.msk.f32.mxu1 %vm347_vm1, %v5654_v18 }
  0x9f   : > { %4976 = vmatmul.mubr.msk.f32.gmra.mrb[6].mxu0 %vm347_vm1, %v5657_v19 }
  0xa0   : > { %5002 = vmatmul.mubr.msk.f32.gmra.mrb[6].mxu1 %vm347_vm1, %v5660_v20  ;;  %4978 = vmatprep.mubr.msk.f32.mxu0 %vm347_vm1, %v5671_v21 }
  0xa1   : > { %5004 = vmatprep.mubr.msk.f32.mxu1 %vm347_vm1, %v5674_v22 }
  0xa3   : > { %4979 = vmatmul.mubr.msk.f32.gmra.mrb[8].mxu0 %vm347_vm1, %v5677_v23 }
  0xa4   : > { %5005 = vmatmul.mubr.msk.f32.gmra.mrb[8].mxu1 %vm347_vm1, %v5680_v24  ;;  %4981 = vmatprep.mubr.msk.f32.mxu0 %vm347_vm1, %v5691_v25 }
  0xa5   : > { %5007 = vmatprep.mubr.msk.f32.mxu1 %vm347_vm1, %v5694_v26 }
  0xa7   : > { %4982 = vmatmul.mubr.msk.f32.gmra.mrb[10].mxu0 %vm347_vm1, %v5697_v27 }
  0xa8   : > { %5008 = vmatmul.mubr.msk.f32.gmra.mrb[10].mxu1 %vm347_vm1, %v5700_v28  ;;  %4984 = vmatprep.mubr.msk.f32.mxu0 %vm347_vm1, %v5711_v29 }
  0xa9   : > { %5010 = vmatprep.mubr.msk.f32.mxu1 %vm347_vm1, %v5714_v30 }
  0xab   : > { %4985 = vmatmul.mubr.msk.f32.gmra.mrb[12].mxu0 %vm347_vm1, %v5717_v31 }
  0xac   : > { %5011 = vmatmul.mubr.msk.f32.gmra.mrb[12].mxu1 %vm347_vm1, %v5720_v32  ;;  %4987 = vmatprep.mubr.msk.f32.mxu0 %vm347_vm1, %v5737_v33 }
  0xad   : > { %5013 = vmatprep.mubr.msk.f32.mxu1 %vm347_vm1, %v5740_v34 }
  0xaf   : > { %4988 = vmatmul.mubr.msk.f32.gmra.mrb[14].mxu0 %vm347_vm1, %v6057_v38 }
  0xb0   : > { %5014 = vmatmul.mubr.msk.f32.gmra.mrb[14].mxu1 %vm347_vm1, %v6131_v4  ;;  %5018 = vmatprep.mubr.msk.f32.mxu0 %vm347_vm1, %v5583_v5  ;;  %v6205_v5 = vld [vmem:[%s5853_s19 + $0x80] sm:$0xff] }
  0xb1   : > { %5044 = vmatprep.mubr.msk.f32.mxu1 %vm347_vm1, %v5875_v53  ;;  %v4404_v53 = vld [vmem:[%s6452_s4 + $0x20] sm:$0x7] }
  0xb3   : > { %5019 = vmatmul.mubr.msk.f32.vlgmr.msra.gmra.mrb[0].mxu0 %vm347_vm1, %v5589_v7 }
  0xb4   : > { %5045 = vmatmul.mubr.msk.f32.vlgmr.msra.gmra.mrb[0].mxu1 %vm347_vm1, %v5878_v54  ;;  %5069 = vmatpush3.msk.msra.mxu0 %vm396_vm0, %v4334_v52 }
  0xb5   : > { %5095 = vmatpush3.msk.msra.mxu1 %vm396_vm0, %v4334_v52  ;;  %5021 = vmatprep.mubr.msk.f32.mxu0 %vm347_vm1, %v5606_v10 }
  0xb6   : > { %5047 = vmatprep.mubr.msk.f32.mxu1 %vm347_vm1, %v5890_v56  ;;  %5120 = vmatprep.subr.msk.mxu0 %vm396_vm0, %v4369_v55 }
  0xb7   : > { %5146 = vmatprep.subr.msk.mxu1 %vm396_vm0, %v4369_v55  ;;  %5022 = vmatmul.mubr.msk.f32.gmra.mrb[2].mxu0 %vm347_vm1, %v5616_v12 }
  0xb8   : > { %5048 = vmatmul.mubr.msk.f32.gmra.mrb[2].mxu1 %vm347_vm1, %v5897_v57  ;;  %5024 = vmatprep.mubr.msk.f32.mxu0 %vm347_vm1, %v5634_v14 }
  0xb9   : > { %5050 = vmatprep.mubr.msk.f32.mxu1 %vm347_vm1, %v5910_v58 }
  0xbb   : > { %5025 = vmatmul.mubr.msk.f32.gmra.mrb[4].mxu0 %vm347_vm1, %v5640_v16 }
  0xbc   : > { %5051 = vmatmul.mubr.msk.f32.gmra.mrb[4].mxu1 %vm347_vm1, %v5913_v59  ;;  %5027 = vmatprep.mubr.msk.f32.mxu0 %vm347_vm1, %v5654_v18 }
  0xbd   : > { %5053 = vmatprep.mubr.msk.f32.mxu1 %vm347_vm1, %v5924_v60 }
  0xbf   : > { %5028 = vmatmul.mubr.msk.f32.gmra.mrb[6].mxu0 %vm347_vm1, %v5660_v20 }
  0xc0   : > { %5054 = vmatmul.mubr.msk.f32.gmra.mrb[6].mxu1 %vm347_vm1, %v5927_v61  ;;  %5030 = vmatprep.mubr.msk.f32.mxu0 %vm347_vm1, %v5674_v22 }
  0xc1   : > { %5056 = vmatprep.mubr.msk.f32.mxu1 %vm347_vm1, %v5938_v62 }
  0xc3   : > { %5031 = vmatmul.mubr.msk.f32.gmra.mrb[8].mxu0 %vm347_vm1, %v5680_v24 }
  0xc4   : > { %5057 = vmatmul.mubr.msk.f32.gmra.mrb[8].mxu1 %vm347_vm1, %v5941_v63  ;;  %5033 = vmatprep.mubr.msk.f32.mxu0 %vm347_vm1, %v5694_v26 }
  0xc5   : > { %5059 = vmatprep.mubr.msk.f32.mxu1 %vm347_vm1, %v5952_v0 }
  0xc7   : > { %5034 = vmatmul.mubr.msk.f32.gmra.mrb[10].mxu0 %vm347_vm1, %v5700_v28 }
  0xc8   : > { %5060 = vmatmul.mubr.msk.f32.gmra.mrb[10].mxu1 %vm347_vm1, %v5955_v1  ;;  %5036 = vmatprep.mubr.msk.f32.mxu0 %vm347_vm1, %v5714_v30 }
  0xc9   : > { %5062 = vmatprep.mubr.msk.f32.mxu1 %vm347_vm1, %v5966_v2 }
  0xcb   : > { %5037 = vmatmul.mubr.msk.f32.gmra.mrb[12].mxu0 %vm347_vm1, %v5720_v32 }
  0xcc   : > { %5063 = vmatmul.mubr.msk.f32.gmra.mrb[12].mxu1 %vm347_vm1, %v5969_v3  ;;  %5039 = vmatprep.mubr.msk.f32.mxu0 %vm347_vm1, %v5740_v34 }
  0xcd   : > { %5065 = vmatprep.mubr.msk.f32.mxu1 %vm347_vm1, %v5980_v8 }
  0xcf   : > { %5040 = vmatmul.mubr.msk.f32.gmra.mrb[14].mxu0 %vm347_vm1, %v6131_v4 }
  0xd0   : > { %5066 = vmatmul.mubr.msk.f32.gmra.mrb[14].mxu1 %vm347_vm1, %v6205_v5  ;;  %5070 = vmatprep.mubr.msk.f32.mxu0 %vm347_vm1, %v5754_v37  ;;  %v2740_v37 = vld [vmem:[%s5726_s14 + $0x88] sm:$0xff] }
  0xd1   : > { %5096 = vmatprep.mubr.msk.f32.mxu1 %vm347_vm1, %v5586_v6 }
  0xd3   : > { %5071 = vmatmul.mubr.msk.f32.vlgmr.msra.gmra.mrb[0].mxu0 %vm347_vm1, %v5768_v39  ;;  %v2968_v39 = vld [vmem:[%s5561_s30 + $0x88] sm:$0xff] }
  0xd4   : > { %5097 = vmatmul.mubr.msk.f32.vlgmr.msra.gmra.mrb[0].mxu1 %vm347_vm1, %v5603_v9  ;;  %5121 = vmatpush3.msk.msra.mxu0 %vm396_vm0, %v4369_v55 }
  0xd5   : > { %5147 = vmatpush3.msk.msra.mxu1 %vm396_vm0, %v4369_v55  ;;  %5073 = vmatprep.mubr.msk.f32.mxu0 %vm347_vm1, %v5775_v40 }
  0xd6   : > { %5099 = vmatprep.mubr.msk.f32.mxu1 %vm347_vm1, %v5613_v11  ;;  %5172 = vmatprep.subr.msk.mxu0 %vm396_vm0, %v4404_v53 }
  0xd7   : > { %5198 = vmatprep.subr.msk.mxu1 %vm396_vm0, %v4404_v53  ;;  %5074 = vmatmul.mubr.msk.f32.gmra.mrb[2].mxu0 %vm347_vm1, %v5788_v41 }
  0xd8   : > { %5100 = vmatmul.mubr.msk.f32.gmra.mrb[2].mxu1 %vm347_vm1, %v5631_v13  ;;  %5076 = vmatprep.mubr.msk.f32.mxu0 %vm347_vm1, %v5791_v42 }
  0xd9   : > { %5102 = vmatprep.mubr.msk.f32.mxu1 %vm347_vm1, %v5637_v15 }
  0xdb   : > { %5077 = vmatmul.mubr.msk.f32.gmra.mrb[4].mxu0 %vm347_vm1, %v5802_v43 }
  0xdc   : > { %5103 = vmatmul.mubr.msk.f32.gmra.mrb[4].mxu1 %vm347_vm1, %v5651_v17  ;;  %5079 = vmatprep.mubr.msk.f32.mxu0 %vm347_vm1, %v5805_v44 }
  0xdd   : > { %5105 = vmatprep.mubr.msk.f32.mxu1 %vm347_vm1, %v5657_v19 }
  0xdf   : > { %5080 = vmatmul.mubr.msk.f32.gmra.mrb[6].mxu0 %vm347_vm1, %v5816_v45 }
  0xe0   : > { %5106 = vmatmul.mubr.msk.f32.gmra.mrb[6].mxu1 %vm347_vm1, %v5671_v21  ;;  %5082 = vmatprep.mubr.msk.f32.mxu0 %vm347_vm1, %v5819_v46 }
  0xe1   : > { %5108 = vmatprep.mubr.msk.f32.mxu1 %vm347_vm1, %v5677_v23 }
  0xe3   : > { %5083 = vmatmul.mubr.msk.f32.gmra.mrb[8].mxu0 %vm347_vm1, %v5830_v47 }
  0xe4   : > { %5109 = vmatmul.mubr.msk.f32.gmra.mrb[8].mxu1 %vm347_vm1, %v5691_v25  ;;  %5085 = vmatprep.mubr.msk.f32.mxu0 %vm347_vm1, %v5833_v48 }
  0xe5   : > { %5111 = vmatprep.mubr.msk.f32.mxu1 %vm347_vm1, %v5697_v27 }
  0xe7   : > { %5086 = vmatmul.mubr.msk.f32.gmra.mrb[10].mxu0 %vm347_vm1, %v5844_v49 }
  0xe8   : > { %5112 = vmatmul.mubr.msk.f32.gmra.mrb[10].mxu1 %vm347_vm1, %v5711_v29  ;;  %5088 = vmatprep.mubr.msk.f32.mxu0 %vm347_vm1, %v5847_v50 }
  0xe9   : > { %5114 = vmatprep.mubr.msk.f32.mxu1 %vm347_vm1, %v5717_v31 }
  0xeb   : > { %5089 = vmatmul.mubr.msk.f32.gmra.mrb[12].mxu0 %vm347_vm1, %v5864_v51 }
  0xec   : > { %5115 = vmatmul.mubr.msk.f32.gmra.mrb[12].mxu1 %vm347_vm1, %v5737_v33  ;;  %5091 = vmatprep.mubr.msk.f32.mxu0 %vm347_vm1, %v6054_v36 }
  0xed   : > { %5117 = vmatprep.mubr.msk.f32.mxu1 %vm347_vm1, %v6057_v38 }
  0xef   : > { %5092 = vmatmul.mubr.msk.f32.gmra.mrb[14].mxu0 %vm347_vm1, %v2740_v37 }
  0xf0   : > { %5118 = vmatmul.mubr.msk.f32.gmra.mrb[14].mxu1 %vm347_vm1, %v2968_v39  ;;  %5122 = vmatprep.mubr.msk.f32.mxu0 %vm347_vm1, %v5586_v6  ;;  %v3359_v6 = vld [vmem:[%s5567_s9 + $0x88] sm:$0xff] }
  0xf1   : > { %5148 = vmatprep.mubr.msk.f32.mxu1 %vm347_vm1, %v5589_v7 }
  0xf3   : > { %5123 = vmatmul.mubr.msk.f32.vlgmr.msra.gmra.mrb[0].mxu0 %vm347_vm1, %v5603_v9 }
  0xf4   : > { %5149 = vmatmul.mubr.msk.f32.vlgmr.msra.gmra.mrb[0].mxu1 %vm347_vm1, %v5606_v10  ;;  %5173 = vmatpush3.msk.msra.mxu0 %vm396_vm0, %v4404_v53 }
  0xf5   : > { %5199 = vmatpush3.msk.msra.mxu1 %vm396_vm0, %v4404_v53  ;;  %5125 = vmatprep.mubr.msk.f32.mxu0 %vm347_vm1, %v5613_v11 }
  0xf6   : > { %5151 = vmatprep.mubr.msk.f32.mxu1 %vm347_vm1, %v5616_v12 }
  0xf7   : > { %5126 = vmatmul.mubr.msk.f32.gmra.mrb[2].mxu0 %vm347_vm1, %v5631_v13 }
  0xf8   : > { %5152 = vmatmul.mubr.msk.f32.gmra.mrb[2].mxu1 %vm347_vm1, %v5634_v14  ;;  %5128 = vmatprep.mubr.msk.f32.mxu0 %vm347_vm1, %v5637_v15  ;;  %v6413_v15 = vld [vmem:[%s6453_s5] ss:$0 sm:$0xff] }
  0xf9   : > { %5154 = vmatprep.mubr.msk.f32.mxu1 %vm347_vm1, %v5640_v16 }
  0xfb   : > { %5129 = vmatmul.mubr.msk.f32.gmra.mrb[4].mxu0 %vm347_vm1, %v5651_v17 }
  0xfc   : > { %5155 = vmatmul.mubr.msk.f32.gmra.mrb[4].mxu1 %vm347_vm1, %v5654_v18  ;;  %5131 = vmatprep.mubr.msk.f32.mxu0 %vm347_vm1, %v5657_v19 }
  0xfd   : > { %5157 = vmatprep.mubr.msk.f32.mxu1 %vm347_vm1, %v5660_v20 }
  0xff   : > { %5132 = vmatmul.mubr.msk.f32.gmra.mrb[6].mxu0 %vm347_vm1, %v5671_v21 }
 0x100   : > { %5158 = vmatmul.mubr.msk.f32.gmra.mrb[6].mxu1 %vm347_vm1, %v5674_v22  ;;  %5134 = vmatprep.mubr.msk.f32.mxu0 %vm347_vm1, %v5677_v23 }
 0x101   : > { %5160 = vmatprep.mubr.msk.f32.mxu1 %vm347_vm1, %v5680_v24 }
 0x103   : > { %5135 = vmatmul.mubr.msk.f32.gmra.mrb[8].mxu0 %vm347_vm1, %v5691_v25 }
 0x104   : > { %5161 = vmatmul.mubr.msk.f32.gmra.mrb[8].mxu1 %vm347_vm1, %v5694_v26  ;;  %5137 = vmatprep.mubr.msk.f32.mxu0 %vm347_vm1, %v5697_v27 }
 0x105   : > { %5163 = vmatprep.mubr.msk.f32.mxu1 %vm347_vm1, %v5700_v28 }
 0x107   : > { %5138 = vmatmul.mubr.msk.f32.gmra.mrb[10].mxu0 %vm347_vm1, %v5711_v29 }
 0x108   : > { %5164 = vmatmul.mubr.msk.f32.gmra.mrb[10].mxu1 %vm347_vm1, %v5714_v30  ;;  %5140 = vmatprep.mubr.msk.f32.mxu0 %vm347_vm1, %v5717_v31 }
 0x109   : > { %5166 = vmatprep.mubr.msk.f32.mxu1 %vm347_vm1, %v5720_v32 }
 0x10b   : > { %5141 = vmatmul.mubr.msk.f32.gmra.mrb[12].mxu0 %vm347_vm1, %v5737_v33 }
 0x10c   : > { %5167 = vmatmul.mubr.msk.f32.gmra.mrb[12].mxu1 %vm347_vm1, %v5740_v34  ;;  %5143 = vmatprep.mubr.msk.f32.mxu0 %vm347_vm1, %v6057_v38 }
 0x10d   : > { %5169 = vmatprep.mubr.msk.f32.mxu1 %vm347_vm1, %v6131_v4 }
 0x10f   : > { %5144 = vmatmul.mubr.msk.f32.gmra.mrb[14].mxu0 %vm347_vm1, %v2968_v39 }
 0x110   : > { %5170 = vmatmul.mubr.msk.f32.gmra.mrb[14].mxu1 %vm347_vm1, %v3359_v6  ;;  %5174 = vmatprep.mubr.msk.f32.mxu0 %vm347_vm1, %v5589_v7  ;;  %v3750_v7 = vld [vmem:[%s5853_s19 + $0x88] sm:$0xff] }
 0x111   : > { %5200 = vmatprep.mubr.msk.f32.mxu1 %vm347_vm1, %v5878_v54 }
 0x113   : > { %5175 = vmatmul.mubr.msk.f32.vlgmr.msra.gmra.mrb[0].mxu0 %vm347_vm1, %v5606_v10 }
 0x114   : > { %5201 = vmatmul.mubr.msk.f32.vlgmr.msra.gmra.mrb[0].mxu1 %vm347_vm1, %v5890_v56  ;;  %5177 = vmatprep.mubr.msk.f32.mxu0 %vm347_vm1, %v5616_v12 }
 0x115   : > { %5203 = vmatprep.mubr.msk.f32.mxu1 %vm347_vm1, %v5897_v57 }
 0x117   : > { %5178 = vmatmul.mubr.msk.f32.gmra.mrb[2].mxu0 %vm347_vm1, %v5634_v14 }
 0x118   : > { %5204 = vmatmul.mubr.msk.f32.gmra.mrb[2].mxu1 %vm347_vm1, %v5910_v58  ;;  %5180 = vmatprep.mubr.msk.f32.mxu0 %vm347_vm1, %v5640_v16 }
 0x119   : > { %5206 = vmatprep.mubr.msk.f32.mxu1 %vm347_vm1, %v5913_v59 }
 0x11b   : > { %5181 = vmatmul.mubr.msk.f32.gmra.mrb[4].mxu0 %vm347_vm1, %v5654_v18 }
 0x11c   : > { %5207 = vmatmul.mubr.msk.f32.gmra.mrb[4].mxu1 %vm347_vm1, %v5924_v60  ;;  %5183 = vmatprep.mubr.msk.f32.mxu0 %vm347_vm1, %v5660_v20 }
 0x11d   : > { %5209 = vmatprep.mubr.msk.f32.mxu1 %vm347_vm1, %v5927_v61 }
 0x11f   : > { %5184 = vmatmul.mubr.msk.f32.gmra.mrb[6].mxu0 %vm347_vm1, %v5674_v22 }
 0x120   : > { %5210 = vmatmul.mubr.msk.f32.gmra.mrb[6].mxu1 %vm347_vm1, %v5938_v62  ;;  %5186 = vmatprep.mubr.msk.f32.mxu0 %vm347_vm1, %v5680_v24 }
 0x121   : > { %5212 = vmatprep.mubr.msk.f32.mxu1 %vm347_vm1, %v5941_v63 }
 0x123   : > { %5187 = vmatmul.mubr.msk.f32.gmra.mrb[8].mxu0 %vm347_vm1, %v5694_v26 }
 0x124   : > { %5213 = vmatmul.mubr.msk.f32.gmra.mrb[8].mxu1 %vm347_vm1, %v5952_v0  ;;  %5189 = vmatprep.mubr.msk.f32.mxu0 %vm347_vm1, %v5700_v28 }
 0x125   : > { %5215 = vmatprep.mubr.msk.f32.mxu1 %vm347_vm1, %v5955_v1 }
 0x127   : > { %5190 = vmatmul.mubr.msk.f32.gmra.mrb[10].mxu0 %vm347_vm1, %v5714_v30 }
 0x128   : > { %5216 = vmatmul.mubr.msk.f32.gmra.mrb[10].mxu1 %vm347_vm1, %v5966_v2  ;;  %5192 = vmatprep.mubr.msk.f32.mxu0 %vm347_vm1, %v5720_v32 }
 0x129   : > { %5218 = vmatprep.mubr.msk.f32.mxu1 %vm347_vm1, %v5969_v3 }
 0x12b   : > { %5193 = vmatmul.mubr.msk.f32.gmra.mrb[12].mxu0 %vm347_vm1, %v5740_v34 }
 0x12c   : > { %5219 = vmatmul.mubr.msk.f32.gmra.mrb[12].mxu1 %vm347_vm1, %v5980_v8  ;;  %5195 = vmatprep.mubr.msk.f32.mxu0 %vm347_vm1, %v6131_v4 }
 0x12d   : > { %5221 = vmatprep.mubr.msk.f32.mxu1 %vm347_vm1, %v6205_v5 }
 0x12f   : > { %5196 = vmatmul.mubr.msk.f32.gmra.mrb[14].mxu0 %vm347_vm1, %v3359_v6 }
 0x130   : > { %5222 = vmatmul.mubr.msk.f32.gmra.mrb[14].mxu1 %vm347_vm1, %v3750_v7 }
 0x1e6   : > { %v5176_v9 = vpop.f32.mrb[0].mxu0 }
 0x1e7   : > { %v5202_v10 = vpop.f32.mrb[0].mxu1  ;;  %v3640_v11 = vpop.f32.mrb[1].mxu0 }
 0x1e8   : > { %v3865_v12 = vpop.f32.mrb[1].mxu1  ;;  %v3961_v13 = vmax.f32 %v3640_v11, %v5176_v9 }
 0x1e9   : > { %v3962_v14 = vmax.f32 %v3865_v12, %v5202_v10 }
 0x1ea   : > { %v5179_v17 = vpop.f32.mrb[2].mxu0 }
 0x1eb   : > { %v3963_v16 = vmax.f32 %v3961_v13, %v3962_v14  ;;  %v5205_v18 = vpop.f32.mrb[2].mxu1  ;;  %v3650_v19 = vpop.f32.mrb[3].mxu0 }
 0x1ec   : > { %v3875_v20 = vpop.f32.mrb[3].mxu1  ;;  %v3974_v22 = vmax.f32 %v3650_v19, %v5179_v17 }
 0x1ed   : > { %v3970_v21 = vadd.f32 %v6413_v15, %v3963_v16  ;;  %v3975_v23 = vmax.f32 %v3875_v20, %v5205_v18 }
 0x1ee   : > { %v5182_v26 = vpop.f32.mrb[4].mxu0 }
 0x1ef   : > { %v3971_v24 = vmax.f32 %v3970_v21, 0.0  ;;  %v3976_v25 = vmax.f32 %v3974_v22, %v3975_v23  ;;  %v5208_v27 = vpop.f32.mrb[4].mxu1  ;;  %v3660_v28 = vpop.f32.mrb[5].mxu0 }
 0x1f0   : > { %v3885_v29 = vpop.f32.mrb[5].mxu1  ;;  %v3981_v31 = vmax.f32 %v3660_v28, %v5182_v26 }
 0x1f1   : > { %3973 = vst.msk [vmem:[%s6420_s13] sm:$0xff] %vm3972_vm2, %v3971_v24  ;;  %v3977_v30 = vadd.f32 %v6413_v15, %v3976_v25  ;;  %v3982_v32 = vmax.f32 %v3885_v29, %v5208_v27 }
 0x1f2   : > { %v5185_v40 = vpop.f32.mrb[6].mxu0 }
 0x1f3   : > { %v3978_v33 = vmax.f32 %v3977_v30, 0.0  ;;  %v3983_v34 = vmax.f32 %v3981_v31, %v3982_v32  ;;  %v5211_v41 = vpop.f32.mrb[6].mxu1  ;;  %v3670_v42 = vpop.f32.mrb[7].mxu0 }
 0x1f4   : > { %v3895_v43 = vpop.f32.mrb[7].mxu1  ;;  %v3988_v45 = vmax.f32 %v3670_v42, %v5185_v40 }
 0x1f5   : > { %4440 = vst.msk [vmem:[%s6420_s13 + $0x8] sm:$0xff] %vm3972_vm2, %v3978_v33  ;;  %v3984_v44 = vadd.f32 %v6413_v15, %v3983_v34  ;;  %v3989_v46 = vmax.f32 %v3895_v43, %v5211_v41 }
 0x1f6   : > { %v5188_v49 = vpop.f32.mrb[8].mxu0 }
 0x1f7   : > { %v3985_v47 = vmax.f32 %v3984_v44, 0.0  ;;  %v3990_v48 = vmax.f32 %v3988_v45, %v3989_v46  ;;  %v5214_v50 = vpop.f32.mrb[8].mxu1  ;;  %v3680_v51 = vpop.f32.mrb[9].mxu0 }
 0x1f8   : > { %v3905_v54 = vpop.f32.mrb[9].mxu1  ;;  %v3995_v57 = vmax.f32 %v3680_v51, %v5188_v49 }
 0x1f9   : > { %4441 = vst.msk [vmem:[%s6420_s13 + $0x10] sm:$0xff] %vm3972_vm2, %v3985_v47  ;;  %v3991_v56 = vadd.f32 %v6413_v15, %v3990_v48  ;;  %v3996_v58 = vmax.f32 %v3905_v54, %v5214_v50 }
 0x1fa   : > { %v5191_v61 = vpop.f32.mrb[10].mxu0 }
 0x1fb   : > { %v3992_v59 = vmax.f32 %v3991_v56, 0.0  ;;  %v3997_v60 = vmax.f32 %v3995_v57, %v3996_v58  ;;  %v5217_v62 = vpop.f32.mrb[10].mxu1  ;;  %v3690_v63 = vpop.f32.mrb[11].mxu0 }
 0x1fc   : > { %v3915_v0 = vpop.f32.mrb[11].mxu1  ;;  %v4002_v2 = vmax.f32 %v3690_v63, %v5191_v61 }
 0x1fd   : > { %4442 = vst.msk [vmem:[%s6420_s13 + $0x18] sm:$0xff] %vm3972_vm2, %v3992_v59  ;;  %v3998_v1 = vadd.f32 %v6413_v15, %v3997_v60  ;;  %v4003_v3 = vmax.f32 %v3915_v0, %v5217_v62 }
 0x1fe   : > { %v5194_v36 = vpop.f32.mrb[12].mxu0 }
 0x1ff   : > { %v3999_v8 = vmax.f32 %v3998_v1, 0.0  ;;  %v4004_v35 = vmax.f32 %v4002_v2, %v4003_v3  ;;  %v5220_v38 = vpop.f32.mrb[12].mxu1  ;;  %v3700_v52 = vpop.f32.mrb[13].mxu0 }
 0x200   : > { %v3925_v4 = vpop.f32.mrb[13].mxu1  ;;  %v4009_v5 = vmax.f32 %v3700_v52, %v5194_v36 }
 0x201   : > { %4443 = vst.msk [vmem:[%s6420_s13 + $0x20] sm:$0xff] %vm3972_vm2, %v3999_v8  ;;  %v4005_v55 = vadd.f32 %v6413_v15, %v4004_v35  ;;  %v4010_v53 = vmax.f32 %v3925_v4, %v5220_v38 }
 0x202   : > { %v5197_v6 = vpop.f32.mrb[14].mxu0 }
 0x203   : > { %v4006_v37 = vmax.f32 %v4005_v55, 0.0  ;;  %v4011_v39 = vmax.f32 %v4009_v5, %v4010_v53  ;;  %v5223_v7 = vpop.f32.mrb[14].mxu1  ;;  %v3710_v9 = vpop.f32.mrb[15].mxu0 }
 0x204   : > { %v3935_v10 = vpop.f32.mrb[15].mxu1  ;;  %v4016_v12 = vmax.f32 %v3710_v9, %v5197_v6 }
 0x205   : > { %4444 = vst.msk [vmem:[%s6420_s13 + $0x28] sm:$0xff] %vm3972_vm2, %v4006_v37  ;;  %v4012_v11 = vadd.f32 %v6413_v15, %v4011_v39  ;;  %v4017_v13 = vmax.f32 %v3935_v10, %v5223_v7 }
 0x207   : > { %v4013_v14 = vmax.f32 %v4012_v11, 0.0  ;;  %v4018_v16 = vmax.f32 %v4016_v12, %v4017_v13 }
 0x209   : > { %4445 = vst.msk [vmem:[%s6420_s13 + $0x30] sm:$0xff] %vm3972_vm2, %v4013_v14  ;;  %v4019_v17 = vadd.f32 %v6413_v15, %v4018_v16 }
 0x20b   : > { %v4020_v18 = vmax.f32 %v4019_v17, 0.0 }
 0x20d   : > { %4446 = vst.msk [vmem:[%s6420_s13 + $0x38] sm:$0xff] %vm3972_vm2, %v4020_v18 }
 0x20e PF: > { %s16_s21 = sadd.s32 1, %s5495_s21  }
 0x20f   : > { %p13_p4 = scmp.ge.s32.totalorder %s16_s21, 4  }
 0x211   :  { %15 = sbr.rel (!%p13_p4) target bundleno = 1 (0x1), region = 98 }

// kernel: cnn_transformer_forward.7
= control target key start
LH: loop header
LB: loop body
LE: loop exit
PB: predicated region body
PF: predicated region fallthrough
CT: control target
= control target key end

     0   :  { %s5209_s0 = inlined_call_operand.vmem [shape: f32[2,512], index: 0, kind: input, shape index: {}]   ;;  %s5210_s1 = inlined_call_operand.vmem [shape: f32[512,256], index: 1, kind: input, shape index: {}]   ;;  %s5211_s2 = inlined_call_operand.vmem [shape: f32[1,256], index: 2, kind: input, shape index: {}]   ;;  %s5212_s3 = inlined_call_operand.vmem [shape: f32[2,256,256], index: 3, kind: input, shape index: {}]   ;;  %s5213_s4 = inlined_call_operand.vmem [shape: f32[2,1,256], index: 4, kind: input, shape index: {}]   ;;  %s5214_s5 = inlined_call_operand.vmem [shape: f32[2,256,256], index: 5, kind: input, shape index: {}]   ;;  %s5215_s6 = inlined_call_operand.vmem [shape: f32[2,1,256], index: 6, kind: input, shape index: {}]   ;;  %s5216_s7 = inlined_call_operand.vmem [shape: f32[2,1,256], index: 7, kind: input, shape index: {}]   ;;  %s5217_s8 = inlined_call_operand.vmem [shape: f32[2,1,256], index: 8, kind: input, shape index: {}]   ;;  %s5218_s9 = inlined_call_operand.vmem [shape: f32[2,256,256], index: 9, kind: input, shape index: {}]   ;;  %s5219_s10 = inlined_call_operand.vmem [shape: f32[2,1,256], index: 10, kind: input, shape index: {}]   ;;  %s5220_s11 = inlined_call_operand.vmem [shape: f32[2,256,256], index: 11, kind: input, shape index: {}]   ;;  %s5221_s12 = inlined_call_operand.vmem [shape: f32[2,1,256], index: 12, kind: input, shape index: {}]   ;;  %s5222_s13 = inlined_call_operand.vmem [shape: f32[2,1,256], index: 13, kind: input, shape index: {}]   ;;  %s5223_s14 = inlined_call_operand.vmem [shape: f32[2,1,256], index: 14, kind: input, shape index: {}]   ;;  %s5224_s15 = inlined_call_operand.vmem [shape: f32[256,16], index: 15, kind: input, shape index: {}]   ;;  %s5225_s16 = inlined_call_operand.vmem [shape: f32[1,16], index: 16, kind: input, shape index: {}]   ;;  %s5226_s17 = inlined_call_operand.hbm [shape: f32[2,16], index: 17, kind: output, shape index: {}]  }
   0x1   :  { %5228 = sst [smem:[#allocation5_spill]] %s5209_s0 }
   0x2   :  { %5229 = sst [smem:[#allocation6_spill]] %s5210_s1 }
   0x3   :  { %s5230_s26 = sld [smem:[#allocation6_spill]]  ;;  %v188_v25 = vlaneseq  ;;  %v2892_v26 = vmov 1983009808   ;;  %s5231_s27 = sld [smem:[#allocation5_spill]] }
   0x4   :  { %v201_v27 = vunpack.c.l.s4 %v2892_v26  ;;  %v367_v26 = vld [vmem:[%s5212_s3 + $0x28] sm:$0xff] }
   0x5   :  { %v3050_v34 = vshrl.u32 %v188_v25, 7  ;;  %v364_v25 = vld [vmem:[%s5212_s3 + $0x10] sm:$0xff] }
   0x6   :  { %v202_v35 = vunpack.c.0.s8 %v201_v27  ;;  %v369_v27 = vld [vmem:[%s5212_s3 + $0x38] sm:$0xff] }
   0x8   :  { %v3065_v42 = vsub.s32 %v202_v35, %v3050_v34 }
   0x9   :  { %v59_v0 = vld [vmem:[%s5230_s26 + $0x8] sm:$0xff]  ;;  %v61_v1 = vld [vmem:[%s5230_s26 + $0x18] sm:$0xff]  ;;  %v58_v2 = vld [vmem:[%s5230_s26] sm:$0xff] }
   0xa   :  { %v2181_v3 = vpack.c.bf16 %v61_v1, %v59_v0  ;;  %v60_v4 = vld [vmem:[%s5230_s26 + $0x10] sm:$0xff]  ;;  %v63_v5 = vld [vmem:[%s5230_s26 + $0x28] sm:$0xff]  ;;  %v65_v6 = vld [vmem:[%s5230_s26 + $0x38] sm:$0xff] }
   0xb   :  { %v2183_v7 = vpack.c.bf16 %v60_v4, %v58_v2  ;;  %v2185_v8 = vpack.c.bf16 %v65_v6, %v63_v5  ;;  %v62_v9 = vld [vmem:[%s5230_s26 + $0x20] sm:$0xff]  ;;  %v64_v10 = vld [vmem:[%s5230_s26 + $0x30] sm:$0xff]  ;;  %v67_v11 = vld [vmem:[%s5230_s26 + $0x48] sm:$0xff] }
   0xc   :  { %2182 = vmatprep.subr.bf16.mxu0 %v2181_v3  ;;  %v69_v12 = vld [vmem:[%s5230_s26 + $0x58] sm:$0xff]  ;;  %v2187_v13 = vpack.c.bf16 %v64_v10, %v62_v9  ;;  %v66_v15 = vld [vmem:[%s5230_s26 + $0x40] sm:$0xff]  ;;  %v68_v16 = vld [vmem:[%s5230_s26 + $0x50] sm:$0xff] }
   0xd   :  { %2184 = vmatpush1.bf16.msra.mxu0 %v2183_v7  ;;  %v2189_v14 = vpack.c.bf16 %v69_v12, %v67_v11  ;;  %v71_v17 = vld [vmem:[%s5230_s26 + $0x68] sm:$0xff]  ;;  %v73_v18 = vld [vmem:[%s5230_s26 + $0x78] sm:$0xff]  ;;  %v2191_v19 = vpack.c.bf16 %v68_v16, %v66_v15  ;;  %v70_v21 = vld [vmem:[%s5230_s26 + $0x60] sm:$0xff] }
   0xe   :  { %2186 = vmatprep.subr.bf16.mxu0 %v2185_v8  ;;  %v2193_v20 = vpack.c.bf16 %v73_v18, %v71_v17  ;;  %v72_v22 = vld [vmem:[%s5230_s26 + $0x70] sm:$0xff]  ;;  %v75_v23 = vld [vmem:[%s5230_s26 + $0x88] sm:$0xff]  ;;  %v77_v24 = vld [vmem:[%s5230_s26 + $0x98] sm:$0xff] }
   0xf   :  { %v2195_v28 = vpack.c.bf16 %v72_v22, %v70_v21  ;;  %v2197_v29 = vpack.c.bf16 %v77_v24, %v75_v23  ;;  %v74_v30 = vld [vmem:[%s5230_s26 + $0x80] sm:$0xff]  ;;  %v76_v31 = vld [vmem:[%s5230_s26 + $0x90] sm:$0xff]  ;;  %v79_v32 = vld [vmem:[%s5230_s26 + $0xa8] sm:$0xff] }
  0x10   :  { %v81_v33 = vld [vmem:[%s5230_s26 + $0xb8] sm:$0xff]  ;;  %v2199_v36 = vpack.c.bf16 %v76_v31, %v74_v30  ;;  %v78_v38 = vld [vmem:[%s5230_s26 + $0xa0] sm:$0xff]  ;;  %v80_v39 = vld [vmem:[%s5230_s26 + $0xb0] sm:$0xff]  ;;  %v2313_v30 = vpack.c.bf16 %v369_v27, %v367_v26 }
  0x11   :  { %2188 = vmatpush1.bf16.msra.mxu0 %v2187_v13  ;;  %v2201_v37 = vpack.c.bf16 %v81_v33, %v79_v32  ;;  %v83_v40 = vld [vmem:[%s5230_s26 + $0xc8] sm:$0xff]  ;;  %v85_v41 = vld [vmem:[%s5230_s26 + $0xd8] sm:$0xff]  ;;  %v2203_v43 = vpack.c.bf16 %v80_v39, %v78_v38  ;;  %v82_v45 = vld [vmem:[%s5230_s26 + $0xc0] sm:$0xff] }
  0x12   :  { %2190 = vmatprep.subr.bf16.mxu0 %v2189_v14  ;;  %v2205_v44 = vpack.c.bf16 %v85_v41, %v83_v40  ;;  %v84_v46 = vld [vmem:[%s5230_s26 + $0xd0] sm:$0xff]  ;;  %v3076_v47 = vld [vmem:[%s5231_s27] sm:$0xff]  ;;  %v87_v48 = vld [vmem:[%s5230_s26 + $0xe8] sm:$0xff] }
  0x13   :  { %v89_v49 = vld [vmem:[%s5230_s26 + $0xf8] sm:$0xff]  ;;  %v3086_v50 = vrot.slane %v3076_v47, %v3065_v42  ;;  %v2207_v51 = vpack.c.bf16 %v84_v46, %v82_v45  ;;  %v86_v54 = vld [vmem:[%s5230_s26 + $0xe0] sm:$0xff]  ;;  %v88_v55 = vld [vmem:[%s5230_s26 + $0xf0] sm:$0xff] }
  0x14   :  { %v2209_v53 = vpack.c.bf16 %v89_v49, %v87_v48  ;;  %v91_v56 = vld [vmem:[%s5230_s26 + $0x108] sm:$0xff]  ;;  %v93_v57 = vld [vmem:[%s5230_s26 + $0x118] sm:$0xff]  ;;  %v2211_v58 = vpack.c.bf16 %v88_v55, %v86_v54  ;;  %v90_v60 = vld [vmem:[%s5230_s26 + $0x100] sm:$0xff] }
  0x15   :  { %2192 = vmatpush1.bf16.msra.mxu0 %v2191_v19  ;;  %v214_v52 = vcombine.high %v3086_v50, %v3086_v50  ;;  %v2213_v59 = vpack.c.bf16 %v93_v57, %v91_v56  ;;  %v92_v61 = vld [vmem:[%s5230_s26 + $0x110] sm:$0xff]  ;;  %v95_v62 = vld [vmem:[%s5230_s26 + $0x128] sm:$0xff]  ;;  %v97_v63 = vld [vmem:[%s5230_s26 + $0x138] sm:$0xff] }
  0x16   :  { %2194 = vmatprep.subr.bf16.mxu0 %v2193_v20  ;;  %v2215_v0 = vpack.c.bf16 %v92_v61, %v90_v60  ;;  %v2217_v1 = vpack.c.bf16 %v97_v63, %v95_v62  ;;  %v94_v2 = vld [vmem:[%s5230_s26 + $0x120] sm:$0xff]  ;;  %v96_v3 = vld [vmem:[%s5230_s26 + $0x130] sm:$0xff]  ;;  %v99_v4 = vld [vmem:[%s5230_s26 + $0x148] sm:$0xff] }
  0x17   :  { %284 = vmatprep.mubr.f32.mxu0 %v214_v52  ;;  %v101_v5 = vld [vmem:[%s5230_s26 + $0x158] sm:$0xff]  ;;  %v2219_v6 = vpack.c.bf16 %v96_v3, %v94_v2  ;;  %v98_v8 = vld [vmem:[%s5230_s26 + $0x140] sm:$0xff]  ;;  %v100_v9 = vld [vmem:[%s5230_s26 + $0x150] sm:$0xff] }
  0x18   :  { %v2221_v7 = vpack.c.bf16 %v101_v5, %v99_v4  ;;  %v103_v10 = vld [vmem:[%s5230_s26 + $0x168] sm:$0xff]  ;;  %v105_v11 = vld [vmem:[%s5230_s26 + $0x178] sm:$0xff]  ;;  %v2223_v12 = vpack.c.bf16 %v100_v9, %v98_v8  ;;  %v102_v14 = vld [vmem:[%s5230_s26 + $0x160] sm:$0xff]  ;;  %v199_v4 = vcombine.high %v3076_v47, %v3076_v47 }
  0x19   :  { %2196 = vmatpush1.bf16.msra.mxu0 %v2195_v28  ;;  %v2225_v13 = vpack.c.bf16 %v105_v11, %v103_v10  ;;  %v104_v15 = vld [vmem:[%s5230_s26 + $0x170] sm:$0xff]  ;;  %v107_v16 = vld [vmem:[%s5230_s26 + $0x188] sm:$0xff]  ;;  %v109_v17 = vld [vmem:[%s5230_s26 + $0x198] sm:$0xff] }
  0x1a   :  { %2198 = vmatprep.subr.bf16.mxu0 %v2197_v29  ;;  %v106_v18 = vld [vmem:[%s5230_s26 + $0x180] sm:$0xff]  ;;  %v108_v19 = vld [vmem:[%s5230_s26 + $0x190] sm:$0xff]  ;;  %v363_v20 = vld [vmem:[%s5212_s3 + $0x8] sm:$0xff]  ;;  %v2227_v23 = vpack.c.bf16 %v104_v15, %v102_v14  ;;  %v2229_v28 = vpack.c.bf16 %v109_v17, %v107_v16  ;;  %v3267_v15 = vrot.slane %v199_v4, %v3065_v42 }
  0x1b   :  { %v365_v21 = vld [vmem:[%s5212_s3 + $0x18] sm:$0xff]  ;;  %v362_v22 = vld [vmem:[%s5212_s3] sm:$0xff]  ;;  %v368_v32 = vld [vmem:[%s5212_s3 + $0x30] sm:$0xff]  ;;  %v2231_v39 = vpack.c.bf16 %v108_v19, %v106_v18 }
  0x1c   :  { %v2309_v24 = vpack.c.bf16 %v365_v21, %v363_v20  ;;  %v2311_v29 = vpack.c.bf16 %v364_v25, %v362_v22  ;;  %v366_v31 = vld [vmem:[%s5212_s3 + $0x20] sm:$0xff]  ;;  %v371_v33 = vld [vmem:[%s5212_s3 + $0x48] sm:$0xff]  ;;  %v112_v46 = vld [vmem:[%s5230_s26 + $0x1b0] sm:$0xff] }
  0x1d   :  { %2200 = vmatpush1.bf16.msra.mxu0 %v2199_v36  ;;  %v111_v35 = vld [vmem:[%s5230_s26 + $0x1a8] sm:$0xff]  ;;  %v113_v36 = vld [vmem:[%s5230_s26 + $0x1b8] sm:$0xff]  ;;  %v2315_v38 = vpack.c.bf16 %v368_v32, %v366_v31  ;;  %v110_v40 = vld [vmem:[%s5230_s26 + $0x1a0] sm:$0xff] }
  0x1e   :  { %2202 = vmatprep.subr.bf16.mxu0 %v2201_v37  ;;  %2310 = vmatprep.subr.bf16.mxu1 %v2309_v24  ;;  %v373_v37 = vld [vmem:[%s5212_s3 + $0x58] sm:$0xff]  ;;  %v2233_v45 = vpack.c.bf16 %v113_v36, %v111_v35  ;;  %v375_v48 = vld [vmem:[%s5212_s3 + $0x68] sm:$0xff]  ;;  %v2235_v54 = vpack.c.bf16 %v112_v46, %v110_v40  ;;  %v114_v55 = vld [vmem:[%s5230_s26 + $0x1c0] sm:$0xff] }
  0x1f   :  { %2312 = vmatpush1.bf16.msra.mxu1 %v2311_v29  ;;  %v2317_v41 = vpack.c.bf16 %v373_v37, %v371_v33  ;;  %v377_v49 = vld [vmem:[%s5212_s3 + $0x78] sm:$0xff]  ;;  %v374_v57 = vld [vmem:[%s5212_s3 + $0x60] sm:$0xff]  ;;  %v116_v60 = vld [vmem:[%s5230_s26 + $0x1d0] sm:$0xff] }
  0x20   :  { %2314 = vmatprep.subr.bf16.mxu1 %v2313_v30  ;;  %v117_v52 = vld [vmem:[%s5230_s26 + $0x1d8] sm:$0xff]  ;;  %v2321_v56 = vpack.c.bf16 %v377_v49, %v375_v48  ;;  %v379_v61 = vld [vmem:[%s5212_s3 + $0x88] sm:$0xff]  ;;  %v2239_v2 = vpack.c.bf16 %v116_v60, %v114_v55  ;;  %v118_v3 = vld [vmem:[%s5230_s26 + $0x1e0] sm:$0xff] }
  0x21   :  { %2204 = vmatpush1.bf16.msra.mxu0 %v2203_v43  ;;  %v370_v43 = vld [vmem:[%s5212_s3 + $0x40] sm:$0xff]  ;;  %v381_v62 = vld [vmem:[%s5212_s3 + $0x98] sm:$0xff]  ;;  %v119_v63 = vld [vmem:[%s5230_s26 + $0x1e8] sm:$0xff] }
  0x22   :  { %2206 = vmatprep.subr.bf16.mxu0 %v2205_v44  ;;  %v372_v44 = vld [vmem:[%s5212_s3 + $0x50] sm:$0xff]  ;;  %v2325_v5 = vpack.c.bf16 %v381_v62, %v379_v61  ;;  %v383_v47 = vld [vmem:[%s5212_s3 + $0xa8] sm:$0xff]  ;;  %v385_v10 = vld [vmem:[%s5212_s3 + $0xb8] sm:$0xff] }
  0x23   :  { %2316 = vmatpush1.bf16.msra.mxu1 %v2315_v38  ;;  %v120_v9 = vld [vmem:[%s5230_s26 + $0x1f0] sm:$0xff]  ;;  %v123_v11 = vld [vmem:[%s5230_s26 + $0x208] sm:$0xff]  ;;  %v2329_v16 = vpack.c.bf16 %v385_v10, %v383_v47  ;;  %v382_v17 = vld [vmem:[%s5212_s3 + $0xa0] sm:$0xff] }
  0x24   :  { %2318 = vmatprep.subr.bf16.mxu1 %v2317_v41  ;;  %v2243_v14 = vpack.c.bf16 %v120_v9, %v118_v3  ;;  %v384_v18 = vld [vmem:[%s5212_s3 + $0xb0] sm:$0xff]  ;;  %v122_v20 = vld [vmem:[%s5230_s26 + $0x200] sm:$0xff]  ;;  %v127_v21 = vld [vmem:[%s5230_s26 + $0x228] sm:$0xff] }
  0x25   :  { %2208 = vmatpush1.bf16.msra.mxu0 %v2207_v51  ;;  %v115_v51 = vld [vmem:[%s5230_s26 + $0x1c8] sm:$0xff]  ;;  %v124_v42 = vld [vmem:[%s5230_s26 + $0x210] sm:$0xff]  ;;  %v129_v22 = vld [vmem:[%s5230_s26 + $0x238] sm:$0xff]  ;;  %v2331_v25 = vpack.c.bf16 %v384_v18, %v382_v17 }
  0x26   :  { %2210 = vmatprep.subr.bf16.mxu0 %v2209_v53  ;;  %v2319_v53 = vpack.c.bf16 %v372_v44, %v370_v43  ;;  %v389_v24 = vld [vmem:[%s5212_s3 + $0xd8] sm:$0xff] }
  0x28   :  { %2320 = vmatpush1.bf16.msra.mxu1 %v2319_v53 }
  0x29   :  { %2212 = vmatpush1.bf16.msra.mxu0 %v2211_v58  ;;  %v376_v58 = vld [vmem:[%s5212_s3 + $0x70] sm:$0xff]  ;;  %2322 = vmatprep.subr.bf16.mxu1 %v2321_v56 }
  0x2a   :  { %2214 = vmatprep.subr.bf16.mxu0 %v2213_v59  ;;  %v2237_v59 = vpack.c.bf16 %v117_v52, %v115_v51 }
  0x2d   :  { %2216 = vmatpush1.bf16.msra.mxu0 %v2215_v0  ;;  %v121_v0 = vld [vmem:[%s5230_s26 + $0x1f8] sm:$0xff] }
  0x2e   :  { %2218 = vmatprep.subr.bf16.mxu0 %v2217_v1  ;;  %v2323_v1 = vpack.c.bf16 %v376_v58, %v374_v57  ;;  %v2241_v8 = vpack.c.bf16 %v121_v0, %v119_v63 }
  0x30   :  { %2324 = vmatpush1.bf16.msra.mxu1 %v2323_v1 }
  0x31   :  { %2220 = vmatpush1.bf16.msra.mxu0 %v2219_v6  ;;  %v378_v6 = vld [vmem:[%s5212_s3 + $0x80] sm:$0xff]  ;;  %2326 = vmatprep.subr.bf16.mxu1 %v2325_v5 }
  0x32   :  { %2222 = vmatprep.subr.bf16.mxu0 %v2221_v7  ;;  %v380_v7 = vld [vmem:[%s5212_s3 + $0x90] sm:$0xff] }
  0x35   :  { %2224 = vmatpush1.bf16.msra.mxu0 %v2223_v12  ;;  %v125_v12 = vld [vmem:[%s5230_s26 + $0x218] sm:$0xff] }
  0x36   :  { %2226 = vmatprep.subr.bf16.mxu0 %v2225_v13  ;;  %v2327_v13 = vpack.c.bf16 %v380_v7, %v378_v6  ;;  %v2245_v19 = vpack.c.bf16 %v125_v12, %v123_v11 }
  0x38   :  { %2328 = vmatpush1.bf16.msra.mxu1 %v2327_v13 }
  0x39   :  { %2228 = vmatpush1.bf16.msra.mxu0 %v2227_v23  ;;  %v387_v23 = vld [vmem:[%s5212_s3 + $0xc8] sm:$0xff] }
  0x3a   :  { %2230 = vmatprep.subr.bf16.mxu0 %v2229_v28 }
  0x3d   :  { %2232 = vmatpush1.bf16.msra.mxu0 %v2231_v39 }
  0x3e   :  { %2234 = vmatprep.subr.bf16.mxu0 %v2233_v45 }
  0x41   :  { %2236 = vmatpush1.bf16.msra.mxu0 %v2235_v54 }
  0x42   :  { %2238 = vmatprep.subr.bf16.mxu0 %v2237_v59 }
  0x45   :  { %2240 = vmatpush1.bf16.msra.mxu0 %v2239_v2 }
  0x46   :  { %2242 = vmatprep.subr.bf16.mxu0 %v2241_v8 }
  0x47   :  { %22 = vsyncpa [#allocation3], 0  ;;  %v2247_v26 = vpack.c.bf16 %v124_v42, %v122_v20  ;;  %v126_v27 = vld [vmem:[%s5230_s26 + $0x220] sm:$0xff]  ;;  %v215_v28 = vcombine.high %v3267_v15, %v3267_v15  ;;  %2330 = vmatprep.subr.bf16.mxu1 %v2329_v16  ;;  %v388_v30 = vld [vmem:[%s5212_s3 + $0xd0] sm:$0xff]  ;;  %v2249_v31 = vpack.c.bf16 %v129_v22, %v127_v21  ;;  %v2333_v33 = vpack.c.bf16 %v389_v24, %v387_v23 }
  0x48   :  { %v386_v29 = vld [vmem:[%s5212_s3 + $0xc0] sm:$0xff]  ;;  %v128_v32 = vld [vmem:[%s5230_s26 + $0x230] sm:$0xff]  ;;  %v391_v35 = vld [vmem:[%s5212_s3 + $0xe8] sm:$0xff]  ;;  %2332 = vmatpush1.bf16.msra.mxu1 %v2331_v25  ;;  %vm660_vm0 = vcmask 1041408   ;;  %vm1865_vm1 = vcmask 123904  }
  0x49   :  { %2244 = vmatpush1.bf16.msra.mxu0 %v2243_v14  ;;  %v393_v36 = vld [vmem:[%s5212_s3 + $0xf8] sm:$0xff]  ;;  %v131_v37 = vld [vmem:[%s5230_s26 + $0x248] sm:$0xff]  ;;  %v2335_v39 = vpack.c.bf16 %v388_v30, %v386_v29  ;;  %v2251_v40 = vpack.c.bf16 %v128_v32, %v126_v27  ;;  %v130_v41 = vld [vmem:[%s5230_s26 + $0x240] sm:$0xff]  ;;  %2334 = vmatprep.subr.bf16.mxu1 %v2333_v33 }
  0x4a   :  { %2246 = vmatprep.subr.bf16.mxu0 %v2245_v19  ;;  %v133_v38 = vld [vmem:[%s5230_s26 + $0x258] sm:$0xff]  ;;  %v2337_v43 = vpack.c.bf16 %v393_v36, %v391_v35  ;;  %v390_v44 = vld [vmem:[%s5212_s3 + $0xe0] sm:$0xff]  ;;  %v392_v45 = vld [vmem:[%s5212_s3 + $0xf0] sm:$0xff] }
  0x4b   :  { %v132_v46 = vld [vmem:[%s5230_s26 + $0x250] sm:$0xff]  ;;  %v395_v48 = vld [vmem:[%s5212_s3 + $0x108] sm:$0xff]  ;;  %v397_v49 = vld [vmem:[%s5212_s3 + $0x118] sm:$0xff]  ;;  %v2339_v53 = vpack.c.bf16 %v392_v45, %v390_v44 }
  0x4c   :  { %285 = vmatmul.mubr.f32.vlgmr.msra.gmra.mrb[0].mxu0 %v3086_v50  ;;  %v2253_v50 = vpack.c.bf16 %v133_v38, %v131_v37  ;;  %v135_v51 = vld [vmem:[%s5230_s26 + $0x268] sm:$0xff]  ;;  %v137_v52 = vld [vmem:[%s5230_s26 + $0x278] sm:$0xff]  ;;  %2336 = vmatpush1.bf16.msra.mxu1 %v2335_v39  ;;  %v2255_v54 = vpack.c.bf16 %v132_v46, %v130_v41  ;;  %v134_v55 = vld [vmem:[%s5230_s26 + $0x260] sm:$0xff]  ;;  %v2341_v56 = vpack.c.bf16 %v397_v49, %v395_v48 }
  0x4d   :  { %2248 = vmatpush1.bf16.msra.mxu0 %v2247_v26  ;;  %355 = vmatprep.mubr.f32.mxu0 %v215_v28  ;;  %v394_v57 = vld [vmem:[%s5212_s3 + $0x100] sm:$0xff]  ;;  %v396_v58 = vld [vmem:[%s5212_s3 + $0x110] sm:$0xff]  ;;  %v2257_v59 = vpack.c.bf16 %v137_v52, %v135_v51  ;;  %v399_v61 = vld [vmem:[%s5212_s3 + $0x128] sm:$0xff] }
  0x4e   :  { %2250 = vmatprep.subr.bf16.mxu0 %v2249_v31  ;;  %2338 = vmatprep.subr.bf16.mxu1 %v2337_v43  ;;  %v136_v60 = vld [vmem:[%s5230_s26 + $0x270] sm:$0xff]  ;;  %v401_v62 = vld [vmem:[%s5212_s3 + $0x138] sm:$0xff]  ;;  %v139_v63 = vld [vmem:[%s5230_s26 + $0x288] sm:$0xff]  ;;  %v2343_v1 = vpack.c.bf16 %v396_v58, %v394_v57 }
  0x4f   :  { %v141_v0 = vld [vmem:[%s5230_s26 + $0x298] sm:$0xff]  ;;  %v2259_v2 = vpack.c.bf16 %v136_v60, %v134_v55  ;;  %v138_v3 = vld [vmem:[%s5230_s26 + $0x280] sm:$0xff]  ;;  %v2345_v4 = vpack.c.bf16 %v401_v62, %v399_v61  ;;  %v400_v6 = vld [vmem:[%s5212_s3 + $0x130] sm:$0xff] }
  0x50   :  { %2340 = vmatpush1.bf16.msra.mxu1 %v2339_v53  ;;  %v398_v5 = vld [vmem:[%s5212_s3 + $0x120] sm:$0xff]  ;;  %v2261_v7 = vpack.c.bf16 %v141_v0, %v139_v63  ;;  %v140_v8 = vld [vmem:[%s5230_s26 + $0x290] sm:$0xff]  ;;  %v403_v9 = vld [vmem:[%s5212_s3 + $0x148] sm:$0xff] }
  0x51   :  { %2252 = vmatpush1.bf16.msra.mxu0 %v2251_v40  ;;  %2342 = vmatprep.subr.bf16.mxu1 %v2341_v56  ;;  %v405_v47 = vld [vmem:[%s5212_s3 + $0x158] sm:$0xff]  ;;  %v143_v10 = vld [vmem:[%s5230_s26 + $0x2a8] sm:$0xff]  ;;  %v2347_v12 = vpack.c.bf16 %v400_v6, %v398_v5  ;;  %v2263_v13 = vpack.c.bf16 %v140_v8, %v138_v3  ;;  %v142_v14 = vld [vmem:[%s5230_s26 + $0x2a0] sm:$0xff] }
  0x52   :  { %2254 = vmatprep.subr.bf16.mxu0 %v2253_v50  ;;  %v145_v11 = vld [vmem:[%s5230_s26 + $0x2b8] sm:$0xff]  ;;  %v2349_v16 = vpack.c.bf16 %v405_v47, %v403_v9  ;;  %v402_v17 = vld [vmem:[%s5212_s3 + $0x140] sm:$0xff]  ;;  %v404_v18 = vld [vmem:[%s5212_s3 + $0x150] sm:$0xff] }
  0x53   :  { %v2265_v19 = vpack.c.bf16 %v145_v11, %v143_v10  ;;  %v144_v20 = vld [vmem:[%s5230_s26 + $0x2b0] sm:$0xff]  ;;  %v407_v42 = vld [vmem:[%s5212_s3 + $0x168] sm:$0xff]  ;;  %v409_v21 = vld [vmem:[%s5212_s3 + $0x178] sm:$0xff]  ;;  %v2351_v24 = vpack.c.bf16 %v404_v18, %v402_v17 }
  0x54   :  { %2344 = vmatpush1.bf16.msra.mxu1 %v2343_v1  ;;  %v147_v22 = vld [vmem:[%s5230_s26 + $0x2c8] sm:$0xff]  ;;  %v149_v23 = vld [vmem:[%s5230_s26 + $0x2d8] sm:$0xff]  ;;  %v2267_v25 = vpack.c.bf16 %v144_v20, %v142_v14  ;;  %v146_v26 = vld [vmem:[%s5230_s26 + $0x2c0] sm:$0xff]  ;;  %v2353_v27 = vpack.c.bf16 %v409_v21, %v407_v42 }
  0x55   :  { %2256 = vmatpush1.bf16.msra.mxu0 %v2255_v54  ;;  %2346 = vmatprep.subr.bf16.mxu1 %v2345_v4  ;;  %v406_v28 = vld [vmem:[%s5212_s3 + $0x160] sm:$0xff]  ;;  %v408_v29 = vld [vmem:[%s5212_s3 + $0x170] sm:$0xff]  ;;  %v2269_v30 = vpack.c.bf16 %v149_v23, %v147_v22  ;;  %v411_v32 = vld [vmem:[%s5212_s3 + $0x188] sm:$0xff] }
  0x56   :  { %2258 = vmatprep.subr.bf16.mxu0 %v2257_v59  ;;  %v148_v31 = vld [vmem:[%s5230_s26 + $0x2d0] sm:$0xff]  ;;  %v413_v33 = vld [vmem:[%s5212_s3 + $0x198] sm:$0xff]  ;;  %v151_v35 = vld [vmem:[%s5230_s26 + $0x2e8] sm:$0xff]  ;;  %v2355_v37 = vpack.c.bf16 %v408_v29, %v406_v28 }
  0x57   :  { %v153_v36 = vld [vmem:[%s5230_s26 + $0x2f8] sm:$0xff]  ;;  %v2271_v38 = vpack.c.bf16 %v148_v31, %v146_v26  ;;  %v150_v39 = vld [vmem:[%s5230_s26 + $0x2e0] sm:$0xff]  ;;  %v2357_v40 = vpack.c.bf16 %v413_v33, %v411_v32  ;;  %v412_v43 = vld [vmem:[%s5212_s3 + $0x190] sm:$0xff] }
  0x58   :  { %2348 = vmatpush1.bf16.msra.mxu1 %v2347_v12  ;;  %v410_v41 = vld [vmem:[%s5212_s3 + $0x180] sm:$0xff]  ;;  %v2273_v44 = vpack.c.bf16 %v153_v36, %v151_v35  ;;  %v152_v45 = vld [vmem:[%s5230_s26 + $0x2f0] sm:$0xff]  ;;  %v415_v50 = vld [vmem:[%s5212_s3 + $0x1a8] sm:$0xff] }
  0x59   :  { %2260 = vmatpush1.bf16.msra.mxu0 %v2259_v2  ;;  %2350 = vmatprep.subr.bf16.mxu1 %v2349_v16  ;;  %v417_v46 = vld [vmem:[%s5212_s3 + $0x1b8] sm:$0xff]  ;;  %v155_v48 = vld [vmem:[%s5230_s26 + $0x308] sm:$0xff]  ;;  %v2359_v51 = vpack.c.bf16 %v412_v43, %v410_v41  ;;  %v2275_v52 = vpack.c.bf16 %v152_v45, %v150_v39  ;;  %v154_v53 = vld [vmem:[%s5230_s26 + $0x300] sm:$0xff] }
  0x5a   :  { %2262 = vmatprep.subr.bf16.mxu0 %v2261_v7  ;;  %v157_v49 = vld [vmem:[%s5230_s26 + $0x318] sm:$0xff]  ;;  %v2361_v54 = vpack.c.bf16 %v417_v46, %v415_v50  ;;  %v414_v55 = vld [vmem:[%s5212_s3 + $0x1a0] sm:$0xff]  ;;  %v416_v56 = vld [vmem:[%s5212_s3 + $0x1b0] sm:$0xff] }
  0x5b   :  { %v2277_v57 = vpack.c.bf16 %v157_v49, %v155_v48  ;;  %v156_v58 = vld [vmem:[%s5230_s26 + $0x310] sm:$0xff]  ;;  %v419_v59 = vld [vmem:[%s5212_s3 + $0x1c8] sm:$0xff]  ;;  %v421_v60 = vld [vmem:[%s5212_s3 + $0x1d8] sm:$0xff]  ;;  %v2363_v63 = vpack.c.bf16 %v416_v56, %v414_v55  ;;  %v3592_v55 = vsub.s32 1, %v3050_v34  ;;  %v3595_v56 = vsub.s32 0, %v3050_v34 }
  0x5c   :  { %2352 = vmatpush1.bf16.msra.mxu1 %v2351_v24  ;;  %v159_v61 = vld [vmem:[%s5230_s26 + $0x328] sm:$0xff]  ;;  %v161_v62 = vld [vmem:[%s5230_s26 + $0x338] sm:$0xff]  ;;  %v2279_v0 = vpack.c.bf16 %v156_v58, %v154_v53  ;;  %v2365_v1 = vpack.c.bf16 %v421_v60, %v419_v59  ;;  %v418_v2 = vld [vmem:[%s5212_s3 + $0x1c0] sm:$0xff] }
  0x5d   :  { %2264 = vmatpush1.bf16.msra.mxu0 %v2263_v13  ;;  %2354 = vmatprep.subr.bf16.mxu1 %v2353_v27  ;;  %v420_v3 = vld [vmem:[%s5212_s3 + $0x1d0] sm:$0xff]  ;;  %v2281_v4 = vpack.c.bf16 %v161_v62, %v159_v61  ;;  %v158_v5 = vld [vmem:[%s5230_s26 + $0x320] sm:$0xff]  ;;  %v163_v7 = vld [vmem:[%s5230_s26 + $0x348] sm:$0xff] }
  0x5e   :  { %2266 = vmatprep.subr.bf16.mxu0 %v2265_v19  ;;  %v160_v6 = vld [vmem:[%s5230_s26 + $0x330] sm:$0xff]  ;;  %v165_v8 = vld [vmem:[%s5230_s26 + $0x358] sm:$0xff]  ;;  %v2367_v9 = vpack.c.bf16 %v420_v3, %v418_v2  ;;  %v162_v11 = vld [vmem:[%s5230_s26 + $0x340] sm:$0xff] }
  0x5f   :  { %v2283_v47 = vpack.c.bf16 %v160_v6, %v158_v5  ;;  %v2285_v10 = vpack.c.bf16 %v165_v8, %v163_v7  ;;  %v164_v12 = vld [vmem:[%s5230_s26 + $0x350] sm:$0xff]  ;;  %v167_v13 = vld [vmem:[%s5230_s26 + $0x368] sm:$0xff]  ;;  %v169_v14 = vld [vmem:[%s5230_s26 + $0x378] sm:$0xff] }
  0x60   :  { %2356 = vmatpush1.bf16.msra.mxu1 %v2355_v37  ;;  %v2287_v16 = vpack.c.bf16 %v164_v12, %v162_v11  ;;  %v2289_v17 = vpack.c.bf16 %v169_v14, %v167_v13  ;;  %v166_v18 = vld [vmem:[%s5230_s26 + $0x360] sm:$0xff]  ;;  %v168_v19 = vld [vmem:[%s5230_s26 + $0x370] sm:$0xff]  ;;  %v171_v20 = vld [vmem:[%s5230_s26 + $0x388] sm:$0xff] }
  0x61   :  { %2268 = vmatpush1.bf16.msra.mxu0 %v2267_v25  ;;  %2358 = vmatprep.subr.bf16.mxu1 %v2357_v40  ;;  %v173_v42 = vld [vmem:[%s5230_s26 + $0x398] sm:$0xff]  ;;  %v2291_v21 = vpack.c.bf16 %v168_v19, %v166_v18  ;;  %v170_v23 = vld [vmem:[%s5230_s26 + $0x380] sm:$0xff]  ;;  %v172_v24 = vld [vmem:[%s5230_s26 + $0x390] sm:$0xff] }
  0x62   :  { %2270 = vmatprep.subr.bf16.mxu0 %v2269_v30  ;;  %v2293_v22 = vpack.c.bf16 %v173_v42, %v171_v20  ;;  %v175_v25 = vld [vmem:[%s5230_s26 + $0x3a8] sm:$0xff]  ;;  %v177_v26 = vld [vmem:[%s5230_s26 + $0x3b8] sm:$0xff]  ;;  %v2295_v27 = vpack.c.bf16 %v172_v24, %v170_v23  ;;  %v174_v29 = vld [vmem:[%s5230_s26 + $0x3a0] sm:$0xff] }
  0x63   :  { %v2297_v28 = vpack.c.bf16 %v177_v26, %v175_v25  ;;  %v176_v30 = vld [vmem:[%s5230_s26 + $0x3b0] sm:$0xff]  ;;  %v179_v31 = vld [vmem:[%s5230_s26 + $0x3c8] sm:$0xff]  ;;  %v181_v32 = vld [vmem:[%s5230_s26 + $0x3d8] sm:$0xff] }
  0x64   :  { %2360 = vmatpush1.bf16.msra.mxu1 %v2359_v51  ;;  %v2299_v33 = vpack.c.bf16 %v176_v30, %v174_v29  ;;  %v2301_v35 = vpack.c.bf16 %v181_v32, %v179_v31  ;;  %v178_v36 = vld [vmem:[%s5230_s26 + $0x3c0] sm:$0xff]  ;;  %v180_v37 = vld [vmem:[%s5230_s26 + $0x3d0] sm:$0xff]  ;;  %v185_v39 = vld [vmem:[%s5230_s26 + $0x3f8] sm:$0xff] }
  0x65   :  { %2272 = vmatpush1.bf16.msra.mxu0 %v2271_v38  ;;  %2362 = vmatprep.subr.bf16.mxu1 %v2361_v54  ;;  %v183_v38 = vld [vmem:[%s5230_s26 + $0x3e8] sm:$0xff]  ;;  %v2303_v40 = vpack.c.bf16 %v180_v37, %v178_v36  ;;  %v182_v43 = vld [vmem:[%s5230_s26 + $0x3e0] sm:$0xff]  ;;  %v425_v46 = vld [vmem:[%s5212_s3 + $0x1f8] sm:$0xff] }
  0x66   :  { %2274 = vmatprep.subr.bf16.mxu0 %v2273_v44  ;;  %v2305_v41 = vpack.c.bf16 %v185_v39, %v183_v38  ;;  %v184_v44 = vld [vmem:[%s5230_s26 + $0x3f0] sm:$0xff]  ;;  %v423_v50 = vld [vmem:[%s5212_s3 + $0x1e8] sm:$0xff]  ;;  %v422_v49 = vld [vmem:[%s5212_s3 + $0x1e0] sm:$0xff] }
  0x67   :  { %v2307_v45 = vpack.c.bf16 %v184_v44, %v182_v43  ;;  %v2369_v48 = vpack.c.bf16 %v425_v46, %v423_v50  ;;  %v424_v51 = vld [vmem:[%s5212_s3 + $0x1f0] sm:$0xff]  ;;  %v512_v53 = vld [vmem:[%s5214_s5 + $0x18] sm:$0xff]  ;;  %v509_v60 = vld [vmem:[%s5214_s5] sm:$0xff] }
  0x68   :  { %2364 = vmatpush1.bf16.msra.mxu1 %v2363_v63  ;;  %v511_v61 = vld [vmem:[%s5214_s5 + $0x10] sm:$0xff]  ;;  %v514_v34 = vld [vmem:[%s5214_s5 + $0x28] sm:$0xff]  ;;  %v516_v63 = vld [vmem:[%s5214_s5 + $0x38] sm:$0xff] }
  0x69   :  { %2276 = vmatpush1.bf16.msra.mxu0 %v2275_v52  ;;  %2366 = vmatprep.subr.bf16.mxu1 %v2365_v1  ;;  %v2371_v52 = vpack.c.bf16 %v424_v51, %v422_v49  ;;  %v2375_v2 = vpack.c.bf16 %v511_v61, %v509_v60  ;;  %v513_v5 = vld [vmem:[%s5214_s5 + $0x20] sm:$0xff]  ;;  %v515_v6 = vld [vmem:[%s5214_s5 + $0x30] sm:$0xff]  ;;  %v518_v7 = vld [vmem:[%s5214_s5 + $0x48] sm:$0xff] }
  0x6a   :  { %2278 = vmatprep.subr.bf16.mxu0 %v2277_v57  ;;  %v186_v57 = vld [vmem:[%s5211_s2] sm:$0x3]  ;;  %v520_v8 = vld [vmem:[%s5214_s5 + $0x58] sm:$0xff]  ;;  %v519_v11 = vld [vmem:[%s5214_s5 + $0x50] sm:$0xff] }
  0x6b   :  { %v195_v58 = vrot.slane %v186_v57, %v3592_v55  ;;  %v191_v59 = vrot.slane %v186_v57, %v3595_v56  ;;  %v522_v12 = vld [vmem:[%s5214_s5 + $0x68] sm:$0xff]  ;;  %v524_v13 = vld [vmem:[%s5214_s5 + $0x78] sm:$0xff]  ;;  %v523_v18 = vld [vmem:[%s5214_s5 + $0x70] sm:$0xff] }
  0x6c   :  { %2368 = vmatpush1.bf16.msra.mxu1 %v2367_v9  ;;  %v2379_v9 = vpack.c.bf16 %v515_v6, %v513_v5  ;;  %v526_v19 = vld [vmem:[%s5214_s5 + $0x88] sm:$0xff]  ;;  %v528_v20 = vld [vmem:[%s5214_s5 + $0x98] sm:$0xff]  ;;  %v527_v23 = vld [vmem:[%s5214_s5 + $0x90] sm:$0xff] }
  0x6d   :  { %2280 = vmatpush1.bf16.msra.mxu0 %v2279_v0  ;;  %2370 = vmatprep.subr.bf16.mxu1 %v2369_v48  ;;  %v530_v24 = vld [vmem:[%s5214_s5 + $0xa8] sm:$0xff]  ;;  %v532_v25 = vld [vmem:[%s5214_s5 + $0xb8] sm:$0xff]  ;;  %v531_v29 = vld [vmem:[%s5214_s5 + $0xb0] sm:$0xff] }
  0x6e   :  { %2282 = vmatprep.subr.bf16.mxu0 %v2281_v4  ;;  %v2377_v4 = vpack.c.bf16 %v516_v63, %v514_v34  ;;  %v534_v30 = vld [vmem:[%s5214_s5 + $0xc8] sm:$0xff]  ;;  %v536_v31 = vld [vmem:[%s5214_s5 + $0xd8] sm:$0xff]  ;;  %v535_v36 = vld [vmem:[%s5214_s5 + $0xd0] sm:$0xff] }
  0x6f   :  { %v538_v37 = vld [vmem:[%s5214_s5 + $0xe8] sm:$0xff]  ;;  %v540_v38 = vld [vmem:[%s5214_s5 + $0xf8] sm:$0xff]  ;;  %v539_v43 = vld [vmem:[%s5214_s5 + $0xf0] sm:$0xff] }
  0x70   :  { %2372 = vmatpush1.bf16.msra.mxu1 %v2371_v52  ;;  %v542_v44 = vld [vmem:[%s5214_s5 + $0x108] sm:$0xff]  ;;  %v541_v48 = vld [vmem:[%s5214_s5 + $0x100] sm:$0xff]  ;;  %v543_v49 = vld [vmem:[%s5214_s5 + $0x110] sm:$0xff] }
  0x71   :  { %2284 = vmatpush1.bf16.msra.mxu0 %v2283_v47  ;;  %v2381_v47 = vpack.c.bf16 %v520_v8, %v518_v7  ;;  %v546_v51 = vld [vmem:[%s5214_s5 + $0x128] sm:$0xff]  ;;  %v548_v52 = vld [vmem:[%s5214_s5 + $0x138] sm:$0xff]  ;;  %v547_v57 = vld [vmem:[%s5214_s5 + $0x130] sm:$0xff] }
  0x72   :  { %2286 = vmatprep.subr.bf16.mxu0 %v2285_v10  ;;  %v517_v10 = vld [vmem:[%s5214_s5 + $0x40] sm:$0xff]  ;;  %v551_v34 = vld [vmem:[%s5214_s5 + $0x150] sm:$0xff]  ;;  %v554_v63 = vld [vmem:[%s5214_s5 + $0x168] sm:$0xff] }
  0x73   :  { %v2383_v14 = vpack.c.bf16 %v519_v11, %v517_v10  ;;  %v553_v5 = vld [vmem:[%s5214_s5 + $0x160] sm:$0xff]  ;;  %v555_v6 = vld [vmem:[%s5214_s5 + $0x170] sm:$0xff]  ;;  %v558_v7 = vld [vmem:[%s5214_s5 + $0x188] sm:$0xff] }
  0x74   :  { %v560_v8 = vld [vmem:[%s5214_s5 + $0x198] sm:$0xff]  ;;  %v557_v10 = vld [vmem:[%s5214_s5 + $0x180] sm:$0xff]  ;;  %v559_v11 = vld [vmem:[%s5214_s5 + $0x190] sm:$0xff] }
  0x75   :  { %2288 = vmatpush1.bf16.msra.mxu0 %v2287_v16  ;;  %v2385_v16 = vpack.c.bf16 %v524_v13, %v522_v12  ;;  %v562_v12 = vld [vmem:[%s5214_s5 + $0x1a8] sm:$0xff]  ;;  %v564_v13 = vld [vmem:[%s5214_s5 + $0x1b8] sm:$0xff] }
  0x76   :  { %2290 = vmatprep.subr.bf16.mxu0 %v2289_v17  ;;  %v521_v17 = vld [vmem:[%s5214_s5 + $0x60] sm:$0xff] }
  0x77   :  { %v2387_v42 = vpack.c.bf16 %v523_v18, %v521_v17  ;;  %v561_v17 = vld [vmem:[%s5214_s5 + $0x1a0] sm:$0xff]  ;;  %v563_v18 = vld [vmem:[%s5214_s5 + $0x1b0] sm:$0xff] }
  0x79   :  { %2292 = vmatpush1.bf16.msra.mxu0 %v2291_v21  ;;  %v2389_v21 = vpack.c.bf16 %v528_v20, %v526_v19  ;;  %v566_v19 = vld [vmem:[%s5214_s5 + $0x1c8] sm:$0xff]  ;;  %v568_v20 = vld [vmem:[%s5214_s5 + $0x1d8] sm:$0xff] }
  0x7a   :  { %2294 = vmatprep.subr.bf16.mxu0 %v2293_v22  ;;  %v525_v22 = vld [vmem:[%s5214_s5 + $0x80] sm:$0xff] }
  0x7b   :  { %v2391_v26 = vpack.c.bf16 %v527_v23, %v525_v22  ;;  %v565_v22 = vld [vmem:[%s5214_s5 + $0x1c0] sm:$0xff]  ;;  %v567_v23 = vld [vmem:[%s5214_s5 + $0x1d0] sm:$0xff] }
  0x7d   :  { %2296 = vmatpush1.bf16.msra.mxu0 %v2295_v27  ;;  %v2393_v27 = vpack.c.bf16 %v532_v25, %v530_v24  ;;  %v2431_v24 = vpack.c.bf16 %v567_v23, %v565_v22  ;;  %v570_v25 = vld [vmem:[%s5214_s5 + $0x1e8] sm:$0xff]  ;;  %v730_v22 = vld [vmem:[%s5218_s9 + $0xb0] sm:$0xff] }
  0x7e   :  { %2298 = vmatprep.subr.bf16.mxu0 %v2297_v28  ;;  %v529_v28 = vld [vmem:[%s5214_s5 + $0xa0] sm:$0xff]  ;;  %v733_v23 = vld [vmem:[%s5218_s9 + $0xc8] sm:$0xff] }
  0x7f   :  { %v2395_v32 = vpack.c.bf16 %v531_v29, %v529_v28  ;;  %v569_v28 = vld [vmem:[%s5214_s5 + $0x1e0] sm:$0xff]  ;;  %v571_v29 = vld [vmem:[%s5214_s5 + $0x1f0] sm:$0xff] }
  0x81   :  { %2300 = vmatpush1.bf16.msra.mxu0 %v2299_v33  ;;  %v2397_v33 = vpack.c.bf16 %v536_v31, %v534_v30  ;;  %v2435_v30 = vpack.c.bf16 %v571_v29, %v569_v28  ;;  %v426_v31 = vld [vmem:[%s5213_s4] sm:$0x3]  ;;  %v734_v28 = vld [vmem:[%s5218_s9 + $0xd0] sm:$0xff]  ;;  %v737_v29 = vld [vmem:[%s5218_s9 + $0xe8] sm:$0xff] }
  0x82   :  { %2302 = vmatprep.subr.bf16.mxu0 %v2301_v35  ;;  %v533_v35 = vld [vmem:[%s5214_s5 + $0xc0] sm:$0xff] }
  0x83   :  { %v2399_v39 = vpack.c.bf16 %v535_v36, %v533_v35 }
  0x85   :  { %2304 = vmatpush1.bf16.msra.mxu0 %v2303_v40  ;;  %v2401_v40 = vpack.c.bf16 %v540_v38, %v538_v37 }
  0x86   :  { %2306 = vmatprep.subr.bf16.mxu0 %v2305_v41  ;;  %v537_v41 = vld [vmem:[%s5214_s5 + $0xe0] sm:$0xff] }
  0x87   :  { %v2403_v50 = vpack.c.bf16 %v539_v43, %v537_v41 }
  0x89   :  { %2308 = vmatpush1.bf16.msra.mxu0 %v2307_v45  ;;  %v544_v45 = vld [vmem:[%s5214_s5 + $0x118] sm:$0xff] }
  0x8a   :  { %v2405_v46 = vpack.c.bf16 %v544_v45, %v542_v44 }
  0x8c   :  { %356 = vmatmul.mubr.f32.vlgmr.msra.gmra.mrb[0].mxu0 %v3267_v15  ;;  %v510_v15 = vld [vmem:[%s5214_s5 + $0x8] sm:$0xff] }
  0x8d   :  { %v2373_v54 = vpack.c.bf16 %v512_v53, %v510_v15  ;;  %v2407_v15 = vpack.c.bf16 %v543_v49, %v541_v48  ;;  %v2409_v53 = vpack.c.bf16 %v548_v52, %v546_v51 }
  0x8f   :  { %2374 = vmatprep.subr.bf16.mxu1 %v2373_v54  ;;  %v545_v54 = vld [vmem:[%s5214_s5 + $0x120] sm:$0xff] }
  0x90   :  { %v2411_v60 = vpack.c.bf16 %v547_v57, %v545_v54  ;;  %v710_v54 = vld [vmem:[%s5218_s9 + $0x10] sm:$0xff]  ;;  %v713_v57 = vld [vmem:[%s5218_s9 + $0x28] sm:$0xff] }
 0x15f   :  { %v357_v62 = vpop.f32.mrb[0].mxu0 }
 0x160   :  { %v359_v0 = vpop.f32.mrb[1].mxu0  ;;  %v3616_v3 = vadd.f32 %v357_v62, %v191_v59  ;;  %v552_v59 = vld [vmem:[%s5214_s5 + $0x158] sm:$0xff]  ;;  %v549_v62 = vld [vmem:[%s5214_s5 + $0x140] sm:$0xff] }
 0x161   :  { %v3614_v1 = vadd.f32 %v359_v0, %v195_v58  ;;  %v550_v58 = vld [vmem:[%s5214_s5 + $0x148] sm:$0xff]  ;;  %v556_v0 = vld [vmem:[%s5214_s5 + $0x178] sm:$0xff] }
 0x162   :  { %v2413_v61 = vpack.c.bf16 %v552_v59, %v550_v58  ;;  %v715_v58 = vld [vmem:[%s5218_s9 + $0x38] sm:$0xff] }
 0x163   :  { %502 = vmatprep.mubr.f32.mxu1 %v3614_v1 }
 0x164   :  { %503 = vmatmul.mubr.f32.vlgmr.msra.gmra.mrb[0].mxu1 %v3616_v3 }
 0x165   :  { %2376 = vmatpush1.bf16.msra.mxu1 %v2375_v2  ;;  %v2415_v2 = vpack.c.bf16 %v551_v34, %v549_v62  ;;  %v714_v62 = vld [vmem:[%s5218_s9 + $0x30] sm:$0xff]  ;;  %v717_v34 = vld [vmem:[%s5218_s9 + $0x48] sm:$0xff] }
 0x166   :  { %2378 = vmatprep.subr.bf16.mxu1 %v2377_v4  ;;  %v2417_v4 = vpack.c.bf16 %v556_v0, %v554_v63  ;;  %v719_v63 = vld [vmem:[%s5218_s9 + $0x58] sm:$0xff] }
 0x169   :  { %2380 = vmatpush1.bf16.msra.mxu1 %v2379_v9  ;;  %v2419_v9 = vpack.c.bf16 %v555_v6, %v553_v5  ;;  %v718_v5 = vld [vmem:[%s5218_s9 + $0x50] sm:$0xff]  ;;  %v721_v6 = vld [vmem:[%s5218_s9 + $0x68] sm:$0xff] }
 0x16a   :  { %2382 = vmatprep.subr.bf16.mxu1 %v2381_v47  ;;  %v2421_v47 = vpack.c.bf16 %v560_v8, %v558_v7  ;;  %v723_v7 = vld [vmem:[%s5218_s9 + $0x78] sm:$0xff] }
 0x16d   :  { %2384 = vmatpush1.bf16.msra.mxu1 %v2383_v14  ;;  %v2423_v14 = vpack.c.bf16 %v559_v11, %v557_v10  ;;  %v722_v10 = vld [vmem:[%s5218_s9 + $0x70] sm:$0xff]  ;;  %v725_v11 = vld [vmem:[%s5218_s9 + $0x88] sm:$0xff] }
 0x16e   :  { %2386 = vmatprep.subr.bf16.mxu1 %v2385_v16  ;;  %v2425_v16 = vpack.c.bf16 %v564_v13, %v562_v12  ;;  %v727_v12 = vld [vmem:[%s5218_s9 + $0x98] sm:$0xff] }
 0x171   :  { %2388 = vmatpush1.bf16.msra.mxu1 %v2387_v42  ;;  %v2427_v42 = vpack.c.bf16 %v563_v18, %v561_v17  ;;  %v726_v17 = vld [vmem:[%s5218_s9 + $0x90] sm:$0xff]  ;;  %v729_v18 = vld [vmem:[%s5218_s9 + $0xa8] sm:$0xff] }
 0x172   :  { %2390 = vmatprep.subr.bf16.mxu1 %v2389_v21  ;;  %v2429_v21 = vpack.c.bf16 %v568_v20, %v566_v19  ;;  %v731_v19 = vld [vmem:[%s5218_s9 + $0xb8] sm:$0xff] }
 0x175   :  { %2392 = vmatpush1.bf16.msra.mxu1 %v2391_v26  ;;  %v572_v26 = vld [vmem:[%s5214_s5 + $0x1f8] sm:$0xff] }
 0x176   :  { %2394 = vmatprep.subr.bf16.mxu1 %v2393_v27  ;;  %v2433_v27 = vpack.c.bf16 %v572_v26, %v570_v25 }
 0x179   :  { %2396 = vmatpush1.bf16.msra.mxu1 %v2395_v32  ;;  %v435_v32 = vrot.slane %v426_v31, %v3592_v55 }
 0x17a   :  { %2398 = vmatprep.subr.bf16.mxu1 %v2397_v33  ;;  %v431_v33 = vrot.slane %v426_v31, %v3595_v56 }
 0x17d   :  { %2400 = vmatpush1.bf16.msra.mxu1 %v2399_v39  ;;  %v573_v39 = vld [vmem:[%s5215_s6] sm:$0x3] }
 0x17e   :  { %2402 = vmatprep.subr.bf16.mxu1 %v2401_v40  ;;  %v578_v40 = vrot.slane %v573_v39, %v3595_v56  ;;  %v582_v41 = vrot.slane %v573_v39, %v3592_v55 }
 0x181   :  { %2404 = vmatpush1.bf16.msra.mxu1 %v2403_v50 }
 0x182   :  { %2406 = vmatprep.subr.bf16.mxu1 %v2405_v46 }
 0x185   :  { %2408 = vmatpush1.bf16.msra.mxu1 %v2407_v15  ;;  %v709_v15 = vld [vmem:[%s5218_s9 + $0x8] sm:$0xff] }
 0x186   :  { %2410 = vmatprep.subr.bf16.mxu1 %v2409_v53 }
 0x189   :  { %2412 = vmatpush1.bf16.msra.mxu1 %v2411_v60  ;;  %v2441_v60 = vpack.c.bf16 %v715_v58, %v713_v57 }
 0x18a   :  { %2414 = vmatprep.subr.bf16.mxu1 %v2413_v61  ;;  %v712_v61 = vld [vmem:[%s5218_s9 + $0x20] sm:$0xff] }
 0x18b   :  { %v2443_v0 = vpack.c.bf16 %v714_v62, %v712_v61 }
 0x18d   :  { %2416 = vmatpush1.bf16.msra.mxu1 %v2415_v2  ;;  %v2445_v2 = vpack.c.bf16 %v719_v63, %v717_v34 }
 0x18e   :  { %2418 = vmatprep.subr.bf16.mxu1 %v2417_v4  ;;  %v716_v4 = vld [vmem:[%s5218_s9 + $0x40] sm:$0xff] }
 0x18f   :  { %v2447_v8 = vpack.c.bf16 %v718_v5, %v716_v4  ;;  %v752_v5 = vld [vmem:[%s5218_s9 + $0x160] sm:$0xff] }
 0x191   :  { %2420 = vmatpush1.bf16.msra.mxu1 %v2419_v9  ;;  %v2449_v9 = vpack.c.bf16 %v723_v7, %v721_v6  ;;  %v754_v6 = vld [vmem:[%s5218_s9 + $0x170] sm:$0xff] }
 0x192   :  { %2422 = vmatprep.subr.bf16.mxu1 %v2421_v47  ;;  %v720_v47 = vld [vmem:[%s5218_s9 + $0x60] sm:$0xff]  ;;  %v2483_v7 = vpack.c.bf16 %v754_v6, %v752_v5  ;;  %v879_v6 = vld [vmem:[%s5220_s11 + $0xb0] sm:$0xff] }
 0x193   :  { %v2451_v13 = vpack.c.bf16 %v722_v10, %v720_v47  ;;  %v756_v10 = vld [vmem:[%s5218_s9 + $0x180] sm:$0xff] }
 0x194   :  { %v877_v5 = vld [vmem:[%s5220_s11 + $0xa0] sm:$0xff] }
 0x195   :  { %2424 = vmatpush1.bf16.msra.mxu1 %v2423_v14  ;;  %v2453_v14 = vpack.c.bf16 %v727_v12, %v725_v11  ;;  %v758_v11 = vld [vmem:[%s5218_s9 + $0x190] sm:$0xff]  ;;  %v761_v12 = vld [vmem:[%s5218_s9 + $0x1a8] sm:$0xff] }
 0x196   :  { %2426 = vmatprep.subr.bf16.mxu1 %v2425_v16  ;;  %v724_v16 = vld [vmem:[%s5218_s9 + $0x80] sm:$0xff] }
 0x197   :  { %v2455_v20 = vpack.c.bf16 %v726_v17, %v724_v16  ;;  %v760_v16 = vld [vmem:[%s5218_s9 + $0x1a0] sm:$0xff]  ;;  %v762_v17 = vld [vmem:[%s5218_s9 + $0x1b0] sm:$0xff] }
 0x199   :  { %2428 = vmatpush1.bf16.msra.mxu1 %v2427_v42  ;;  %v2457_v42 = vpack.c.bf16 %v731_v19, %v729_v18  ;;  %v765_v19 = vld [vmem:[%s5218_s9 + $0x1c8] sm:$0xff] }
 0x19a   :  { %2430 = vmatprep.subr.bf16.mxu1 %v2429_v21  ;;  %v728_v21 = vld [vmem:[%s5218_s9 + $0xa0] sm:$0xff] }
 0x19b   :  { %v2459_v25 = vpack.c.bf16 %v730_v22, %v728_v21  ;;  %v764_v22 = vld [vmem:[%s5218_s9 + $0x1c0] sm:$0xff] }
 0x19d   :  { %2432 = vmatpush1.bf16.msra.mxu1 %v2431_v24  ;;  %v735_v24 = vld [vmem:[%s5218_s9 + $0xd8] sm:$0xff] }
 0x19e   :  { %2434 = vmatprep.subr.bf16.mxu1 %v2433_v27  ;;  %v2461_v26 = vpack.c.bf16 %v735_v24, %v733_v23  ;;  %v732_v27 = vld [vmem:[%s5218_s9 + $0xc0] sm:$0xff]  ;;  %v766_v23 = vld [vmem:[%s5218_s9 + $0x1d0] sm:$0xff]  ;;  %v769_v24 = vld [vmem:[%s5218_s9 + $0x1e8] sm:$0xff] }
 0x19f   :  { %v2463_v31 = vpack.c.bf16 %v734_v28, %v732_v27  ;;  %v768_v28 = vld [vmem:[%s5218_s9 + $0x1e0] sm:$0xff] }
 0x1a1   :  { %2436 = vmatpush1.bf16.msra.mxu1 %v2435_v30  ;;  %v739_v30 = vld [vmem:[%s5218_s9 + $0xf8] sm:$0xff] }
 0x237   :  { %v504_v35 = vpop.f32.mrb[0].mxu1 }
 0x238   :  { %v506_v36 = vpop.f32.mrb[1].mxu1  ;;  %v505_v38 = vadd.f32 %v504_v35, %v431_v33  ;;  %v736_v33 = vld [vmem:[%s5218_s9 + $0xe0] sm:$0xff]  ;;  %v738_v35 = vld [vmem:[%s5218_s9 + $0xf0] sm:$0xff] }
 0x239   :  { %v507_v37 = vadd.f32 %v506_v36, %v435_v32  ;;  %v2465_v32 = vpack.c.bf16 %v739_v30, %v737_v29  ;;  %v741_v36 = vld [vmem:[%s5218_s9 + $0x108] sm:$0xff]  ;;  %v770_v29 = vld [vmem:[%s5218_s9 + $0x1f0] sm:$0xff] }
 0x23a   :  { %v2499_v30 = vpack.c.bf16 %v770_v29, %v768_v28  ;;  %v893_v28 = vld [vmem:[%s5220_s11 + $0x120] sm:$0xff]  ;;  %v895_v29 = vld [vmem:[%s5220_s11 + $0x130] sm:$0xff] }
 0x23b   :  { %649 = vmatprep.mubr.f32.mxu1 %v507_v37  ;;  %v743_v37 = vld [vmem:[%s5218_s9 + $0x118] sm:$0xff] }
 0x23c   :  { %650 = vmatmul.mubr.f32.vlgmr.msra.gmra.mrb[2].mxu1 %v505_v38  ;;  %v2467_v38 = vpack.c.bf16 %v738_v35, %v736_v33  ;;  %v2469_v39 = vpack.c.bf16 %v743_v37, %v741_v36  ;;  %v857_v33 = vld [vmem:[%s5220_s11] sm:$0xff]  ;;  %v859_v36 = vld [vmem:[%s5220_s11 + $0x10] sm:$0xff]  ;;  %v862_v37 = vld [vmem:[%s5220_s11 + $0x28] sm:$0xff] }
 0x30f   :  { %v651_v43 = vpop.f32.mrb[2].mxu1 }
 0x310   :  { %v652_v44 = vadd.f32 %v651_v43, %v578_v40  ;;  %v653_v45 = vpop.f32.mrb[3].mxu1  ;;  %v740_v40 = vld [vmem:[%s5218_s9 + $0x100] sm:$0xff]  ;;  %v745_v43 = vld [vmem:[%s5218_s9 + $0x128] sm:$0xff] }
 0x311   :  { %v654_v50 = vadd.f32 %v653_v45, %v582_v41  ;;  %v742_v41 = vld [vmem:[%s5218_s9 + $0x110] sm:$0xff] }
 0x312   :  { %v3805_v46 = vadd.f32 %v3616_v3, %v652_v44  ;;  %v711_v3 = vld [vmem:[%s5218_s9 + $0x18] sm:$0xff]  ;;  %v2471_v45 = vpack.c.bf16 %v742_v41, %v740_v40  ;;  %v861_v41 = vld [vmem:[%s5220_s11 + $0x20] sm:$0xff] }
 0x313   :  { %v3808_v48 = vadd.f32 %v3614_v1, %v654_v50  ;;  %v708_v1 = vld [vmem:[%s5218_s9] sm:$0xff]  ;;  %v2437_v53 = vpack.c.bf16 %v711_v3, %v709_v15  ;;  %v747_v44 = vld [vmem:[%s5218_s9 + $0x138] sm:$0xff] }
 0x314   :  { %v661_v49 = vsel %vm660_vm0, %v3805_v46, 0.0  ;;  %v2439_v59 = vpack.c.bf16 %v710_v54, %v708_v1  ;;  %v2473_v50 = vpack.c.bf16 %v747_v44, %v745_v43  ;;  %v751_v15 = vld [vmem:[%s5218_s9 + $0x158] sm:$0xff]  ;;  %v750_v54 = vld [vmem:[%s5218_s9 + $0x150] sm:$0xff]  ;;  %v866_v44 = vld [vmem:[%s5220_s11 + $0x48] sm:$0xff] }
 0x315   :  { %v662_v51 = vsel %vm660_vm0, %v3808_v48, 0.0  ;;  %2438 = vmatprep.subr.bf16.mxu0 %v2437_v53  ;;  %v748_v53 = vld [vmem:[%s5218_s9 + $0x140] sm:$0xff]  ;;  %v863_v43 = vld [vmem:[%s5220_s11 + $0x30] sm:$0xff] }
 0x316   :  { %v663_v52 = vadd.f32 %v662_v51, %v661_v49  ;;  %2440 = vmatpush1.bf16.msra.mxu0 %v2439_v59  ;;  %v744_v49 = vld [vmem:[%s5218_s9 + $0x120] sm:$0xff]  ;;  %v746_v51 = vld [vmem:[%s5218_s9 + $0x130] sm:$0xff]  ;;  %v2479_v57 = vpack.c.bf16 %v750_v54, %v748_v53 }
 0x317   :  { %2442 = vmatprep.subr.bf16.mxu0 %v2441_v60  ;;  %v2475_v3 = vpack.c.bf16 %v746_v51, %v744_v49  ;;  %v865_v51 = vld [vmem:[%s5220_s11 + $0x40] sm:$0xff] }
 0x318   :  { %664 = vadd.xlane.f32.xlu0 %v663_v52  ;;  %v749_v52 = vld [vmem:[%s5218_s9 + $0x148] sm:$0xff]  ;;  %v869_v54 = vld [vmem:[%s5220_s11 + $0x60] sm:$0xff] }
 0x319   :  { %v2477_v1 = vpack.c.bf16 %v751_v15, %v749_v52  ;;  %v867_v52 = vld [vmem:[%s5220_s11 + $0x50] sm:$0xff]  ;;  %v870_v15 = vld [vmem:[%s5220_s11 + $0x68] sm:$0xff] }
 0x31a   :  { %2444 = vmatpush1.bf16.msra.mxu0 %v2443_v0 }
 0x31b   :  { %2446 = vmatprep.subr.bf16.mxu0 %v2445_v2 }
 0x31e   :  { %2448 = vmatpush1.bf16.msra.mxu0 %v2447_v8  ;;  %v757_v8 = vld [vmem:[%s5218_s9 + $0x188] sm:$0xff] }
 0x31f   :  { %2450 = vmatprep.subr.bf16.mxu0 %v2449_v9  ;;  %v759_v9 = vld [vmem:[%s5218_s9 + $0x198] sm:$0xff] }
 0x320   :  { %v2485_v47 = vpack.c.bf16 %v759_v9, %v757_v8  ;;  %v884_v8 = vld [vmem:[%s5220_s11 + $0xd8] sm:$0xff]  ;;  %v2523_v9 = vpack.c.bf16 %v879_v6, %v877_v5 }
 0x322   :  { %2452 = vmatpush1.bf16.msra.mxu0 %v2451_v13  ;;  %v2487_v13 = vpack.c.bf16 %v758_v11, %v756_v10  ;;  %v881_v10 = vld [vmem:[%s5220_s11 + $0xc0] sm:$0xff]  ;;  %v883_v11 = vld [vmem:[%s5220_s11 + $0xd0] sm:$0xff] }
 0x323   :  { %2454 = vmatprep.subr.bf16.mxu0 %v2453_v14  ;;  %v763_v14 = vld [vmem:[%s5218_s9 + $0x1b8] sm:$0xff] }
 0x324   :  { %v2489_v18 = vpack.c.bf16 %v763_v14, %v761_v12  ;;  %v886_v12 = vld [vmem:[%s5220_s11 + $0xe8] sm:$0xff]  ;;  %v2527_v14 = vpack.c.bf16 %v883_v11, %v881_v10 }
 0x326   :  { %2456 = vmatpush1.bf16.msra.mxu0 %v2455_v20  ;;  %v767_v20 = vld [vmem:[%s5218_s9 + $0x1d8] sm:$0xff] }
 0x327   :  { %2458 = vmatprep.subr.bf16.mxu0 %v2457_v42  ;;  %v2491_v42 = vpack.c.bf16 %v762_v17, %v760_v16  ;;  %v2493_v21 = vpack.c.bf16 %v767_v20, %v765_v19  ;;  %v885_v17 = vld [vmem:[%s5220_s11 + $0xe0] sm:$0xff]  ;;  %v890_v19 = vld [vmem:[%s5220_s11 + $0x108] sm:$0xff]  ;;  %v892_v20 = vld [vmem:[%s5220_s11 + $0x118] sm:$0xff] }
 0x32a   :  { %2460 = vmatpush1.bf16.msra.mxu0 %v2459_v25  ;;  %v771_v25 = vld [vmem:[%s5218_s9 + $0x1f8] sm:$0xff] }
 0x32b   :  { %2462 = vmatprep.subr.bf16.mxu0 %v2461_v26  ;;  %v2495_v26 = vpack.c.bf16 %v766_v23, %v764_v22  ;;  %v2497_v27 = vpack.c.bf16 %v771_v25, %v769_v24  ;;  %v889_v22 = vld [vmem:[%s5220_s11 + $0x100] sm:$0xff]  ;;  %v891_v23 = vld [vmem:[%s5220_s11 + $0x110] sm:$0xff]  ;;  %v894_v24 = vld [vmem:[%s5220_s11 + $0x128] sm:$0xff] }
 0x32c   :  { %v896_v25 = vld [vmem:[%s5220_s11 + $0x138] sm:$0xff] }
 0x32e   :  { %2464 = vmatpush1.bf16.msra.mxu0 %v2463_v31  ;;  %v858_v31 = vld [vmem:[%s5220_s11 + $0x8] sm:$0xff] }
 0x32f   :  { %2466 = vmatprep.subr.bf16.mxu0 %v2465_v32  ;;  %v860_v32 = vld [vmem:[%s5220_s11 + $0x18] sm:$0xff] }
 0x330   :  { %v2501_v35 = vpack.c.bf16 %v860_v32, %v858_v31  ;;  %v900_v31 = vld [vmem:[%s5220_s11 + $0x158] sm:$0xff]  ;;  %v2539_v32 = vpack.c.bf16 %v895_v29, %v893_v28 }
 0x332   :  { %2468 = vmatpush1.bf16.msra.mxu0 %v2467_v38  ;;  %v864_v38 = vld [vmem:[%s5220_s11 + $0x38] sm:$0xff]  ;;  %2502 = vmatprep.subr.bf16.mxu1 %v2501_v35  ;;  %v897_v35 = vld [vmem:[%s5220_s11 + $0x140] sm:$0xff] }
 0x333   :  { %2470 = vmatprep.subr.bf16.mxu0 %v2469_v39  ;;  %v2503_v39 = vpack.c.bf16 %v859_v36, %v857_v33  ;;  %v2505_v40 = vpack.c.bf16 %v864_v38, %v862_v37  ;;  %v899_v36 = vld [vmem:[%s5220_s11 + $0x150] sm:$0xff]  ;;  %v902_v37 = vld [vmem:[%s5220_s11 + $0x168] sm:$0xff]  ;;  %v904_v38 = vld [vmem:[%s5220_s11 + $0x178] sm:$0xff] }
 0x335   :  { %2504 = vmatpush1.bf16.msra.mxu1 %v2503_v39  ;;  %v2543_v39 = vpack.c.bf16 %v899_v36, %v897_v35 }
 0x336   :  { %2472 = vmatpush1.bf16.msra.mxu0 %v2471_v45  ;;  %v868_v45 = vld [vmem:[%s5220_s11 + $0x58] sm:$0xff]  ;;  %2506 = vmatprep.subr.bf16.mxu1 %v2505_v40  ;;  %v2545_v40 = vpack.c.bf16 %v904_v38, %v902_v37 }
 0x337   :  { %2474 = vmatprep.subr.bf16.mxu0 %v2473_v50  ;;  %v2507_v50 = vpack.c.bf16 %v863_v43, %v861_v41  ;;  %v2509_v49 = vpack.c.bf16 %v868_v45, %v866_v44  ;;  %v901_v41 = vld [vmem:[%s5220_s11 + $0x160] sm:$0xff]  ;;  %v903_v43 = vld [vmem:[%s5220_s11 + $0x170] sm:$0xff]  ;;  %v906_v44 = vld [vmem:[%s5220_s11 + $0x188] sm:$0xff] }
 0x338   :  { %v908_v45 = vld [vmem:[%s5220_s11 + $0x198] sm:$0xff] }
 0x339   :  { %2508 = vmatpush1.bf16.msra.mxu1 %v2507_v50  ;;  %v2547_v50 = vpack.c.bf16 %v903_v43, %v901_v41 }
 0x33a   :  { %2476 = vmatpush1.bf16.msra.mxu0 %v2475_v3  ;;  %v872_v3 = vld [vmem:[%s5220_s11 + $0x78] sm:$0xff]  ;;  %2510 = vmatprep.subr.bf16.mxu1 %v2509_v49  ;;  %v2549_v49 = vpack.c.bf16 %v908_v45, %v906_v44  ;;  %v1882_v44 = vld [vmem:[%s5212_s3 + $0x208] sm:$0xff] }
 0x33b   :  { %2478 = vmatprep.subr.bf16.mxu0 %v2477_v1  ;;  %v2511_v1 = vpack.c.bf16 %v867_v52, %v865_v51  ;;  %v2513_v53 = vpack.c.bf16 %v872_v3, %v870_v15  ;;  %v905_v51 = vld [vmem:[%s5220_s11 + $0x180] sm:$0xff]  ;;  %v907_v52 = vld [vmem:[%s5220_s11 + $0x190] sm:$0xff]  ;;  %v910_v15 = vld [vmem:[%s5220_s11 + $0x1a8] sm:$0xff] }
 0x33c   :  { %v912_v3 = vld [vmem:[%s5220_s11 + $0x1b8] sm:$0xff] }
 0x33d   :  { %2512 = vmatpush1.bf16.msra.mxu1 %v2511_v1  ;;  %v2551_v1 = vpack.c.bf16 %v907_v52, %v905_v51  ;;  %v1884_v45 = vld [vmem:[%s5212_s3 + $0x218] sm:$0xff]  ;;  %v1883_v51 = vld [vmem:[%s5212_s3 + $0x210] sm:$0xff]  ;;  %v1886_v52 = vld [vmem:[%s5212_s3 + $0x228] sm:$0xff] }
 0x33e   :  { %2480 = vmatpush1.bf16.msra.mxu0 %v2479_v57  ;;  %v871_v57 = vld [vmem:[%s5220_s11 + $0x70] sm:$0xff]  ;;  %2514 = vmatprep.subr.bf16.mxu1 %v2513_v53  ;;  %v2553_v53 = vpack.c.bf16 %v912_v3, %v910_v15  ;;  %v1888_v15 = vld [vmem:[%s5212_s3 + $0x238] sm:$0xff] }
 0x3a5   :  { %v665_v58 = vpop.xlane.xlu0 %664 }
 0x3a6   :  { %v667_v59 = vmul.f32 0.00390625, %v665_v58  ;;  %v874_v58 = vld [vmem:[%s5220_s11 + $0x88] sm:$0xff] }
 0x3a8   :  { %v3947_v60 = vsub.f32 %v3805_v46, %v667_v59  ;;  %v3950_v61 = vsub.f32 %v3808_v48, %v667_v59  ;;  %v753_v46 = vld [vmem:[%s5218_s9 + $0x168] sm:$0xff]  ;;  %v755_v48 = vld [vmem:[%s5218_s9 + $0x178] sm:$0xff] }
 0x3a9   :  { %v2481_v4 = vpack.c.bf16 %v755_v48, %v753_v46  ;;  %v876_v59 = vld [vmem:[%s5220_s11 + $0x98] sm:$0xff] }
 0x3aa   :  { %v670_v62 = vmul.f32 %v3947_v60, %v3947_v60  ;;  %v671_v34 = vmul.f32 %v3950_v61, %v3950_v61  ;;  %v880_v46 = vld [vmem:[%s5220_s11 + $0xb8] sm:$0xff] }
 0x3ab   :  { %2482 = vmatprep.subr.bf16.mxu0 %v2481_v4 }
 0x3ac   :  { %v672_v63 = vsel %vm660_vm0, %v670_v62, 0.0  ;;  %v673_v0 = vsel %vm660_vm0, %v671_v34, 0.0  ;;  %2484 = vmatpush1.bf16.msra.mxu0 %v2483_v7  ;;  %v2515_v62 = vpack.c.bf16 %v871_v57, %v869_v54  ;;  %v2517_v34 = vpack.c.bf16 %v876_v59, %v874_v58  ;;  %v882_v7 = vld [vmem:[%s5220_s11 + $0xc8] sm:$0xff]  ;;  %v909_v54 = vld [vmem:[%s5220_s11 + $0x1a0] sm:$0xff]  ;;  %v911_v57 = vld [vmem:[%s5220_s11 + $0x1b0] sm:$0xff] }
 0x3ad   :  { %v674_v2 = vadd.f32 %v673_v0, %v672_v63  ;;  %2486 = vmatprep.subr.bf16.mxu0 %v2485_v47  ;;  %v873_v63 = vld [vmem:[%s5220_s11 + $0x80] sm:$0xff]  ;;  %v875_v0 = vld [vmem:[%s5220_s11 + $0x90] sm:$0xff]  ;;  %v2525_v47 = vpack.c.bf16 %v884_v8, %v882_v7  ;;  %v914_v58 = vld [vmem:[%s5220_s11 + $0x1c8] sm:$0xff] }
 0x3ae   :  { %2516 = vmatpush1.bf16.msra.mxu1 %v2515_v62  ;;  %v2519_v48 = vpack.c.bf16 %v875_v0, %v873_v63  ;;  %v916_v59 = vld [vmem:[%s5220_s11 + $0x1d8] sm:$0xff]  ;;  %v2555_v62 = vpack.c.bf16 %v911_v57, %v909_v54  ;;  %v1887_v54 = vld [vmem:[%s5212_s3 + $0x230] sm:$0xff]  ;;  %v1890_v57 = vld [vmem:[%s5212_s3 + $0x248] sm:$0xff] }
 0x3af   :  { %675 = vadd.xlane.f32.xlu0 %v674_v2  ;;  %v878_v2 = vld [vmem:[%s5220_s11 + $0xa8] sm:$0xff]  ;;  %2518 = vmatprep.subr.bf16.mxu1 %v2517_v34  ;;  %v2557_v34 = vpack.c.bf16 %v916_v59, %v914_v58  ;;  %v1892_v58 = vld [vmem:[%s5212_s3 + $0x258] sm:$0xff] }
 0x3b0   :  { %2488 = vmatpush1.bf16.msra.mxu0 %v2487_v13  ;;  %v2521_v4 = vpack.c.bf16 %v880_v46, %v878_v2  ;;  %v888_v13 = vld [vmem:[%s5220_s11 + $0xf8] sm:$0xff]  ;;  %v658_v46 = vld [vmem:[%s5216_s7] sm:$0x3] }
 0x3b1   :  { %2490 = vmatprep.subr.bf16.mxu0 %v2489_v18  ;;  %v2529_v16 = vpack.c.bf16 %v888_v13, %v886_v12  ;;  %v887_v18 = vld [vmem:[%s5220_s11 + $0xf0] sm:$0xff]  ;;  %v690_v5 = vrot.slane %v658_v46, %v3592_v55 }
 0x3b2   :  { %2520 = vmatpush1.bf16.msra.mxu1 %v2519_v48  ;;  %v659_v48 = vld [vmem:[%s5217_s8] sm:$0x3] }
 0x3b3   :  { %2522 = vmatprep.subr.bf16.mxu1 %v2521_v4  ;;  %v686_v4 = vrot.slane %v658_v46, %v3595_v56  ;;  %v699_v8 = vrot.slane %v659_v48, %v3595_v56 }
 0x3b4   :  { %2492 = vmatpush1.bf16.msra.mxu0 %v2491_v42  ;;  %v2531_v42 = vpack.c.bf16 %v887_v18, %v885_v17  ;;  %v920_v17 = vld [vmem:[%s5220_s11 + $0x1f8] sm:$0xff] }
 0x3b5   :  { %2494 = vmatprep.subr.bf16.mxu0 %v2493_v21  ;;  %v2533_v21 = vpack.c.bf16 %v892_v20, %v890_v19  ;;  %v917_v19 = vld [vmem:[%s5220_s11 + $0x1e0] sm:$0xff]  ;;  %v919_v20 = vld [vmem:[%s5220_s11 + $0x1f0] sm:$0xff] }
 0x3b6   :  { %2524 = vmatpush1.bf16.msra.mxu1 %v2523_v9  ;;  %v703_v9 = vrot.slane %v659_v48, %v3592_v55 }
 0x3b7   :  { %2526 = vmatprep.subr.bf16.mxu1 %v2525_v47 }
 0x3b8   :  { %2496 = vmatpush1.bf16.msra.mxu0 %v2495_v26  ;;  %v2535_v26 = vpack.c.bf16 %v891_v23, %v889_v22 }
 0x3b9   :  { %2498 = vmatprep.subr.bf16.mxu0 %v2497_v27  ;;  %v2537_v27 = vpack.c.bf16 %v896_v25, %v894_v24 }
 0x3ba   :  { %2528 = vmatpush1.bf16.msra.mxu1 %v2527_v14  ;;  %v913_v14 = vld [vmem:[%s5220_s11 + $0x1c0] sm:$0xff] }
 0x3bb   :  { %2530 = vmatprep.subr.bf16.mxu1 %v2529_v16 }
 0x3bc   :  { %2500 = vmatpush1.bf16.msra.mxu0 %v2499_v30  ;;  %v898_v30 = vld [vmem:[%s5220_s11 + $0x148] sm:$0xff] }
 0x3bd   :  { %v2541_v33 = vpack.c.bf16 %v900_v31, %v898_v30  ;;  %v921_v30 = vld [vmem:[%s5221_s12] sm:$0x3] }
 0x3be   :  { %2532 = vmatpush1.bf16.msra.mxu1 %v2531_v42  ;;  %v2563_v42 = vpack.c.bf16 %v919_v20, %v917_v19  ;;  %v926_v31 = vrot.slane %v921_v30, %v3595_v56  ;;  %v1905_v20 = vld [vmem:[%s5212_s3 + $0x2c0] sm:$0xff] }
 0x3bf   :  { %2534 = vmatprep.subr.bf16.mxu1 %v2533_v21  ;;  %v772_v21 = vld [vmem:[%s5219_s10] sm:$0x3] }
 0x3c0   :  { %v777_v22 = vrot.slane %v772_v21, %v3595_v56  ;;  %v781_v23 = vrot.slane %v772_v21, %v3592_v55  ;;  %v1910_v21 = vld [vmem:[%s5212_s3 + $0x2e8] sm:$0xff] }
 0x3c2   :  { %2536 = vmatpush1.bf16.msra.mxu1 %v2535_v26 }
 0x3c3   :  { %2538 = vmatprep.subr.bf16.mxu1 %v2537_v27 }
 0x3c6   :  { %2540 = vmatpush1.bf16.msra.mxu1 %v2539_v32  ;;  %v930_v32 = vrot.slane %v921_v30, %v3592_v55 }
 0x3c7   :  { %2542 = vmatprep.subr.bf16.mxu1 %v2541_v33 }
 0x3ca   :  { %2544 = vmatpush1.bf16.msra.mxu1 %v2543_v39 }
 0x3cb   :  { %2546 = vmatprep.subr.bf16.mxu1 %v2545_v40 }
 0x3ce   :  { %2548 = vmatpush1.bf16.msra.mxu1 %v2547_v50  ;;  %v1881_v50 = vld [vmem:[%s5212_s3 + $0x200] sm:$0xff] }
 0x3cf   :  { %2550 = vmatprep.subr.bf16.mxu1 %v2549_v49  ;;  %v2565_v49 = vpack.c.bf16 %v1884_v45, %v1882_v44  ;;  %v2567_v3 = vpack.c.bf16 %v1883_v51, %v1881_v50  ;;  %v1924_v44 = vld [vmem:[%s5212_s3 + $0x358] sm:$0xff]  ;;  %v1923_v51 = vld [vmem:[%s5212_s3 + $0x350] sm:$0xff] }
 0x3d1   :  { %2566 = vmatprep.subr.bf16.mxu0 %v2565_v49  ;;  %v1921_v49 = vld [vmem:[%s5212_s3 + $0x340] sm:$0xff] }
 0x3d2   :  { %2552 = vmatpush1.bf16.msra.mxu1 %v2551_v1  ;;  %v2569_v1 = vpack.c.bf16 %v1888_v15, %v1886_v52  ;;  %v2607_v52 = vpack.c.bf16 %v1923_v51, %v1921_v49  ;;  %v1958_v51 = vld [vmem:[%s5214_s5 + $0x260] sm:$0xff] }
 0x3d3   :  { %2554 = vmatprep.subr.bf16.mxu1 %v2553_v53  ;;  %v1885_v53 = vld [vmem:[%s5212_s3 + $0x220] sm:$0xff] }
 0x3d4   :  { %v2571_v59 = vpack.c.bf16 %v1887_v54, %v1885_v53 }
 0x3d6   :  { %2556 = vmatpush1.bf16.msra.mxu1 %v2555_v62  ;;  %v2573_v62 = vpack.c.bf16 %v1892_v58, %v1890_v57 }
 0x3d7   :  { %2558 = vmatprep.subr.bf16.mxu1 %v2557_v34  ;;  %v1889_v34 = vld [vmem:[%s5212_s3 + $0x240] sm:$0xff] }
 0x43c   :  { %v676_v63 = vpop.xlane.xlu0 %675 }
 0x43d   :  { %v677_v0 = vmul.f32 0.00390625, %v676_v63  ;;  %v1891_v63 = vld [vmem:[%s5212_s3 + $0x250] sm:$0xff] }
 0x43e   :  { %v2575_v46 = vpack.c.bf16 %v1891_v63, %v1889_v34  ;;  %v1925_v63 = vld [vmem:[%s5212_s3 + $0x360] sm:$0xff] }
 0x43f   :  { %v678_v2 = vadd.f32 1e-05, %v677_v0  ;;  %v1894_v0 = vld [vmem:[%s5212_s3 + $0x268] sm:$0xff] }
 0x441   :  { %2860 = vrsqrt.f32 %v678_v2  ;;  %v1896_v2 = vld [vmem:[%s5212_s3 + $0x278] sm:$0xff] }
 0x442   :  { %v2577_v48 = vpack.c.bf16 %v1896_v2, %v1894_v0  ;;  %v1927_v0 = vld [vmem:[%s5212_s3 + $0x370] sm:$0xff] }
 0x443   :  { %v2611_v2 = vpack.c.bf16 %v1927_v0, %v1925_v63  ;;  %v1966_v63 = vld [vmem:[%s5214_s5 + $0x2a0] sm:$0xff]  ;;  %v1968_v0 = vld [vmem:[%s5214_s5 + $0x2b0] sm:$0xff] }
 0x44b   :  { %v2861_v6 = vpop.eup %2860 }
 0x44c   :  { %v681_v7 = vmul.f32 %v2861_v6, %v3950_v61  ;;  %v680_v47 = vmul.f32 %v2861_v6, %v3947_v60  ;;  %v915_v61 = vld [vmem:[%s5220_s11 + $0x1d0] sm:$0xff]  ;;  %v918_v60 = vld [vmem:[%s5220_s11 + $0x1e8] sm:$0xff] }
 0x44d   :  { %v2559_v16 = vpack.c.bf16 %v915_v61, %v913_v14  ;;  %v2561_v18 = vpack.c.bf16 %v920_v17, %v918_v60  ;;  %v1898_v6 = vld [vmem:[%s5212_s3 + $0x288] sm:$0xff]  ;;  %v1901_v61 = vld [vmem:[%s5212_s3 + $0x2a0] sm:$0xff]  ;;  %v1908_v17 = vld [vmem:[%s5212_s3 + $0x2d8] sm:$0xff] }
 0x44e   :  { %v694_v10 = vmul.f32 %v690_v5, %v681_v7  ;;  %v693_v11 = vmul.f32 %v686_v4, %v680_v47  ;;  %v1893_v4 = vld [vmem:[%s5212_s3 + $0x260] sm:$0xff]  ;;  %v1895_v5 = vld [vmem:[%s5212_s3 + $0x270] sm:$0xff]  ;;  %v1900_v7 = vld [vmem:[%s5212_s3 + $0x298] sm:$0xff] }
 0x44f   :  { %2560 = vmatpush1.bf16.msra.mxu1 %v2559_v16  ;;  %v1897_v47 = vld [vmem:[%s5212_s3 + $0x280] sm:$0xff]  ;;  %v1903_v16 = vld [vmem:[%s5212_s3 + $0x2b0] sm:$0xff]  ;;  %v1906_v60 = vld [vmem:[%s5212_s3 + $0x2c8] sm:$0xff] }
 0x450   :  { %v707_v12 = vadd.f32 %v703_v9, %v694_v10  ;;  %v706_v13 = vadd.f32 %v699_v8, %v693_v11  ;;  %2562 = vmatprep.subr.bf16.mxu1 %v2561_v18  ;;  %v2579_v8 = vpack.c.bf16 %v1895_v5, %v1893_v4  ;;  %v2581_v9 = vpack.c.bf16 %v1900_v7, %v1898_v6  ;;  %v1899_v10 = vld [vmem:[%s5212_s3 + $0x290] sm:$0xff]  ;;  %v1902_v11 = vld [vmem:[%s5212_s3 + $0x2a8] sm:$0xff]  ;;  %v1929_v5 = vld [vmem:[%s5212_s3 + $0x380] sm:$0xff] }
 0x451   :  { %v2587_v18 = vpack.c.bf16 %v1903_v16, %v1901_v61  ;;  %v2589_v19 = vpack.c.bf16 %v1908_v17, %v1906_v60  ;;  %v1931_v6 = vld [vmem:[%s5212_s3 + $0x390] sm:$0xff]  ;;  %v1934_v7 = vld [vmem:[%s5212_s3 + $0x3a8] sm:$0xff]  ;;  %v1937_v16 = vld [vmem:[%s5212_s3 + $0x3c0] sm:$0xff] }
 0x452   :  { %848 = vmatprep.mubr.f32.mxu0 %v707_v12  ;;  %v1939_v60 = vld [vmem:[%s5212_s3 + $0x3d0] sm:$0xff]  ;;  %v1942_v17 = vld [vmem:[%s5212_s3 + $0x3e8] sm:$0xff] }
 0x453   :  { %849 = vmatmul.mubr.f32.vlgmr.msra.gmra.mrb[2].mxu0 %v706_v13  ;;  %2564 = vmatpush1.bf16.msra.mxu1 %v2563_v42  ;;  %v1907_v42 = vld [vmem:[%s5212_s3 + $0x2d0] sm:$0xff] }
 0x454   :  { %2568 = vmatpush1.bf16.msra.mxu0 %v2567_v3 }
 0x455   :  { %2570 = vmatprep.subr.bf16.mxu0 %v2569_v1 }
 0x458   :  { %2572 = vmatpush1.bf16.msra.mxu0 %v2571_v59 }
 0x459   :  { %2574 = vmatprep.subr.bf16.mxu0 %v2573_v62 }
 0x45c   :  { %2576 = vmatpush1.bf16.msra.mxu0 %v2575_v46  ;;  %v1930_v46 = vld [vmem:[%s5212_s3 + $0x388] sm:$0xff] }
 0x45d   :  { %2578 = vmatprep.subr.bf16.mxu0 %v2577_v48  ;;  %v1932_v48 = vld [vmem:[%s5212_s3 + $0x398] sm:$0xff] }
 0x45e   :  { %v2613_v4 = vpack.c.bf16 %v1932_v48, %v1930_v46  ;;  %v1973_v46 = vld [vmem:[%s5214_s5 + $0x2d8] sm:$0xff]  ;;  %v2651_v48 = vpack.c.bf16 %v1968_v0, %v1966_v63  ;;  %v1006_v63 = vld [vmem:[%s5222_s13] sm:$0x3] }
 0x45f   :  { %v1007_v0 = vld [vmem:[%s5223_s14] sm:$0x3] }
 0x460   :  { %2580 = vmatpush1.bf16.msra.mxu0 %v2579_v8  ;;  %v2615_v8 = vpack.c.bf16 %v1931_v6, %v1929_v5  ;;  %v1970_v5 = vld [vmem:[%s5214_s5 + $0x2c0] sm:$0xff]  ;;  %v1972_v6 = vld [vmem:[%s5214_s5 + $0x2d0] sm:$0xff] }
 0x461   :  { %2582 = vmatprep.subr.bf16.mxu0 %v2581_v9  ;;  %v1936_v9 = vld [vmem:[%s5212_s3 + $0x3b8] sm:$0xff] }
 0x526   :  { %v850_v24 = vpop.f32.mrb[2].mxu0 }
 0x527   :  { %v851_v25 = vadd.f32 %v850_v24, %v777_v22  ;;  %v852_v26 = vpop.f32.mrb[3].mxu0  ;;  %v1912_v22 = vld [vmem:[%s5212_s3 + $0x2f8] sm:$0xff] }
 0x528   :  { %v853_v27 = vadd.f32 %v852_v26, %v781_v23  ;;  %v2591_v23 = vpack.c.bf16 %v1907_v42, %v1905_v20  ;;  %v2593_v24 = vpack.c.bf16 %v1912_v22, %v1910_v21  ;;  %v1911_v26 = vld [vmem:[%s5212_s3 + $0x2f0] sm:$0xff]  ;;  %v1941_v42 = vld [vmem:[%s5212_s3 + $0x3e0] sm:$0xff] }
 0x529   :  { %v855_v29 = vmax.f32 %v851_v25, 0.0  ;;  %v1909_v25 = vld [vmem:[%s5212_s3 + $0x2e0] sm:$0xff]  ;;  %v1943_v21 = vld [vmem:[%s5212_s3 + $0x3f0] sm:$0xff] }
 0x52a   :  { %v856_v28 = vmax.f32 %v853_v27, 0.0  ;;  %v1914_v27 = vld [vmem:[%s5212_s3 + $0x308] sm:$0xff]  ;;  %v2627_v22 = vpack.c.bf16 %v1943_v21, %v1941_v42  ;;  %v1982_v42 = vld [vmem:[%s5214_s5 + $0x320] sm:$0xff]  ;;  %v1984_v21 = vld [vmem:[%s5214_s5 + $0x330] sm:$0xff] }
 0x52c   :  { %997 = vmatprep.mubr.f32.mxu1 %v856_v28  ;;  %v1916_v28 = vld [vmem:[%s5212_s3 + $0x318] sm:$0xff] }
 0x52d   :  { %998 = vmatmul.mubr.f32.vlgmr.msra.gmra.mrb[4].mxu1 %v855_v29  ;;  %v2595_v29 = vpack.c.bf16 %v1911_v26, %v1909_v25  ;;  %v2597_v30 = vpack.c.bf16 %v1916_v28, %v1914_v27  ;;  %v1946_v25 = vld [vmem:[%s5214_s5 + $0x200] sm:$0xff]  ;;  %v1948_v27 = vld [vmem:[%s5214_s5 + $0x210] sm:$0xff]  ;;  %v1951_v28 = vld [vmem:[%s5214_s5 + $0x228] sm:$0xff] }
 0x600   :  { %v999_v33 = vpop.f32.mrb[4].mxu1 }
 0x601   :  { %v1000_v35 = vadd.f32 %v999_v33, %v926_v31  ;;  %v1001_v36 = vpop.f32.mrb[5].mxu1  ;;  %v1913_v31 = vld [vmem:[%s5212_s3 + $0x300] sm:$0xff]  ;;  %v1918_v33 = vld [vmem:[%s5212_s3 + $0x328] sm:$0xff] }
 0x602   :  { %v1002_v37 = vadd.f32 %v1001_v36, %v930_v32  ;;  %v1915_v32 = vld [vmem:[%s5212_s3 + $0x310] sm:$0xff] }
 0x603   :  { %v4232_v38 = vadd.f32 %v1000_v35, %v706_v13  ;;  %v2583_v13 = vpack.c.bf16 %v1899_v10, %v1897_v47  ;;  %v1920_v35 = vld [vmem:[%s5212_s3 + $0x338] sm:$0xff]  ;;  %v2599_v36 = vpack.c.bf16 %v1915_v32, %v1913_v31  ;;  %v1933_v47 = vld [vmem:[%s5212_s3 + $0x3a0] sm:$0xff]  ;;  %v1935_v10 = vld [vmem:[%s5212_s3 + $0x3b0] sm:$0xff] }
 0x604   :  { %v4234_v39 = vadd.f32 %v1002_v37, %v707_v12  ;;  %v1904_v12 = vld [vmem:[%s5212_s3 + $0x2b8] sm:$0xff]  ;;  %v2601_v37 = vpack.c.bf16 %v1920_v35, %v1918_v33  ;;  %v1950_v32 = vld [vmem:[%s5214_s5 + $0x220] sm:$0xff]  ;;  %v1952_v33 = vld [vmem:[%s5214_s5 + $0x230] sm:$0xff] }
 0x605   :  { %v1008_v40 = vsel %vm660_vm0, %v4232_v38, 0.0  ;;  %v2585_v14 = vpack.c.bf16 %v1904_v12, %v1902_v11  ;;  %2584 = vmatpush1.bf16.msra.mxu0 %v2583_v13  ;;  %v2617_v11 = vpack.c.bf16 %v1936_v9, %v1934_v7  ;;  %v1938_v12 = vld [vmem:[%s5212_s3 + $0x3c8] sm:$0xff]  ;;  %v1940_v13 = vld [vmem:[%s5212_s3 + $0x3d8] sm:$0xff]  ;;  %v2655_v9 = vpack.c.bf16 %v1972_v6, %v1970_v5 }
 0x606   :  { %v1009_v41 = vsel %vm660_vm0, %v4234_v39, 0.0  ;;  %v2621_v61 = vpack.c.bf16 %v1940_v13, %v1938_v12  ;;  %v1955_v35 = vld [vmem:[%s5214_s5 + $0x248] sm:$0xff]  ;;  %v1981_v13 = vld [vmem:[%s5214_s5 + $0x318] sm:$0xff]  ;;  %v1045_v5 = vrot.slane %v1007_v0, %v3595_v56  ;;  %v1049_v6 = vrot.slane %v1007_v0, %v3592_v55 }
 0x607   :  { %v1010_v43 = vadd.f32 %v1009_v41, %v1008_v40  ;;  %2586 = vmatprep.subr.bf16.mxu0 %v2585_v14  ;;  %v1917_v40 = vld [vmem:[%s5212_s3 + $0x320] sm:$0xff]  ;;  %v1919_v41 = vld [vmem:[%s5212_s3 + $0x330] sm:$0xff]  ;;  %v2619_v14 = vpack.c.bf16 %v1935_v10, %v1933_v47  ;;  %v1975_v7 = vld [vmem:[%s5214_s5 + $0x2e8] sm:$0xff] }
 0x608   :  { %v2603_v45 = vpack.c.bf16 %v1919_v41, %v1917_v40  ;;  %v1954_v41 = vld [vmem:[%s5214_s5 + $0x240] sm:$0xff]  ;;  %v1979_v12 = vld [vmem:[%s5214_s5 + $0x308] sm:$0xff] }
 0x609   :  { %1011 = vadd.xlane.f32.xlu1 %v1010_v43  ;;  %2588 = vmatpush1.bf16.msra.mxu0 %v2587_v18  ;;  %v1922_v43 = vld [vmem:[%s5212_s3 + $0x348] sm:$0xff]  ;;  %v1944_v18 = vld [vmem:[%s5212_s3 + $0x3f8] sm:$0xff]  ;;  %v1974_v10 = vld [vmem:[%s5214_s5 + $0x2e0] sm:$0xff] }
 0x60a   :  { %2590 = vmatprep.subr.bf16.mxu0 %v2589_v19  ;;  %v2605_v50 = vpack.c.bf16 %v1924_v44, %v1922_v43  ;;  %v2623_v19 = vpack.c.bf16 %v1939_v60, %v1937_v16  ;;  %v2625_v20 = vpack.c.bf16 %v1944_v18, %v1942_v17  ;;  %v1956_v43 = vld [vmem:[%s5214_s5 + $0x250] sm:$0xff]  ;;  %v1959_v44 = vld [vmem:[%s5214_s5 + $0x268] sm:$0xff]  ;;  %v1978_v16 = vld [vmem:[%s5214_s5 + $0x300] sm:$0xff] }
 0x60b   :  { %v1980_v60 = vld [vmem:[%s5214_s5 + $0x310] sm:$0xff]  ;;  %v1983_v17 = vld [vmem:[%s5214_s5 + $0x328] sm:$0xff]  ;;  %v1985_v18 = vld [vmem:[%s5214_s5 + $0x338] sm:$0xff] }
 0x60d   :  { %2592 = vmatpush1.bf16.msra.mxu0 %v2591_v23  ;;  %v1947_v23 = vld [vmem:[%s5214_s5 + $0x208] sm:$0xff] }
 0x60e   :  { %2594 = vmatprep.subr.bf16.mxu0 %v2593_v24  ;;  %v1949_v24 = vld [vmem:[%s5214_s5 + $0x218] sm:$0xff] }
 0x60f   :  { %v2629_v26 = vpack.c.bf16 %v1949_v24, %v1947_v23  ;;  %v1989_v23 = vld [vmem:[%s5214_s5 + $0x358] sm:$0xff]  ;;  %v2667_v24 = vpack.c.bf16 %v1984_v21, %v1982_v42  ;;  %v2010_v42 = vld [vmem:[%s5215_s6 + $0x2] sm:$0x3] }
 0x610   :  { %v1274_v21 = vrot.slane %v2010_v42, %v3595_v56 }
 0x611   :  { %2596 = vmatpush1.bf16.msra.mxu0 %v2595_v29  ;;  %v1953_v29 = vld [vmem:[%s5214_s5 + $0x238] sm:$0xff]  ;;  %2630 = vmatprep.subr.bf16.mxu1 %v2629_v26  ;;  %v1986_v26 = vld [vmem:[%s5214_s5 + $0x340] sm:$0xff] }
 0x612   :  { %2598 = vmatprep.subr.bf16.mxu0 %v2597_v30  ;;  %v2631_v30 = vpack.c.bf16 %v1948_v27, %v1946_v25  ;;  %v2633_v31 = vpack.c.bf16 %v1953_v29, %v1951_v28  ;;  %v1988_v27 = vld [vmem:[%s5214_s5 + $0x350] sm:$0xff]  ;;  %v1991_v28 = vld [vmem:[%s5214_s5 + $0x368] sm:$0xff]  ;;  %v1993_v29 = vld [vmem:[%s5214_s5 + $0x378] sm:$0xff] }
 0x614   :  { %2632 = vmatpush1.bf16.msra.mxu1 %v2631_v30  ;;  %v2671_v30 = vpack.c.bf16 %v1988_v27, %v1986_v26 }
 0x615   :  { %2600 = vmatpush1.bf16.msra.mxu0 %v2599_v36  ;;  %v1957_v36 = vld [vmem:[%s5214_s5 + $0x258] sm:$0xff]  ;;  %2634 = vmatprep.subr.bf16.mxu1 %v2633_v31  ;;  %v2673_v31 = vpack.c.bf16 %v1993_v29, %v1991_v28 }
 0x616   :  { %2602 = vmatprep.subr.bf16.mxu0 %v2601_v37  ;;  %v2635_v37 = vpack.c.bf16 %v1952_v33, %v1950_v32  ;;  %v2637_v40 = vpack.c.bf16 %v1957_v36, %v1955_v35  ;;  %v1990_v32 = vld [vmem:[%s5214_s5 + $0x360] sm:$0xff]  ;;  %v1992_v33 = vld [vmem:[%s5214_s5 + $0x370] sm:$0xff]  ;;  %v1995_v35 = vld [vmem:[%s5214_s5 + $0x388] sm:$0xff] }
 0x617   :  { %v1997_v36 = vld [vmem:[%s5214_s5 + $0x398] sm:$0xff] }
 0x618   :  { %2636 = vmatpush1.bf16.msra.mxu1 %v2635_v37  ;;  %v2675_v37 = vpack.c.bf16 %v1992_v33, %v1990_v32  ;;  %v2014_v32 = vld [vmem:[%s5218_s9 + $0x208] sm:$0xff]  ;;  %v2016_v33 = vld [vmem:[%s5218_s9 + $0x218] sm:$0xff] }
 0x619   :  { %2604 = vmatpush1.bf16.msra.mxu0 %v2603_v45  ;;  %v1961_v45 = vld [vmem:[%s5214_s5 + $0x278] sm:$0xff]  ;;  %2638 = vmatprep.subr.bf16.mxu1 %v2637_v40  ;;  %v2677_v40 = vpack.c.bf16 %v1997_v36, %v1995_v35  ;;  %v2013_v35 = vld [vmem:[%s5218_s9 + $0x200] sm:$0xff]  ;;  %v2693_v36 = vpack.c.bf16 %v2016_v33, %v2014_v32 }
 0x61a   :  { %2606 = vmatprep.subr.bf16.mxu0 %v2605_v50  ;;  %v2639_v50 = vpack.c.bf16 %v1956_v43, %v1954_v41  ;;  %v2641_v49 = vpack.c.bf16 %v1961_v45, %v1959_v44  ;;  %v1994_v41 = vld [vmem:[%s5214_s5 + $0x380] sm:$0xff]  ;;  %v1996_v43 = vld [vmem:[%s5214_s5 + $0x390] sm:$0xff]  ;;  %v1999_v44 = vld [vmem:[%s5214_s5 + $0x3a8] sm:$0xff] }
 0x61b   :  { %v2001_v45 = vld [vmem:[%s5214_s5 + $0x3b8] sm:$0xff] }
 0x61c   :  { %2640 = vmatpush1.bf16.msra.mxu1 %v2639_v50  ;;  %v2679_v50 = vpack.c.bf16 %v1996_v43, %v1994_v41  ;;  %v2020_v41 = vld [vmem:[%s5218_s9 + $0x238] sm:$0xff] }
 0x61d   :  { %2608 = vmatpush1.bf16.msra.mxu0 %v2607_v52  ;;  %v1960_v52 = vld [vmem:[%s5214_s5 + $0x270] sm:$0xff]  ;;  %2642 = vmatprep.subr.bf16.mxu1 %v2641_v49  ;;  %v2681_v49 = vpack.c.bf16 %v2001_v45, %v1999_v44  ;;  %v2017_v45 = vld [vmem:[%s5218_s9 + $0x220] sm:$0xff]  ;;  %v2056_v32 = vld [vmem:[%s5218_s9 + $0x358] sm:$0xff] }
 0x696   :  { %v1012_v15 = vpop.xlane.xlu1 %1011 }
 0x697   :  { %v1013_v3 = vmul.f32 0.00390625, %v1012_v15  ;;  %v1963_v15 = vld [vmem:[%s5214_s5 + $0x288] sm:$0xff] }
 0x699   :  { %v4373_v1 = vsub.f32 %v4232_v38, %v1013_v3  ;;  %v4376_v53 = vsub.f32 %v4234_v39, %v1013_v3  ;;  %v1926_v38 = vld [vmem:[%s5212_s3 + $0x368] sm:$0xff]  ;;  %v1928_v39 = vld [vmem:[%s5212_s3 + $0x378] sm:$0xff] }
 0x69a   :  { %v2609_v34 = vpack.c.bf16 %v1928_v39, %v1926_v38  ;;  %v1965_v3 = vld [vmem:[%s5214_s5 + $0x298] sm:$0xff] }
 0x69b   :  { %v1016_v54 = vmul.f32 %v4373_v1, %v4373_v1  ;;  %v1017_v57 = vmul.f32 %v4376_v53, %v4376_v53  ;;  %v1969_v38 = vld [vmem:[%s5214_s5 + $0x2b8] sm:$0xff] }
 0x69c   :  { %2610 = vmatprep.subr.bf16.mxu0 %v2609_v34 }
 0x69d   :  { %v1018_v58 = vsel %vm660_vm0, %v1016_v54, 0.0  ;;  %v1019_v59 = vsel %vm660_vm0, %v1017_v57, 0.0  ;;  %2612 = vmatpush1.bf16.msra.mxu0 %v2611_v2  ;;  %v2643_v54 = vpack.c.bf16 %v1960_v52, %v1958_v51  ;;  %v2645_v57 = vpack.c.bf16 %v1965_v3, %v1963_v15  ;;  %v1971_v2 = vld [vmem:[%s5214_s5 + $0x2c8] sm:$0xff]  ;;  %v1998_v51 = vld [vmem:[%s5214_s5 + $0x3a0] sm:$0xff]  ;;  %v2000_v52 = vld [vmem:[%s5214_s5 + $0x3b0] sm:$0xff] }
 0x69e   :  { %v1020_v62 = vadd.f32 %v1019_v59, %v1018_v58  ;;  %2614 = vmatprep.subr.bf16.mxu0 %v2613_v4  ;;  %v1962_v58 = vld [vmem:[%s5214_s5 + $0x280] sm:$0xff]  ;;  %v1964_v59 = vld [vmem:[%s5214_s5 + $0x290] sm:$0xff]  ;;  %v2653_v4 = vpack.c.bf16 %v1973_v46, %v1971_v2  ;;  %v2003_v15 = vld [vmem:[%s5214_s5 + $0x3c8] sm:$0xff]  ;;  %v1032_v2 = vrot.slane %v1006_v63, %v3595_v56  ;;  %v1036_v46 = vrot.slane %v1006_v63, %v3592_v55 }
 0x69f   :  { %2644 = vmatpush1.bf16.msra.mxu1 %v2643_v54  ;;  %v2647_v39 = vpack.c.bf16 %v1964_v59, %v1962_v58  ;;  %v2005_v3 = vld [vmem:[%s5214_s5 + $0x3d8] sm:$0xff]  ;;  %v2683_v54 = vpack.c.bf16 %v2000_v52, %v1998_v51  ;;  %v2002_v58 = vld [vmem:[%s5214_s5 + $0x3c0] sm:$0xff]  ;;  %v2004_v59 = vld [vmem:[%s5214_s5 + $0x3d0] sm:$0xff] }
 0x6a0   :  { %1021 = vadd.xlane.f32.xlu1 %v1020_v62  ;;  %v1967_v62 = vld [vmem:[%s5214_s5 + $0x2a8] sm:$0xff]  ;;  %2646 = vmatprep.subr.bf16.mxu1 %v2645_v57  ;;  %v2685_v57 = vpack.c.bf16 %v2005_v3, %v2003_v15  ;;  %v2024_v51 = vld [vmem:[%s5218_s9 + $0x258] sm:$0xff]  ;;  %v2021_v3 = vld [vmem:[%s5218_s9 + $0x240] sm:$0xff] }
 0x6a1   :  { %2616 = vmatpush1.bf16.msra.mxu0 %v2615_v8  ;;  %v2649_v34 = vpack.c.bf16 %v1969_v38, %v1967_v62  ;;  %v1977_v8 = vld [vmem:[%s5214_s5 + $0x2f8] sm:$0xff]  ;;  %v2687_v62 = vpack.c.bf16 %v2004_v59, %v2002_v58 }
 0x6a2   :  { %2618 = vmatprep.subr.bf16.mxu0 %v2617_v11  ;;  %v2657_v47 = vpack.c.bf16 %v1977_v8, %v1975_v7  ;;  %v1976_v11 = vld [vmem:[%s5214_s5 + $0x2f0] sm:$0xff]  ;;  %v2028_v58 = vld [vmem:[%s5218_s9 + $0x278] sm:$0xff] }
 0x6a3   :  { %2648 = vmatpush1.bf16.msra.mxu1 %v2647_v39  ;;  %v2032_v63 = vld [vmem:[%s5218_s9 + $0x298] sm:$0xff] }
 0x6a4   :  { %2650 = vmatprep.subr.bf16.mxu1 %v2649_v34 }
 0x6a5   :  { %2620 = vmatpush1.bf16.msra.mxu0 %v2619_v14  ;;  %v2659_v14 = vpack.c.bf16 %v1976_v11, %v1974_v10  ;;  %v2007_v11 = vld [vmem:[%s5214_s5 + $0x3e8] sm:$0xff] }
 0x6a6   :  { %2622 = vmatprep.subr.bf16.mxu0 %v2621_v61  ;;  %v2661_v61 = vpack.c.bf16 %v1981_v13, %v1979_v12  ;;  %v2006_v13 = vld [vmem:[%s5214_s5 + $0x3e0] sm:$0xff] }
 0x6a7   :  { %2652 = vmatpush1.bf16.msra.mxu1 %v2651_v48 }
 0x6a8   :  { %2654 = vmatprep.subr.bf16.mxu1 %v2653_v4 }
 0x6a9   :  { %2624 = vmatpush1.bf16.msra.mxu0 %v2623_v19  ;;  %v2663_v19 = vpack.c.bf16 %v1980_v60, %v1978_v16 }
 0x6aa   :  { %2626 = vmatprep.subr.bf16.mxu0 %v2625_v20  ;;  %v2665_v20 = vpack.c.bf16 %v1985_v18, %v1983_v17 }
 0x6ab   :  { %2656 = vmatpush1.bf16.msra.mxu1 %v2655_v9 }
 0x6ac   :  { %2658 = vmatprep.subr.bf16.mxu1 %v2657_v47 }
 0x6ad   :  { %2628 = vmatpush1.bf16.msra.mxu0 %v2627_v22  ;;  %v1987_v22 = vld [vmem:[%s5214_s5 + $0x348] sm:$0xff] }
 0x6ae   :  { %v2669_v25 = vpack.c.bf16 %v1989_v23, %v1987_v22  ;;  %v1278_v22 = vrot.slane %v2010_v42, %v3592_v55  ;;  %2694 = vmatprep.subr.bf16.mxu0 %v2693_v36  ;;  %v2053_v36 = vld [vmem:[%s5218_s9 + $0x340] sm:$0xff] }
 0x6af   :  { %2660 = vmatpush1.bf16.msra.mxu1 %v2659_v14 }
 0x6b0   :  { %2662 = vmatprep.subr.bf16.mxu1 %v2661_v61  ;;  %v1945_v61 = vld [vmem:[%s5213_s4 + $0x2] sm:$0x3] }
 0x6b1   :  { %v1129_v16 = vrot.slane %v1945_v61, %v3592_v55  ;;  %v1125_v60 = vrot.slane %v1945_v61, %v3595_v56 }
 0x6b3   :  { %2664 = vmatpush1.bf16.msra.mxu1 %v2663_v19 }
 0x6b4   :  { %2666 = vmatprep.subr.bf16.mxu1 %v2665_v20 }
 0x6b7   :  { %2668 = vmatpush1.bf16.msra.mxu1 %v2667_v24 }
 0x6b8   :  { %2670 = vmatprep.subr.bf16.mxu1 %v2669_v25 }
 0x6bb   :  { %2672 = vmatpush1.bf16.msra.mxu1 %v2671_v30 }
 0x6bc   :  { %2674 = vmatprep.subr.bf16.mxu1 %v2673_v31 }
 0x6bf   :  { %2676 = vmatpush1.bf16.msra.mxu1 %v2675_v37  ;;  %v2015_v37 = vld [vmem:[%s5218_s9 + $0x210] sm:$0xff] }
 0x6c0   :  { %2678 = vmatprep.subr.bf16.mxu1 %v2677_v40  ;;  %v2018_v40 = vld [vmem:[%s5218_s9 + $0x228] sm:$0xff]  ;;  %v2695_v43 = vpack.c.bf16 %v2015_v37, %v2013_v35  ;;  %v2055_v37 = vld [vmem:[%s5218_s9 + $0x350] sm:$0xff] }
 0x6c1   :  { %v2697_v44 = vpack.c.bf16 %v2020_v41, %v2018_v40  ;;  %v2735_v40 = vpack.c.bf16 %v2055_v37, %v2053_v36  ;;  %v2090_v37 = vld [vmem:[%s5220_s11 + $0x260] sm:$0xff] }
 0x6c3   :  { %2680 = vmatpush1.bf16.msra.mxu1 %v2679_v50  ;;  %v2019_v50 = vld [vmem:[%s5218_s9 + $0x230] sm:$0xff] }
 0x6c4   :  { %2682 = vmatprep.subr.bf16.mxu1 %v2681_v49  ;;  %v2022_v49 = vld [vmem:[%s5218_s9 + $0x248] sm:$0xff]  ;;  %v2699_v52 = vpack.c.bf16 %v2019_v50, %v2017_v45 }
 0x6c5   :  { %v2701_v15 = vpack.c.bf16 %v2024_v51, %v2022_v49 }
 0x6c7   :  { %2684 = vmatpush1.bf16.msra.mxu1 %v2683_v54  ;;  %v2023_v54 = vld [vmem:[%s5218_s9 + $0x250] sm:$0xff] }
 0x6c8   :  { %2686 = vmatprep.subr.bf16.mxu1 %v2685_v57  ;;  %v2026_v57 = vld [vmem:[%s5218_s9 + $0x268] sm:$0xff]  ;;  %v2703_v59 = vpack.c.bf16 %v2023_v54, %v2021_v3  ;;  %v2057_v54 = vld [vmem:[%s5218_s9 + $0x360] sm:$0xff] }
 0x6cb   :  { %2688 = vmatpush1.bf16.msra.mxu1 %v2687_v62  ;;  %v2705_v62 = vpack.c.bf16 %v2028_v58, %v2026_v57  ;;  %v2059_v57 = vld [vmem:[%s5218_s9 + $0x370] sm:$0xff] }
 0x6cc   :  { %v2739_v58 = vpack.c.bf16 %v2059_v57, %v2057_v54  ;;  %v2098_v54 = vld [vmem:[%s5220_s11 + $0x2a0] sm:$0xff]  ;;  %v2100_v57 = vld [vmem:[%s5220_s11 + $0x2b0] sm:$0xff] }
 0x72d   :  { %v1022_v38 = vpop.xlane.xlu1 %1021 }
 0x72e   :  { %v1023_v39 = vmul.f32 0.00390625, %v1022_v38  ;;  %v2025_v38 = vld [vmem:[%s5218_s9 + $0x260] sm:$0xff] }
 0x730   :  { %v1024_v34 = vadd.f32 1e-05, %v1023_v39  ;;  %v2027_v39 = vld [vmem:[%s5218_s9 + $0x270] sm:$0xff] }
 0x731   :  { %v2707_v0 = vpack.c.bf16 %v2027_v39, %v2025_v38  ;;  %v2061_v39 = vld [vmem:[%s5218_s9 + $0x380] sm:$0xff] }
 0x732   :  { %2862 = vrsqrt.f32 %v1024_v34  ;;  %v2030_v34 = vld [vmem:[%s5218_s9 + $0x288] sm:$0xff] }
 0x73c   :  { %v2863_v48 = vpop.eup %2862 }
 0x73d   :  { %v1027_v4 = vmul.f32 %v2863_v48, %v4376_v53  ;;  %v1026_v7 = vmul.f32 %v2863_v48, %v4373_v1  ;;  %v2009_v53 = vld [vmem:[%s5214_s5 + $0x3f8] sm:$0xff]  ;;  %v2008_v1 = vld [vmem:[%s5214_s5 + $0x3f0] sm:$0xff] }
 0x73e   :  { %v2689_v12 = vpack.c.bf16 %v2009_v53, %v2007_v11  ;;  %v2691_v14 = vpack.c.bf16 %v2008_v1, %v2006_v13  ;;  %v2031_v48 = vld [vmem:[%s5218_s9 + $0x290] sm:$0xff]  ;;  %v2042_v1 = vld [vmem:[%s5218_s9 + $0x2e8] sm:$0xff] }
 0x73f   :  { %v1040_v8 = vmul.f32 %v1036_v46, %v1027_v4  ;;  %v1039_v9 = vmul.f32 %v1032_v2, %v1026_v7  ;;  %v2709_v2 = vpack.c.bf16 %v2032_v63, %v2030_v34  ;;  %v2029_v46 = vld [vmem:[%s5218_s9 + $0x280] sm:$0xff]  ;;  %v2034_v4 = vld [vmem:[%s5218_s9 + $0x2a8] sm:$0xff]  ;;  %v2039_v13 = vld [vmem:[%s5218_s9 + $0x2d0] sm:$0xff] }
 0x740   :  { %2690 = vmatprep.subr.bf16.mxu1 %v2689_v12  ;;  %v2037_v12 = vld [vmem:[%s5218_s9 + $0x2c0] sm:$0xff]  ;;  %v2063_v34 = vld [vmem:[%s5218_s9 + $0x390] sm:$0xff]  ;;  %v2066_v63 = vld [vmem:[%s5218_s9 + $0x3a8] sm:$0xff] }
 0x741   :  { %v1053_v47 = vadd.f32 %v1049_v6, %v1040_v8  ;;  %v1052_v10 = vadd.f32 %v1045_v5, %v1039_v9  ;;  %2692 = vmatpush1.bf16.msra.mxu1 %v2691_v14  ;;  %v2036_v5 = vld [vmem:[%s5218_s9 + $0x2b8] sm:$0xff]  ;;  %v2711_v6 = vpack.c.bf16 %v2031_v48, %v2029_v46  ;;  %v2033_v8 = vld [vmem:[%s5218_s9 + $0x2a0] sm:$0xff]  ;;  %v2035_v9 = vld [vmem:[%s5218_s9 + $0x2b0] sm:$0xff]  ;;  %v2719_v61 = vpack.c.bf16 %v2039_v13, %v2037_v12 }
 0x742   :  { %v2713_v7 = vpack.c.bf16 %v2036_v5, %v2034_v4  ;;  %v2715_v11 = vpack.c.bf16 %v2035_v9, %v2033_v8  ;;  %v2044_v14 = vld [vmem:[%s5218_s9 + $0x2f8] sm:$0xff]  ;;  %v2065_v46 = vld [vmem:[%s5218_s9 + $0x3a0] sm:$0xff]  ;;  %v2067_v48 = vld [vmem:[%s5218_s9 + $0x3b0] sm:$0xff] }
 0x743   :  { %1196 = vmatprep.mubr.f32.mxu0 %v1053_v47  ;;  %v2070_v5 = vld [vmem:[%s5218_s9 + $0x3c8] sm:$0xff]  ;;  %v2069_v9 = vld [vmem:[%s5218_s9 + $0x3c0] sm:$0xff] }
 0x744   :  { %1197 = vmatmul.mubr.f32.vlgmr.msra.gmra.mrb[4].mxu0 %v1052_v10  ;;  %v2073_v13 = vld [vmem:[%s5218_s9 + $0x3e0] sm:$0xff] }
 0x745   :  { %2696 = vmatpush1.bf16.msra.mxu0 %v2695_v43 }
 0x746   :  { %2698 = vmatprep.subr.bf16.mxu0 %v2697_v44 }
 0x749   :  { %2700 = vmatpush1.bf16.msra.mxu0 %v2699_v52 }
 0x74a   :  { %2702 = vmatprep.subr.bf16.mxu0 %v2701_v15 }
 0x74d   :  { %2704 = vmatpush1.bf16.msra.mxu0 %v2703_v59  ;;  %v2062_v59 = vld [vmem:[%s5218_s9 + $0x388] sm:$0xff] }
 0x74e   :  { %2706 = vmatprep.subr.bf16.mxu0 %v2705_v62  ;;  %v2064_v62 = vld [vmem:[%s5218_s9 + $0x398] sm:$0xff] }
 0x74f   :  { %v2741_v38 = vpack.c.bf16 %v2064_v62, %v2062_v59  ;;  %v2105_v59 = vld [vmem:[%s5220_s11 + $0x2d8] sm:$0xff]  ;;  %v2779_v62 = vpack.c.bf16 %v2100_v57, %v2098_v54 }
 0x751   :  { %2708 = vmatpush1.bf16.msra.mxu0 %v2707_v0  ;;  %v2743_v0 = vpack.c.bf16 %v2063_v34, %v2061_v39  ;;  %v2102_v39 = vld [vmem:[%s5220_s11 + $0x2c0] sm:$0xff]  ;;  %v2104_v34 = vld [vmem:[%s5220_s11 + $0x2d0] sm:$0xff] }
 0x752   :  { %2710 = vmatprep.subr.bf16.mxu0 %v2709_v2  ;;  %v2068_v2 = vld [vmem:[%s5218_s9 + $0x3b8] sm:$0xff] }
 0x753   :  { %v2745_v4 = vpack.c.bf16 %v2068_v2, %v2066_v63  ;;  %v2107_v63 = vld [vmem:[%s5220_s11 + $0x2e8] sm:$0xff]  ;;  %v2783_v2 = vpack.c.bf16 %v2104_v34, %v2102_v39 }
 0x755   :  { %2712 = vmatpush1.bf16.msra.mxu0 %v2711_v6  ;;  %v2072_v6 = vld [vmem:[%s5218_s9 + $0x3d8] sm:$0xff] }
 0x756   :  { %2714 = vmatprep.subr.bf16.mxu0 %v2713_v7  ;;  %v2747_v7 = vpack.c.bf16 %v2067_v48, %v2065_v46  ;;  %v2749_v8 = vpack.c.bf16 %v2072_v6, %v2070_v5  ;;  %v2106_v48 = vld [vmem:[%s5220_s11 + $0x2e0] sm:$0xff]  ;;  %v2111_v5 = vld [vmem:[%s5220_s11 + $0x308] sm:$0xff]  ;;  %v2113_v6 = vld [vmem:[%s5220_s11 + $0x318] sm:$0xff] }
 0x759   :  { %2716 = vmatpush1.bf16.msra.mxu0 %v2715_v11  ;;  %v2076_v11 = vld [vmem:[%s5218_s9 + $0x3f8] sm:$0xff] }
 0x817   :  { %v1198_v17 = vpop.f32.mrb[4].mxu0 }
 0x818   :  { %v1200_v18 = vpop.f32.mrb[5].mxu0  ;;  %v1199_v20 = vadd.f32 %v1198_v17, %v1125_v60  ;;  %v2041_v60 = vld [vmem:[%s5218_s9 + $0x2e0] sm:$0xff]  ;;  %v2043_v17 = vld [vmem:[%s5218_s9 + $0x2f0] sm:$0xff] }
 0x819   :  { %v1201_v19 = vadd.f32 %v1200_v18, %v1129_v16  ;;  %v2721_v16 = vpack.c.bf16 %v2044_v14, %v2042_v1  ;;  %v2046_v18 = vld [vmem:[%s5218_s9 + $0x308] sm:$0xff]  ;;  %v2075_v1 = vld [vmem:[%s5218_s9 + $0x3f0] sm:$0xff] }
 0x81a   :  { %v2755_v14 = vpack.c.bf16 %v2075_v1, %v2073_v13  ;;  %v2114_v13 = vld [vmem:[%s5220_s11 + $0x320] sm:$0xff]  ;;  %v2116_v1 = vld [vmem:[%s5220_s11 + $0x330] sm:$0xff] }
 0x81b   :  { %1345 = vmatprep.mubr.f32.mxu1 %v1201_v19  ;;  %v2048_v19 = vld [vmem:[%s5218_s9 + $0x318] sm:$0xff] }
 0x81c   :  { %1346 = vmatmul.mubr.f32.vlgmr.msra.gmra.mrb[6].mxu1 %v1199_v20  ;;  %v2723_v20 = vpack.c.bf16 %v2043_v17, %v2041_v60  ;;  %v2725_v42 = vpack.c.bf16 %v2048_v19, %v2046_v18  ;;  %v2078_v60 = vld [vmem:[%s5220_s11 + $0x200] sm:$0xff]  ;;  %v2080_v18 = vld [vmem:[%s5220_s11 + $0x210] sm:$0xff]  ;;  %v2083_v19 = vld [vmem:[%s5220_s11 + $0x228] sm:$0xff] }
 0x8ef   :  { %v1347_v23 = vpop.f32.mrb[6].mxu1 }
 0x8f0   :  { %v1348_v24 = vadd.f32 %v1347_v23, %v1274_v21  ;;  %v1349_v25 = vpop.f32.mrb[7].mxu1  ;;  %v2045_v21 = vld [vmem:[%s5218_s9 + $0x300] sm:$0xff]  ;;  %v2050_v23 = vld [vmem:[%s5218_s9 + $0x328] sm:$0xff] }
 0x8f1   :  { %v1350_v26 = vadd.f32 %v1349_v25, %v1278_v22  ;;  %v2047_v22 = vld [vmem:[%s5218_s9 + $0x310] sm:$0xff] }
 0x8f2   :  { %v4658_v27 = vadd.f32 %v1348_v24, %v1052_v10  ;;  %v2040_v10 = vld [vmem:[%s5218_s9 + $0x2d8] sm:$0xff]  ;;  %v2727_v25 = vpack.c.bf16 %v2047_v22, %v2045_v21  ;;  %v2082_v22 = vld [vmem:[%s5220_s11 + $0x220] sm:$0xff] }
 0x8f3   :  { %v4660_v28 = vadd.f32 %v1350_v26, %v1053_v47  ;;  %v2038_v47 = vld [vmem:[%s5218_s9 + $0x2c8] sm:$0xff]  ;;  %v2052_v24 = vld [vmem:[%s5218_s9 + $0x338] sm:$0xff] }
 0x8f4   :  { %v1358_v29 = vsel %vm660_vm0, %v4658_v27, 0.0  ;;  %v2717_v53 = vpack.c.bf16 %v2040_v10, %v2038_v47  ;;  %v2729_v26 = vpack.c.bf16 %v2052_v24, %v2050_v23  ;;  %v2071_v47 = vld [vmem:[%s5218_s9 + $0x3d0] sm:$0xff]  ;;  %v2074_v10 = vld [vmem:[%s5218_s9 + $0x3e8] sm:$0xff] }
 0x8f5   :  { %v1359_v30 = vsel %vm660_vm0, %v4660_v28, 0.0  ;;  %v2753_v12 = vpack.c.bf16 %v2076_v11, %v2074_v10  ;;  %v2084_v23 = vld [vmem:[%s5220_s11 + $0x230] sm:$0xff]  ;;  %v2087_v24 = vld [vmem:[%s5220_s11 + $0x248] sm:$0xff]  ;;  %v2117_v11 = vld [vmem:[%s5220_s11 + $0x338] sm:$0xff] }
 0x8f6   :  { %v1360_v31 = vadd.f32 %v1359_v30, %v1358_v29  ;;  %2718 = vmatprep.subr.bf16.mxu0 %v2717_v53  ;;  %v2049_v29 = vld [vmem:[%s5218_s9 + $0x320] sm:$0xff]  ;;  %v2051_v30 = vld [vmem:[%s5218_s9 + $0x330] sm:$0xff]  ;;  %v2751_v53 = vpack.c.bf16 %v2071_v47, %v2069_v9  ;;  %v2115_v10 = vld [vmem:[%s5220_s11 + $0x328] sm:$0xff] }
 0x8f7   :  { %2720 = vmatpush1.bf16.msra.mxu0 %v2719_v61  ;;  %v2731_v33 = vpack.c.bf16 %v2051_v30, %v2049_v29  ;;  %v2079_v61 = vld [vmem:[%s5220_s11 + $0x208] sm:$0xff]  ;;  %v2086_v30 = vld [vmem:[%s5220_s11 + $0x240] sm:$0xff]  ;;  %v2112_v47 = vld [vmem:[%s5220_s11 + $0x310] sm:$0xff] }
 0x8f8   :  { %1361 = vadd.xlane.f32.xlu0 %v1360_v31  ;;  %2722 = vmatprep.subr.bf16.mxu0 %v2721_v16  ;;  %v2054_v31 = vld [vmem:[%s5218_s9 + $0x348] sm:$0xff]  ;;  %v2081_v16 = vld [vmem:[%s5220_s11 + $0x218] sm:$0xff]  ;;  %v2110_v9 = vld [vmem:[%s5220_s11 + $0x300] sm:$0xff] }
 0x8f9   :  { %v2733_v35 = vpack.c.bf16 %v2056_v32, %v2054_v31  ;;  %v2757_v17 = vpack.c.bf16 %v2081_v16, %v2079_v61  ;;  %v2088_v31 = vld [vmem:[%s5220_s11 + $0x250] sm:$0xff]  ;;  %v2091_v32 = vld [vmem:[%s5220_s11 + $0x268] sm:$0xff]  ;;  %v2121_v61 = vld [vmem:[%s5220_s11 + $0x358] sm:$0xff]  ;;  %v2795_v16 = vpack.c.bf16 %v2116_v1, %v2114_v13 }
 0x8fb   :  { %2724 = vmatpush1.bf16.msra.mxu0 %v2723_v20  ;;  %v2085_v20 = vld [vmem:[%s5220_s11 + $0x238] sm:$0xff]  ;;  %2758 = vmatprep.subr.bf16.mxu1 %v2757_v17  ;;  %v2118_v17 = vld [vmem:[%s5220_s11 + $0x340] sm:$0xff] }
 0x8fc   :  { %2726 = vmatprep.subr.bf16.mxu0 %v2725_v42  ;;  %v2759_v42 = vpack.c.bf16 %v2080_v18, %v2078_v60  ;;  %v2761_v21 = vpack.c.bf16 %v2085_v20, %v2083_v19  ;;  %v2120_v18 = vld [vmem:[%s5220_s11 + $0x350] sm:$0xff]  ;;  %v2123_v19 = vld [vmem:[%s5220_s11 + $0x368] sm:$0xff]  ;;  %v2125_v20 = vld [vmem:[%s5220_s11 + $0x378] sm:$0xff] }
 0x8fe   :  { %2760 = vmatpush1.bf16.msra.mxu1 %v2759_v42  ;;  %v2799_v42 = vpack.c.bf16 %v2120_v18, %v2118_v17 }
 0x8ff   :  { %2728 = vmatpush1.bf16.msra.mxu0 %v2727_v25  ;;  %v2089_v25 = vld [vmem:[%s5220_s11 + $0x258] sm:$0xff]  ;;  %2762 = vmatprep.subr.bf16.mxu1 %v2761_v21  ;;  %v2801_v21 = vpack.c.bf16 %v2125_v20, %v2123_v19 }
 0x900   :  { %2730 = vmatprep.subr.bf16.mxu0 %v2729_v26  ;;  %v2763_v26 = vpack.c.bf16 %v2084_v23, %v2082_v22  ;;  %v2765_v29 = vpack.c.bf16 %v2089_v25, %v2087_v24  ;;  %v2122_v22 = vld [vmem:[%s5220_s11 + $0x360] sm:$0xff]  ;;  %v2124_v23 = vld [vmem:[%s5220_s11 + $0x370] sm:$0xff]  ;;  %v2127_v24 = vld [vmem:[%s5220_s11 + $0x388] sm:$0xff] }
 0x901   :  { %v2129_v25 = vld [vmem:[%s5220_s11 + $0x398] sm:$0xff] }
 0x902   :  { %2764 = vmatpush1.bf16.msra.mxu1 %v2763_v26  ;;  %v2803_v26 = vpack.c.bf16 %v2124_v23, %v2122_v22 }
 0x903   :  { %2732 = vmatpush1.bf16.msra.mxu0 %v2731_v33  ;;  %v2093_v33 = vld [vmem:[%s5220_s11 + $0x278] sm:$0xff]  ;;  %2766 = vmatprep.subr.bf16.mxu1 %v2765_v29  ;;  %v2805_v29 = vpack.c.bf16 %v2129_v25, %v2127_v24  ;;  %v1772_v24 = vld [vmem:[%s5224_s15 + $0x80] sm:$0xff]  ;;  %v1773_v25 = vld [vmem:[%s5224_s15 + $0x88] sm:$0xff] }
 0x904   :  { %2734 = vmatprep.subr.bf16.mxu0 %v2733_v35  ;;  %v2767_v35 = vpack.c.bf16 %v2088_v31, %v2086_v30  ;;  %v2769_v36 = vpack.c.bf16 %v2093_v33, %v2091_v32  ;;  %v2126_v30 = vld [vmem:[%s5220_s11 + $0x380] sm:$0xff]  ;;  %v2128_v31 = vld [vmem:[%s5220_s11 + $0x390] sm:$0xff]  ;;  %v2131_v32 = vld [vmem:[%s5220_s11 + $0x3a8] sm:$0xff] }
 0x905   :  { %v2133_v33 = vld [vmem:[%s5220_s11 + $0x3b8] sm:$0xff] }
 0x906   :  { %2768 = vmatpush1.bf16.msra.mxu1 %v2767_v35  ;;  %v2807_v35 = vpack.c.bf16 %v2128_v31, %v2126_v30  ;;  %v1757_v30 = vld [vmem:[%s5224_s15 + $0x8] sm:$0xff]  ;;  %v1774_v31 = vld [vmem:[%s5224_s15 + $0x90] sm:$0xff] }
 0x907   :  { %2736 = vmatpush1.bf16.msra.mxu0 %v2735_v40  ;;  %v2092_v40 = vld [vmem:[%s5220_s11 + $0x270] sm:$0xff]  ;;  %2770 = vmatprep.subr.bf16.mxu1 %v2769_v36  ;;  %v2809_v36 = vpack.c.bf16 %v2133_v33, %v2131_v32  ;;  %v1775_v32 = vld [vmem:[%s5224_s15 + $0x98] sm:$0xff] }
 0x985   :  { %v1362_v41 = vpop.xlane.xlu0 %1361 }
 0x986   :  { %v1363_v43 = vmul.f32 0.00390625, %v1362_v41  ;;  %v2095_v41 = vld [vmem:[%s5220_s11 + $0x288] sm:$0xff] }
 0x988   :  { %v4799_v44 = vsub.f32 %v4658_v27, %v1363_v43  ;;  %v4802_v45 = vsub.f32 %v4660_v28, %v1363_v43  ;;  %v2058_v27 = vld [vmem:[%s5218_s9 + $0x368] sm:$0xff]  ;;  %v2060_v28 = vld [vmem:[%s5218_s9 + $0x378] sm:$0xff] }
 0x989   :  { %v2737_v3 = vpack.c.bf16 %v2060_v28, %v2058_v27  ;;  %v2097_v43 = vld [vmem:[%s5220_s11 + $0x298] sm:$0xff] }
 0x98a   :  { %v1366_v50 = vmul.f32 %v4799_v44, %v4799_v44  ;;  %v1367_v49 = vmul.f32 %v4802_v45, %v4802_v45  ;;  %v2101_v27 = vld [vmem:[%s5220_s11 + $0x2b8] sm:$0xff] }
 0x98b   :  { %2738 = vmatprep.subr.bf16.mxu0 %v2737_v3 }
 0x98c   :  { %v1368_v51 = vsel %vm660_vm0, %v1366_v50, 0.0  ;;  %v1369_v52 = vsel %vm660_vm0, %v1367_v49, 0.0  ;;  %2740 = vmatpush1.bf16.msra.mxu0 %v2739_v58  ;;  %v2771_v50 = vpack.c.bf16 %v2092_v40, %v2090_v37  ;;  %v2773_v49 = vpack.c.bf16 %v2097_v43, %v2095_v41  ;;  %v2103_v58 = vld [vmem:[%s5220_s11 + $0x2c8] sm:$0xff]  ;;  %v2130_v37 = vld [vmem:[%s5220_s11 + $0x3a0] sm:$0xff]  ;;  %v2132_v40 = vld [vmem:[%s5220_s11 + $0x3b0] sm:$0xff] }
 0x98d   :  { %v1370_v15 = vadd.f32 %v1369_v52, %v1368_v51  ;;  %2742 = vmatprep.subr.bf16.mxu0 %v2741_v38  ;;  %v2094_v51 = vld [vmem:[%s5220_s11 + $0x280] sm:$0xff]  ;;  %v2096_v52 = vld [vmem:[%s5220_s11 + $0x290] sm:$0xff]  ;;  %v2781_v38 = vpack.c.bf16 %v2105_v59, %v2103_v58  ;;  %v2135_v41 = vld [vmem:[%s5220_s11 + $0x3c8] sm:$0xff] }
 0x98e   :  { %2772 = vmatpush1.bf16.msra.mxu1 %v2771_v50  ;;  %v2775_v28 = vpack.c.bf16 %v2096_v52, %v2094_v51  ;;  %v2137_v43 = vld [vmem:[%s5220_s11 + $0x3d8] sm:$0xff]  ;;  %v2811_v50 = vpack.c.bf16 %v2132_v40, %v2130_v37  ;;  %v1776_v40 = vld [vmem:[%s5224_s15 + $0xa0] sm:$0xff] }
 0x98f   :  { %1371 = vadd.xlane.f32.xlu1 %v1370_v15  ;;  %v2099_v15 = vld [vmem:[%s5220_s11 + $0x2a8] sm:$0xff]  ;;  %2774 = vmatprep.subr.bf16.mxu1 %v2773_v49  ;;  %v2813_v49 = vpack.c.bf16 %v2137_v43, %v2135_v41  ;;  %v1759_v37 = vld [vmem:[%s5224_s15 + $0x18] sm:$0xff] }
 0x990   :  { %2744 = vmatpush1.bf16.msra.mxu0 %v2743_v0  ;;  %v2777_v3 = vpack.c.bf16 %v2101_v27, %v2099_v15  ;;  %v2109_v0 = vld [vmem:[%s5220_s11 + $0x2f8] sm:$0xff]  ;;  %v2011_v27 = vld [vmem:[%s5216_s7 + $0x2] sm:$0x3]  ;;  %v1777_v41 = vld [vmem:[%s5224_s15 + $0xa8] sm:$0xff] }
 0x991   :  { %2746 = vmatprep.subr.bf16.mxu0 %v2745_v4  ;;  %v2785_v46 = vpack.c.bf16 %v2109_v0, %v2107_v63  ;;  %v2108_v4 = vld [vmem:[%s5220_s11 + $0x2f0] sm:$0xff]  ;;  %v1386_v54 = vrot.slane %v2011_v27, %v3592_v55 }
 0x992   :  { %2776 = vmatpush1.bf16.msra.mxu1 %v2775_v28  ;;  %v2012_v28 = vld [vmem:[%s5217_s8 + $0x2] sm:$0x3] }
 0x993   :  { %2778 = vmatprep.subr.bf16.mxu1 %v2777_v3  ;;  %v1382_v3 = vrot.slane %v2011_v27, %v3595_v56  ;;  %v1395_v59 = vrot.slane %v2012_v28, %v3595_v56 }
 0x994   :  { %2748 = vmatpush1.bf16.msra.mxu0 %v2747_v7  ;;  %v2787_v7 = vpack.c.bf16 %v2108_v4, %v2106_v48  ;;  %v2141_v48 = vld [vmem:[%s5220_s11 + $0x3f8] sm:$0xff] }
 0x995   :  { %2750 = vmatprep.subr.bf16.mxu0 %v2749_v8  ;;  %v2789_v8 = vpack.c.bf16 %v2113_v6, %v2111_v5  ;;  %v2138_v5 = vld [vmem:[%s5220_s11 + $0x3e0] sm:$0xff]  ;;  %v2140_v6 = vld [vmem:[%s5220_s11 + $0x3f0] sm:$0xff] }
 0x996   :  { %2780 = vmatpush1.bf16.msra.mxu1 %v2779_v62  ;;  %v1399_v62 = vrot.slane %v2012_v28, %v3592_v55 }
 0x997   :  { %2782 = vmatprep.subr.bf16.mxu1 %v2781_v38 }
 0x998   :  { %2752 = vmatpush1.bf16.msra.mxu0 %v2751_v53  ;;  %v2791_v53 = vpack.c.bf16 %v2112_v47, %v2110_v9 }
 0x999   :  { %2754 = vmatprep.subr.bf16.mxu0 %v2753_v12  ;;  %v2793_v12 = vpack.c.bf16 %v2117_v11, %v2115_v10 }
 0x99a   :  { %2784 = vmatpush1.bf16.msra.mxu1 %v2783_v2  ;;  %v2134_v2 = vld [vmem:[%s5220_s11 + $0x3c0] sm:$0xff] }
 0x99b   :  { %2786 = vmatprep.subr.bf16.mxu1 %v2785_v46 }
 0x99c   :  { %2756 = vmatpush1.bf16.msra.mxu0 %v2755_v14  ;;  %v2119_v14 = vld [vmem:[%s5220_s11 + $0x348] sm:$0xff] }
 0x99d   :  { %v2797_v60 = vpack.c.bf16 %v2121_v61, %v2119_v14  ;;  %v2142_v14 = vld [vmem:[%s5221_s12 + $0x2] sm:$0x3] }
 0x99e   :  { %2788 = vmatpush1.bf16.msra.mxu1 %v2787_v7  ;;  %v2819_v7 = vpack.c.bf16 %v2140_v6, %v2138_v5  ;;  %v1626_v61 = vrot.slane %v2142_v14, %v3595_v56  ;;  %v1782_v5 = vld [vmem:[%s5224_s15 + $0xd0] sm:$0xff] }
 0x99f   :  { %2790 = vmatprep.subr.bf16.mxu1 %v2789_v8  ;;  %v2077_v8 = vld [vmem:[%s5219_s10 + $0x2] sm:$0x3] }
 0x9a0   :  { %v1475_v9 = vrot.slane %v2077_v8, %v3595_v56  ;;  %v1479_v47 = vrot.slane %v2077_v8, %v3592_v55  ;;  %v1766_v8 = vld [vmem:[%s5224_s15 + $0x50] sm:$0xff] }
 0x9a2   :  { %2792 = vmatpush1.bf16.msra.mxu1 %v2791_v53 }
 0x9a3   :  { %2794 = vmatprep.subr.bf16.mxu1 %v2793_v12 }
 0x9a6   :  { %2796 = vmatpush1.bf16.msra.mxu1 %v2795_v16  ;;  %v1630_v16 = vrot.slane %v2142_v14, %v3592_v55  ;;  %v1786_v14 = vld [vmem:[%s5224_s15 + $0xf0] sm:$0xff] }
 0x9a7   :  { %2798 = vmatprep.subr.bf16.mxu1 %v2797_v60 }
 0x9aa   :  { %2800 = vmatpush1.bf16.msra.mxu1 %v2799_v42 }
 0x9ab   :  { %2802 = vmatprep.subr.bf16.mxu1 %v2801_v21 }
 0x9ae   :  { %2804 = vmatpush1.bf16.msra.mxu1 %v2803_v26  ;;  %v1756_v26 = vld [vmem:[%s5224_s15] sm:$0xff] }
 0x9af   :  { %2806 = vmatprep.subr.bf16.mxu1 %v2805_v29  ;;  %v2821_v29 = vpack.c.bf16 %v1773_v25, %v1772_v24  ;;  %v2823_v33 = vpack.c.bf16 %v1757_v30, %v1756_v26 }
 0x9b1   :  { %2822 = vmatprep.subr.bf16.mxu0 %v2821_v29 }
 0x9b2   :  { %2808 = vmatpush1.bf16.msra.mxu1 %v2807_v35  ;;  %v2825_v35 = vpack.c.bf16 %v1775_v32, %v1774_v31 }
 0x9b3   :  { %2810 = vmatprep.subr.bf16.mxu1 %v2809_v36  ;;  %v1758_v36 = vld [vmem:[%s5224_s15 + $0x10] sm:$0xff] }
 0x9b4   :  { %v2827_v43 = vpack.c.bf16 %v1759_v37, %v1758_v36 }
 0x9b6   :  { %2812 = vmatpush1.bf16.msra.mxu1 %v2811_v50  ;;  %v2829_v50 = vpack.c.bf16 %v1777_v41, %v1776_v40  ;;  %v2145_v41 = vld [vmem:[%s5225_s16] ss:$0 sm:$0xff] }
 0x9b7   :  { %2814 = vmatprep.subr.bf16.mxu1 %v2813_v49  ;;  %v1760_v49 = vld [vmem:[%s5224_s15 + $0x20] sm:$0xff] }
 0xa1c   :  { %v1372_v51 = vpop.xlane.xlu1 %1371 }
 0xa1d   :  { %v1373_v52 = vmul.f32 0.00390625, %v1372_v51  ;;  %v1761_v51 = vld [vmem:[%s5224_s15 + $0x28] sm:$0xff] }
 0xa1f   :  { %v1374_v15 = vadd.f32 1e-05, %v1373_v52  ;;  %v2831_v52 = vpack.c.bf16 %v1761_v51, %v1760_v49 }
 0xa21   :  { %2864 = vrsqrt.f32 %v1374_v15 }
 0xa2b   :  { %v2865_v57 = vpop.eup %2864 }
 0xa2c   :  { %v1377_v58 = vmul.f32 %v2865_v57, %v4802_v45  ;;  %v1376_v38 = vmul.f32 %v2865_v57, %v4799_v44  ;;  %v2136_v45 = vld [vmem:[%s5220_s11 + $0x3d0] sm:$0xff]  ;;  %v2139_v44 = vld [vmem:[%s5220_s11 + $0x3e8] sm:$0xff] }
 0xa2d   :  { %v2815_v46 = vpack.c.bf16 %v2136_v45, %v2134_v2  ;;  %v2817_v4 = vpack.c.bf16 %v2141_v48, %v2139_v44  ;;  %v1780_v45 = vld [vmem:[%s5224_s15 + $0xc0] sm:$0xff] }
 0xa2e   :  { %v1390_v39 = vmul.f32 %v1386_v54, %v1377_v58  ;;  %v1389_v34 = vmul.f32 %v1382_v3, %v1376_v38  ;;  %v1778_v38 = vld [vmem:[%s5224_s15 + $0xb0] sm:$0xff]  ;;  %v1764_v48 = vld [vmem:[%s5224_s15 + $0x40] sm:$0xff] }
 0xa2f   :  { %2816 = vmatpush1.bf16.msra.mxu1 %v2815_v46  ;;  %v1781_v46 = vld [vmem:[%s5224_s15 + $0xc8] sm:$0xff] }
 0xa30   :  { %v1403_v63 = vadd.f32 %v1399_v62, %v1390_v39  ;;  %v1402_v0 = vadd.f32 %v1395_v59, %v1389_v34  ;;  %2818 = vmatprep.subr.bf16.mxu1 %v2817_v4  ;;  %v1779_v39 = vld [vmem:[%s5224_s15 + $0xb8] sm:$0xff]  ;;  %v2837_v44 = vpack.c.bf16 %v1781_v46, %v1780_v45  ;;  %v1765_v4 = vld [vmem:[%s5224_s15 + $0x48] sm:$0xff] }
 0xa31   :  { %v2833_v34 = vpack.c.bf16 %v1779_v39, %v1778_v38  ;;  %v2839_v6 = vpack.c.bf16 %v1765_v4, %v1764_v48 }
 0xa32   :  { %1546 = vmatprep.mubr.f32.mxu0 %v1403_v63 }
 0xa33   :  { %1547 = vmatmul.mubr.f32.vlgmr.msra.gmra.mrb[6].mxu0 %v1402_v0  ;;  %2820 = vmatpush1.bf16.msra.mxu1 %v2819_v7  ;;  %v1783_v7 = vld [vmem:[%s5224_s15 + $0xd8] sm:$0xff] }
 0xa34   :  { %2824 = vmatpush3.bf16.msra.mxu0 %v2823_v33 }
 0xa35   :  { %2826 = vmatprep.subr.bf16.mxu0 %v2825_v35 }
 0xa38   :  { %2828 = vmatpush3.bf16.msra.mxu0 %v2827_v43 }
 0xa39   :  { %2830 = vmatprep.subr.bf16.mxu0 %v2829_v50 }
 0xa3c   :  { %2832 = vmatpush3.bf16.msra.mxu0 %v2831_v52 }
 0xa3d   :  { %2834 = vmatprep.subr.bf16.mxu0 %v2833_v34 }
 0xb06   :  { %v1548_v10 = vpop.f32.mrb[6].mxu0 }
 0xb07   :  { %v1549_v11 = vadd.f32 %v1548_v10, %v1475_v9  ;;  %v1550_v53 = vpop.f32.mrb[7].mxu0  ;;  %v1767_v9 = vld [vmem:[%s5224_s15 + $0x58] sm:$0xff]  ;;  %v1784_v10 = vld [vmem:[%s5224_s15 + $0xe0] sm:$0xff] }
 0xb08   :  { %v1551_v12 = vadd.f32 %v1550_v53, %v1479_v47  ;;  %v2841_v47 = vpack.c.bf16 %v1783_v7, %v1782_v5  ;;  %v2843_v53 = vpack.c.bf16 %v1767_v9, %v1766_v8 }
 0xb09   :  { %v1553_v1 = vmax.f32 %v1549_v11, 0.0  ;;  %v1785_v11 = vld [vmem:[%s5224_s15 + $0xe8] sm:$0xff] }
 0xb0a   :  { %v1554_v13 = vmax.f32 %v1551_v12, 0.0  ;;  %v2845_v12 = vpack.c.bf16 %v1785_v11, %v1784_v10 }
 0xb0c   :  { %1697 = vmatprep.mubr.f32.mxu1 %v1554_v13  ;;  %v1768_v13 = vld [vmem:[%s5224_s15 + $0x60] sm:$0xff] }
 0xb0d   :  { %1698 = vmatmul.mubr.f32.vlgmr.msra.gmra.mrb[8].mxu1 %v1553_v1  ;;  %v1769_v1 = vld [vmem:[%s5224_s15 + $0x68] sm:$0xff] }
 0xbe0   :  { %v1699_v60 = vpop.f32.mrb[8].mxu1 }
 0xbe1   :  { %v1700_v17 = vadd.f32 %v1699_v60, %v1626_v61  ;;  %v1701_v18 = vpop.f32.mrb[9].mxu1  ;;  %v1787_v61 = vld [vmem:[%s5224_s15 + $0xf8] sm:$0xff] }
 0xbe2   :  { %v1702_v19 = vadd.f32 %v1701_v18, %v1630_v16  ;;  %v2847_v16 = vpack.c.bf16 %v1769_v1, %v1768_v13  ;;  %v2849_v60 = vpack.c.bf16 %v1787_v61, %v1786_v14  ;;  %v1771_v18 = vld [vmem:[%s5224_s15 + $0x78] sm:$0xff] }
 0xbe3   :  { %v1704_v20 = vadd.f32 %v1700_v17, %v1402_v0  ;;  %v1763_v0 = vld [vmem:[%s5224_s15 + $0x38] sm:$0xff]  ;;  %v1770_v17 = vld [vmem:[%s5224_s15 + $0x70] sm:$0xff] }
 0xbe4   :  { %v1705_v42 = vadd.f32 %v1702_v19, %v1403_v63  ;;  %v1762_v63 = vld [vmem:[%s5224_s15 + $0x30] sm:$0xff]  ;;  %v2851_v19 = vpack.c.bf16 %v1771_v18, %v1770_v17  ;;  %s2893_s15 = smov [#allocation2]  }
 0xbe5   :  { %v1710_v21 = vsel %vm660_vm0, %v1704_v20, 0.0  ;;  %v2835_v2 = vpack.c.bf16 %v1763_v0, %v1762_v63  ;;  %s1873_s1 = sshll.u32 %s2893_s15, 4  ;;  %s1874_s1 = int_to_ptr.vmem [resolvable:$true] %s1873_s1 }
 0xbe6   :  { %v1711_v22 = vsel %vm660_vm0, %v1705_v42, 0.0  ;;  %s2868_s20 = scalar_lea.vmem %s1874_s1, 32  ;;  %p2873_p1 = scmp.lt.s32.totalorder %s1874_s1, %s1874_s1 }
 0xbe7   :  { %v1712_v23 = vadd.f32 %v1711_v22, %v1710_v21  ;;  %2836 = vmatpush3.bf16.msra.mxu0 %v2835_v2  ;;  %v2143_v22 = vld [vmem:[%s5222_s13 + $0x2] sm:$0x3]  ;;  %p2869_p0 = scmp.ne.s32.totalorder %s1874_s1, %s2868_s20  ;;  %p2874_p2 = scmp.lt.s32.totalorder %s2868_s20, %s2868_s20 }
 0xbe8   :  { %2838 = vmatprep.subr.bf16.mxu0 %v2837_v44  ;;  %v1734_v24 = vrot.slane %v2143_v22, %v3595_v56  ;;  %v1738_v25 = vrot.slane %v2143_v22, %v3592_v55 }
 0xbe9   :  { %1713 = vadd.xlane.f32.xlu0 %v1712_v23  ;;  %v2144_v23 = vld [vmem:[%s5223_s14 + $0x2] sm:$0x3]  ;;  %p2875_p3 = por %p2874_p2, %p2873_p1 }
 0xbea   :  { %v1747_v30 = vrot.slane %v2144_v23, %v3595_v56  ;;  %v1751_v31 = vrot.slane %v2144_v23, %v3592_v55 }
 0xbeb   :  { %2840 = vmatpush3.bf16.msra.mxu0 %v2839_v6  ;;  %p2876_p4 = pnand %p2875_p3, %p2869_p0 }
 0xbec   :  { %2842 = vmatprep.subr.bf16.mxu0 %v2841_v47 }
 0xbef   :  { %2844 = vmatpush3.bf16.msra.mxu0 %v2843_v53 }
 0xbf0   :  { %2846 = vmatprep.subr.bf16.mxu0 %v2845_v12 }
 0xbf3   :  { %2848 = vmatpush3.bf16.msra.mxu0 %v2847_v16 }
 0xbf4   :  { %2850 = vmatprep.subr.bf16.mxu0 %v2849_v60 }
 0xbf7   :  { %2852 = vmatpush3.bf16.msra.mxu0 %v2851_v19 }
 0xc76   :  { %v1714_v15 = vpop.xlane.xlu0 %1713 }
 0xc77   :  { %v1715_v27 = vmul.f32 0.00390625, %v1714_v15 }
 0xc79   :  { %v1716_v28 = vsub.f32 %v1704_v20, %v1715_v27  ;;  %v1717_v3 = vsub.f32 %v1705_v42, %v1715_v27 }
 0xc7b   :  { %v1718_v54 = vmul.f32 %v1716_v28, %v1716_v28  ;;  %v1719_v57 = vmul.f32 %v1717_v3, %v1717_v3 }
 0xc7d   :  { %v1720_v58 = vsel %vm660_vm0, %v1718_v54, 0.0  ;;  %v1721_v59 = vsel %vm660_vm0, %v1719_v57, 0.0 }
 0xc7e   :  { %v1722_v62 = vadd.f32 %v1721_v59, %v1720_v58 }
 0xc80   :  { %1723 = vadd.xlane.f32.xlu1 %v1722_v62 }
 0xd0d   :  { %v1724_v20 = vpop.xlane.xlu1 %1723 }
 0xd0e   :  { %v1725_v42 = vmul.f32 0.00390625, %v1724_v20 }
 0xd10   :  { %v1726_v21 = vadd.f32 1e-05, %v1725_v42 }
 0xd12   :  { %2866 = vrsqrt.f32 %v1726_v21 }
 0xd1c   :  { %v2867_v26 = vpop.eup %2866 }
 0xd1d   :  { %v1729_v29 = vmul.f32 %v2867_v26, %v1717_v3  ;;  %v1728_v32 = vmul.f32 %v2867_v26, %v1716_v28 }
 0xd1f   :  { %v1742_v33 = vmul.f32 %v1738_v25, %v1729_v29  ;;  %v1741_v35 = vmul.f32 %v1734_v24, %v1728_v32 }
 0xd21   :  { %v1755_v36 = vadd.f32 %v1751_v31, %v1742_v33  ;;  %v1754_v37 = vadd.f32 %v1747_v30, %v1741_v35 }
 0xd23   :  { %1859 = vmatprep.mubr.f32.mxu0 %v1755_v36 }
 0xd24   :  { %1860 = vmatmul.mubr.f32.vlgmr.msra.gmra.mrb[8].mxu0 %v1754_v37 }
 0xdf7   :  { %v2178_v40 = vpop.f32.mrb[8].mxu0 }
 0xdf8   :  { %v2179_v43 = vpop.f32.mrb[9].mxu0 }
 0xdf9   :  { %v2180_v50 = vadd.f32 %v2179_v43, %v2178_v40 }
 0xdfb   :  { %v1862_v56 = vadd.f32 %v2180_v50, %v2145_v41 }
 0xdfd   :  { %1866 = vst.msk [vmem:[#allocation2] sm:$0x3] %vm1865_vm1, %v1862_v56 }
 0xdfe   :  { %2879 = shalt.err (!%p2876_p4)
}
 0xdff   :  { %s2880_s23 = scalar_lea.hbm %s5226_s17, 32 }
 0xe00   :  { %p2881_p5 = scmp.ne.s32.totalorder %s5226_s17, %s2880_s23  ;;  %p2884_p6 = scmp.lt.u32.totalorder %s2880_s23, %s5226_s17 }
 0xe02   :  { %p2886_p7 = pnand %p2884_p6, %p2881_p5 }
 0xe04   :  { %2889 = shalt.err (!%p2886_p7)
}
 0xe05   :  { %1876 = dma.vmem_to_hbm [thread:$0]  %s1874_s1, 32, %s5226_s17, [#allocation3]  }
 0xe06   :  { %2890 = dma.done.wait [#allocation3], 32  }
 0xe07   :  { %2891 = vsyncadd [#allocation3], 4294967264 }
 0xe08   :  { %1880 = vsyncpa [#allocation3], 1 }

</bundles_post_ra>
